<compile_context>
chip_gen: v6e
topology: v6e:2x2x1
jax: 0.10.0
libtpu: 0.0.40
codegen_flags: <defaults>
</compile_context>

<pallas_src>
import math
import jax
import jax.numpy as jnp
from jax.experimental import pallas as pl
from jax.experimental.pallas import tpu as pltpu

IN_FEATURES = 7 * 7 * 64   # 3136
HIDDEN = 1028
NUM_CLASSES = 10

H_PAD = 1152               # 9 * 128; zero padding is exact: relu(x@0 + 0) = 0
C_PAD = 128                # lane-dense class dim; padded b2 = -1e30 (see below)
NEG_PAD = -1e30


def _round_up(v, m):
    return (v + m - 1) // m * m


def _section3_kernel(x_ref, w1_ref, b1_ref, w2_ref, b2_ref, o_ref):
    """One batch tile: full forward pass (linear1 + ReLU + linear2 + softmax).

    W1/b1/W2/b2 blocks have constant index_maps -> VMEM-resident for the whole
    call; only x / out move per grid step.
    """
    # ---- linear1: bf16 x bf16 on the MXU, f32 accumulation ----
    x = x_ref[...].astype(jnp.bfloat16)
    h = jnp.dot(x, w1_ref[...], preferred_element_type=jnp.float32)
    h = jnp.maximum(h + b1_ref[...], 0.0)

    # dropout3(p=0.25): identity in eval / inference mode.
    # TODO(synk): training-mode dropout would need pltpu.prng_seed + prng_random_bits.

    # ---- linear2 (tiny, kept in f32 for free accuracy) + bias ----
    logits = jnp.dot(h, w2_ref[...], preferred_element_type=jnp.float32) + b2_ref[...]
    # Padded classes carry logit -1e30 -> exp underflows to 0 -> softmax exact.

    # ---- softmax over the lane-dense (128-wide) class axis ----
    m = jnp.max(logits, axis=-1, keepdims=True)
    e = jnp.exp(logits - m)
    denom = jnp.sum(e, axis=-1, keepdims=True)
    o_ref[...] = e / denom     # exact reciprocal: calibrated probabilities


def prepare_params(w1, b1, w2, b2):
    """One-time padding / casting of the parameters.

    w1: (IN_FEATURES, HIDDEN) f32 -> (IN_FEATURES, H_PAD) bf16   (zero-padded)
    b1: (1, HIDDEN)           f32 -> (1, H_PAD)            f32   (zero-padded)
    w2: (HIDDEN, NUM_CLASSES) f32 -> (H_PAD, C_PAD)        f32   (zero-padded)
    b2: (1, NUM_CLASSES)      f32 -> (1, C_PAD)            f32   (padded -1e30)
    """
    w1p = jnp.pad(w1, ((0, 0), (0, H_PAD - HIDDEN))).astype(jnp.bfloat16)
    b1p = jnp.pad(b1, ((0, 0), (0, H_PAD - HIDDEN)))
    w2p = jnp.pad(w2, ((0, H_PAD - HIDDEN), (0, C_PAD - NUM_CLASSES)))
    b2p = jnp.pad(b2, ((0, 0), (0, C_PAD - NUM_CLASSES)), constant_values=NEG_PAD)
    return w1p, b1p, w2p, b2p


def section3_forward(x, w1p, b1p, w2p, b2p, *, max_tb=256):
    """x: (B, IN_FEATURES) f32.  Params already prepared by prepare_params."""
    B = x.shape[0]
    tb = min(max_tb, _round_up(B, 16))      # multiple of 16 (bf16 sublane packing)
    b_pad = _round_up(B, tb)
    xp = x if b_pad == B else jnp.pad(x, ((0, b_pad - B), (0, 0)))

    grid = (b_pad // tb,)                   # batch tiles only; weights resident

    out = pl.pallas_call(
        _section3_kernel,
        out_shape=jax.ShapeDtypeStruct((b_pad, C_PAD), jnp.float32),
        grid_spec=pltpu.PrefetchScalarGridSpec(
            num_scalar_prefetch=0,
            grid=grid,
            in_specs=[
                pl.BlockSpec((tb, IN_FEATURES), lambda bi: (bi, 0)),      # x tile
                pl.BlockSpec((IN_FEATURES, H_PAD), lambda bi: (0, 0)),    # W1 (resident)
                pl.BlockSpec((1, H_PAD), lambda bi: (0, 0)),              # b1 (resident)
                pl.BlockSpec((H_PAD, C_PAD), lambda bi: (0, 0)),          # W2 (resident)
                pl.BlockSpec((1, C_PAD), lambda bi: (0, 0)),              # b2 (resident)
            ],
            out_specs=pl.BlockSpec((tb, C_PAD), lambda bi: (bi, 0)),
        ),
        compiler_params=pltpu.CompilerParams(
            dimension_semantics=("parallel",),
            vmem_limit_bytes=40 << 20,
        ),
    )(xp, w1p, b1p, w2p, b2p)
    return out[:B, :NUM_CLASSES]


def init_params(key):
    """Deterministic init mimicking nn.Linear's default (uniform +/- 1/sqrt(fan_in)).
    Stored as (in, out) = torch weight transposed."""
    k1, k2, k3, k4 = jax.random.split(key, 4)
    bound1 = 1.0 / math.sqrt(IN_FEATURES)
    bound2 = 1.0 / math.sqrt(HIDDEN)
    w1 = jax.random.uniform(k1, (IN_FEATURES, HIDDEN), jnp.float32, -bound1, bound1)
    b1 = jax.random.uniform(k2, (1, HIDDEN), jnp.float32, -bound1, bound1)
    w2 = jax.random.uniform(k3, (HIDDEN, NUM_CLASSES), jnp.float32, -bound2, bound2)
    b2 = jax.random.uniform(k4, (1, NUM_CLASSES), jnp.float32, -bound2, bound2)
    return w1, b1, w2, b2


if __name__ == "__main__":
    key = jax.random.PRNGKey(0)
    kx, kp = jax.random.split(key)

    B = 8
    x = jax.random.normal(kx, (B, IN_FEATURES), jnp.float32)
    w1, b1, w2, b2 = init_params(kp)
    w1p, b1p, w2p, b2p = prepare_params(w1, b1, w2, b2)

    out = section3_forward(x, w1p, b1p, w2p, b2p)
    out = jax.block_until_ready(out)

    # Pure-JAX f32 reference of the same forward pass.
    h_ref = jnp.maximum(x @ w1 + b1, 0.0)
    ref = jax.nn.softmax(h_ref @ w2 + b2, axis=-1)

    assert out.shape == (B, NUM_CLASSES)
    row_sums = jnp.sum(out, axis=-1)
    assert bool(jnp.all(jnp.abs(row_sums - 1.0) < 1e-3))   # exact-recip softmax
    assert bool(jnp.max(jnp.abs(out - ref)) < 2e-2)        # bf16-weight tolerance

    print("KERNEL_OK")
</pallas_src>

<mosaic_0001>
module attributes {stable_mosaic.version = 11 : i64} {
  func.func @_section3_kernel(%arg0: i32, %arg1: memref<16x3136xf32, #tpu.memory_space<vmem>>, %arg2: memref<3136x1152xbf16, #tpu.memory_space<vmem>>, %arg3: memref<1x1152xf32, #tpu.memory_space<vmem>>, %arg4: memref<1152x128xf32, #tpu.memory_space<vmem>>, %arg5: memref<1x128xf32, #tpu.memory_space<vmem>>, %arg6: memref<16x128xf32, #tpu.memory_space<vmem>>) attributes {dimension_semantics = [#tpu.dimension_semantics<parallel>], iteration_bounds = array<i64: 1>, scalar_prefetch = 0 : i64, scratch_operands = 0 : i64, tpu.core_type = #tpu.core_type<tc>, window_params = [{transform_indices = @transform_0, window_bounds = array<i64: 16, 3136>}, {pipeline_mode = #tpu.pipeline_mode<synchronous>, transform_indices = @transform_1, window_bounds = array<i64: 3136, 1152>}, {pipeline_mode = #tpu.pipeline_mode<synchronous>, transform_indices = @transform_2, window_bounds = array<i64: 1, 1152>}, {pipeline_mode = #tpu.pipeline_mode<synchronous>, transform_indices = @transform_3, window_bounds = array<i64: 1152, 128>}, {pipeline_mode = #tpu.pipeline_mode<synchronous>, transform_indices = @transform_4, window_bounds = array<i64: 1, 128>}, {transform_indices = @transform_5, window_bounds = array<i64: 16, 128>}]} {
    %c0 = arith.constant 0 : index
    %c0_0 = arith.constant 0 : index
    %0 = vector.load %arg1[%c0, %c0_0] : memref<16x3136xf32, #tpu.memory_space<vmem>>, vector<16x3136xf32>
    %1 = arith.truncf %0 : vector<16x3136xf32> to vector<16x3136xbf16>
    %c0_1 = arith.constant 0 : index
    %c0_2 = arith.constant 0 : index
    %2 = vector.load %arg2[%c0_1, %c0_2] : memref<3136x1152xbf16, #tpu.memory_space<vmem>>, vector<3136x1152xbf16>
    %cst = arith.constant dense<0.000000e+00> : vector<16x1152xf32>
    %3 = tpu.matmul %1, %2, %cst {dimension_numbers = #tpu.dot_dimension_numbers<[1], [0], [0], [1], [0, 0, 1, 1], [], []>} : vector<16x3136xbf16>, vector<3136x1152xbf16>, vector<16x1152xf32> -> vector<16x1152xf32>
    %c0_3 = arith.constant 0 : index
    %c0_4 = arith.constant 0 : index
    %4 = vector.load %arg3[%c0_3, %c0_4] : memref<1x1152xf32, #tpu.memory_space<vmem>>, vector<1x1152xf32>
    %5 = vector.broadcast %4 : vector<1x1152xf32> to vector<16x1152xf32>
    %6 = arith.addf %3, %5 : vector<16x1152xf32>
    %cst_5 = arith.constant 0.000000e+00 : f32
    %7 = vector.broadcast %cst_5 : f32 to vector<16x1152xf32>
    %8 = arith.maximumf %6, %7 : vector<16x1152xf32>
    %c0_6 = arith.constant 0 : index
    %c0_7 = arith.constant 0 : index
    %9 = vector.load %arg4[%c0_6, %c0_7] : memref<1152x128xf32, #tpu.memory_space<vmem>>, vector<1152x128xf32>
    %cst_8 = arith.constant dense<0.000000e+00> : vector<16x128xf32>
    %10 = tpu.matmul %8, %9, %cst_8 {dimension_numbers = #tpu.dot_dimension_numbers<[1], [0], [0], [1], [0, 0, 1, 1], [], []>} : vector<16x1152xf32>, vector<1152x128xf32>, vector<16x128xf32> -> vector<16x128xf32>
    %c0_9 = arith.constant 0 : index
    %c0_10 = arith.constant 0 : index
    %11 = vector.load %arg5[%c0_9, %c0_10] : memref<1x128xf32, #tpu.memory_space<vmem>>, vector<1x128xf32>
    %12 = vector.broadcast %11 : vector<1x128xf32> to vector<16x128xf32>
    %13 = arith.addf %10, %12 : vector<16x128xf32>
    %cst_11 = arith.constant dense<0xFF800000> : vector<16xf32>
    %14 = vector.multi_reduction <maximumf>, %13, %cst_11 [1] : vector<16x128xf32> to vector<16xf32>
    %15 = vector.shape_cast %14 : vector<16xf32> to vector<16x1xf32>
    %16 = vector.broadcast %15 : vector<16x1xf32> to vector<16x128xf32>
    %17 = arith.subf %13, %16 : vector<16x128xf32>
    %18 = math.exp %17 : vector<16x128xf32>
    %cst_12 = arith.constant dense<0.000000e+00> : vector<16xf32>
    %19 = vector.multi_reduction <add>, %18, %cst_12 [1] : vector<16x128xf32> to vector<16xf32>
    %20 = vector.shape_cast %19 : vector<16xf32> to vector<16x1xf32>
    %21 = vector.broadcast %20 : vector<16x1xf32> to vector<16x128xf32>
    %22 = arith.divf %18, %21 : vector<16x128xf32>
    %c0_13 = arith.constant 0 : index
    %c0_14 = arith.constant 0 : index
    %23 = vector.load %arg6[%c0_13, %c0_14] : memref<16x128xf32, #tpu.memory_space<vmem>>, vector<16x128xf32>
    tpu.vector_store %arg6[%c0_13, %c0_14], %22 {strides = array<i32>} : memref<16x128xf32, #tpu.memory_space<vmem>>, vector<16x128xf32>,
    return
  }
  func.func @transform_0(%arg0: i32) -> (i32, i32) {
    %c0_i32 = arith.constant 0 : i32
    %c0_i32_0 = arith.constant 0 : i32
    return %arg0, %c0_i32 : i32, i32
  }
  func.func @transform_1(%arg0: i32) -> (i32, i32) {
    %c0_i32 = arith.constant 0 : i32
    %c0_i32_0 = arith.constant 0 : i32
    %c0_i32_1 = arith.constant 0 : i32
    return %c0_i32, %c0_i32_0 : i32, i32
  }
  func.func @transform_2(%arg0: i32) -> (i32, i32) {
    %c0_i32 = arith.constant 0 : i32
    %c0_i32_0 = arith.constant 0 : i32
    %c0_i32_1 = arith.constant 0 : i32
    return %c0_i32, %c0_i32_0 : i32, i32
  }
  func.func @transform_3(%arg0: i32) -> (i32, i32) {
    %c0_i32 = arith.constant 0 : i32
    %c0_i32_0 = arith.constant 0 : i32
    %c0_i32_1 = arith.constant 0 : i32
    return %c0_i32, %c0_i32_0 : i32, i32
  }
  func.func @transform_4(%arg0: i32) -> (i32, i32) {
    %c0_i32 = arith.constant 0 : i32
    %c0_i32_0 = arith.constant 0 : i32
    %c0_i32_1 = arith.constant 0 : i32
    return %c0_i32, %c0_i32_0 : i32, i32
  }
  func.func @transform_5(%arg0: i32) -> (i32, i32) {
    %c0_i32 = arith.constant 0 : i32
    %c0_i32_0 = arith.constant 0 : i32
    return %arg0, %c0_i32 : i32, i32
  }
}

</mosaic_0001>

<bundles_post_ra>
// kernel: tpu_custom_call.1
= control target key start
LH: loop header
LB: loop body
LE: loop exit
PB: predicated region body
PF: predicated region fallthrough
CT: control target
= control target key end

     0   :  { %10 = vsyncpa [#allocation3], 0  ;;  %s20201_s0 = inlined_call_operand.hbm [shape: f32[16,3136], index: 0, kind: input, shape index: {}]   ;;  %s20202_s1 = inlined_call_operand.hbm [shape: bf16[3136,1152], index: 1, kind: input, shape index: {}]   ;;  %s20203_s2 = inlined_call_operand.hbm [shape: f32[1,1152], index: 2, kind: input, shape index: {}]   ;;  %s20204_s3 = inlined_call_operand.hbm [shape: f32[1152,128], index: 3, kind: input, shape index: {}]   ;;  %s20205_s4 = inlined_call_operand.hbm [shape: f32[1,128], index: 4, kind: input, shape index: {}]   ;;  %s20206_s5 = inlined_call_operand.hbm [shape: f32[16,128], index: 5, kind: output, shape index: {}]  }
   0x1   :  { %11 = vsyncpa [#allocation6], 0 }
   0x2   :  { %12 = vsyncpa [#allocation9], 0 }
   0x3   :  { %13 = vsyncpa [#allocation4], 0  ;;  %s19501_s18 = smov [#allocation5]  }
   0x4   :  { %s31_s19 = sshll.u32 %s19501_s18, 4  ;;  %s32_s19 = int_to_ptr.vmem [resolvable:$true] %s31_s19 }
   0x5   :  { %s19381_s20 = scalar_lea.vmem %s32_s19, 225792  ;;  %p19386_p1 = scmp.lt.s32.totalorder %s32_s19, %s32_s19 }
   0x6   :  { %p19382_p0 = scmp.ne.s32.totalorder %s32_s19, %s19381_s20  ;;  %p19387_p2 = scmp.lt.s32.totalorder %s19381_s20, %s19381_s20 }
   0x8   :  { %p19388_p3 = por %p19387_p2, %p19386_p1 }
   0xa   :  { %p19389_p4 = pnand %p19388_p3, %p19382_p0 }
   0xc   :  { %19392 = shalt.err (!%p19389_p4)
}
   0xd   :  { %s19502_s21 = smov 576   ;;  %s19503_s22 = smov 36  }
   0xe   :  { %37 = dma.hbm_to_vmem [thread:$0]  %s20202_s1, 225792, %s32_s19, [#allocation6], %s19502_s21, %s19502_s21, %s19503_s22  }
   0xf   :  { %s19504_s25 = smov [#allocation8]  }
  0x10   :  { %s53_s26 = sshll.u32 %s19504_s25, 4  ;;  %s54_s26 = int_to_ptr.vmem [resolvable:$true] %s53_s26 }
  0x11   :  { %s19401_s27 = scalar_lea.vmem %s54_s26, 18432  ;;  %p19406_p6 = scmp.lt.s32.totalorder %s54_s26, %s54_s26 }
  0x12   :  { %p19402_p5 = scmp.ne.s32.totalorder %s54_s26, %s19401_s27  ;;  %p19407_p7 = scmp.lt.s32.totalorder %s19401_s27, %s19401_s27 }
  0x14   :  { %p19408_p8 = por %p19407_p7, %p19406_p6 }
  0x16   :  { %p19409_p9 = pnand %p19408_p8, %p19402_p5 }
  0x18   :  { %19412 = shalt.err (!%p19409_p9)
}
  0x19   :  { %s19505_s28 = smov 128   ;;  %s19506_s29 = smov 8  }
  0x1a   :  { %59 = dma.hbm_to_vmem [thread:$0]  %s20204_s3, 18432, %s54_s26, [#allocation9], %s19505_s28, %s19505_s28, %s19506_s29  }
  0x1b   :  { %s19507_s1 = smov [#allocation2]  }
  0x1c   :  { %s19_s7 = sshll.u32 %s19507_s1, 4  ;;  %s20_s7 = int_to_ptr.vmem [resolvable:$true] %s19_s7 }
  0x1d   :  { %s19421_s8 = scalar_lea.vmem %s20_s7, 6400  ;;  %p19426_p11 = scmp.lt.s32.totalorder %s20_s7, %s20_s7 }
  0x1e   :  { %p19422_p10 = scmp.ne.s32.totalorder %s20_s7, %s19421_s8  ;;  %p19427_p12 = scmp.lt.s32.totalorder %s19421_s8, %s19421_s8 }
  0x20   :  { %p19428_p13 = por %p19427_p12, %p19426_p11 }
  0x22   :  { %p19429_p0 = pnand %p19428_p13, %p19422_p10 }
  0x24   :  { %19432 = shalt.err (!%p19429_p0)
}
  0x25   :  { %s19508_s9 = smov 3200   ;;  %s19509_s10 = smov 200  }
  0x26   :  { %25 = dma.hbm_to_vmem [thread:$0]  %s20201_s0, 6400, %s20_s7, [#allocation3], %s19508_s9, %s19508_s9, %s19509_s10  }
  0x27   :  { %s19510_s13 = smov [#allocation7]   ;;  %s19511_s3 = smov [#allocation10]  }
  0x28   :  { %s44_s14 = sshll.u32 %s19510_s13, 4  ;;  %s66_s15 = sshll.u32 %s19511_s3, 4  ;;  %s45_s14 = int_to_ptr.vmem [resolvable:$true] %s44_s14  ;;  %s67_s15 = int_to_ptr.vmem [resolvable:$true] %s66_s15 }
  0x29   :  { %s19441_s16 = scalar_lea.vmem %s45_s14, 144  ;;  %s19445_s17 = scalar_lea.vmem %s45_s14, 160 }
  0x2a   :  { %p19442_p1 = scmp.ne.s32.totalorder %s45_s14, %s19441_s16  ;;  %p19446_p2 = scmp.lt.s32.totalorder %s45_s14, %s45_s14 }
  0x2b   :  { %p19447_p3 = scmp.lt.s32.totalorder %s19445_s17, %s19441_s16 }
  0x2d   :  { %p19448_p4 = por %p19447_p3, %p19446_p2 }
  0x2f   :  { %p19449_p5 = pnand %p19448_p4, %p19442_p1 }
  0x31   :  { %19452 = shalt.err (!%p19449_p5)
}
  0x32   :  { %47 = dma.hbm_to_vmem [thread:$0]  %s20203_s2, 144, %s45_s14, [#allocation6]  }
  0x33   :  { %s19461_s20 = scalar_lea.vmem %s67_s15, 16  ;;  %s19465_s0 = scalar_lea.vmem %s67_s15, 32 }
  0x34   :  { %p19462_p6 = scmp.ne.s32.totalorder %s67_s15, %s19461_s20  ;;  %p19466_p7 = scmp.lt.s32.totalorder %s67_s15, %s67_s15 }
  0x35   :  { %p19467_p8 = scmp.lt.s32.totalorder %s19465_s0, %s19461_s20 }
  0x37   :  { %p19468_p9 = por %p19467_p8, %p19466_p7 }
  0x39   :  { %p19469_p10 = pnand %p19468_p9, %p19462_p6 }
  0x3b   :  { %19472 = shalt.err (!%p19469_p10)
}
  0x3c   :  { %69 = dma.hbm_to_vmem [thread:$0]  %s20205_s4, 16, %s67_s15, [#allocation9]  }
  0x3d   :  { %19493 = dma.done.wait [#allocation3], 6400  }
  0x3e   :  { %19494 = vsyncadd [#allocation3], 4294960896 }
  0x3f   :  { %19495 = dma.done.wait [#allocation6], 225936  }
  0x40   :  { %19496 = vsyncadd [#allocation6], 4294741360 }
  0x41   :  { %19497 = dma.done.wait [#allocation9], 18448  }
  0x42   :  { %19498 = vsyncadd [#allocation9], 4294948848  ;;  %v16814_v0 = vld [vmem:[#allocation5 + $0x1fc] ss:$36 sps:$4 sm:$0xff]   ;;  %v16820_v4 = vld [vmem:[#allocation5 + $0x1b4] ss:$36 sps:$4 sm:$0xff]  }
  0x43   :  { %v16816_v1 = vld [vmem:[#allocation5 + $0x67c] ss:$36 sps:$4 sm:$0xff]   ;;  %11190 = vmatprep.subr.bf16.mxu0 %v16814_v0  ;;  %v16822_v5 = vld [vmem:[#allocation5 + $0x634] ss:$36 sps:$4 sm:$0xff]   ;;  %v16826_v8 = vld [vmem:[#allocation5 + $0x16c] ss:$36 sps:$4 sm:$0xff]  }
  0x44   :  { %v16818_v2 = vld [vmem:[#allocation5 + $0x1f8] ss:$36 sps:$4 sm:$0xff]   ;;  %11233 = vmatprep.subr.bf16.mxu1 %v16816_v1  ;;  %v16824_v6 = vld [vmem:[#allocation5 + $0x1b0] ss:$36 sps:$4 sm:$0xff]   ;;  %v16830_v10 = vld [vmem:[#allocation5 + $0x168] ss:$36 sps:$4 sm:$0xff]  }
  0x45   :  { %v16819_v3 = vld [vmem:[#allocation5 + $0x678] ss:$36 sps:$4 sm:$0xff]   ;;  %11191 = vmatpush1.bf16.msra.mxu0 %v16818_v2  ;;  %v16825_v7 = vld [vmem:[#allocation5 + $0x630] ss:$36 sps:$4 sm:$0xff]   ;;  %v16831_v11 = vld [vmem:[#allocation5 + $0x5e8] ss:$36 sps:$4 sm:$0xff]  }
  0x46   :  { %11234 = vmatpush1.bf16.msra.mxu1 %v16819_v3  ;;  %11192 = vmatprep.subr.bf16.mxu0 %v16820_v4  ;;  %v16828_v9 = vld [vmem:[#allocation5 + $0x5ec] ss:$36 sps:$4 sm:$0xff]   ;;  %v16832_v12 = vld [vmem:[#allocation5 + $0x124] ss:$36 sps:$4 sm:$0xff]   ;;  %v16838_v16 = vld [vmem:[#allocation5 + $0xdc] ss:$36 sps:$4 sm:$0xff]  }
  0x47   :  { %11235 = vmatprep.subr.bf16.mxu1 %v16822_v5  ;;  %v16834_v13 = vld [vmem:[#allocation5 + $0x5a4] ss:$36 sps:$4 sm:$0xff]   ;;  %v16840_v17 = vld [vmem:[#allocation5 + $0x55c] ss:$36 sps:$4 sm:$0xff]   ;;  %v16844_v20 = vld [vmem:[#allocation5 + $0x94] ss:$36 sps:$4 sm:$0xff]  }
  0x48   :  { %v16836_v14 = vld [vmem:[#allocation5 + $0x120] ss:$36 sps:$4 sm:$0xff]   ;;  %v16842_v18 = vld [vmem:[#allocation5 + $0xd8] ss:$36 sps:$4 sm:$0xff]   ;;  %v16848_v22 = vld [vmem:[#allocation5 + $0x90] ss:$36 sps:$4 sm:$0xff]  }
  0x49   :  { %11193 = vmatpush1.bf16.msra.mxu0 %v16824_v6  ;;  %v16837_v15 = vld [vmem:[#allocation5 + $0x5a0] ss:$36 sps:$4 sm:$0xff]   ;;  %v16843_v19 = vld [vmem:[#allocation5 + $0x558] ss:$36 sps:$4 sm:$0xff]   ;;  %v16849_v23 = vld [vmem:[#allocation5 + $0x510] ss:$36 sps:$4 sm:$0xff]  }
  0x4a   :  { %11236 = vmatpush1.bf16.msra.mxu1 %v16825_v7  ;;  %11194 = vmatprep.subr.bf16.mxu0 %v16826_v8  ;;  %v16846_v21 = vld [vmem:[#allocation5 + $0x514] ss:$36 sps:$4 sm:$0xff]   ;;  %v16850_v24 = vld [vmem:[#allocation5 + $0x4c] ss:$36 sps:$4 sm:$0xff]   ;;  %v16856_v28 = vld [vmem:[#allocation5 + $0x4] ss:$36 sps:$4 sm:$0xff]  }
  0x4b   :  { %11237 = vmatprep.subr.bf16.mxu1 %v16828_v9  ;;  %v16852_v25 = vld [vmem:[#allocation5 + $0x4cc] ss:$36 sps:$4 sm:$0xff]   ;;  %v16858_v29 = vld [vmem:[#allocation5 + $0x484] ss:$36 sps:$4 sm:$0xff]   ;;  %v16862_v32 = vld [vmem:[#allocation5 + $0x43c] ss:$36 sps:$4 sm:$0xff]  }
  0x4c   :  { %v16854_v26 = vld [vmem:[#allocation5 + $0x48] ss:$36 sps:$4 sm:$0xff]   ;;  %v16860_v30 = vld [vmem:[#allocation5] ss:$36 sps:$4 sm:$0xff]   ;;  %v16866_v34 = vld [vmem:[#allocation5 + $0x438] ss:$36 sps:$4 sm:$0xff]  }
  0x4d   :  { %11195 = vmatpush1.bf16.msra.mxu0 %v16830_v10  ;;  %v16855_v27 = vld [vmem:[#allocation5 + $0x4c8] ss:$36 sps:$4 sm:$0xff]   ;;  %v16861_v31 = vld [vmem:[#allocation5 + $0x480] ss:$36 sps:$4 sm:$0xff]   ;;  %v16867_v35 = vld [vmem:[#allocation5 + $0x8b8] ss:$36 sps:$4 sm:$0xff]  }
  0x4e   :  { %11238 = vmatpush1.bf16.msra.mxu1 %v16831_v11  ;;  %11196 = vmatprep.subr.bf16.mxu0 %v16832_v12  ;;  %v16864_v33 = vld [vmem:[#allocation5 + $0x8bc] ss:$36 sps:$4 sm:$0xff]   ;;  %v16868_v36 = vld [vmem:[#allocation5 + $0x3f4] ss:$36 sps:$4 sm:$0xff]   ;;  %v16874_v40 = vld [vmem:[#allocation5 + $0x3ac] ss:$36 sps:$4 sm:$0xff]  }
  0x4f   :  { %11239 = vmatprep.subr.bf16.mxu1 %v16834_v13  ;;  %v16870_v37 = vld [vmem:[#allocation5 + $0x874] ss:$36 sps:$4 sm:$0xff]   ;;  %v16876_v41 = vld [vmem:[#allocation5 + $0x82c] ss:$36 sps:$4 sm:$0xff]   ;;  %v16880_v44 = vld [vmem:[#allocation5 + $0x364] ss:$36 sps:$4 sm:$0xff]  }
  0x50   :  { %v16872_v38 = vld [vmem:[#allocation5 + $0x3f0] ss:$36 sps:$4 sm:$0xff]   ;;  %v16878_v42 = vld [vmem:[#allocation5 + $0x3a8] ss:$36 sps:$4 sm:$0xff]   ;;  %v87_v46 = vld [vmem:[#allocation2 + $0x8] sm:$0xff]  ;;  %vm11186_vm0 = vcmask 523264  }
  0x51   :  { %11197 = vmatpush1.bf16.msra.mxu0 %v16836_v14  ;;  %v16873_v39 = vld [vmem:[#allocation5 + $0x870] ss:$36 sps:$4 sm:$0xff]   ;;  %v16879_v43 = vld [vmem:[#allocation5 + $0x828] ss:$36 sps:$4 sm:$0xff]   ;;  %v16884_v47 = vld [vmem:[#allocation5 + $0x360] ss:$36 sps:$4 sm:$0xff]  }
  0x52   :  { %11240 = vmatpush1.bf16.msra.mxu1 %v16837_v15  ;;  %11198 = vmatprep.subr.bf16.mxu0 %v16838_v16  ;;  %v16882_v45 = vld [vmem:[#allocation5 + $0x7e4] ss:$36 sps:$4 sm:$0xff]   ;;  %v114_v52 = vld [vmem:[#allocation2 + $0xe0] sm:$0xff]  ;;  %v16886_v53 = vld [vmem:[#allocation5 + $0x31c] ss:$36 sps:$4 sm:$0xff]   ;;  %vm19514_vm1 = vmmov 0  }
  0x53   :  { %11241 = vmatprep.subr.bf16.mxu1 %v16840_v17  ;;  %v16885_v48 = vld [vmem:[#allocation5 + $0x7e0] ss:$36 sps:$4 sm:$0xff]   ;;  %v89_v51 = vld [vmem:[#allocation2 + $0x18] sm:$0xff]  ;;  %v16890_v56 = vld [vmem:[#allocation5 + $0x318] ss:$36 sps:$4 sm:$0xff]   ;;  %s19515_s2 = smov [#allocation11]  }
  0x54   :  { %v112_v49 = vld [vmem:[#allocation2 + $0xd0] sm:$0xff]  ;;  %v19566_v55 = vpack.c.bf16 %v114_v52, %v89_v51  ;;  %v16891_v57 = vld [vmem:[#allocation5 + $0x798] ss:$36 sps:$4 sm:$0xff]   ;;  %v16896_v60 = vld [vmem:[#allocation5 + $0x2d0] ss:$36 sps:$4 sm:$0xff]   ;;  %s14528_s4 = sshll.u32 %s19515_s2, 4  ;;  %s14529_s4 = int_to_ptr.vmem [resolvable:$true] %s14528_s4 }
  0x55   :  { %11199 = vmatpush1.bf16.msra.mxu0 %v16842_v18  ;;  %v19564_v50 = vpack.c.bf16 %v112_v49, %v87_v46  ;;  %v16888_v54 = vld [vmem:[#allocation5 + $0x79c] ss:$36 sps:$4 sm:$0xff]   ;;  %v16892_v58 = vld [vmem:[#allocation5 + $0x2d4] ss:$36 sps:$4 sm:$0xff]   ;;  %v16898_v62 = vld [vmem:[#allocation5 + $0x28c] ss:$36 sps:$4 sm:$0xff]   ;;  %p19478_p12 = scmp.lt.s32.totalorder %s14529_s4, %s14529_s4 }
  0x56   :  { %11242 = vmatpush1.bf16.msra.mxu1 %v16843_v19  ;;  %11200 = vmatprep.subr.bf16.mxu0 %v16844_v20  ;;  %v16894_v59 = vld [vmem:[#allocation5 + $0x754] ss:$36 sps:$4 sm:$0xff]   ;;  %v16900_v63 = vld [vmem:[#allocation5 + $0x70c] ss:$36 sps:$4 sm:$0xff]   ;;  %v16904_v2 = vld [vmem:[#allocation5 + $0x244] ss:$36 sps:$4 sm:$0xff]  }
  0x57   :  { %11243 = vmatprep.subr.bf16.mxu1 %v16846_v21  ;;  %11222 = vmatprep.mubr.bf16.mxu0 %v19564_v50  ;;  %v16897_v61 = vld [vmem:[#allocation5 + $0x750] ss:$36 sps:$4 sm:$0xff]   ;;  %v16902_v0 = vld [vmem:[#allocation5 + $0x288] ss:$36 sps:$4 sm:$0xff]   ;;  %v16908_v4 = vld [vmem:[#allocation5 + $0x240] ss:$36 sps:$4 sm:$0xff]  }
  0x58   :  { %11265 = vmatprep.mubr.bf16.mxu1 %v19566_v55  ;;  %v16903_v1 = vld [vmem:[#allocation5 + $0x708] ss:$36 sps:$4 sm:$0xff]   ;;  %v16909_v5 = vld [vmem:[#allocation5 + $0x6c0] ss:$36 sps:$4 sm:$0xff]   ;;  %v86_v6 = vld [vmem:[#allocation2] sm:$0xff]  ;;  %s19473_s23 = scalar_lea.vmem %s14529_s4, 256 }
  0x59   :  { %11201 = vmatpush1.bf16.msra.mxu0 %v16848_v22  ;;  %v16906_v3 = vld [vmem:[#allocation5 + $0x6c4] ss:$36 sps:$4 sm:$0xff]   ;;  %v111_v7 = vld [vmem:[#allocation2 + $0xc8] sm:$0xff]  ;;  %v16916_v18 = vld [vmem:[#allocation5 + $0xab0] ss:$36 sps:$4 sm:$0xff]   ;;  %p19474_p11 = scmp.ne.s32.totalorder %s14529_s4, %s19473_s23  ;;  %p19479_p13 = scmp.lt.s32.totalorder %s19473_s23, %s19473_s23 }
  0x5a   :  { %11244 = vmatpush1.bf16.msra.mxu1 %v16849_v23  ;;  %11202 = vmatprep.subr.bf16.mxu0 %v16850_v24  ;;  %v16912_v8 = vld [vmem:[#allocation5 + $0xafc] ss:$36 sps:$4 sm:$0xff]   ;;  %v113_v10 = vld [vmem:[#allocation2 + $0xd8] sm:$0xff]  ;;  %v19570_v12 = vpack.c.bf16 %v111_v7, %v86_v6  ;;  %v16918_v16 = vld [vmem:[#allocation5 + $0xab4] ss:$36 sps:$4 sm:$0xff]  }
  0x5b   :  { %11245 = vmatprep.subr.bf16.mxu1 %v16852_v25  ;;  %v88_v9 = vld [vmem:[#allocation2 + $0x10] sm:$0xff]  ;;  %v16910_v13 = vld [vmem:[#allocation5 + $0xaf8] ss:$36 sps:$4 sm:$0xff]   ;;  %v16919_v19 = vld [vmem:[#allocation5 + $0xf30] ss:$36 sps:$4 sm:$0xff]   ;;  %p19480_p0 = por %p19479_p13, %p19478_p12 }
  0x5c   :  { %v16915_v11 = vld [vmem:[#allocation5 + $0xf7c] ss:$36 sps:$4 sm:$0xff]   ;;  %v19572_v15 = vpack.c.bf16 %v113_v10, %v88_v9  ;;  %v16921_v17 = vld [vmem:[#allocation5 + $0xf34] ss:$36 sps:$4 sm:$0xff]   ;;  %v16924_v20 = vld [vmem:[#allocation5 + $0xa6c] ss:$36 sps:$4 sm:$0xff]  }
  0x5d   :  { %11203 = vmatpush1.bf16.msra.mxu0 %v16854_v26  ;;  %v16913_v14 = vld [vmem:[#allocation5 + $0xf78] ss:$36 sps:$4 sm:$0xff]   ;;  %v16927_v21 = vld [vmem:[#allocation5 + $0xeec] ss:$36 sps:$4 sm:$0xff]   ;;  %v16930_v24 = vld [vmem:[#allocation5 + $0xa24] ss:$36 sps:$4 sm:$0xff]   ;;  %p19481_p1 = pnand %p19480_p0, %p19474_p11 }
  0x5e   :  { %11246 = vmatpush1.bf16.msra.mxu1 %v16855_v27  ;;  %11204 = vmatprep.subr.bf16.mxu0 %v16856_v28  ;;  %v16922_v22 = vld [vmem:[#allocation5 + $0xa68] ss:$36 sps:$4 sm:$0xff]   ;;  %v16928_v26 = vld [vmem:[#allocation5 + $0xa20] ss:$36 sps:$4 sm:$0xff]   ;;  %v118_v46 = vld [vmem:[#allocation2 + $0x100] sm:$0xff] }
  0x5f   :  { %11247 = vmatprep.subr.bf16.mxu1 %v16858_v29  ;;  %v16925_v23 = vld [vmem:[#allocation5 + $0xee8] ss:$36 sps:$4 sm:$0xff]   ;;  %v16931_v27 = vld [vmem:[#allocation5 + $0xea0] ss:$36 sps:$4 sm:$0xff]   ;;  %v16982_v6 = vld [vmem:[#allocation5 + $0xc18] ss:$36 sps:$4 sm:$0xff]  }
  0x60   :  { %v16933_v25 = vld [vmem:[#allocation5 + $0xea4] ss:$36 sps:$4 sm:$0xff]   ;;  %v16936_v28 = vld [vmem:[#allocation5 + $0x9dc] ss:$36 sps:$4 sm:$0xff]   ;;  %v16993_v9 = vld [vmem:[#allocation5 + $0x1054] ss:$36 sps:$4 sm:$0xff]  }
  0x61   :  { %11205 = vmatpush1.bf16.msra.mxu0 %v16860_v30  ;;  %v16939_v29 = vld [vmem:[#allocation5 + $0xe5c] ss:$36 sps:$4 sm:$0xff]   ;;  %v16988_v10 = vld [vmem:[#allocation5 + $0xbd0] ss:$36 sps:$4 sm:$0xff]  }
  0x62   :  { %11248 = vmatpush1.bf16.msra.mxu1 %v16861_v31  ;;  %11206 = vmatprep.subr.bf16.mxu0 %v16862_v32  ;;  %v16934_v30 = vld [vmem:[#allocation5 + $0x9d8] ss:$36 sps:$4 sm:$0xff]   ;;  %v16955_v49 = vld [vmem:[#allocation5 + $0xd80] ss:$36 sps:$4 sm:$0xff]  }
  0x63   :  { %11249 = vmatprep.subr.bf16.mxu1 %v16864_v33  ;;  %v16937_v31 = vld [vmem:[#allocation5 + $0xe58] ss:$36 sps:$4 sm:$0xff]  }
  0x64   :  { %v16942_v32 = vld [vmem:[#allocation5 + $0x994] ss:$36 sps:$4 sm:$0xff]   ;;  %v16960_v51 = vld [vmem:[#allocation5 + $0xd3c] ss:$36 sps:$4 sm:$0xff]  }
  0x65   :  { %11207 = vmatpush2.bf16.msra.mxu0 %v16866_v34  ;;  %v16945_v33 = vld [vmem:[#allocation5 + $0xe14] ss:$36 sps:$4 sm:$0xff]   ;;  %v16963_v52 = vld [vmem:[#allocation5 + $0x11bc] ss:$36 sps:$4 sm:$0xff]  }
  0x66   :  { %11250 = vmatpush2.bf16.msra.mxu1 %v16867_v35  ;;  %11208 = vmatprep.subr.bf16.mxu0 %v16868_v36  ;;  %v16940_v34 = vld [vmem:[#allocation5 + $0x990] ss:$36 sps:$4 sm:$0xff]   ;;  %v16985_v7 = vld [vmem:[#allocation5 + $0x1098] ss:$36 sps:$4 sm:$0xff]  }
  0x67   :  { %11251 = vmatprep.subr.bf16.mxu1 %v16870_v37  ;;  %v16943_v35 = vld [vmem:[#allocation5 + $0xe10] ss:$36 sps:$4 sm:$0xff]  }
  0x68   :  { %v16948_v36 = vld [vmem:[#allocation5 + $0x94c] ss:$36 sps:$4 sm:$0xff]  }
  0x69   :  { %11209 = vmatpush2.bf16.msra.mxu0 %v16872_v38  ;;  %v16951_v37 = vld [vmem:[#allocation5 + $0xdcc] ss:$36 sps:$4 sm:$0xff]  }
  0x6a   :  { %11252 = vmatpush2.bf16.msra.mxu1 %v16873_v39  ;;  %11210 = vmatprep.subr.bf16.mxu0 %v16874_v40  ;;  %v16946_v38 = vld [vmem:[#allocation5 + $0x948] ss:$36 sps:$4 sm:$0xff]  }
  0x6b   :  { %11253 = vmatprep.subr.bf16.mxu1 %v16876_v41  ;;  %v16949_v39 = vld [vmem:[#allocation5 + $0xdc8] ss:$36 sps:$4 sm:$0xff]   ;;  %v91_v41 = vld [vmem:[#allocation2 + $0x28] sm:$0xff] }
  0x6c   :  { %v16954_v40 = vld [vmem:[#allocation5 + $0x904] ss:$36 sps:$4 sm:$0xff]  }
  0x6d   :  { %11211 = vmatpush2.bf16.msra.mxu0 %v16878_v42  ;;  %v116_v42 = vld [vmem:[#allocation2 + $0xf0] sm:$0xff] }
  0x6e   :  { %11254 = vmatpush2.bf16.msra.mxu1 %v16879_v43  ;;  %11212 = vmatprep.subr.bf16.mxu0 %v16880_v44  ;;  %v16957_v43 = vld [vmem:[#allocation5 + $0xd84] ss:$36 sps:$4 sm:$0xff]   ;;  %v19576_v44 = vpack.c.bf16 %v116_v42, %v91_v41  ;;  %v122_v42 = vld [vmem:[#allocation2 + $0x120] sm:$0xff] }
  0x6f   :  { %11255 = vmatprep.subr.bf16.mxu1 %v16882_v45  ;;  %v93_v45 = vld [vmem:[#allocation2 + $0x38] sm:$0xff] }
  0x70   :  { %v97_v41 = vld [vmem:[#allocation2 + $0x58] sm:$0xff] }
  0x71   :  { %11213 = vmatpush2.bf16.msra.mxu0 %v16884_v47  ;;  %v19578_v47 = vpack.c.bf16 %v118_v46, %v93_v45  ;;  %v17021_v45 = vld [vmem:[#allocation5 + $0x17e8] ss:$36 sps:$4 sm:$0xff]   ;;  %v19590_v46 = vpack.c.bf16 %v122_v42, %v97_v41  ;;  %v17096_v41 = vld [vmem:[#allocation5 + $0x1440] ss:$36 sps:$4 sm:$0xff]  }
  0x72   :  { %11256 = vmatpush2.bf16.msra.mxu1 %v16885_v48  ;;  %11214 = vmatprep.subr.bf16.mxu0 %v16886_v53  ;;  %v16952_v48 = vld [vmem:[#allocation5 + $0x900] ss:$36 sps:$4 sm:$0xff]   ;;  %v16958_v53 = vld [vmem:[#allocation5 + $0xd38] ss:$36 sps:$4 sm:$0xff]  }
  0x73   :  { %11257 = vmatprep.subr.bf16.mxu1 %v16888_v54  ;;  %v16961_v54 = vld [vmem:[#allocation5 + $0x11b8] ss:$36 sps:$4 sm:$0xff]   ;;  %v17099_v42 = vld [vmem:[#allocation5 + $0x18c0] ss:$36 sps:$4 sm:$0xff]  }
  0x75   :  { %11215 = vmatpush2.bf16.msra.mxu0 %v16890_v56  ;;  %v16966_v56 = vld [vmem:[#allocation5 + $0xcf4] ss:$36 sps:$4 sm:$0xff]  }
  0x76   :  { %11258 = vmatpush2.bf16.msra.mxu1 %v16891_v57  ;;  %11216 = vmatprep.subr.bf16.mxu0 %v16892_v58  ;;  %v16969_v57 = vld [vmem:[#allocation5 + $0x1174] ss:$36 sps:$4 sm:$0xff]  }
  0x77   :  { %11259 = vmatprep.subr.bf16.mxu1 %v16894_v59  ;;  %v16964_v58 = vld [vmem:[#allocation5 + $0xcf0] ss:$36 sps:$4 sm:$0xff]  }
  0x78   :  { %v16967_v59 = vld [vmem:[#allocation5 + $0x1170] ss:$36 sps:$4 sm:$0xff]  }
  0x79   :  { %11217 = vmatpush2.bf16.msra.mxu0 %v16896_v60  ;;  %v16972_v60 = vld [vmem:[#allocation5 + $0xcac] ss:$36 sps:$4 sm:$0xff]  }
  0x7a   :  { %11260 = vmatpush2.bf16.msra.mxu1 %v16897_v61  ;;  %11218 = vmatprep.subr.bf16.mxu0 %v16898_v62  ;;  %v16975_v61 = vld [vmem:[#allocation5 + $0x112c] ss:$36 sps:$4 sm:$0xff]  }
  0x7b   :  { %11261 = vmatprep.subr.bf16.mxu1 %v16900_v63  ;;  %v16970_v62 = vld [vmem:[#allocation5 + $0xca8] ss:$36 sps:$4 sm:$0xff]  }
  0x7c   :  { %v16973_v63 = vld [vmem:[#allocation5 + $0x1128] ss:$36 sps:$4 sm:$0xff]  }
  0x7d   :  { %11219 = vmatpush2.bf16.msra.mxu0 %v16902_v0  ;;  %v16978_v0 = vld [vmem:[#allocation5 + $0xc64] ss:$36 sps:$4 sm:$0xff]  }
  0x7e   :  { %11262 = vmatpush2.bf16.msra.mxu1 %v16903_v1  ;;  %11220 = vmatprep.subr.bf16.mxu0 %v16904_v2  ;;  %v16981_v1 = vld [vmem:[#allocation5 + $0x10e4] ss:$36 sps:$4 sm:$0xff]  }
  0x7f   :  { %11263 = vmatprep.subr.bf16.mxu1 %v16906_v3  ;;  %v16976_v2 = vld [vmem:[#allocation5 + $0xc60] ss:$36 sps:$4 sm:$0xff]  }
  0x80   :  { %v16979_v3 = vld [vmem:[#allocation5 + $0x10e0] ss:$36 sps:$4 sm:$0xff]  }
  0x81   :  { %11221 = vmatpush2.bf16.msra.mxu0 %v16908_v4  ;;  %v16984_v4 = vld [vmem:[#allocation5 + $0xc1c] ss:$36 sps:$4 sm:$0xff]  }
  0x82   :  { %11264 = vmatpush2.bf16.msra.mxu1 %v16909_v5  ;;  %11276 = vmatprep.subr.bf16.mxu0 %v16912_v8  ;;  %v16987_v5 = vld [vmem:[#allocation5 + $0x109c] ss:$36 sps:$4 sm:$0xff]   ;;  %v16990_v8 = vld [vmem:[#allocation5 + $0xbd4] ss:$36 sps:$4 sm:$0xff]  }
  0x83   :  { %11319 = vmatprep.subr.bf16.mxu1 %v16915_v11  ;;  %v16991_v11 = vld [vmem:[#allocation5 + $0x1050] ss:$36 sps:$4 sm:$0xff]  }
  0x84   :  { %11223 = vmatmul.mubr.bf16.vlgmr.msra.gmra.mxu0 %v19570_v12 }
  0x85   :  { %11266 = vmatmul.mubr.bf16.vlgmr.msra.gmra.mxu1 %v19572_v15  ;;  %11277 = vmatpush1.bf16.msra.mxu0 %v16910_v13  ;;  %v16996_v13 = vld [vmem:[#allocation5 + $0xb8c] ss:$36 sps:$4 sm:$0xff]  }
  0x86   :  { %11320 = vmatpush1.bf16.msra.mxu1 %v16913_v14  ;;  %11278 = vmatprep.subr.bf16.mxu0 %v16918_v16  ;;  %v16999_v14 = vld [vmem:[#allocation5 + $0x100c] ss:$36 sps:$4 sm:$0xff]  }
  0x87   :  { %11321 = vmatprep.subr.bf16.mxu1 %v16921_v17  ;;  %11308 = vmatprep.mubr.bf16.mxu0 %v19576_v44  ;;  %v16994_v16 = vld [vmem:[#allocation5 + $0xb88] ss:$36 sps:$4 sm:$0xff]  }
  0x88   :  { %11351 = vmatprep.mubr.bf16.mxu1 %v19578_v47  ;;  %v16997_v17 = vld [vmem:[#allocation5 + $0x1008] ss:$36 sps:$4 sm:$0xff]  }
  0x89   :  { %11279 = vmatpush1.bf16.msra.mxu0 %v16916_v18  ;;  %v17002_v18 = vld [vmem:[#allocation5 + $0xb44] ss:$36 sps:$4 sm:$0xff]  }
  0x8a   :  { %11322 = vmatpush1.bf16.msra.mxu1 %v16919_v19  ;;  %11280 = vmatprep.subr.bf16.mxu0 %v16924_v20  ;;  %v17005_v19 = vld [vmem:[#allocation5 + $0xfc4] ss:$36 sps:$4 sm:$0xff]  }
  0x8b   :  { %11323 = vmatprep.subr.bf16.mxu1 %v16927_v21  ;;  %v17000_v20 = vld [vmem:[#allocation5 + $0xb40] ss:$36 sps:$4 sm:$0xff]  }
  0x8c   :  { %v17003_v21 = vld [vmem:[#allocation5 + $0xfc0] ss:$36 sps:$4 sm:$0xff]  }
  0x8d   :  { %11281 = vmatpush1.bf16.msra.mxu0 %v16922_v22  ;;  %v90_v22 = vld [vmem:[#allocation2 + $0x20] sm:$0xff] }
  0x8e   :  { %11324 = vmatpush1.bf16.msra.mxu1 %v16925_v23  ;;  %11282 = vmatprep.subr.bf16.mxu0 %v16930_v24  ;;  %v115_v23 = vld [vmem:[#allocation2 + $0xe8] sm:$0xff] }
  0x8f   :  { %11325 = vmatprep.subr.bf16.mxu1 %v16933_v25  ;;  %v17008_v24 = vld [vmem:[#allocation5 + $0x13fc] ss:$36 sps:$4 sm:$0xff]  }
  0x90   :  { %v92_v25 = vld [vmem:[#allocation2 + $0x30] sm:$0xff] }
  0x91   :  { %11283 = vmatpush1.bf16.msra.mxu0 %v16928_v26  ;;  %v117_v26 = vld [vmem:[#allocation2 + $0xf8] sm:$0xff] }
  0x92   :  { %11326 = vmatpush1.bf16.msra.mxu1 %v16931_v27  ;;  %11284 = vmatprep.subr.bf16.mxu0 %v16936_v28  ;;  %v17011_v27 = vld [vmem:[#allocation5 + $0x187c] ss:$36 sps:$4 sm:$0xff]   ;;  %v19582_v28 = vpack.c.bf16 %v115_v23, %v90_v22 }
  0x93   :  { %11327 = vmatprep.subr.bf16.mxu1 %v16939_v29  ;;  %v17006_v29 = vld [vmem:[#allocation5 + $0x13f8] ss:$36 sps:$4 sm:$0xff]   ;;  %v17072_v22 = vld [vmem:[#allocation5 + $0x1560] ss:$36 sps:$4 sm:$0xff]  }
  0x94   :  { %v17075_v23 = vld [vmem:[#allocation5 + $0x19e0] ss:$36 sps:$4 sm:$0xff]  }
  0x95   :  { %11285 = vmatpush1.bf16.msra.mxu0 %v16934_v30  ;;  %v17009_v30 = vld [vmem:[#allocation5 + $0x1878] ss:$36 sps:$4 sm:$0xff]  }
  0x96   :  { %11328 = vmatpush1.bf16.msra.mxu1 %v16937_v31  ;;  %11286 = vmatprep.subr.bf16.mxu0 %v16942_v32  ;;  %v19584_v31 = vpack.c.bf16 %v117_v26, %v92_v25  ;;  %v17014_v32 = vld [vmem:[#allocation5 + $0x13b4] ss:$36 sps:$4 sm:$0xff]   ;;  %v17083_v25 = vld [vmem:[#allocation5 + $0x199c] ss:$36 sps:$4 sm:$0xff]  }
  0x97   :  { %11329 = vmatprep.subr.bf16.mxu1 %v16945_v33  ;;  %v17017_v33 = vld [vmem:[#allocation5 + $0x1834] ss:$36 sps:$4 sm:$0xff]  }
  0x98   :  { %v17078_v26 = vld [vmem:[#allocation5 + $0x1518] ss:$36 sps:$4 sm:$0xff]  }
  0x99   :  { %11287 = vmatpush1.bf16.msra.mxu0 %v16940_v34  ;;  %v17012_v34 = vld [vmem:[#allocation5 + $0x13b0] ss:$36 sps:$4 sm:$0xff]  }
  0x9a   :  { %11330 = vmatpush1.bf16.msra.mxu1 %v16943_v35  ;;  %11288 = vmatprep.subr.bf16.mxu0 %v16948_v36  ;;  %v17015_v35 = vld [vmem:[#allocation5 + $0x1830] ss:$36 sps:$4 sm:$0xff]  }
  0x9b   :  { %11331 = vmatprep.subr.bf16.mxu1 %v16951_v37  ;;  %v17020_v36 = vld [vmem:[#allocation5 + $0x136c] ss:$36 sps:$4 sm:$0xff]  }
  0x9c   :  { %v17023_v37 = vld [vmem:[#allocation5 + $0x17ec] ss:$36 sps:$4 sm:$0xff]  }
  0x9d   :  { %11289 = vmatpush1.bf16.msra.mxu0 %v16946_v38  ;;  %v95_v38 = vld [vmem:[#allocation2 + $0x48] sm:$0xff] }
  0x9e   :  { %11332 = vmatpush1.bf16.msra.mxu1 %v16949_v39  ;;  %11290 = vmatprep.subr.bf16.mxu0 %v16954_v40  ;;  %v120_v39 = vld [vmem:[#allocation2 + $0x110] sm:$0xff] }
  0x9f   :  { %11333 = vmatprep.subr.bf16.mxu1 %v16957_v43  ;;  %v19588_v40 = vpack.c.bf16 %v120_v39, %v95_v38  ;;  %v17018_v43 = vld [vmem:[#allocation5 + $0x1368] ss:$36 sps:$4 sm:$0xff]  }
  0xa0   :  { %v17098_v38 = vld [vmem:[#allocation5 + $0x1444] ss:$36 sps:$4 sm:$0xff]  }
  0xa1   :  { %11291 = vmatpush1.bf16.msra.mxu0 %v16952_v48  ;;  %v17026_v48 = vld [vmem:[#allocation5 + $0x1324] ss:$36 sps:$4 sm:$0xff]  }
  0xa2   :  { %11334 = vmatpush1.bf16.msra.mxu1 %v16955_v49  ;;  %11292 = vmatprep.subr.bf16.mxu0 %v16960_v51  ;;  %v17029_v49 = vld [vmem:[#allocation5 + $0x17a4] ss:$36 sps:$4 sm:$0xff]  }
  0xa3   :  { %11335 = vmatprep.subr.bf16.mxu1 %v16963_v52  ;;  %v17024_v51 = vld [vmem:[#allocation5 + $0x1320] ss:$36 sps:$4 sm:$0xff]  }
  0xa4   :  { %v17027_v52 = vld [vmem:[#allocation5 + $0x17a0] ss:$36 sps:$4 sm:$0xff]  }
  0xa5   :  { %11293 = vmatpush2.bf16.msra.mxu0 %v16958_v53  ;;  %v17032_v53 = vld [vmem:[#allocation5 + $0x12dc] ss:$36 sps:$4 sm:$0xff]   ;;  %v17101_v39 = vld [vmem:[#allocation5 + $0x18c4] ss:$36 sps:$4 sm:$0xff]  }
  0xa6   :  { %11336 = vmatpush2.bf16.msra.mxu1 %v16961_v54  ;;  %11294 = vmatprep.subr.bf16.mxu0 %v16966_v56  ;;  %v17035_v54 = vld [vmem:[#allocation5 + $0x175c] ss:$36 sps:$4 sm:$0xff]  }
  0xa7   :  { %11337 = vmatprep.subr.bf16.mxu1 %v16969_v57  ;;  %v17030_v56 = vld [vmem:[#allocation5 + $0x12d8] ss:$36 sps:$4 sm:$0xff]  }
  0xa8   :  { %v17033_v57 = vld [vmem:[#allocation5 + $0x1758] ss:$36 sps:$4 sm:$0xff]  }
  0xa9   :  { %11295 = vmatpush2.bf16.msra.mxu0 %v16964_v58  ;;  %v17038_v58 = vld [vmem:[#allocation5 + $0x1294] ss:$36 sps:$4 sm:$0xff]  }
  0xaa   :  { %11338 = vmatpush2.bf16.msra.mxu1 %v16967_v59  ;;  %11296 = vmatprep.subr.bf16.mxu0 %v16972_v60  ;;  %v17041_v59 = vld [vmem:[#allocation5 + $0x1714] ss:$36 sps:$4 sm:$0xff]  }
  0xab   :  { %11339 = vmatprep.subr.bf16.mxu1 %v16975_v61  ;;  %v17036_v60 = vld [vmem:[#allocation5 + $0x1290] ss:$36 sps:$4 sm:$0xff]  }
  0xac   :  { %v17039_v61 = vld [vmem:[#allocation5 + $0x1710] ss:$36 sps:$4 sm:$0xff]  }
  0xad   :  { %11297 = vmatpush2.bf16.msra.mxu0 %v16970_v62  ;;  %v17044_v62 = vld [vmem:[#allocation5 + $0x124c] ss:$36 sps:$4 sm:$0xff]  }
  0xae   :  { %11340 = vmatpush2.bf16.msra.mxu1 %v16973_v63  ;;  %11298 = vmatprep.subr.bf16.mxu0 %v16978_v0  ;;  %v17047_v63 = vld [vmem:[#allocation5 + $0x16cc] ss:$36 sps:$4 sm:$0xff]  }
  0xaf   :  { %11341 = vmatprep.subr.bf16.mxu1 %v16981_v1  ;;  %v17042_v0 = vld [vmem:[#allocation5 + $0x1248] ss:$36 sps:$4 sm:$0xff]  }
  0xb0   :  { %v17045_v1 = vld [vmem:[#allocation5 + $0x16c8] ss:$36 sps:$4 sm:$0xff]  }
  0xb1   :  { %11299 = vmatpush2.bf16.msra.mxu0 %v16976_v2  ;;  %v17050_v2 = vld [vmem:[#allocation5 + $0x1204] ss:$36 sps:$4 sm:$0xff]  }
  0xb2   :  { %11342 = vmatpush2.bf16.msra.mxu1 %v16979_v3  ;;  %11300 = vmatprep.subr.bf16.mxu0 %v16984_v4  ;;  %v17053_v3 = vld [vmem:[#allocation5 + $0x1684] ss:$36 sps:$4 sm:$0xff]  }
  0xb3   :  { %11343 = vmatprep.subr.bf16.mxu1 %v16987_v5  ;;  %v17048_v4 = vld [vmem:[#allocation5 + $0x1200] ss:$36 sps:$4 sm:$0xff]  }
  0xb4   :  { %v17051_v5 = vld [vmem:[#allocation5 + $0x1680] ss:$36 sps:$4 sm:$0xff]  }
  0xb5   :  { %11301 = vmatpush2.bf16.msra.mxu0 %v16982_v6  ;;  %v17056_v6 = vld [vmem:[#allocation5 + $0x163c] ss:$36 sps:$4 sm:$0xff]  }
  0xb6   :  { %11344 = vmatpush2.bf16.msra.mxu1 %v16985_v7  ;;  %11302 = vmatprep.subr.bf16.mxu0 %v16990_v8  ;;  %v17059_v7 = vld [vmem:[#allocation5 + $0x1abc] ss:$36 sps:$4 sm:$0xff]  }
  0xb7   :  { %11345 = vmatprep.subr.bf16.mxu1 %v16993_v9  ;;  %v17054_v8 = vld [vmem:[#allocation5 + $0x1638] ss:$36 sps:$4 sm:$0xff]  }
  0xb8   :  { %v17057_v9 = vld [vmem:[#allocation5 + $0x1ab8] ss:$36 sps:$4 sm:$0xff]  }
  0xb9   :  { %11303 = vmatpush2.bf16.msra.mxu0 %v16988_v10  ;;  %v17062_v10 = vld [vmem:[#allocation5 + $0x15f4] ss:$36 sps:$4 sm:$0xff]  }
  0xba   :  { %11346 = vmatpush2.bf16.msra.mxu1 %v16991_v11  ;;  %11304 = vmatprep.subr.bf16.mxu0 %v16996_v13  ;;  %v17065_v11 = vld [vmem:[#allocation5 + $0x1a74] ss:$36 sps:$4 sm:$0xff]  }
  0xbb   :  { %11347 = vmatprep.subr.bf16.mxu1 %v16999_v14  ;;  %v17060_v13 = vld [vmem:[#allocation5 + $0x15f0] ss:$36 sps:$4 sm:$0xff]  }
  0xbc   :  { %v17063_v14 = vld [vmem:[#allocation5 + $0x1a70] ss:$36 sps:$4 sm:$0xff]  }
  0xbd   :  { %11305 = vmatpush2.bf16.msra.mxu0 %v16994_v16  ;;  %v17068_v16 = vld [vmem:[#allocation5 + $0x15ac] ss:$36 sps:$4 sm:$0xff]  }
  0xbe   :  { %11348 = vmatpush2.bf16.msra.mxu1 %v16997_v17  ;;  %11306 = vmatprep.subr.bf16.mxu0 %v17002_v18  ;;  %v17071_v17 = vld [vmem:[#allocation5 + $0x1a2c] ss:$36 sps:$4 sm:$0xff]  }
  0xbf   :  { %11349 = vmatprep.subr.bf16.mxu1 %v17005_v19  ;;  %v17066_v18 = vld [vmem:[#allocation5 + $0x15a8] ss:$36 sps:$4 sm:$0xff]  }
  0xc0   :  { %v17069_v19 = vld [vmem:[#allocation5 + $0x1a28] ss:$36 sps:$4 sm:$0xff]  }
  0xc1   :  { %11307 = vmatpush2.bf16.msra.mxu0 %v17000_v20  ;;  %v17074_v20 = vld [vmem:[#allocation5 + $0x1564] ss:$36 sps:$4 sm:$0xff]  }
  0xc2   :  { %11350 = vmatpush2.bf16.msra.mxu1 %v17003_v21  ;;  %11362 = vmatprep.subr.bf16.mxu0 %v17008_v24  ;;  %v17077_v21 = vld [vmem:[#allocation5 + $0x19e4] ss:$36 sps:$4 sm:$0xff]   ;;  %v17080_v24 = vld [vmem:[#allocation5 + $0x151c] ss:$36 sps:$4 sm:$0xff]  }
  0xc3   :  { %11405 = vmatprep.subr.bf16.mxu1 %v17011_v27  ;;  %v17081_v27 = vld [vmem:[#allocation5 + $0x1998] ss:$36 sps:$4 sm:$0xff]  }
  0xc4   :  { %11309 = vmatmul.mubr.bf16.vlgmr.msra.gmra.mxu0 %v19582_v28 }
  0xc5   :  { %11352 = vmatmul.mubr.bf16.vlgmr.msra.gmra.mxu1 %v19584_v31  ;;  %11363 = vmatpush1.bf16.msra.mxu0 %v17006_v29  ;;  %v17086_v29 = vld [vmem:[#allocation5 + $0x14d4] ss:$36 sps:$4 sm:$0xff]  }
  0xc6   :  { %11406 = vmatpush1.bf16.msra.mxu1 %v17009_v30  ;;  %11364 = vmatprep.subr.bf16.mxu0 %v17014_v32  ;;  %v17089_v30 = vld [vmem:[#allocation5 + $0x1954] ss:$36 sps:$4 sm:$0xff]  }
  0xc7   :  { %11407 = vmatprep.subr.bf16.mxu1 %v17017_v33  ;;  %11394 = vmatprep.mubr.bf16.mxu0 %v19588_v40  ;;  %v17084_v32 = vld [vmem:[#allocation5 + $0x14d0] ss:$36 sps:$4 sm:$0xff]  }
  0xc8   :  { %11437 = vmatprep.mubr.bf16.mxu1 %v19590_v46  ;;  %v17087_v33 = vld [vmem:[#allocation5 + $0x1950] ss:$36 sps:$4 sm:$0xff]  }
  0xc9   :  { %11365 = vmatpush1.bf16.msra.mxu0 %v17012_v34  ;;  %v17092_v34 = vld [vmem:[#allocation5 + $0x148c] ss:$36 sps:$4 sm:$0xff]  }
  0xca   :  { %11408 = vmatpush1.bf16.msra.mxu1 %v17015_v35  ;;  %11366 = vmatprep.subr.bf16.mxu0 %v17020_v36  ;;  %v17095_v35 = vld [vmem:[#allocation5 + $0x190c] ss:$36 sps:$4 sm:$0xff]  }
  0xcb   :  { %11409 = vmatprep.subr.bf16.mxu1 %v17023_v37  ;;  %v17090_v36 = vld [vmem:[#allocation5 + $0x1488] ss:$36 sps:$4 sm:$0xff]  }
  0xcc   :  { %v17093_v37 = vld [vmem:[#allocation5 + $0x1908] ss:$36 sps:$4 sm:$0xff]  }
  0xcd   :  { %11367 = vmatpush1.bf16.msra.mxu0 %v17018_v43  ;;  %v94_v43 = vld [vmem:[#allocation2 + $0x40] sm:$0xff] }
  0xce   :  { %11410 = vmatpush1.bf16.msra.mxu1 %v17021_v45  ;;  %11368 = vmatprep.subr.bf16.mxu0 %v17026_v48  ;;  %v119_v45 = vld [vmem:[#allocation2 + $0x108] sm:$0xff] }
  0xcf   :  { %11411 = vmatprep.subr.bf16.mxu1 %v17029_v49  ;;  %v17104_v48 = vld [vmem:[#allocation5 + $0x1cfc] ss:$36 sps:$4 sm:$0xff]  }
  0xd0   :  { %v96_v49 = vld [vmem:[#allocation2 + $0x50] sm:$0xff] }
  0xd1   :  { %11369 = vmatpush1.bf16.msra.mxu0 %v17024_v51  ;;  %v121_v51 = vld [vmem:[#allocation2 + $0x118] sm:$0xff] }
  0xd2   :  { %11412 = vmatpush1.bf16.msra.mxu1 %v17027_v52  ;;  %11370 = vmatprep.subr.bf16.mxu0 %v17032_v53  ;;  %v17107_v52 = vld [vmem:[#allocation5 + $0x217c] ss:$36 sps:$4 sm:$0xff]  }
  0xd3   :  { %11413 = vmatprep.subr.bf16.mxu1 %v17035_v54  ;;  %v99_v53 = vld [vmem:[#allocation2 + $0x68] sm:$0xff] }
  0xd4   :  { %v17102_v54 = vld [vmem:[#allocation5 + $0x1cf8] ss:$36 sps:$4 sm:$0xff]  }
  0xd5   :  { %11371 = vmatpush1.bf16.msra.mxu0 %v17030_v56  ;;  %v124_v56 = vld [vmem:[#allocation2 + $0x130] sm:$0xff] }
  0xd6   :  { %11414 = vmatpush1.bf16.msra.mxu1 %v17033_v57  ;;  %11372 = vmatprep.subr.bf16.mxu0 %v17038_v58  ;;  %v101_v57 = vld [vmem:[#allocation2 + $0x78] sm:$0xff]  ;;  %v19594_v58 = vpack.c.bf16 %v119_v45, %v94_v43 }
  0xd7   :  { %11415 = vmatprep.subr.bf16.mxu1 %v17041_v59  ;;  %v19596_v59 = vpack.c.bf16 %v121_v51, %v96_v49  ;;  %v17162_v43 = vld [vmem:[#allocation5 + $0x1ea8] ss:$36 sps:$4 sm:$0xff]   ;;  %v17168_v51 = vld [vmem:[#allocation5 + $0x1e60] ss:$36 sps:$4 sm:$0xff]  }
  0xd8   :  { %v17165_v45 = vld [vmem:[#allocation5 + $0x2328] ss:$36 sps:$4 sm:$0xff]  }
  0xd9   :  { %11373 = vmatpush1.bf16.msra.mxu0 %v17036_v60  ;;  %v126_v60 = vld [vmem:[#allocation2 + $0x140] sm:$0xff]  ;;  %v17173_v49 = vld [vmem:[#allocation5 + $0x22e4] ss:$36 sps:$4 sm:$0xff]  }
  0xda   :  { %11416 = vmatpush1.bf16.msra.mxu1 %v17039_v61  ;;  %11374 = vmatprep.subr.bf16.mxu0 %v17044_v62  ;;  %v17105_v61 = vld [vmem:[#allocation5 + $0x2178] ss:$36 sps:$4 sm:$0xff]  }
  0xdb   :  { %11417 = vmatprep.subr.bf16.mxu1 %v17047_v63  ;;  %v17110_v62 = vld [vmem:[#allocation5 + $0x1cb4] ss:$36 sps:$4 sm:$0xff]  }
  0xdc   :  { %v17113_v63 = vld [vmem:[#allocation5 + $0x2134] ss:$36 sps:$4 sm:$0xff]  }
  0xdd   :  { %11375 = vmatpush1.bf16.msra.mxu0 %v17042_v0  ;;  %v19598_v0 = vpack.c.bf16 %v124_v56, %v99_v53  ;;  %v17176_v53 = vld [vmem:[#allocation5 + $0x1e1c] ss:$36 sps:$4 sm:$0xff]  }
  0xde   :  { %11418 = vmatpush1.bf16.msra.mxu1 %v17045_v1  ;;  %11376 = vmatprep.subr.bf16.mxu0 %v17050_v2  ;;  %v19600_v1 = vpack.c.bf16 %v126_v60, %v101_v57  ;;  %v17108_v2 = vld [vmem:[#allocation5 + $0x1cb0] ss:$36 sps:$4 sm:$0xff]   ;;  %v17174_v56 = vld [vmem:[#allocation5 + $0x1e18] ss:$36 sps:$4 sm:$0xff]  }
  0xdf   :  { %11419 = vmatprep.subr.bf16.mxu1 %v17053_v3  ;;  %v17111_v3 = vld [vmem:[#allocation5 + $0x2130] ss:$36 sps:$4 sm:$0xff]   ;;  %v17177_v57 = vld [vmem:[#allocation5 + $0x2298] ss:$36 sps:$4 sm:$0xff]  }
  0xe0   :  { %v17182_v60 = vld [vmem:[#allocation5 + $0x1dd4] ss:$36 sps:$4 sm:$0xff]  }
  0xe1   :  { %11377 = vmatpush1.bf16.msra.mxu0 %v17048_v4  ;;  %v17116_v4 = vld [vmem:[#allocation5 + $0x1c6c] ss:$36 sps:$4 sm:$0xff]  }
  0xe2   :  { %11420 = vmatpush1.bf16.msra.mxu1 %v17051_v5  ;;  %11378 = vmatprep.subr.bf16.mxu0 %v17056_v6  ;;  %v17119_v5 = vld [vmem:[#allocation5 + $0x20ec] ss:$36 sps:$4 sm:$0xff]  }
  0xe3   :  { %11421 = vmatprep.subr.bf16.mxu1 %v17059_v7  ;;  %v17114_v6 = vld [vmem:[#allocation5 + $0x1c68] ss:$36 sps:$4 sm:$0xff]  }
  0xe4   :  { %v17117_v7 = vld [vmem:[#allocation5 + $0x20e8] ss:$36 sps:$4 sm:$0xff]  }
  0xe5   :  { %11379 = vmatpush2.bf16.msra.mxu0 %v17054_v8  ;;  %v17122_v8 = vld [vmem:[#allocation5 + $0x1c24] ss:$36 sps:$4 sm:$0xff]  }
  0xe6   :  { %11422 = vmatpush2.bf16.msra.mxu1 %v17057_v9  ;;  %11380 = vmatprep.subr.bf16.mxu0 %v17062_v10  ;;  %v17125_v9 = vld [vmem:[#allocation5 + $0x20a4] ss:$36 sps:$4 sm:$0xff]  }
  0xe7   :  { %11423 = vmatprep.subr.bf16.mxu1 %v17065_v11  ;;  %v17120_v10 = vld [vmem:[#allocation5 + $0x1c20] ss:$36 sps:$4 sm:$0xff]  }
  0xe8   :  { %v17123_v11 = vld [vmem:[#allocation5 + $0x20a0] ss:$36 sps:$4 sm:$0xff]  }
  0xe9   :  { %11381 = vmatpush2.bf16.msra.mxu0 %v17060_v13  ;;  %v17128_v13 = vld [vmem:[#allocation5 + $0x1bdc] ss:$36 sps:$4 sm:$0xff]  }
  0xea   :  { %11424 = vmatpush2.bf16.msra.mxu1 %v17063_v14  ;;  %11382 = vmatprep.subr.bf16.mxu0 %v17068_v16  ;;  %v17131_v14 = vld [vmem:[#allocation5 + $0x205c] ss:$36 sps:$4 sm:$0xff]  }
  0xeb   :  { %11425 = vmatprep.subr.bf16.mxu1 %v17071_v17  ;;  %v17126_v16 = vld [vmem:[#allocation5 + $0x1bd8] ss:$36 sps:$4 sm:$0xff]  }
  0xec   :  { %v17129_v17 = vld [vmem:[#allocation5 + $0x2058] ss:$36 sps:$4 sm:$0xff]  }
  0xed   :  { %11383 = vmatpush2.bf16.msra.mxu0 %v17066_v18  ;;  %v17134_v18 = vld [vmem:[#allocation5 + $0x1b94] ss:$36 sps:$4 sm:$0xff]  }
  0xee   :  { %11426 = vmatpush2.bf16.msra.mxu1 %v17069_v19  ;;  %11384 = vmatprep.subr.bf16.mxu0 %v17074_v20  ;;  %v17137_v19 = vld [vmem:[#allocation5 + $0x2014] ss:$36 sps:$4 sm:$0xff]  }
  0xef   :  { %11427 = vmatprep.subr.bf16.mxu1 %v17077_v21  ;;  %v17132_v20 = vld [vmem:[#allocation5 + $0x1b90] ss:$36 sps:$4 sm:$0xff]  }
  0xf0   :  { %v17135_v21 = vld [vmem:[#allocation5 + $0x2010] ss:$36 sps:$4 sm:$0xff]  }
  0xf1   :  { %11385 = vmatpush2.bf16.msra.mxu0 %v17072_v22  ;;  %v17140_v22 = vld [vmem:[#allocation5 + $0x1b4c] ss:$36 sps:$4 sm:$0xff]  }
  0xf2   :  { %11428 = vmatpush2.bf16.msra.mxu1 %v17075_v23  ;;  %11386 = vmatprep.subr.bf16.mxu0 %v17080_v24  ;;  %v17143_v23 = vld [vmem:[#allocation5 + $0x1fcc] ss:$36 sps:$4 sm:$0xff]  }
  0xf3   :  { %11429 = vmatprep.subr.bf16.mxu1 %v17083_v25  ;;  %v17138_v24 = vld [vmem:[#allocation5 + $0x1b48] ss:$36 sps:$4 sm:$0xff]  }
  0xf4   :  { %v17141_v25 = vld [vmem:[#allocation5 + $0x1fc8] ss:$36 sps:$4 sm:$0xff]  }
  0xf5   :  { %11387 = vmatpush2.bf16.msra.mxu0 %v17078_v26  ;;  %v17146_v26 = vld [vmem:[#allocation5 + $0x1b04] ss:$36 sps:$4 sm:$0xff]  }
  0xf6   :  { %11430 = vmatpush2.bf16.msra.mxu1 %v17081_v27  ;;  %11388 = vmatprep.subr.bf16.mxu0 %v17086_v29  ;;  %v17149_v27 = vld [vmem:[#allocation5 + $0x1f84] ss:$36 sps:$4 sm:$0xff]  }
  0xf7   :  { %11431 = vmatprep.subr.bf16.mxu1 %v17089_v30  ;;  %v17144_v29 = vld [vmem:[#allocation5 + $0x1b00] ss:$36 sps:$4 sm:$0xff]  }
  0xf8   :  { %v17147_v30 = vld [vmem:[#allocation5 + $0x1f80] ss:$36 sps:$4 sm:$0xff]  }
  0xf9   :  { %11389 = vmatpush2.bf16.msra.mxu0 %v17084_v32  ;;  %v17152_v32 = vld [vmem:[#allocation5 + $0x1f3c] ss:$36 sps:$4 sm:$0xff]  }
  0xfa   :  { %11432 = vmatpush2.bf16.msra.mxu1 %v17087_v33  ;;  %11390 = vmatprep.subr.bf16.mxu0 %v17092_v34  ;;  %v17155_v33 = vld [vmem:[#allocation5 + $0x23bc] ss:$36 sps:$4 sm:$0xff]  }
  0xfb   :  { %11433 = vmatprep.subr.bf16.mxu1 %v17095_v35  ;;  %v17150_v34 = vld [vmem:[#allocation5 + $0x1f38] ss:$36 sps:$4 sm:$0xff]  }
  0xfc   :  { %v17153_v35 = vld [vmem:[#allocation5 + $0x23b8] ss:$36 sps:$4 sm:$0xff]  }
  0xfd   :  { %11391 = vmatpush2.bf16.msra.mxu0 %v17090_v36  ;;  %v17158_v36 = vld [vmem:[#allocation5 + $0x1ef4] ss:$36 sps:$4 sm:$0xff]  }
  0xfe   :  { %11434 = vmatpush2.bf16.msra.mxu1 %v17093_v37  ;;  %11392 = vmatprep.subr.bf16.mxu0 %v17098_v38  ;;  %v17161_v37 = vld [vmem:[#allocation5 + $0x2374] ss:$36 sps:$4 sm:$0xff]  }
  0xff   :  { %11435 = vmatprep.subr.bf16.mxu1 %v17101_v39  ;;  %v17156_v38 = vld [vmem:[#allocation5 + $0x1ef0] ss:$36 sps:$4 sm:$0xff]  }
 0x100   :  { %v17159_v39 = vld [vmem:[#allocation5 + $0x2370] ss:$36 sps:$4 sm:$0xff]  }
 0x101   :  { %11393 = vmatpush2.bf16.msra.mxu0 %v17096_v41  ;;  %v17164_v41 = vld [vmem:[#allocation5 + $0x1eac] ss:$36 sps:$4 sm:$0xff]  }
 0x102   :  { %11436 = vmatpush2.bf16.msra.mxu1 %v17099_v42  ;;  %11448 = vmatprep.subr.bf16.mxu0 %v17104_v48  ;;  %v17167_v42 = vld [vmem:[#allocation5 + $0x232c] ss:$36 sps:$4 sm:$0xff]   ;;  %v17170_v48 = vld [vmem:[#allocation5 + $0x1e64] ss:$36 sps:$4 sm:$0xff]  }
 0x103   :  { %11491 = vmatprep.subr.bf16.mxu1 %v17107_v52  ;;  %v17171_v52 = vld [vmem:[#allocation5 + $0x22e0] ss:$36 sps:$4 sm:$0xff]  }
 0x104   :  { %11395 = vmatmul.mubr.bf16.vlgmr.msra.gmra.mxu0 %v19594_v58 }
 0x105   :  { %11438 = vmatmul.mubr.bf16.vlgmr.msra.gmra.mxu1 %v19596_v59  ;;  %11449 = vmatpush1.bf16.msra.mxu0 %v17102_v54  ;;  %v17179_v54 = vld [vmem:[#allocation5 + $0x229c] ss:$36 sps:$4 sm:$0xff]  }
 0x106   :  { %11492 = vmatpush1.bf16.msra.mxu1 %v17105_v61  ;;  %11450 = vmatprep.subr.bf16.mxu0 %v17110_v62  ;;  %v17185_v61 = vld [vmem:[#allocation5 + $0x2254] ss:$36 sps:$4 sm:$0xff]  }
 0x107   :  { %11493 = vmatprep.subr.bf16.mxu1 %v17113_v63  ;;  %11480 = vmatprep.mubr.bf16.mxu0 %v19598_v0  ;;  %v17180_v62 = vld [vmem:[#allocation5 + $0x1dd0] ss:$36 sps:$4 sm:$0xff]  }
 0x108   :  { %11523 = vmatprep.mubr.bf16.mxu1 %v19600_v1  ;;  %v17183_v63 = vld [vmem:[#allocation5 + $0x2250] ss:$36 sps:$4 sm:$0xff]  }
 0x109   :  { %11451 = vmatpush1.bf16.msra.mxu0 %v17108_v2  ;;  %v2125_v2 = vlaneseq }
 0x10a   :  { %11494 = vmatpush1.bf16.msra.mxu1 %v17111_v3  ;;  %11452 = vmatprep.subr.bf16.mxu0 %v17116_v4  ;;  %v17188_v3 = vld [vmem:[#allocation5 + $0x1d8c] ss:$36 sps:$4 sm:$0xff]  }
 0x10b   :  { %11495 = vmatprep.subr.bf16.mxu1 %v17119_v5  ;;  %v17191_v4 = vld [vmem:[#allocation5 + $0x220c] ss:$36 sps:$4 sm:$0xff]  }
 0x10c   :  { %v17186_v5 = vld [vmem:[#allocation5 + $0x1d88] ss:$36 sps:$4 sm:$0xff]  }
 0x10d   :  { %11453 = vmatpush1.bf16.msra.mxu0 %v17114_v6  ;;  %v17189_v6 = vld [vmem:[#allocation5 + $0x2208] ss:$36 sps:$4 sm:$0xff]  }
 0x10e   :  { %11496 = vmatpush1.bf16.msra.mxu1 %v17117_v7  ;;  %11454 = vmatprep.subr.bf16.mxu0 %v17122_v8  ;;  %v19606_v7 = vshrl.u32 %v2125_v2, 7  ;;  %v17194_v8 = vld [vmem:[#allocation5 + $0x1d44] ss:$36 sps:$4 sm:$0xff]  }
 0x10f   :  { %11497 = vmatprep.subr.bf16.mxu1 %v17125_v9  ;;  %v17197_v9 = vld [vmem:[#allocation5 + $0x21c4] ss:$36 sps:$4 sm:$0xff]  }
 0x110   :  { %20211 = vst [vmem:[#allocation16_spill] sm:$0xff] %v19606_v7  ;;  %v17218_v2 = vld [vmem:[#allocation5 + $0x2524] ss:$36 sps:$4 sm:$0xff]  }
 0x111   :  { %11455 = vmatpush1.bf16.msra.mxu0 %v17120_v10  ;;  %v17192_v10 = vld [vmem:[#allocation5 + $0x1d40] ss:$36 sps:$4 sm:$0xff]  }
 0x112   :  { %11498 = vmatpush1.bf16.msra.mxu1 %v17123_v11  ;;  %11456 = vmatprep.subr.bf16.mxu0 %v17128_v13  ;;  %v17195_v11 = vld [vmem:[#allocation5 + $0x21c0] ss:$36 sps:$4 sm:$0xff]   ;;  %v98_v13 = vld [vmem:[#allocation2 + $0x60] sm:$0xff] }
 0x113   :  { %11499 = vmatprep.subr.bf16.mxu1 %v17131_v14  ;;  %v123_v14 = vld [vmem:[#allocation2 + $0x128] sm:$0xff] }
 0x115   :  { %11457 = vmatpush1.bf16.msra.mxu0 %v17126_v16  ;;  %v2121_v16 = vld [vmem:[#allocation7] sm:$0xff] }
 0x116   :  { %11500 = vmatpush1.bf16.msra.mxu1 %v17129_v17  ;;  %11458 = vmatprep.subr.bf16.mxu0 %v17134_v18  ;;  %v17200_v17 = vld [vmem:[#allocation5 + $0x25fc] ss:$36 sps:$4 sm:$0xff]  }
 0x117   :  { %11501 = vmatprep.subr.bf16.mxu1 %v17137_v19  ;;  %v100_v18 = vld [vmem:[#allocation2 + $0x70] sm:$0xff]  ;;  %v2127_v19 = vsub.s32 0, %v19606_v7 }
 0x119   :  { %11459 = vmatpush1.bf16.msra.mxu0 %v17132_v20  ;;  %v125_v20 = vld [vmem:[#allocation2 + $0x138] sm:$0xff] }
 0x11a   :  { %11502 = vmatpush1.bf16.msra.mxu1 %v17135_v21  ;;  %11460 = vmatprep.subr.bf16.mxu0 %v17140_v22  ;;  %v17203_v21 = vld [vmem:[#allocation5 + $0x2a7c] ss:$36 sps:$4 sm:$0xff]  }
 0x11b   :  { %11503 = vmatprep.subr.bf16.mxu1 %v17143_v23  ;;  %v103_v22 = vld [vmem:[#allocation2 + $0x88] sm:$0xff] }
 0x11c   :  { %v17198_v23 = vld [vmem:[#allocation5 + $0x25f8] ss:$36 sps:$4 sm:$0xff]  }
 0x11d   :  { %11461 = vmatpush1.bf16.msra.mxu0 %v17138_v24  ;;  %v2131_v24 = vsub.s32 1, %v19606_v7 }
 0x11e   :  { %11504 = vmatpush1.bf16.msra.mxu1 %v17141_v25  ;;  %11462 = vmatprep.subr.bf16.mxu0 %v17146_v26  ;;  %v128_v25 = vld [vmem:[#allocation2 + $0x150] sm:$0xff]  ;;  %v105_v26 = vld [vmem:[#allocation2 + $0x98] sm:$0xff] }
 0x11f   :  { %11505 = vmatprep.subr.bf16.mxu1 %v17149_v27  ;;  %v19610_v27 = vpack.c.bf16 %v123_v14, %v98_v13  ;;  %v17230_v13 = vld [vmem:[#allocation5 + $0x2494] ss:$36 sps:$4 sm:$0xff]  }
 0x120   :  { %v17233_v14 = vld [vmem:[#allocation5 + $0x2914] ss:$36 sps:$4 sm:$0xff]  }
 0x121   :  { %11463 = vmatpush1.bf16.msra.mxu0 %v17144_v29  ;;  %v19612_v29 = vpack.c.bf16 %v125_v20, %v100_v18  ;;  %v17236_v18 = vld [vmem:[#allocation5 + $0x244c] ss:$36 sps:$4 sm:$0xff]  }
 0x122   :  { %11506 = vmatpush1.bf16.msra.mxu1 %v17147_v30  ;;  %11464 = vmatprep.subr.bf16.mxu0 %v17152_v32  ;;  %v130_v30 = vld [vmem:[#allocation2 + $0x160] sm:$0xff]  ;;  %v2128_v32 = vrot.slane %v2121_v16, %v2127_v19  ;;  %v17234_v20 = vld [vmem:[#allocation5 + $0x2448] ss:$36 sps:$4 sm:$0xff]  }
 0x123   :  { %11507 = vmatprep.subr.bf16.mxu1 %v17155_v33  ;;  %v17201_v33 = vld [vmem:[#allocation5 + $0x2a78] ss:$36 sps:$4 sm:$0xff]   ;;  %v17239_v19 = vld [vmem:[#allocation5 + $0x28cc] ss:$36 sps:$4 sm:$0xff]  }
 0x125   :  { %11465 = vmatpush2.bf16.msra.mxu0 %v17150_v34  ;;  %v17206_v34 = vld [vmem:[#allocation5 + $0x25b4] ss:$36 sps:$4 sm:$0xff]  }
 0x126   :  { %11508 = vmatpush2.bf16.msra.mxu1 %v17153_v35  ;;  %11466 = vmatprep.subr.bf16.mxu0 %v17158_v36  ;;  %v17209_v35 = vld [vmem:[#allocation5 + $0x2a34] ss:$36 sps:$4 sm:$0xff]   ;;  %v19614_v36 = vrot.slane %v2121_v16, %v2131_v24  ;;  %v17240_v24 = vld [vmem:[#allocation5 + $0x2400] ss:$36 sps:$4 sm:$0xff]  }
 0x127   :  { %11509 = vmatprep.subr.bf16.mxu1 %v17161_v37  ;;  %v19616_v37 = vpack.c.bf16 %v128_v25, %v103_v22  ;;  %v17228_v16 = vld [vmem:[#allocation5 + $0x2490] ss:$36 sps:$4 sm:$0xff]   ;;  %v17242_v22 = vld [vmem:[#allocation5 + $0x2404] ss:$36 sps:$4 sm:$0xff]  }
 0x128   :  { %v17243_v25 = vld [vmem:[#allocation5 + $0x2880] ss:$36 sps:$4 sm:$0xff]  }
 0x129   :  { %11467 = vmatpush2.bf16.msra.mxu0 %v17156_v38  ;;  %v19618_v38 = vpack.c.bf16 %v130_v30, %v105_v26  ;;  %v17248_v26 = vld [vmem:[#allocation5 + $0x283c] ss:$36 sps:$4 sm:$0xff]  }
 0x12a   :  { %11510 = vmatpush2.bf16.msra.mxu1 %v17159_v39  ;;  %11468 = vmatprep.subr.bf16.mxu0 %v17164_v41  ;;  %v17251_v30 = vld [vmem:[#allocation5 + $0x2cbc] ss:$36 sps:$4 sm:$0xff]  }
 0x12b   :  { %11511 = vmatprep.subr.bf16.mxu1 %v17167_v42  ;;  %v17204_v42 = vld [vmem:[#allocation5 + $0x25b0] ss:$36 sps:$4 sm:$0xff]  }
 0x12d   :  { %11469 = vmatpush2.bf16.msra.mxu0 %v17162_v43 }
 0x12e   :  { %11512 = vmatpush2.bf16.msra.mxu1 %v17165_v45  ;;  %11470 = vmatprep.subr.bf16.mxu0 %v17170_v48  ;;  %v17207_v45 = vld [vmem:[#allocation5 + $0x2a30] ss:$36 sps:$4 sm:$0xff]  }
 0x12f   :  { %11513 = vmatprep.subr.bf16.mxu1 %v17173_v49 }
 0x131   :  { %11471 = vmatpush2.bf16.msra.mxu0 %v17168_v51  ;;  %v17212_v51 = vld [vmem:[#allocation5 + $0x256c] ss:$36 sps:$4 sm:$0xff]  }
 0x132   :  { %11514 = vmatpush2.bf16.msra.mxu1 %v17171_v52  ;;  %11472 = vmatprep.subr.bf16.mxu0 %v17176_v53  ;;  %v17215_v52 = vld [vmem:[#allocation5 + $0x29ec] ss:$36 sps:$4 sm:$0xff]  }
 0x133   :  { %11515 = vmatprep.subr.bf16.mxu1 %v17179_v54 }
 0x135   :  { %11473 = vmatpush2.bf16.msra.mxu0 %v17174_v56 }
 0x136   :  { %11516 = vmatpush2.bf16.msra.mxu1 %v17177_v57  ;;  %11474 = vmatprep.subr.bf16.mxu0 %v17182_v60  ;;  %v17210_v60 = vld [vmem:[#allocation5 + $0x2568] ss:$36 sps:$4 sm:$0xff]  }
 0x137   :  { %11517 = vmatprep.subr.bf16.mxu1 %v17185_v61 }
 0x139   :  { %11475 = vmatpush2.bf16.msra.mxu0 %v17180_v62 }
 0x13a   :  { %11518 = vmatpush2.bf16.msra.mxu1 %v17183_v63  ;;  %11476 = vmatprep.subr.bf16.mxu0 %v17188_v3  ;;  %v17213_v63 = vld [vmem:[#allocation5 + $0x29e8] ss:$36 sps:$4 sm:$0xff]  }
 0x13b   :  { %11519 = vmatprep.subr.bf16.mxu1 %v17191_v4  ;;  %v17221_v3 = vld [vmem:[#allocation5 + $0x29a4] ss:$36 sps:$4 sm:$0xff]  }
 0x13d   :  { %11477 = vmatpush2.bf16.msra.mxu0 %v17186_v5  ;;  %v17216_v5 = vld [vmem:[#allocation5 + $0x2520] ss:$36 sps:$4 sm:$0xff]  }
 0x13e   :  { %11520 = vmatpush2.bf16.msra.mxu1 %v17189_v6  ;;  %11478 = vmatprep.subr.bf16.mxu0 %v17194_v8  ;;  %v17219_v6 = vld [vmem:[#allocation5 + $0x29a0] ss:$36 sps:$4 sm:$0xff]  }
 0x13f   :  { %11521 = vmatprep.subr.bf16.mxu1 %v17197_v9  ;;  %v17224_v8 = vld [vmem:[#allocation5 + $0x24dc] ss:$36 sps:$4 sm:$0xff]  }
 0x140   :  { %v17227_v9 = vld [vmem:[#allocation5 + $0x295c] ss:$36 sps:$4 sm:$0xff]  }
 0x141   :  { %11479 = vmatpush2.bf16.msra.mxu0 %v17192_v10  ;;  %v17222_v10 = vld [vmem:[#allocation5 + $0x24d8] ss:$36 sps:$4 sm:$0xff]  }
 0x142   :  { %11522 = vmatpush2.bf16.msra.mxu1 %v17195_v11  ;;  %11534 = vmatprep.subr.bf16.mxu0 %v17200_v17  ;;  %v17225_v11 = vld [vmem:[#allocation5 + $0x2958] ss:$36 sps:$4 sm:$0xff]   ;;  %v17231_v17 = vld [vmem:[#allocation5 + $0x2910] ss:$36 sps:$4 sm:$0xff]  }
 0x143   :  { %11577 = vmatprep.subr.bf16.mxu1 %v17203_v21  ;;  %v17237_v21 = vld [vmem:[#allocation5 + $0x28c8] ss:$36 sps:$4 sm:$0xff]  }
 0x144   :  { %v11224_v39 = vpop.f32.mrf.mxu0  ;;  %11481 = vmatmul.mubr.bf16.vlgmr.msra.gmra.mxu0 %v19610_v27 }
 0x145   :  { %11524 = vmatmul.mubr.bf16.vlgmr.msra.gmra.mxu1 %v19612_v29  ;;  %v11267_v41 = vpop.f32.mrf.mxu1  ;;  %v11225_v43 = vadd.f32 %v11224_v39, %v2128_v32  ;;  %11535 = vmatpush1.bf16.msra.mxu0 %v17198_v23  ;;  %v17245_v23 = vld [vmem:[#allocation5 + $0x2884] ss:$36 sps:$4 sm:$0xff]   ;;  %v17252_v39 = vld [vmem:[#allocation5 + $0x27f0] ss:$36 sps:$4 sm:$0xff]  }
 0x146   :  { %11578 = vmatpush1.bf16.msra.mxu1 %v17201_v33  ;;  %v11226_v48 = vpop.f32.mrf.mxu0  ;;  %11536 = vmatprep.subr.bf16.mxu0 %v17206_v34  ;;  %v17249_v33 = vld [vmem:[#allocation5 + $0x2cb8] ss:$36 sps:$4 sm:$0xff]  }
 0x147   :  { %v11269_v49 = vpop.f32.mrf.mxu1  ;;  %11579 = vmatprep.subr.bf16.mxu1 %v17209_v35  ;;  %v11227_v53 = vadd.f32 %v11226_v48, %v19614_v36  ;;  %v19623_v54 = vadd.f32 %v11267_v41, %v11225_v43  ;;  %11566 = vmatprep.mubr.bf16.mxu0 %v19616_v37  ;;  %v17254_v34 = vld [vmem:[#allocation5 + $0x27f4] ss:$36 sps:$4 sm:$0xff]   ;;  %v17263_v43 = vld [vmem:[#allocation5 + $0x2c2c] ss:$36 sps:$4 sm:$0xff]  }
 0x148   :  { %11609 = vmatprep.mubr.bf16.mxu1 %v19618_v38  ;;  %v11228_v56 = vpop.f32.mrf.mxu0  ;;  %v17257_v35 = vld [vmem:[#allocation5 + $0x2c74] ss:$36 sps:$4 sm:$0xff]   ;;  %v17261_v48 = vld [vmem:[#allocation5 + $0x2c28] ss:$36 sps:$4 sm:$0xff]  }
 0x149   :  { %v11271_v57 = vpop.f32.mrf.mxu1  ;;  %v11229_v61 = vadd.f32 %v11228_v56, %v2128_v32  ;;  %v19627_v62 = vadd.f32 %v11269_v49, %v11227_v53  ;;  %11537 = vmatpush1.bf16.msra.mxu0 %v17204_v42  ;;  %v17246_v32 = vld [vmem:[#allocation5 + $0x2838] ss:$36 sps:$4 sm:$0xff]   ;;  %v17255_v41 = vld [vmem:[#allocation5 + $0x2c70] ss:$36 sps:$4 sm:$0xff]   ;;  %v17266_v49 = vld [vmem:[#allocation5 + $0x2764] ss:$36 sps:$4 sm:$0xff]  }
 0x14a   :  { %11580 = vmatpush1.bf16.msra.mxu1 %v17207_v45  ;;  %11538 = vmatprep.subr.bf16.mxu0 %v17212_v51  ;;  %v17260_v42 = vld [vmem:[#allocation5 + $0x27ac] ss:$36 sps:$4 sm:$0xff]   ;;  %v17269_v51 = vld [vmem:[#allocation5 + $0x2be4] ss:$36 sps:$4 sm:$0xff]   ;;  %v17272_v56 = vld [vmem:[#allocation5 + $0x271c] ss:$36 sps:$4 sm:$0xff]  }
 0x14b   :  { %11581 = vmatprep.subr.bf16.mxu1 %v17215_v52  ;;  %v19629_v4 = vadd.f32 %v11271_v57, %v11229_v61  ;;  %v17258_v45 = vld [vmem:[#allocation5 + $0x27a8] ss:$36 sps:$4 sm:$0xff]   ;;  %v17264_v52 = vld [vmem:[#allocation5 + $0x2760] ss:$36 sps:$4 sm:$0xff]   ;;  %v17273_v61 = vld [vmem:[#allocation5 + $0x2b98] ss:$36 sps:$4 sm:$0xff]  }
 0x14c   :  { %v17267_v53 = vld [vmem:[#allocation5 + $0x2be0] ss:$36 sps:$4 sm:$0xff]  }
 0x14d   :  { %11539 = vmatpush1.bf16.msra.mxu0 %v17210_v60  ;;  %v17275_v57 = vld [vmem:[#allocation5 + $0x2b9c] ss:$36 sps:$4 sm:$0xff]  }
 0x14e   :  { %11582 = vmatpush1.bf16.msra.mxu1 %v17213_v63  ;;  %11540 = vmatprep.subr.bf16.mxu0 %v17218_v2  ;;  %v17270_v60 = vld [vmem:[#allocation5 + $0x2718] ss:$36 sps:$4 sm:$0xff]  }
 0x14f   :  { %11583 = vmatprep.subr.bf16.mxu1 %v17221_v3  ;;  %v17278_v63 = vld [vmem:[#allocation5 + $0x26d4] ss:$36 sps:$4 sm:$0xff]  }
 0x150   :  { %v17281_v2 = vld [vmem:[#allocation5 + $0x2b54] ss:$36 sps:$4 sm:$0xff]  }
 0x151   :  { %11541 = vmatpush1.bf16.msra.mxu0 %v17216_v5  ;;  %v17276_v3 = vld [vmem:[#allocation5 + $0x26d0] ss:$36 sps:$4 sm:$0xff]  }
 0x152   :  { %11584 = vmatpush1.bf16.msra.mxu1 %v17219_v6  ;;  %11542 = vmatprep.subr.bf16.mxu0 %v17224_v8  ;;  %v17279_v5 = vld [vmem:[#allocation5 + $0x2b50] ss:$36 sps:$4 sm:$0xff]  }
 0x153   :  { %11585 = vmatprep.subr.bf16.mxu1 %v17227_v9  ;;  %v17284_v6 = vld [vmem:[#allocation5 + $0x268c] ss:$36 sps:$4 sm:$0xff]  }
 0x154   :  { %v17287_v8 = vld [vmem:[#allocation5 + $0x2b0c] ss:$36 sps:$4 sm:$0xff]  }
 0x155   :  { %11543 = vmatpush1.bf16.msra.mxu0 %v17222_v10  ;;  %v17282_v9 = vld [vmem:[#allocation5 + $0x2688] ss:$36 sps:$4 sm:$0xff]  }
 0x156   :  { %11586 = vmatpush1.bf16.msra.mxu1 %v17225_v11  ;;  %11544 = vmatprep.subr.bf16.mxu0 %v17230_v13  ;;  %v17285_v10 = vld [vmem:[#allocation5 + $0x2b08] ss:$36 sps:$4 sm:$0xff]  }
 0x157   :  { %11587 = vmatprep.subr.bf16.mxu1 %v17233_v14  ;;  %v17290_v11 = vld [vmem:[#allocation5 + $0x2644] ss:$36 sps:$4 sm:$0xff]  }
 0x158   :  { %v17293_v13 = vld [vmem:[#allocation5 + $0x2ac4] ss:$36 sps:$4 sm:$0xff]  }
 0x159   :  { %11545 = vmatpush1.bf16.msra.mxu0 %v17228_v16  ;;  %v17288_v14 = vld [vmem:[#allocation5 + $0x2640] ss:$36 sps:$4 sm:$0xff]  }
 0x15a   :  { %11588 = vmatpush1.bf16.msra.mxu1 %v17231_v17  ;;  %11546 = vmatprep.subr.bf16.mxu0 %v17236_v18  ;;  %v17291_v16 = vld [vmem:[#allocation5 + $0x2ac0] ss:$36 sps:$4 sm:$0xff]   ;;  %v102_v17 = vld [vmem:[#allocation2 + $0x80] sm:$0xff]  ;;  %v127_v18 = vld [vmem:[#allocation2 + $0x148] sm:$0xff] }
 0x15b   :  { %11589 = vmatprep.subr.bf16.mxu1 %v17239_v19  ;;  %v17296_v19 = vld [vmem:[#allocation5 + $0x2efc] ss:$36 sps:$4 sm:$0xff]  }
 0x15d   :  { %11547 = vmatpush1.bf16.msra.mxu0 %v17234_v20  ;;  %v17299_v20 = vld [vmem:[#allocation5 + $0x337c] ss:$36 sps:$4 sm:$0xff]  }
 0x15e   :  { %11590 = vmatpush1.bf16.msra.mxu1 %v17237_v21  ;;  %11548 = vmatprep.subr.bf16.mxu0 %v17242_v22  ;;  %v104_v21 = vld [vmem:[#allocation2 + $0x90] sm:$0xff]  ;;  %v129_v22 = vld [vmem:[#allocation2 + $0x158] sm:$0xff] }
 0x15f   :  { %11591 = vmatprep.subr.bf16.mxu1 %v17245_v23  ;;  %v107_v23 = vld [vmem:[#allocation2 + $0xa8] sm:$0xff] }
 0x161   :  { %11549 = vmatpush1.bf16.msra.mxu0 %v17240_v24  ;;  %v132_v24 = vld [vmem:[#allocation2 + $0x170] sm:$0xff] }
 0x162   :  { %11592 = vmatpush1.bf16.msra.mxu1 %v17243_v25  ;;  %11550 = vmatprep.subr.bf16.mxu0 %v17248_v26  ;;  %v109_v25 = vld [vmem:[#allocation2 + $0xb8] sm:$0xff]  ;;  %v134_v26 = vld [vmem:[#allocation2 + $0x180] sm:$0xff] }
 0x163   :  { %11593 = vmatprep.subr.bf16.mxu1 %v17251_v30  ;;  %v17294_v30 = vld [vmem:[#allocation5 + $0x2ef8] ss:$36 sps:$4 sm:$0xff]  }
 0x165   :  { %11551 = vmatpush2.bf16.msra.mxu0 %v17246_v32  ;;  %v17297_v32 = vld [vmem:[#allocation5 + $0x3378] ss:$36 sps:$4 sm:$0xff]  }
 0x166   :  { %11594 = vmatpush2.bf16.msra.mxu1 %v17249_v33  ;;  %11552 = vmatprep.subr.bf16.mxu0 %v17254_v34  ;;  %v19631_v33 = vpack.c.bf16 %v127_v18, %v102_v17  ;;  %v19633_v34 = vpack.c.bf16 %v129_v22, %v104_v21  ;;  %v17323_v17 = vld [vmem:[#allocation5 + $0x325c] ss:$36 sps:$4 sm:$0xff]   ;;  %v17324_v21 = vld [vmem:[#allocation5 + $0x2d90] ss:$36 sps:$4 sm:$0xff]  }
 0x167   :  { %11595 = vmatprep.subr.bf16.mxu1 %v17257_v35  ;;  %v19635_v35 = vpop.f32.mrf.mxu0  ;;  %v17318_v18 = vld [vmem:[#allocation5 + $0x2dd8] ss:$36 sps:$4 sm:$0xff]   ;;  %v17327_v22 = vld [vmem:[#allocation5 + $0x3210] ss:$36 sps:$4 sm:$0xff]  }
 0x169   :  { %11553 = vmatpush2.bf16.msra.mxu0 %v17252_v39  ;;  %v19637_v39 = vpop.f32.mrf.mxu1 }
 0x16a   :  { %11596 = vmatpush2.bf16.msra.mxu1 %v17255_v41  ;;  %11554 = vmatprep.subr.bf16.mxu0 %v17260_v42  ;;  %v17302_v41 = vld [vmem:[#allocation5 + $0x2eb4] ss:$36 sps:$4 sm:$0xff]  }
 0x16b   :  { %11597 = vmatprep.subr.bf16.mxu1 %v17263_v43  ;;  %v17305_v42 = vld [vmem:[#allocation5 + $0x3334] ss:$36 sps:$4 sm:$0xff]  }
 0x16c   :  { %v17300_v43 = vld [vmem:[#allocation5 + $0x2eb0] ss:$36 sps:$4 sm:$0xff]  }
 0x16d   :  { %11555 = vmatpush2.bf16.msra.mxu0 %v17258_v45  ;;  %v17303_v45 = vld [vmem:[#allocation5 + $0x3330] ss:$36 sps:$4 sm:$0xff]  }
 0x16e   :  { %11598 = vmatpush2.bf16.msra.mxu1 %v17261_v48  ;;  %11556 = vmatprep.subr.bf16.mxu0 %v17266_v49  ;;  %v19639_v48 = vpack.c.bf16 %v132_v24, %v107_v23  ;;  %v19641_v49 = vpack.c.bf16 %v134_v26, %v109_v25  ;;  %v17332_v23 = vld [vmem:[#allocation5 + $0x2d4c] ss:$36 sps:$4 sm:$0xff]  }
 0x16f   :  { %11599 = vmatprep.subr.bf16.mxu1 %v17269_v51  ;;  %v17335_v24 = vld [vmem:[#allocation5 + $0x31cc] ss:$36 sps:$4 sm:$0xff]  }
 0x170   :  { %v17330_v25 = vld [vmem:[#allocation5 + $0x2d48] ss:$36 sps:$4 sm:$0xff]  }
 0x171   :  { %11557 = vmatpush2.bf16.msra.mxu0 %v17264_v52  ;;  %v17333_v26 = vld [vmem:[#allocation5 + $0x31c8] ss:$36 sps:$4 sm:$0xff]  }
 0x172   :  { %11600 = vmatpush2.bf16.msra.mxu1 %v17267_v53  ;;  %11558 = vmatprep.subr.bf16.mxu0 %v17272_v56 }
 0x173   :  { %11601 = vmatprep.subr.bf16.mxu1 %v17275_v57 }
 0x175   :  { %11559 = vmatpush2.bf16.msra.mxu0 %v17270_v60  ;;  %v17308_v60 = vld [vmem:[#allocation5 + $0x2e6c] ss:$36 sps:$4 sm:$0xff]  }
 0x176   :  { %11602 = vmatpush2.bf16.msra.mxu1 %v17273_v61  ;;  %11560 = vmatprep.subr.bf16.mxu0 %v17278_v63  ;;  %v17311_v61 = vld [vmem:[#allocation5 + $0x32ec] ss:$36 sps:$4 sm:$0xff]  }
 0x177   :  { %11603 = vmatprep.subr.bf16.mxu1 %v17281_v2 }
 0x179   :  { %11561 = vmatpush2.bf16.msra.mxu0 %v17276_v3  ;;  %v17306_v3 = vld [vmem:[#allocation5 + $0x2e68] ss:$36 sps:$4 sm:$0xff]  }
 0x17a   :  { %11604 = vmatpush2.bf16.msra.mxu1 %v17279_v5  ;;  %11562 = vmatprep.subr.bf16.mxu0 %v17284_v6  ;;  %v17309_v5 = vld [vmem:[#allocation5 + $0x32e8] ss:$36 sps:$4 sm:$0xff]  }
 0x17b   :  { %11605 = vmatprep.subr.bf16.mxu1 %v17287_v8 }
 0x17d   :  { %11563 = vmatpush2.bf16.msra.mxu0 %v17282_v9 }
 0x17e   :  { %11606 = vmatpush2.bf16.msra.mxu1 %v17285_v10  ;;  %11564 = vmatprep.subr.bf16.mxu0 %v17290_v11  ;;  %v17314_v10 = vld [vmem:[#allocation5 + $0x2e24] ss:$36 sps:$4 sm:$0xff]  }
 0x17f   :  { %11607 = vmatprep.subr.bf16.mxu1 %v17293_v13  ;;  %v17312_v13 = vld [vmem:[#allocation5 + $0x2e20] ss:$36 sps:$4 sm:$0xff]  }
 0x181   :  { %11565 = vmatpush2.bf16.msra.mxu0 %v17288_v14  ;;  %v17315_v14 = vld [vmem:[#allocation5 + $0x32a0] ss:$36 sps:$4 sm:$0xff]  }
 0x182   :  { %11608 = vmatpush2.bf16.msra.mxu1 %v17291_v16  ;;  %11620 = vmatprep.subr.bf16.mxu0 %v17296_v19  ;;  %v17320_v16 = vld [vmem:[#allocation5 + $0x2ddc] ss:$36 sps:$4 sm:$0xff]   ;;  %v17326_v19 = vld [vmem:[#allocation5 + $0x2d94] ss:$36 sps:$4 sm:$0xff]  }
 0x183   :  { %11663 = vmatprep.subr.bf16.mxu1 %v17299_v20  ;;  %v17329_v20 = vld [vmem:[#allocation5 + $0x3214] ss:$36 sps:$4 sm:$0xff]  }
 0x184   :  { %v11310_v51 = vpop.f32.mrf.mxu0  ;;  %11567 = vmatmul.mubr.bf16.vlgmr.msra.gmra.mxu0 %v19631_v33 }
 0x185   :  { %11610 = vmatmul.mubr.bf16.vlgmr.msra.gmra.mxu1 %v19633_v34  ;;  %v11353_v52 = vpop.f32.mrf.mxu1  ;;  %v11311_v53 = vadd.f32 %v11310_v51, %v19623_v54  ;;  %11621 = vmatpush1.bf16.msra.mxu0 %v17294_v30  ;;  %v17338_v30 = vld [vmem:[#allocation5 + $0x2d04] ss:$36 sps:$4 sm:$0xff]   ;;  %v17342_v51 = vld [vmem:[#allocation5 + $0x3138] ss:$36 sps:$4 sm:$0xff]  }
 0x186   :  { %11664 = vmatpush1.bf16.msra.mxu1 %v17297_v32  ;;  %v11312_v56 = vpop.f32.mrf.mxu0  ;;  %11622 = vmatprep.subr.bf16.mxu0 %v17302_v41  ;;  %v17341_v32 = vld [vmem:[#allocation5 + $0x3184] ss:$36 sps:$4 sm:$0xff]  }
 0x187   :  { %v11355_v57 = vpop.f32.mrf.mxu1  ;;  %11665 = vmatprep.subr.bf16.mxu1 %v17305_v42  ;;  %v11313_v63 = vadd.f32 %v11312_v56, %v19627_v62  ;;  %v19647_v2 = vadd.f32 %v11353_v52, %v11311_v53  ;;  %11652 = vmatprep.mubr.bf16.mxu0 %v19639_v48  ;;  %v17317_v62 = vld [vmem:[#allocation5 + $0x32a4] ss:$36 sps:$4 sm:$0xff]   ;;  %v17345_v52 = vld [vmem:[#allocation5 + $0x35b8] ss:$36 sps:$4 sm:$0xff]  }
 0x188   :  { %11695 = vmatprep.mubr.bf16.mxu1 %v19641_v49  ;;  %v11314_v6 = vpop.f32.mrf.mxu0  ;;  %v17336_v41 = vld [vmem:[#allocation5 + $0x2d00] ss:$36 sps:$4 sm:$0xff]   ;;  %v17350_v53 = vld [vmem:[#allocation5 + $0x30f4] ss:$36 sps:$4 sm:$0xff]  }
 0x189   :  { %v11357_v54 = vpop.f32.mrf.mxu1  ;;  %v11315_v8 = vadd.f32 %v11314_v6, %v19629_v4  ;;  %v19652_v9 = vadd.f32 %v11355_v57, %v11313_v63  ;;  %11623 = vmatpush1.bf16.msra.mxu0 %v17300_v43  ;;  %v17321_v4 = vld [vmem:[#allocation5 + $0x3258] ss:$36 sps:$4 sm:$0xff]   ;;  %v17339_v42 = vld [vmem:[#allocation5 + $0x3180] ss:$36 sps:$4 sm:$0xff]   ;;  %v17348_v57 = vld [vmem:[#allocation5 + $0x30f0] ss:$36 sps:$4 sm:$0xff]  }
 0x18a   :  { %11666 = vmatpush1.bf16.msra.mxu1 %v17303_v45  ;;  %11624 = vmatprep.subr.bf16.mxu0 %v17308_v60  ;;  %v17344_v43 = vld [vmem:[#allocation5 + $0x313c] ss:$36 sps:$4 sm:$0xff]   ;;  %v17353_v56 = vld [vmem:[#allocation5 + $0x3574] ss:$36 sps:$4 sm:$0xff]   ;;  %v17359_v63 = vld [vmem:[#allocation5 + $0x352c] ss:$36 sps:$4 sm:$0xff]  }
 0x18b   :  { %11667 = vmatprep.subr.bf16.mxu1 %v17311_v61  ;;  %v19654_v11 = vadd.f32 %v11357_v54, %v11315_v8  ;;  %v17347_v45 = vld [vmem:[#allocation5 + $0x35bc] ss:$36 sps:$4 sm:$0xff]   ;;  %v17351_v60 = vld [vmem:[#allocation5 + $0x3570] ss:$36 sps:$4 sm:$0xff]   ;;  %v17362_v6 = vld [vmem:[#allocation5 + $0x3064] ss:$36 sps:$4 sm:$0xff]  }
 0x18c   :  { %v17356_v61 = vld [vmem:[#allocation5 + $0x30ac] ss:$36 sps:$4 sm:$0xff]   ;;  %v17365_v54 = vld [vmem:[#allocation5 + $0x34e4] ss:$36 sps:$4 sm:$0xff]  }
 0x18d   :  { %11625 = vmatpush1.bf16.msra.mxu0 %v17306_v3  ;;  %v17354_v3 = vld [vmem:[#allocation5 + $0x30a8] ss:$36 sps:$4 sm:$0xff]   ;;  %v17360_v8 = vld [vmem:[#allocation5 + $0x3060] ss:$36 sps:$4 sm:$0xff]  }
 0x18e   :  { %11668 = vmatpush1.bf16.msra.mxu1 %v17309_v5  ;;  %11626 = vmatprep.subr.bf16.mxu0 %v17314_v10  ;;  %v17357_v5 = vld [vmem:[#allocation5 + $0x3528] ss:$36 sps:$4 sm:$0xff]   ;;  %v17363_v10 = vld [vmem:[#allocation5 + $0x34e0] ss:$36 sps:$4 sm:$0xff]  }
 0x18f   :  { %11669 = vmatprep.subr.bf16.mxu1 %v17317_v62  ;;  %v17368_v62 = vld [vmem:[#allocation5 + $0x301c] ss:$36 sps:$4 sm:$0xff]  }
 0x191   :  { %11627 = vmatpush1.bf16.msra.mxu0 %v17312_v13  ;;  %v17371_v13 = vld [vmem:[#allocation5 + $0x349c] ss:$36 sps:$4 sm:$0xff]  }
 0x192   :  { %11670 = vmatpush1.bf16.msra.mxu1 %v17315_v14  ;;  %11628 = vmatprep.subr.bf16.mxu0 %v17320_v16  ;;  %v17366_v14 = vld [vmem:[#allocation5 + $0x3018] ss:$36 sps:$4 sm:$0xff]  }
 0x193   :  { %11671 = vmatprep.subr.bf16.mxu1 %v17323_v17  ;;  %v17369_v16 = vld [vmem:[#allocation5 + $0x3498] ss:$36 sps:$4 sm:$0xff]  }
 0x194   :  { %v17374_v17 = vld [vmem:[#allocation5 + $0x2fd4] ss:$36 sps:$4 sm:$0xff]  }
 0x195   :  { %11629 = vmatpush1.bf16.msra.mxu0 %v17318_v18  ;;  %v17377_v18 = vld [vmem:[#allocation5 + $0x3454] ss:$36 sps:$4 sm:$0xff]  }
 0x196   :  { %11672 = vmatpush1.bf16.msra.mxu1 %v17321_v4  ;;  %11630 = vmatprep.subr.bf16.mxu0 %v17326_v19  ;;  %v17372_v4 = vld [vmem:[#allocation5 + $0x2fd0] ss:$36 sps:$4 sm:$0xff]  }
 0x197   :  { %11673 = vmatprep.subr.bf16.mxu1 %v17329_v20  ;;  %v17375_v19 = vld [vmem:[#allocation5 + $0x3450] ss:$36 sps:$4 sm:$0xff]  }
 0x198   :  { %v17380_v20 = vld [vmem:[#allocation5 + $0x2f8c] ss:$36 sps:$4 sm:$0xff]  }
 0x199   :  { %11631 = vmatpush1.bf16.msra.mxu0 %v17324_v21  ;;  %v17383_v21 = vld [vmem:[#allocation5 + $0x340c] ss:$36 sps:$4 sm:$0xff]  }
 0x19a   :  { %11674 = vmatpush1.bf16.msra.mxu1 %v17327_v22  ;;  %11632 = vmatprep.subr.bf16.mxu0 %v17332_v23  ;;  %v17378_v22 = vld [vmem:[#allocation5 + $0x2f88] ss:$36 sps:$4 sm:$0xff]  }
 0x19b   :  { %11675 = vmatprep.subr.bf16.mxu1 %v17335_v24  ;;  %v17381_v23 = vld [vmem:[#allocation5 + $0x3408] ss:$36 sps:$4 sm:$0xff]  }
 0x19c   :  { %v17386_v24 = vld [vmem:[#allocation5 + $0x2f44] ss:$36 sps:$4 sm:$0xff]  }
 0x19d   :  { %11633 = vmatpush1.bf16.msra.mxu0 %v17330_v25  ;;  %v17389_v25 = vld [vmem:[#allocation5 + $0x33c4] ss:$36 sps:$4 sm:$0xff]  }
 0x19e   :  { %11676 = vmatpush1.bf16.msra.mxu1 %v17333_v26  ;;  %11634 = vmatprep.subr.bf16.mxu0 %v17338_v30  ;;  %v17384_v26 = vld [vmem:[#allocation5 + $0x2f40] ss:$36 sps:$4 sm:$0xff]  }
 0x19f   :  { %11677 = vmatprep.subr.bf16.mxu1 %v17341_v32  ;;  %v17387_v30 = vld [vmem:[#allocation5 + $0x33c0] ss:$36 sps:$4 sm:$0xff]   ;;  %v106_v32 = vld [vmem:[#allocation2 + $0xa0] sm:$0xff] }
 0x1a1   :  { %11635 = vmatpush1.bf16.msra.mxu0 %v17336_v41  ;;  %v131_v41 = vld [vmem:[#allocation2 + $0x168] sm:$0xff] }
 0x1a2   :  { %11678 = vmatpush1.bf16.msra.mxu1 %v17339_v42  ;;  %11636 = vmatprep.subr.bf16.mxu0 %v17344_v43  ;;  %v108_v42 = vld [vmem:[#allocation2 + $0xb0] sm:$0xff]  ;;  %v133_v43 = vld [vmem:[#allocation2 + $0x178] sm:$0xff] }
 0x1a3   :  { %11679 = vmatprep.subr.bf16.mxu1 %v17347_v45  ;;  %v17392_v45 = vld [vmem:[#allocation5 + $0x36dc] ss:$36 sps:$4 sm:$0xff]  }
 0x1a5   :  { %11637 = vmatpush2.bf16.msra.mxu0 %v17342_v51  ;;  %v17395_v51 = vld [vmem:[#allocation5 + $0x204] ss:$36 sps:$4 sm:$0xff]  }
 0x1a6   :  { %11680 = vmatpush2.bf16.msra.mxu1 %v17345_v52  ;;  %11638 = vmatprep.subr.bf16.mxu0 %v17350_v53  ;;  %v17390_v52 = vld [vmem:[#allocation5 + $0x36d8] ss:$36 sps:$4 sm:$0xff]   ;;  %v17393_v53 = vld [vmem:[#allocation5 + $0x200] ss:$36 sps:$4 sm:$0xff]  }
 0x1a7   :  { %11681 = vmatprep.subr.bf16.mxu1 %v17353_v56  ;;  %v19656_v56 = vpack.c.bf16 %v131_v41, %v106_v32  ;;  %v110_v32 = vld [vmem:[#allocation2 + $0xc0] sm:$0xff]  ;;  %v135_v41 = vld [vmem:[#allocation2 + $0x188] sm:$0xff] }
 0x1a9   :  { %11639 = vmatpush2.bf16.msra.mxu0 %v17348_v57  ;;  %v19658_v57 = vpack.c.bf16 %v133_v43, %v108_v42  ;;  %v17416_v42 = vld [vmem:[#allocation5 + $0xe4] ss:$36 sps:$4 sm:$0xff]  }
 0x1aa   :  { %11682 = vmatpush2.bf16.msra.mxu1 %v17351_v60  ;;  %11640 = vmatprep.subr.bf16.mxu0 %v17356_v61  ;;  %v19660_v60 = vpop.f32.mrf.mxu0  ;;  %v19662_v61 = vpop.f32.mrf.mxu1  ;;  %v17414_v43 = vld [vmem:[#allocation5 + $0xe0] ss:$36 sps:$4 sm:$0xff]  }
 0x1ab   :  { %11683 = vmatprep.subr.bf16.mxu1 %v17359_v63  ;;  %v17398_v63 = vld [vmem:[#allocation5 + $0x3694] ss:$36 sps:$4 sm:$0xff]  }
 0x1ad   :  { %11641 = vmatpush2.bf16.msra.mxu0 %v17354_v3  ;;  %v17401_v3 = vld [vmem:[#allocation5 + $0x1bc] ss:$36 sps:$4 sm:$0xff]  }
 0x1ae   :  { %11684 = vmatpush2.bf16.msra.mxu1 %v17357_v5  ;;  %11642 = vmatprep.subr.bf16.mxu0 %v17362_v6  ;;  %v17396_v5 = vld [vmem:[#allocation5 + $0x3690] ss:$36 sps:$4 sm:$0xff]   ;;  %v17399_v6 = vld [vmem:[#allocation5 + $0x1b8] ss:$36 sps:$4 sm:$0xff]  }
 0x1af   :  { %11685 = vmatprep.subr.bf16.mxu1 %v17365_v54 }
 0x1b1   :  { %11643 = vmatpush2.bf16.msra.mxu0 %v17360_v8 }
 0x1b2   :  { %11686 = vmatpush2.bf16.msra.mxu1 %v17363_v10  ;;  %11644 = vmatprep.subr.bf16.mxu0 %v17368_v62 }
 0x1b3   :  { %11687 = vmatprep.subr.bf16.mxu1 %v17371_v13 }
 0x1b5   :  { %11645 = vmatpush2.bf16.msra.mxu0 %v17366_v14  ;;  %v17404_v14 = vld [vmem:[#allocation5 + $0x364c] ss:$36 sps:$4 sm:$0xff]  }
 0x1b6   :  { %11688 = vmatpush2.bf16.msra.mxu1 %v17369_v16  ;;  %11646 = vmatprep.subr.bf16.mxu0 %v17374_v17  ;;  %v17407_v16 = vld [vmem:[#allocation5 + $0x174] ss:$36 sps:$4 sm:$0xff]  }
 0x1b7   :  { %11689 = vmatprep.subr.bf16.mxu1 %v17377_v18 }
 0x1b9   :  { %11647 = vmatpush2.bf16.msra.mxu0 %v17372_v4  ;;  %v17402_v4 = vld [vmem:[#allocation5 + $0x3648] ss:$36 sps:$4 sm:$0xff]  }
 0x1ba   :  { %11690 = vmatpush2.bf16.msra.mxu1 %v17375_v19  ;;  %11648 = vmatprep.subr.bf16.mxu0 %v17380_v20  ;;  %v17405_v19 = vld [vmem:[#allocation5 + $0x170] ss:$36 sps:$4 sm:$0xff]   ;;  %v20207_v20 = vmov 0  }
 0x1bb   :  { %11691 = vmatprep.subr.bf16.mxu1 %v17383_v21 }
 0x1bd   :  { %11649 = vmatpush2.bf16.msra.mxu0 %v17378_v22 }
 0x1be   :  { %11692 = vmatpush2.bf16.msra.mxu1 %v17381_v23  ;;  %11650 = vmatprep.subr.bf16.mxu0 %v17386_v24  ;;  %v17413_v24 = vld [vmem:[#allocation5 + $0x12c] ss:$36 sps:$4 sm:$0xff]  }
 0x1bf   :  { %11693 = vmatprep.subr.bf16.mxu1 %v17389_v25 }
 0x1c1   :  { %11651 = vmatpush2.bf16.msra.mxu0 %v17384_v26  ;;  %v17408_v26 = vld [vmem:[#allocation5 + $0x3600] ss:$36 sps:$4 sm:$0xff]  }
 0x1c2   :  { %11694 = vmatpush2.bf16.msra.mxu1 %v17387_v30  ;;  %11714 = vmatprep.subr.bf16.mxu0 %v17392_v45  ;;  %v17411_v30 = vld [vmem:[#allocation5 + $0x128] ss:$36 sps:$4 sm:$0xff]   ;;  %v17417_v45 = vld [vmem:[#allocation5 + $0x680] ss:$36 sps:$4 sm:$0xff]  }
 0x1c3   :  { %11749 = vmatprep.subr.bf16.mxu1 %v17395_v51  ;;  %v19677_v51 = vpack.c.bf16 %v135_v41, %v110_v32  ;;  %v17453_v32 = vld [vmem:[#allocation5 + $0x4d0] ss:$36 sps:$4 sm:$0xff]  }
 0x1c4   :  { %v11396_v54 = vpop.f32.mrf.mxu0  ;;  %11653 = vmatmul.mubr.bf16.vlgmr.msra.gmra.mxu0 %v19656_v56  ;;  %v17458_v41 = vld [vmem:[#allocation5 + $0x36c] ss:$36 sps:$4 sm:$0xff]  }
 0x1c5   :  { %11696 = vmatmul.mubr.bf16.vlgmr.msra.gmra.mxu1 %v19658_v57  ;;  %v11439_v8 = vpop.f32.mrf.mxu1  ;;  %v11397_v10 = vadd.f32 %v11396_v54, %v19647_v2  ;;  %11715 = vmatpush1.bf16.msra.mxu0 %v17390_v52  ;;  %v17422_v52 = vld [vmem:[#allocation5 + $0x9c] ss:$36 sps:$4 sm:$0xff]   ;;  %v17426_v54 = vld [vmem:[#allocation5 + $0x50] ss:$36 sps:$4 sm:$0xff]  }
 0x1c6   :  { %11750 = vmatpush1.bf16.msra.mxu1 %v17393_v53  ;;  %v11398_v62 = vpop.f32.mrf.mxu0  ;;  %11716 = vmatprep.subr.bf16.mxu0 %v17398_v63  ;;  %v17425_v53 = vld [vmem:[#allocation5 + $0x63c] ss:$36 sps:$4 sm:$0xff]  }
 0x1c7   :  { %v11441_v13 = vpop.f32.mrf.mxu1  ;;  %11751 = vmatprep.subr.bf16.mxu1 %v17401_v3  ;;  %v11399_v17 = vadd.f32 %v11398_v62, %v19652_v9  ;;  %v19668_v18 = vadd.f32 %v11439_v8, %v11397_v10  ;;  %11738 = vmatprep.mubr.bf16.mxu0 %v20207_v20  ;;  %v17410_v9 = vld [vmem:[#allocation5 + $0x3604] ss:$36 sps:$4 sm:$0xff]   ;;  %v17420_v63 = vld [vmem:[#allocation5 + $0x98] ss:$36 sps:$4 sm:$0xff]   ;;  %v17429_v8 = vld [vmem:[#allocation5 + $0x5f0] ss:$36 sps:$4 sm:$0xff]  }
 0x1c8   :  { %11781 = vmatprep.mubr.bf16.mxu1 %v19564_v50  ;;  %v11400_v2 = vpop.f32.mrf.mxu0  ;;  %v17423_v3 = vld [vmem:[#allocation5 + $0x638] ss:$36 sps:$4 sm:$0xff]   ;;  %v17434_v10 = vld [vmem:[#allocation5 + $0xc] ss:$36 sps:$4 sm:$0xff]  }
 0x1c9   :  { %v11443_v21 = vpop.f32.mrf.mxu1  ;;  %v11401_v22 = vadd.f32 %v11400_v2, %v19654_v11  ;;  %v19673_v23 = vadd.f32 %v11441_v13, %v11399_v17  ;;  %11717 = vmatpush1.bf16.msra.mxu0 %v17396_v5  ;;  %v17419_v11 = vld [vmem:[#allocation5 + $0x684] ss:$36 sps:$4 sm:$0xff]   ;;  %v17428_v5 = vld [vmem:[#allocation5 + $0x54] ss:$36 sps:$4 sm:$0xff]   ;;  %v17437_v62 = vld [vmem:[#allocation5 + $0x5ac] ss:$36 sps:$4 sm:$0xff]  }
 0x1ca   :  { %11752 = vmatpush1.bf16.msra.mxu1 %v17399_v6  ;;  %11718 = vmatprep.subr.bf16.mxu0 %v17404_v14  ;;  %v17431_v6 = vld [vmem:[#allocation5 + $0x5f4] ss:$36 sps:$4 sm:$0xff]   ;;  %v17432_v13 = vld [vmem:[#allocation5 + $0x8] ss:$36 sps:$4 sm:$0xff]   ;;  %v17446_v2 = vld [vmem:[#allocation5 + $0x3fc] ss:$36 sps:$4 sm:$0xff]  }
 0x1cb   :  { %11753 = vmatprep.subr.bf16.mxu1 %v17407_v16  ;;  %v19675_v25 = vadd.f32 %v11443_v21, %v11401_v22  ;;  %v17435_v14 = vld [vmem:[#allocation5 + $0x5a8] ss:$36 sps:$4 sm:$0xff]   ;;  %v17449_v21 = vld [vmem:[#allocation5 + $0x51c] ss:$36 sps:$4 sm:$0xff]  }
 0x1cc   :  { %v17440_v16 = vld [vmem:[#allocation5 + $0x444] ss:$36 sps:$4 sm:$0xff]   ;;  %v17444_v22 = vld [vmem:[#allocation5 + $0x3f8] ss:$36 sps:$4 sm:$0xff]  }
 0x1cd   :  { %11719 = vmatpush1.bf16.msra.mxu0 %v17402_v4  ;;  %v17443_v17 = vld [vmem:[#allocation5 + $0x564] ss:$36 sps:$4 sm:$0xff]   ;;  %v17809_v20 = vld [vmem:[#allocation5 + $0x2a3c] ss:$36 sps:$4 sm:$0xff]  }
 0x1ce   :  { %11754 = vmatpush1.bf16.msra.mxu1 %v17405_v19  ;;  %11720 = vmatprep.subr.bf16.mxu0 %v17410_v9  ;;  %v17438_v4 = vld [vmem:[#allocation5 + $0x440] ss:$36 sps:$4 sm:$0xff]   ;;  %v17447_v9 = vld [vmem:[#allocation5 + $0x518] ss:$36 sps:$4 sm:$0xff]  }
 0x1cf   :  { %11755 = vmatprep.subr.bf16.mxu1 %v17413_v24  ;;  %v17441_v19 = vld [vmem:[#allocation5 + $0x560] ss:$36 sps:$4 sm:$0xff]   ;;  %v17452_v24 = vld [vmem:[#allocation5 + $0x3b4] ss:$36 sps:$4 sm:$0xff]  }
 0x1d1   :  { %11721 = vmatpush1.bf16.msra.mxu0 %v17408_v26  ;;  %v17455_v26 = vld [vmem:[#allocation5 + $0x4d4] ss:$36 sps:$4 sm:$0xff]  }
 0x1d2   :  { %11756 = vmatpush1.bf16.msra.mxu1 %v17411_v30  ;;  %11792 = vmatprep.subr.bf16.mxu0 %v17419_v11  ;;  %v17450_v30 = vld [vmem:[#allocation5 + $0x3b0] ss:$36 sps:$4 sm:$0xff]   ;;  %v17456_v11 = vld [vmem:[#allocation5 + $0x368] ss:$36 sps:$4 sm:$0xff]  }
 0x1d3   :  { %11757 = vmatprep.subr.bf16.mxu1 %v17416_v42  ;;  %v17461_v42 = vld [vmem:[#allocation5 + $0x48c] ss:$36 sps:$4 sm:$0xff]  }
 0x1d4   :  { %16307 = vmatmul.mubr.msk.bf16.vlgmr.msra.gmra.mxu0 %vm11186_vm0, %v19677_v51 }
 0x1d5   :  { %11793 = vmatpush1.bf16.msra.mxu0 %v17417_v45  ;;  %11824 = vmatprep.mubr.bf16.mxu0 %v19566_v55  ;;  %v17464_v45 = vld [vmem:[#allocation5 + $0x324] ss:$36 sps:$4 sm:$0xff]  }
 0x1d6   :  { %11758 = vmatpush1.bf16.msra.mxu1 %v17414_v43  ;;  %11794 = vmatprep.subr.bf16.mxu0 %v17425_v53  ;;  %v17459_v43 = vld [vmem:[#allocation5 + $0x488] ss:$36 sps:$4 sm:$0xff]   ;;  %v17462_v53 = vld [vmem:[#allocation5 + $0x320] ss:$36 sps:$4 sm:$0xff]  }
 0x1d7   :  { %11759 = vmatprep.subr.bf16.mxu1 %v17422_v52  ;;  %v17467_v52 = vld [vmem:[#allocation5 + $0x8c4] ss:$36 sps:$4 sm:$0xff]  }
 0x1d9   :  { %11795 = vmatpush1.bf16.msra.mxu0 %v17423_v3  ;;  %v17470_v3 = vld [vmem:[#allocation5 + $0x2dc] ss:$36 sps:$4 sm:$0xff]  }
 0x1da   :  { %11760 = vmatpush1.bf16.msra.mxu1 %v17420_v63  ;;  %11796 = vmatprep.subr.bf16.mxu0 %v17431_v6  ;;  %v17465_v63 = vld [vmem:[#allocation5 + $0x8c0] ss:$36 sps:$4 sm:$0xff]   ;;  %v17468_v6 = vld [vmem:[#allocation5 + $0x2d8] ss:$36 sps:$4 sm:$0xff]  }
 0x1db   :  { %11761 = vmatprep.subr.bf16.mxu1 %v17428_v5  ;;  %v17473_v5 = vld [vmem:[#allocation5 + $0x87c] ss:$36 sps:$4 sm:$0xff]  }
 0x1dd   :  { %11797 = vmatpush1.bf16.msra.mxu0 %v17429_v8  ;;  %v17476_v8 = vld [vmem:[#allocation5 + $0x294] ss:$36 sps:$4 sm:$0xff]  }
 0x1de   :  { %11762 = vmatpush1.bf16.msra.mxu1 %v17426_v54  ;;  %11798 = vmatprep.subr.bf16.mxu0 %v17437_v62  ;;  %v17471_v54 = vld [vmem:[#allocation5 + $0x878] ss:$36 sps:$4 sm:$0xff]   ;;  %v17474_v62 = vld [vmem:[#allocation5 + $0x290] ss:$36 sps:$4 sm:$0xff]  }
 0x1df   :  { %11763 = vmatprep.subr.bf16.mxu1 %v17434_v10  ;;  %v17479_v10 = vld [vmem:[#allocation5 + $0x834] ss:$36 sps:$4 sm:$0xff]  }
 0x1e1   :  { %11799 = vmatpush1.bf16.msra.mxu0 %v17435_v14  ;;  %v17482_v14 = vld [vmem:[#allocation5 + $0x24c] ss:$36 sps:$4 sm:$0xff]  }
 0x1e2   :  { %11764 = vmatpush1.bf16.msra.mxu1 %v17432_v13  ;;  %11800 = vmatprep.subr.bf16.mxu0 %v17443_v17  ;;  %v17477_v13 = vld [vmem:[#allocation5 + $0x830] ss:$36 sps:$4 sm:$0xff]   ;;  %v17480_v17 = vld [vmem:[#allocation5 + $0x248] ss:$36 sps:$4 sm:$0xff]  }
 0x1e3   :  { %11765 = vmatprep.subr.bf16.mxu1 %v17440_v16  ;;  %v17485_v16 = vld [vmem:[#allocation5 + $0x7ec] ss:$36 sps:$4 sm:$0xff]  }
 0x1e5   :  { %11801 = vmatpush1.bf16.msra.mxu0 %v17441_v19  ;;  %v17488_v19 = vld [vmem:[#allocation5 + $0x7a4] ss:$36 sps:$4 sm:$0xff]  }
 0x1e6   :  { %11766 = vmatpush2.bf16.msra.mxu1 %v17438_v4  ;;  %11802 = vmatprep.subr.bf16.mxu0 %v17449_v21  ;;  %v17483_v4 = vld [vmem:[#allocation5 + $0x7e8] ss:$36 sps:$4 sm:$0xff]   ;;  %v17486_v21 = vld [vmem:[#allocation5 + $0x7a0] ss:$36 sps:$4 sm:$0xff]  }
 0x1e7   :  { %11767 = vmatprep.subr.bf16.mxu1 %v17446_v2  ;;  %v17491_v2 = vld [vmem:[#allocation5 + $0xb04] ss:$36 sps:$4 sm:$0xff]  }
 0x1e9   :  { %11803 = vmatpush1.bf16.msra.mxu0 %v17447_v9  ;;  %v19682_v9 = vpop.f32.mrf.mxu0 }
 0x1ea   :  { %11768 = vmatpush2.bf16.msra.mxu1 %v17444_v22  ;;  %11804 = vmatprep.subr.bf16.mxu0 %v17455_v26  ;;  %v17489_v22 = vld [vmem:[#allocation5 + $0xb00] ss:$36 sps:$4 sm:$0xff]  }
 0x1eb   :  { %11769 = vmatprep.subr.bf16.mxu1 %v17452_v24  ;;  %v19684_v24 = vpop.f32.mrf.mxu1  ;;  %v17494_v26 = vld [vmem:[#allocation5 + $0x75c] ss:$36 sps:$4 sm:$0xff]  }
 0x1ed   :  { %11805 = vmatpush1.bf16.msra.mxu0 %v17453_v32  ;;  %v17492_v32 = vld [vmem:[#allocation5 + $0x758] ss:$36 sps:$4 sm:$0xff]  }
 0x1ee   :  { %11770 = vmatpush2.bf16.msra.mxu1 %v17450_v30  ;;  %11806 = vmatprep.subr.bf16.mxu0 %v17461_v42  ;;  %v17497_v30 = vld [vmem:[#allocation5 + $0xabc] ss:$36 sps:$4 sm:$0xff]  }
 0x1ef   :  { %11771 = vmatprep.subr.bf16.mxu1 %v17458_v41  ;;  %v17495_v41 = vld [vmem:[#allocation5 + $0xab8] ss:$36 sps:$4 sm:$0xff]  }
 0x1f1   :  { %11807 = vmatpush1.bf16.msra.mxu0 %v17459_v43 }
 0x1f2   :  { %11772 = vmatpush2.bf16.msra.mxu1 %v17456_v11  ;;  %11808 = vmatprep.subr.bf16.mxu0 %v17467_v52 }
 0x1f3   :  { %11773 = vmatprep.subr.bf16.mxu1 %v17464_v45 }
 0x1f5   :  { %11809 = vmatpush2.bf16.msra.mxu0 %v17465_v63  ;;  %v17503_v63 = vld [vmem:[#allocation5 + $0xa74] ss:$36 sps:$4 sm:$0xff]  }
 0x1f6   :  { %11774 = vmatpush2.bf16.msra.mxu1 %v17462_v53  ;;  %11810 = vmatprep.subr.bf16.mxu0 %v17473_v5  ;;  %v17500_v53 = vld [vmem:[#allocation5 + $0x714] ss:$36 sps:$4 sm:$0xff]  }
 0x1f7   :  { %11775 = vmatprep.subr.bf16.mxu1 %v17470_v3 }
 0x1f9   :  { %11811 = vmatpush2.bf16.msra.mxu0 %v17471_v54  ;;  %v17501_v54 = vld [vmem:[#allocation5 + $0xa70] ss:$36 sps:$4 sm:$0xff]  }
 0x1fa   :  { %11776 = vmatpush2.bf16.msra.mxu1 %v17468_v6  ;;  %11812 = vmatprep.subr.bf16.mxu0 %v17479_v10  ;;  %v17498_v6 = vld [vmem:[#allocation5 + $0x710] ss:$36 sps:$4 sm:$0xff]  }
 0x1fb   :  { %11777 = vmatprep.subr.bf16.mxu1 %v17476_v8 }
 0x1fd   :  { %11813 = vmatpush2.bf16.msra.mxu0 %v17477_v13  ;;  %v17506_v13 = vld [vmem:[#allocation5 + $0x6cc] ss:$36 sps:$4 sm:$0xff]  }
 0x1fe   :  { %11778 = vmatpush2.bf16.msra.mxu1 %v17474_v62  ;;  %11814 = vmatprep.subr.bf16.mxu0 %v17485_v16 }
 0x1ff   :  { %11779 = vmatprep.subr.bf16.mxu1 %v17482_v14  ;;  %v17509_v14 = vld [vmem:[#allocation5 + $0xa2c] ss:$36 sps:$4 sm:$0xff]  }
 0x201   :  { %11815 = vmatpush2.bf16.msra.mxu0 %v17483_v4  ;;  %v17512_v4 = vld [vmem:[#allocation5 + $0x9e4] ss:$36 sps:$4 sm:$0xff]  }
 0x202   :  { %11780 = vmatpush2.bf16.msra.mxu1 %v17480_v17  ;;  %11816 = vmatprep.subr.bf16.mxu0 %v17488_v19  ;;  %v17507_v17 = vld [vmem:[#allocation5 + $0xa28] ss:$36 sps:$4 sm:$0xff]  }
 0x203   :  { %11835 = vmatprep.subr.bf16.mxu1 %v17491_v2  ;;  %v17515_v19 = vld [vmem:[#allocation5 + $0xf84] ss:$36 sps:$4 sm:$0xff]  }
 0x204   :  { %v11482_v42 = vpop.f32.mrf.mxu0  ;;  %v17510_v2 = vld [vmem:[#allocation5 + $0x9e0] ss:$36 sps:$4 sm:$0xff]  }
 0x205   :  { %11782 = vmatmul.mubr.bf16.vlgmr.msra.gmra.mxu1 %v19570_v12  ;;  %v11525_v11 = vpop.f32.mrf.mxu1  ;;  %v11483_v43 = vadd.f32 %v11482_v42, %v19668_v18  ;;  %11817 = vmatpush2.bf16.msra.mxu0 %v17486_v21  ;;  %v17518_v21 = vld [vmem:[#allocation5 + $0x99c] ss:$36 sps:$4 sm:$0xff]   ;;  %v17522_v42 = vld [vmem:[#allocation5 + $0x950] ss:$36 sps:$4 sm:$0xff]  }
 0x206   :  { %11836 = vmatpush1.bf16.msra.mxu1 %v17489_v22  ;;  %v11484_v45 = vpop.f32.mrf.mxu0  ;;  %11818 = vmatprep.subr.bf16.mxu0 %v17494_v26  ;;  %v17521_v22 = vld [vmem:[#allocation5 + $0xf3c] ss:$36 sps:$4 sm:$0xff]  }
 0x207   :  { %v11527_v52 = vpop.f32.mrf.mxu1  ;;  %11837 = vmatprep.subr.bf16.mxu1 %v17497_v30  ;;  %v11485_v3 = vadd.f32 %v11484_v45, %v19673_v23  ;;  %v19689_v5 = vadd.f32 %v11525_v11, %v11483_v43  ;;  %11867 = vmatprep.mubr.bf16.mxu1 %v19576_v44  ;;  %v17504_v23 = vld [vmem:[#allocation5 + $0x6c8] ss:$36 sps:$4 sm:$0xff]   ;;  %v17516_v26 = vld [vmem:[#allocation5 + $0x998] ss:$36 sps:$4 sm:$0xff]   ;;  %v17525_v11 = vld [vmem:[#allocation5 + $0xef0] ss:$36 sps:$4 sm:$0xff]  }
 0x208   :  { %v11486_v8 = vpop.f32.mrf.mxu0  ;;  %v17519_v30 = vld [vmem:[#allocation5 + $0xf38] ss:$36 sps:$4 sm:$0xff]   ;;  %v17530_v43 = vld [vmem:[#allocation5 + $0x90c] ss:$36 sps:$4 sm:$0xff]  }
 0x209   :  { %v11529_v10 = vpop.f32.mrf.mxu1  ;;  %v11487_v18 = vadd.f32 %v11486_v8, %v19675_v25  ;;  %v19693_v62 = vadd.f32 %v11527_v52, %v11485_v3  ;;  %11819 = vmatpush2.bf16.msra.mxu0 %v17492_v32  ;;  %v17513_v25 = vld [vmem:[#allocation5 + $0xf80] ss:$36 sps:$4 sm:$0xff]   ;;  %v17524_v32 = vld [vmem:[#allocation5 + $0x954] ss:$36 sps:$4 sm:$0xff]   ;;  %v17533_v45 = vld [vmem:[#allocation5 + $0xeac] ss:$36 sps:$4 sm:$0xff]  }
 0x20a   :  { %11838 = vmatpush1.bf16.msra.mxu1 %v17495_v41  ;;  %11820 = vmatprep.subr.bf16.mxu0 %v17500_v53  ;;  %v17527_v41 = vld [vmem:[#allocation5 + $0xef4] ss:$36 sps:$4 sm:$0xff]   ;;  %v17528_v52 = vld [vmem:[#allocation5 + $0x908] ss:$36 sps:$4 sm:$0xff]   ;;  %v17542_v8 = vld [vmem:[#allocation5 + $0xcfc] ss:$36 sps:$4 sm:$0xff]  }
 0x20b   :  { %11839 = vmatprep.subr.bf16.mxu1 %v17503_v63  ;;  %v19695_v16 = vadd.f32 %v11529_v10, %v11487_v18  ;;  %v17531_v53 = vld [vmem:[#allocation5 + $0xea8] ss:$36 sps:$4 sm:$0xff]   ;;  %v17545_v10 = vld [vmem:[#allocation5 + $0xe1c] ss:$36 sps:$4 sm:$0xff]  }
 0x20c   :  { %v17536_v63 = vld [vmem:[#allocation5 + $0xd44] ss:$36 sps:$4 sm:$0xff]   ;;  %v17540_v18 = vld [vmem:[#allocation5 + $0xcf8] ss:$36 sps:$4 sm:$0xff]  }
 0x20d   :  { %11821 = vmatpush2.bf16.msra.mxu0 %v17498_v6  ;;  %v17539_v3 = vld [vmem:[#allocation5 + $0xe64] ss:$36 sps:$4 sm:$0xff]  }
 0x20e   :  { %11840 = vmatpush1.bf16.msra.mxu1 %v17501_v54  ;;  %11822 = vmatprep.subr.bf16.mxu0 %v17506_v13  ;;  %v17534_v6 = vld [vmem:[#allocation5 + $0xd40] ss:$36 sps:$4 sm:$0xff]   ;;  %v17543_v13 = vld [vmem:[#allocation5 + $0xe18] ss:$36 sps:$4 sm:$0xff]  }
 0x20f   :  { %11841 = vmatprep.subr.bf16.mxu1 %v17509_v14  ;;  %v17537_v54 = vld [vmem:[#allocation5 + $0xe60] ss:$36 sps:$4 sm:$0xff]   ;;  %v17548_v14 = vld [vmem:[#allocation5 + $0xcb4] ss:$36 sps:$4 sm:$0xff]  }
 0x211   :  { %11823 = vmatpush2.bf16.msra.mxu0 %v17504_v23  ;;  %v17551_v23 = vld [vmem:[#allocation5 + $0xdd4] ss:$36 sps:$4 sm:$0xff]  }
 0x212   :  { %11842 = vmatpush1.bf16.msra.mxu1 %v17507_v17  ;;  %11878 = vmatprep.subr.bf16.mxu0 %v17515_v19  ;;  %v17546_v17 = vld [vmem:[#allocation5 + $0xcb0] ss:$36 sps:$4 sm:$0xff]  }
 0x213   :  { %11843 = vmatprep.subr.bf16.mxu1 %v17512_v4  ;;  %v17549_v4 = vld [vmem:[#allocation5 + $0xdd0] ss:$36 sps:$4 sm:$0xff]  }
 0x214   :  { %11825 = vmatmul.mubr.bf16.vlgmr.msra.gmra.mxu0 %v19572_v15  ;;  %v17554_v19 = vld [vmem:[#allocation5 + $0xc6c] ss:$36 sps:$4 sm:$0xff]  }
 0x215   :  { %11879 = vmatpush1.bf16.msra.mxu0 %v17513_v25  ;;  %11910 = vmatprep.mubr.bf16.mxu0 %v19578_v47  ;;  %v17552_v25 = vld [vmem:[#allocation5 + $0xc68] ss:$36 sps:$4 sm:$0xff]  }
 0x216   :  { %11844 = vmatpush1.bf16.msra.mxu1 %v17510_v2  ;;  %11880 = vmatprep.subr.bf16.mxu0 %v17521_v22  ;;  %v17557_v2 = vld [vmem:[#allocation5 + $0xd8c] ss:$36 sps:$4 sm:$0xff]   ;;  %v17560_v22 = vld [vmem:[#allocation5 + $0xc24] ss:$36 sps:$4 sm:$0xff]  }
 0x217   :  { %11845 = vmatprep.subr.bf16.mxu1 %v17518_v21  ;;  %v17555_v21 = vld [vmem:[#allocation5 + $0xd88] ss:$36 sps:$4 sm:$0xff]  }
 0x219   :  { %11881 = vmatpush1.bf16.msra.mxu0 %v17519_v30  ;;  %v17558_v30 = vld [vmem:[#allocation5 + $0xc20] ss:$36 sps:$4 sm:$0xff]  }
 0x21a   :  { %11846 = vmatpush1.bf16.msra.mxu1 %v17516_v26  ;;  %11882 = vmatprep.subr.bf16.mxu0 %v17527_v41  ;;  %v17563_v26 = vld [vmem:[#allocation5 + $0x11c4] ss:$36 sps:$4 sm:$0xff]   ;;  %v17566_v41 = vld [vmem:[#allocation5 + $0xbdc] ss:$36 sps:$4 sm:$0xff]  }
 0x21b   :  { %11847 = vmatprep.subr.bf16.mxu1 %v17524_v32  ;;  %v17561_v32 = vld [vmem:[#allocation5 + $0x11c0] ss:$36 sps:$4 sm:$0xff]  }
 0x21d   :  { %11883 = vmatpush1.bf16.msra.mxu0 %v17525_v11  ;;  %v17564_v11 = vld [vmem:[#allocation5 + $0xbd8] ss:$36 sps:$4 sm:$0xff]  }
 0x21e   :  { %11848 = vmatpush1.bf16.msra.mxu1 %v17522_v42  ;;  %11884 = vmatprep.subr.bf16.mxu0 %v17533_v45  ;;  %v17569_v42 = vld [vmem:[#allocation5 + $0x117c] ss:$36 sps:$4 sm:$0xff]   ;;  %v17572_v45 = vld [vmem:[#allocation5 + $0xb94] ss:$36 sps:$4 sm:$0xff]  }
 0x21f   :  { %11849 = vmatprep.subr.bf16.mxu1 %v17530_v43  ;;  %v17567_v43 = vld [vmem:[#allocation5 + $0x1178] ss:$36 sps:$4 sm:$0xff]  }
 0x221   :  { %11885 = vmatpush1.bf16.msra.mxu0 %v17531_v53  ;;  %v17570_v53 = vld [vmem:[#allocation5 + $0xb90] ss:$36 sps:$4 sm:$0xff]  }
 0x222   :  { %11850 = vmatpush1.bf16.msra.mxu1 %v17528_v52  ;;  %11886 = vmatprep.subr.bf16.mxu0 %v17539_v3  ;;  %v17575_v52 = vld [vmem:[#allocation5 + $0x1134] ss:$36 sps:$4 sm:$0xff]   ;;  %v17578_v3 = vld [vmem:[#allocation5 + $0xb4c] ss:$36 sps:$4 sm:$0xff]  }
 0x223   :  { %11851 = vmatprep.subr.bf16.mxu1 %v17536_v63  ;;  %v17573_v63 = vld [vmem:[#allocation5 + $0x1130] ss:$36 sps:$4 sm:$0xff]  }
 0x225   :  { %11887 = vmatpush1.bf16.msra.mxu0 %v17537_v54  ;;  %v17576_v54 = vld [vmem:[#allocation5 + $0xb48] ss:$36 sps:$4 sm:$0xff]  }
 0x226   :  { %11852 = vmatpush2.bf16.msra.mxu1 %v17534_v6  ;;  %11888 = vmatprep.subr.bf16.mxu0 %v17545_v10  ;;  %v17581_v6 = vld [vmem:[#allocation5 + $0x10ec] ss:$36 sps:$4 sm:$0xff]   ;;  %v17584_v10 = vld [vmem:[#allocation5 + $0x10a4] ss:$36 sps:$4 sm:$0xff]  }
 0x227   :  { %11853 = vmatprep.subr.bf16.mxu1 %v17542_v8  ;;  %v17579_v8 = vld [vmem:[#allocation5 + $0x10e8] ss:$36 sps:$4 sm:$0xff]  }
 0x229   :  { %11889 = vmatpush1.bf16.msra.mxu0 %v17543_v13  ;;  %v17582_v13 = vld [vmem:[#allocation5 + $0x10a0] ss:$36 sps:$4 sm:$0xff]  }
 0x22a   :  { %11854 = vmatpush2.bf16.msra.mxu1 %v17540_v18  ;;  %11890 = vmatprep.subr.bf16.mxu0 %v17551_v23  ;;  %v17587_v18 = vld [vmem:[#allocation5 + $0x1404] ss:$36 sps:$4 sm:$0xff]   ;;  %v19699_v23 = vpop.f32.mrf.mxu0 }
 0x22b   :  { %11855 = vmatprep.subr.bf16.mxu1 %v17548_v14  ;;  %v17585_v14 = vld [vmem:[#allocation5 + $0x1400] ss:$36 sps:$4 sm:$0xff]  }
 0x22d   :  { %11891 = vmatpush1.bf16.msra.mxu0 %v17549_v4  ;;  %v17590_v4 = vld [vmem:[#allocation5 + $0x105c] ss:$36 sps:$4 sm:$0xff]  }
 0x22e   :  { %11856 = vmatpush2.bf16.msra.mxu1 %v17546_v17  ;;  %11892 = vmatprep.subr.bf16.mxu0 %v17557_v2  ;;  %v19701_v17 = vpop.f32.mrf.mxu1 }
 0x22f   :  { %11857 = vmatprep.subr.bf16.mxu1 %v17554_v19  ;;  %20212 = vst [vmem:[#allocation17_spill] sm:$0xff] %v19701_v17  ;;  %v17593_v19 = vld [vmem:[#allocation5 + $0x13bc] ss:$36 sps:$4 sm:$0xff]   ;;  %v18488_v17 = vld [vmem:[#allocation5 + $0x2e30] ss:$36 sps:$4 sm:$0xff]  }
 0x231   :  { %11893 = vmatpush1.bf16.msra.mxu0 %v17555_v21 }
 0x232   :  { %11858 = vmatpush2.bf16.msra.mxu1 %v17552_v25  ;;  %11894 = vmatprep.subr.bf16.mxu0 %v17563_v26  ;;  %v17591_v26 = vld [vmem:[#allocation5 + $0x13b8] ss:$36 sps:$4 sm:$0xff]  }
 0x233   :  { %11859 = vmatprep.subr.bf16.mxu1 %v17560_v22  ;;  %v17588_v22 = vld [vmem:[#allocation5 + $0x1058] ss:$36 sps:$4 sm:$0xff]  }
 0x235   :  { %11895 = vmatpush2.bf16.msra.mxu0 %v17561_v32 }
 0x236   :  { %11860 = vmatpush2.bf16.msra.mxu1 %v17558_v30  ;;  %11896 = vmatprep.subr.bf16.mxu0 %v17569_v42  ;;  %v17599_v42 = vld [vmem:[#allocation5 + $0x1374] ss:$36 sps:$4 sm:$0xff]  }
 0x237   :  { %11861 = vmatprep.subr.bf16.mxu1 %v17566_v41  ;;  %v17596_v41 = vld [vmem:[#allocation5 + $0x1014] ss:$36 sps:$4 sm:$0xff]  }
 0x239   :  { %11897 = vmatpush2.bf16.msra.mxu0 %v17567_v43 }
 0x23a   :  { %11862 = vmatpush2.bf16.msra.mxu1 %v17564_v11  ;;  %11898 = vmatprep.subr.bf16.mxu0 %v17575_v52 }
 0x23b   :  { %11863 = vmatprep.subr.bf16.mxu1 %v17572_v45 }
 0x23d   :  { %11899 = vmatpush2.bf16.msra.mxu0 %v17573_v63  ;;  %v17597_v63 = vld [vmem:[#allocation5 + $0x1370] ss:$36 sps:$4 sm:$0xff]  }
 0x23e   :  { %11864 = vmatpush2.bf16.msra.mxu1 %v17570_v53  ;;  %11900 = vmatprep.subr.bf16.mxu0 %v17581_v6  ;;  %v17594_v53 = vld [vmem:[#allocation5 + $0x1010] ss:$36 sps:$4 sm:$0xff]  }
 0x23f   :  { %11865 = vmatprep.subr.bf16.mxu1 %v17578_v3  ;;  %v17602_v3 = vld [vmem:[#allocation5 + $0xfcc] ss:$36 sps:$4 sm:$0xff]  }
 0x240   :  { %v17605_v6 = vld [vmem:[#allocation5 + $0x132c] ss:$36 sps:$4 sm:$0xff]  }
 0x241   :  { %11901 = vmatpush2.bf16.msra.mxu0 %v17579_v8  ;;  %v17603_v8 = vld [vmem:[#allocation5 + $0x1328] ss:$36 sps:$4 sm:$0xff]  }
 0x242   :  { %11866 = vmatpush2.bf16.msra.mxu1 %v17576_v54  ;;  %11902 = vmatprep.subr.bf16.mxu0 %v17584_v10  ;;  %v17608_v10 = vld [vmem:[#allocation5 + $0x12e4] ss:$36 sps:$4 sm:$0xff]  }
 0x243   :  { %11921 = vmatprep.subr.bf16.mxu1 %v17587_v18  ;;  %v17611_v18 = vld [vmem:[#allocation5 + $0x1884] ss:$36 sps:$4 sm:$0xff]  }
 0x244   :  { %v11568_v2 = vpop.f32.mrf.mxu0 }
 0x245   :  { %11868 = vmatmul.mubr.bf16.vlgmr.msra.gmra.mxu1 %v19582_v28  ;;  %v11611_v25 = vpop.f32.mrf.mxu1  ;;  %v11569_v21 = vadd.f32 %v11568_v2, %v19689_v5  ;;  %11903 = vmatpush2.bf16.msra.mxu0 %v17582_v13  ;;  %v17606_v13 = vld [vmem:[#allocation5 + $0x12e0] ss:$36 sps:$4 sm:$0xff]   ;;  %v17615_v2 = vld [vmem:[#allocation5 + $0x1838] ss:$36 sps:$4 sm:$0xff]  }
 0x246   :  { %11922 = vmatpush1.bf16.msra.mxu1 %v17585_v14  ;;  %v11570_v30 = vpop.f32.mrf.mxu0  ;;  %11904 = vmatprep.subr.bf16.mxu0 %v17590_v4  ;;  %v17614_v14 = vld [vmem:[#allocation5 + $0x129c] ss:$36 sps:$4 sm:$0xff]  }
 0x247   :  { %v19705_v32 = vpop.f32.mrf.mxu1  ;;  %11923 = vmatprep.subr.bf16.mxu1 %v17593_v19  ;;  %v19708_v11 = vadd.f32 %v11570_v30, %v19693_v62  ;;  %v19710_v43 = vadd.f32 %v11611_v25, %v11569_v21  ;;  %11953 = vmatprep.mubr.bf16.mxu1 %v19588_v40  ;;  %v17600_v62 = vld [vmem:[#allocation5 + $0xfc8] ss:$36 sps:$4 sm:$0xff]   ;;  %v17617_v4 = vld [vmem:[#allocation5 + $0x183c] ss:$36 sps:$4 sm:$0xff]   ;;  %v17620_v25 = vld [vmem:[#allocation5 + $0x1254] ss:$36 sps:$4 sm:$0xff]  }
 0x248   :  { %v11572_v45 = vpop.f32.mrf.mxu0  ;;  %v17612_v19 = vld [vmem:[#allocation5 + $0x1298] ss:$36 sps:$4 sm:$0xff]   ;;  %v17626_v30 = vld [vmem:[#allocation5 + $0x120c] ss:$36 sps:$4 sm:$0xff]  }
 0x249   :  { %v11615_v5 = vpop.f32.mrf.mxu1  ;;  %v11573_v52 = vadd.f32 %v11572_v45, %v19695_v16  ;;  %11905 = vmatpush2.bf16.msra.mxu0 %v17588_v22  ;;  %v17609_v16 = vld [vmem:[#allocation5 + $0x1880] ss:$36 sps:$4 sm:$0xff]   ;;  %v17623_v21 = vld [vmem:[#allocation5 + $0x17f4] ss:$36 sps:$4 sm:$0xff]   ;;  %v17627_v45 = vld [vmem:[#allocation5 + $0x17a8] ss:$36 sps:$4 sm:$0xff]  }
 0x24a   :  { %11924 = vmatpush1.bf16.msra.mxu1 %v17591_v26  ;;  %11906 = vmatprep.subr.bf16.mxu0 %v17596_v41  ;;  %v17618_v22 = vld [vmem:[#allocation5 + $0x1250] ss:$36 sps:$4 sm:$0xff]  }
 0x24b   :  { %11925 = vmatprep.subr.bf16.mxu1 %v17599_v42  ;;  %v19714_v54 = vadd.f32 %v11615_v5, %v11573_v52  ;;  %v17621_v26 = vld [vmem:[#allocation5 + $0x17f0] ss:$36 sps:$4 sm:$0xff]   ;;  %v17624_v42 = vld [vmem:[#allocation5 + $0x1208] ss:$36 sps:$4 sm:$0xff]  }
 0x24c   :  { %v17629_v41 = vld [vmem:[#allocation5 + $0x17ac] ss:$36 sps:$4 sm:$0xff]   ;;  %v17632_v5 = vld [vmem:[#allocation5 + $0x1644] ss:$36 sps:$4 sm:$0xff]  }
 0x24d   :  { %11907 = vmatpush2.bf16.msra.mxu0 %v17594_v53  ;;  %v17635_v52 = vld [vmem:[#allocation5 + $0x1764] ss:$36 sps:$4 sm:$0xff]  }
 0x24e   :  { %11926 = vmatpush1.bf16.msra.mxu1 %v17597_v63  ;;  %11908 = vmatprep.subr.bf16.mxu0 %v17602_v3  ;;  %v17630_v53 = vld [vmem:[#allocation5 + $0x1640] ss:$36 sps:$4 sm:$0xff]  }
 0x24f   :  { %11927 = vmatprep.subr.bf16.mxu1 %v17605_v6  ;;  %v17633_v63 = vld [vmem:[#allocation5 + $0x1760] ss:$36 sps:$4 sm:$0xff]  }
 0x250   :  { %v17638_v3 = vld [vmem:[#allocation5 + $0x15fc] ss:$36 sps:$4 sm:$0xff]  }
 0x251   :  { %11909 = vmatpush2.bf16.msra.mxu0 %v17600_v62  ;;  %v17641_v6 = vld [vmem:[#allocation5 + $0x171c] ss:$36 sps:$4 sm:$0xff]  }
 0x252   :  { %11928 = vmatpush1.bf16.msra.mxu1 %v17603_v8  ;;  %11964 = vmatprep.subr.bf16.mxu0 %v17611_v18  ;;  %v17636_v62 = vld [vmem:[#allocation5 + $0x15f8] ss:$36 sps:$4 sm:$0xff]  }
 0x253   :  { %11929 = vmatprep.subr.bf16.mxu1 %v17608_v10  ;;  %v17639_v8 = vld [vmem:[#allocation5 + $0x1718] ss:$36 sps:$4 sm:$0xff]  }
 0x254   :  { %11911 = vmatmul.mubr.bf16.vlgmr.msra.gmra.mxu0 %v19584_v31  ;;  %v17644_v10 = vld [vmem:[#allocation5 + $0x15b4] ss:$36 sps:$4 sm:$0xff]  }
 0x255   :  { %11965 = vmatpush1.bf16.msra.mxu0 %v17609_v16  ;;  %11996 = vmatprep.mubr.bf16.mxu0 %v19590_v46  ;;  %v17647_v18 = vld [vmem:[#allocation5 + $0x16d4] ss:$36 sps:$4 sm:$0xff]  }
 0x256   :  { %11930 = vmatpush1.bf16.msra.mxu1 %v17606_v13  ;;  %11966 = vmatprep.subr.bf16.mxu0 %v17617_v4  ;;  %v17642_v13 = vld [vmem:[#allocation5 + $0x15b0] ss:$36 sps:$4 sm:$0xff]  }
 0x257   :  { %11931 = vmatprep.subr.bf16.mxu1 %v17614_v14  ;;  %v17645_v16 = vld [vmem:[#allocation5 + $0x16d0] ss:$36 sps:$4 sm:$0xff]  }
 0x258   :  { %v17650_v14 = vld [vmem:[#allocation5 + $0x156c] ss:$36 sps:$4 sm:$0xff]  }
 0x259   :  { %11967 = vmatpush1.bf16.msra.mxu0 %v17615_v2  ;;  %v17653_v4 = vld [vmem:[#allocation5 + $0x168c] ss:$36 sps:$4 sm:$0xff]  }
 0x25a   :  { %11932 = vmatpush1.bf16.msra.mxu1 %v17612_v19  ;;  %11968 = vmatprep.subr.bf16.mxu0 %v17623_v21  ;;  %v17648_v19 = vld [vmem:[#allocation5 + $0x1568] ss:$36 sps:$4 sm:$0xff]  }
 0x25b   :  { %11933 = vmatprep.subr.bf16.mxu1 %v17620_v25  ;;  %v17651_v2 = vld [vmem:[#allocation5 + $0x1688] ss:$36 sps:$4 sm:$0xff]  }
 0x25c   :  { %v17656_v25 = vld [vmem:[#allocation5 + $0x1524] ss:$36 sps:$4 sm:$0xff]  }
 0x25d   :  { %11969 = vmatpush1.bf16.msra.mxu0 %v17621_v26  ;;  %v17659_v21 = vld [vmem:[#allocation5 + $0x1ac4] ss:$36 sps:$4 sm:$0xff]  }
 0x25e   :  { %11934 = vmatpush1.bf16.msra.mxu1 %v17618_v22  ;;  %11970 = vmatprep.subr.bf16.mxu0 %v17629_v41  ;;  %v17654_v22 = vld [vmem:[#allocation5 + $0x1520] ss:$36 sps:$4 sm:$0xff]  }
 0x25f   :  { %11935 = vmatprep.subr.bf16.mxu1 %v17626_v30  ;;  %v17657_v26 = vld [vmem:[#allocation5 + $0x1ac0] ss:$36 sps:$4 sm:$0xff]  }
 0x260   :  { %v17662_v30 = vld [vmem:[#allocation5 + $0x14dc] ss:$36 sps:$4 sm:$0xff]  }
 0x261   :  { %11971 = vmatpush1.bf16.msra.mxu0 %v17627_v45  ;;  %v17665_v41 = vld [vmem:[#allocation5 + $0x1a7c] ss:$36 sps:$4 sm:$0xff]  }
 0x262   :  { %11936 = vmatpush1.bf16.msra.mxu1 %v17624_v42  ;;  %11972 = vmatprep.subr.bf16.mxu0 %v17635_v52  ;;  %v17660_v42 = vld [vmem:[#allocation5 + $0x14d8] ss:$36 sps:$4 sm:$0xff]  }
 0x263   :  { %11937 = vmatprep.subr.bf16.mxu1 %v17632_v5  ;;  %v17663_v45 = vld [vmem:[#allocation5 + $0x1a78] ss:$36 sps:$4 sm:$0xff]  }
 0x264   :  { %v17668_v5 = vld [vmem:[#allocation5 + $0x1494] ss:$36 sps:$4 sm:$0xff]  }
 0x265   :  { %11973 = vmatpush1.bf16.msra.mxu0 %v17633_v63  ;;  %v17671_v52 = vld [vmem:[#allocation5 + $0x1a34] ss:$36 sps:$4 sm:$0xff]  }
 0x266   :  { %11938 = vmatpush2.bf16.msra.mxu1 %v17630_v53  ;;  %11974 = vmatprep.subr.bf16.mxu0 %v17641_v6  ;;  %v17666_v53 = vld [vmem:[#allocation5 + $0x1490] ss:$36 sps:$4 sm:$0xff]  }
 0x267   :  { %11939 = vmatprep.subr.bf16.mxu1 %v17638_v3  ;;  %v17669_v63 = vld [vmem:[#allocation5 + $0x1a30] ss:$36 sps:$4 sm:$0xff]  }
 0x268   :  { %v17674_v3 = vld [vmem:[#allocation5 + $0x144c] ss:$36 sps:$4 sm:$0xff]  }
 0x269   :  { %11975 = vmatpush1.bf16.msra.mxu0 %v17639_v8  ;;  %v17677_v6 = vld [vmem:[#allocation5 + $0x19ec] ss:$36 sps:$4 sm:$0xff]  }
 0x26a   :  { %11940 = vmatpush2.bf16.msra.mxu1 %v17636_v62  ;;  %11976 = vmatprep.subr.bf16.mxu0 %v17647_v18  ;;  %v17672_v62 = vld [vmem:[#allocation5 + $0x1448] ss:$36 sps:$4 sm:$0xff]  }
 0x26b   :  { %11941 = vmatprep.subr.bf16.mxu1 %v17644_v10  ;;  %v17675_v8 = vld [vmem:[#allocation5 + $0x19e8] ss:$36 sps:$4 sm:$0xff]  }
 0x26c   :  { %v17680_v10 = vld [vmem:[#allocation5 + $0x19a4] ss:$36 sps:$4 sm:$0xff]  }
 0x26d   :  { %11977 = vmatpush1.bf16.msra.mxu0 %v17645_v16  ;;  %v17683_v18 = vld [vmem:[#allocation5 + $0x1d04] ss:$36 sps:$4 sm:$0xff]  }
 0x26e   :  { %11942 = vmatpush2.bf16.msra.mxu1 %v17642_v13  ;;  %11978 = vmatprep.subr.bf16.mxu0 %v17653_v4  ;;  %v17678_v13 = vld [vmem:[#allocation5 + $0x19a0] ss:$36 sps:$4 sm:$0xff]   ;;  %v19720_v4 = vpop.f32.mrf.mxu1 }
 0x26f   :  { %11943 = vmatprep.subr.bf16.mxu1 %v17650_v14  ;;  %v17681_v16 = vld [vmem:[#allocation5 + $0x1d00] ss:$36 sps:$4 sm:$0xff]   ;;  %v19718_v14 = vpop.f32.mrf.mxu0  ;;  %20214 = vst [vmem:[#allocation19_spill] sm:$0xff] %v19720_v4 }
 0x270   :  { %20213 = vst [vmem:[#allocation18_spill] sm:$0xff] %v19718_v14 }
 0x271   :  { %11979 = vmatpush1.bf16.msra.mxu0 %v17651_v2  ;;  %v17689_v2 = vld [vmem:[#allocation5 + $0x1cbc] ss:$36 sps:$4 sm:$0xff]  }
 0x272   :  { %11944 = vmatpush2.bf16.msra.mxu1 %v17648_v19  ;;  %11980 = vmatprep.subr.bf16.mxu0 %v17659_v21  ;;  %v17686_v19 = vld [vmem:[#allocation5 + $0x195c] ss:$36 sps:$4 sm:$0xff]  }
 0x273   :  { %11945 = vmatprep.subr.bf16.mxu1 %v17656_v25  ;;  %v17684_v25 = vld [vmem:[#allocation5 + $0x1958] ss:$36 sps:$4 sm:$0xff]  }
 0x274   :  { %v17687_v21 = vld [vmem:[#allocation5 + $0x1cb8] ss:$36 sps:$4 sm:$0xff]  }
 0x275   :  { %11981 = vmatpush2.bf16.msra.mxu0 %v17657_v26 }
 0x276   :  { %11946 = vmatpush2.bf16.msra.mxu1 %v17654_v22  ;;  %11982 = vmatprep.subr.bf16.mxu0 %v17665_v41 }
 0x277   :  { %11947 = vmatprep.subr.bf16.mxu1 %v17662_v30 }
 0x279   :  { %11983 = vmatpush2.bf16.msra.mxu0 %v17663_v45  ;;  %v17692_v45 = vld [vmem:[#allocation5 + $0x1914] ss:$36 sps:$4 sm:$0xff]  }
 0x27a   :  { %11948 = vmatpush2.bf16.msra.mxu1 %v17660_v42  ;;  %11984 = vmatprep.subr.bf16.mxu0 %v17671_v52 }
 0x27b   :  { %11949 = vmatprep.subr.bf16.mxu1 %v17668_v5  ;;  %v17695_v5 = vld [vmem:[#allocation5 + $0x1c74] ss:$36 sps:$4 sm:$0xff]  }
 0x27d   :  { %11985 = vmatpush2.bf16.msra.mxu0 %v17669_v63  ;;  %v17693_v63 = vld [vmem:[#allocation5 + $0x1c70] ss:$36 sps:$4 sm:$0xff]  }
 0x27e   :  { %11950 = vmatpush2.bf16.msra.mxu1 %v17666_v53  ;;  %11986 = vmatprep.subr.bf16.mxu0 %v17677_v6  ;;  %v17690_v53 = vld [vmem:[#allocation5 + $0x1910] ss:$36 sps:$4 sm:$0xff]  }
 0x27f   :  { %11951 = vmatprep.subr.bf16.mxu1 %v17674_v3 }
 0x281   :  { %11987 = vmatpush2.bf16.msra.mxu0 %v17675_v8  ;;  %v17701_v8 = vld [vmem:[#allocation5 + $0x1c2c] ss:$36 sps:$4 sm:$0xff]  }
 0x282   :  { %11952 = vmatpush2.bf16.msra.mxu1 %v17672_v62  ;;  %11988 = vmatprep.subr.bf16.mxu0 %v17680_v10 }
 0x283   :  { %12007 = vmatprep.subr.bf16.mxu1 %v17683_v18  ;;  %v17696_v18 = vld [vmem:[#allocation5 + $0x18c8] ss:$36 sps:$4 sm:$0xff]  }
 0x284   :  { %v11654_v22 = vpop.f32.mrf.mxu0 }
 0x285   :  { %11954 = vmatmul.mubr.bf16.vlgmr.msra.gmra.mxu1 %v19594_v58  ;;  %v11697_v26 = vpop.f32.mrf.mxu1  ;;  %v11655_v30 = vadd.f32 %v11654_v22, %v19710_v43  ;;  %11989 = vmatpush2.bf16.msra.mxu0 %v17678_v13  ;;  %v17698_v43 = vld [vmem:[#allocation5 + $0x18cc] ss:$36 sps:$4 sm:$0xff]   ;;  %v17705_v22 = vld [vmem:[#allocation5 + $0x2180] ss:$36 sps:$4 sm:$0xff]  }
 0x286   :  { %12008 = vmatpush1.bf16.msra.mxu1 %v17681_v16  ;;  %v19724_v41 = vpop.f32.mrf.mxu0  ;;  %11990 = vmatprep.subr.bf16.mxu0 %v17686_v19  ;;  %v17699_v13 = vld [vmem:[#allocation5 + $0x1c28] ss:$36 sps:$4 sm:$0xff]  }
 0x287   :  { %v19726_v42 = vpop.f32.mrf.mxu1  ;;  %12009 = vmatprep.subr.bf16.mxu1 %v17689_v2  ;;  %v11698_v52 = vadd.f32 %v11697_v26, %v11655_v30  ;;  %12039 = vmatprep.mubr.bf16.mxu1 %v19598_v0  ;;  %v17704_v16 = vld [vmem:[#allocation5 + $0x1be4] ss:$36 sps:$4 sm:$0xff]   ;;  %v17708_v26 = vld [vmem:[#allocation5 + $0x1b98] ss:$36 sps:$4 sm:$0xff]  }
 0x288   :  { %v11658_v3 = vpop.f32.mrf.mxu0  ;;  %v17707_v19 = vld [vmem:[#allocation5 + $0x2184] ss:$36 sps:$4 sm:$0xff]   ;;  %v17711_v30 = vld [vmem:[#allocation5 + $0x2138] ss:$36 sps:$4 sm:$0xff]  }
 0x289   :  { %v11701_v6 = vpop.f32.mrf.mxu1  ;;  %v11659_v62 = vadd.f32 %v11658_v3, %v19714_v54  ;;  %11991 = vmatpush2.bf16.msra.mxu0 %v17684_v25  ;;  %v17702_v2 = vld [vmem:[#allocation5 + $0x1be0] ss:$36 sps:$4 sm:$0xff]   ;;  %v17719_v3 = vld [vmem:[#allocation5 + $0x20f4] ss:$36 sps:$4 sm:$0xff]  }
 0x28a   :  { %12010 = vmatpush1.bf16.msra.mxu1 %v17687_v21  ;;  %11992 = vmatprep.subr.bf16.mxu0 %v17692_v45  ;;  %v19730_v54 = vpop.f32.mrf.mxu0  ;;  %v17710_v25 = vld [vmem:[#allocation5 + $0x1b9c] ss:$36 sps:$4 sm:$0xff]  }
 0x28b   :  { %12011 = vmatprep.subr.bf16.mxu1 %v17695_v5  ;;  %v11702_v10 = vadd.f32 %v11701_v6, %v11659_v62  ;;  %20215 = vst [vmem:[#allocation20_spill] sm:$0xff] %v19730_v54  ;;  %v17713_v21 = vld [vmem:[#allocation5 + $0x213c] ss:$36 sps:$4 sm:$0xff]   ;;  %v17714_v6 = vld [vmem:[#allocation5 + $0x1b50] ss:$36 sps:$4 sm:$0xff]  }
 0x28c   :  { %v17717_v62 = vld [vmem:[#allocation5 + $0x20f0] ss:$36 sps:$4 sm:$0xff]  }
 0x28d   :  { %11993 = vmatpush2.bf16.msra.mxu0 %v17690_v53  ;;  %v17813_v54 = vld [vmem:[#allocation5 + $0x29f0] ss:$36 sps:$4 sm:$0xff]  }
 0x28e   :  { %12012 = vmatpush1.bf16.msra.mxu1 %v17693_v63  ;;  %11994 = vmatprep.subr.bf16.mxu0 %v17698_v43  ;;  %v17716_v63 = vld [vmem:[#allocation5 + $0x1b54] ss:$36 sps:$4 sm:$0xff]  }
 0x28f   :  { %12013 = vmatprep.subr.bf16.mxu1 %v17701_v8 }
 0x291   :  { %11995 = vmatpush2.bf16.msra.mxu0 %v17696_v18  ;;  %v17725_v18 = vld [vmem:[#allocation5 + $0x20ac] ss:$36 sps:$4 sm:$0xff]  }
 0x292   :  { %12014 = vmatpush1.bf16.msra.mxu1 %v17699_v13  ;;  %12050 = vmatprep.subr.bf16.mxu0 %v17707_v19  ;;  %v17720_v13 = vld [vmem:[#allocation5 + $0x1b08] ss:$36 sps:$4 sm:$0xff]  }
 0x293   :  { %12015 = vmatprep.subr.bf16.mxu1 %v17704_v16  ;;  %v17723_v16 = vld [vmem:[#allocation5 + $0x20a8] ss:$36 sps:$4 sm:$0xff]  }
 0x294   :  { %v11740_v45 = vpop.f32.mrf.mxu0  ;;  %11997 = vmatmul.mubr.bf16.vlgmr.msra.gmra.mxu0 %v19596_v59  ;;  %v17728_v19 = vld [vmem:[#allocation5 + $0x1f44] ss:$36 sps:$4 sm:$0xff]  }
 0x295   :  { %v19733_v5 = vadd.f32 %v11740_v45, %v11698_v52  ;;  %12051 = vmatpush1.bf16.msra.mxu0 %v17705_v22  ;;  %12082 = vmatprep.mubr.bf16.mxu0 %v19600_v1  ;;  %v17722_v52 = vld [vmem:[#allocation5 + $0x1b0c] ss:$36 sps:$4 sm:$0xff]   ;;  %v17726_v22 = vld [vmem:[#allocation5 + $0x1f40] ss:$36 sps:$4 sm:$0xff]   ;;  %v17740_v45 = vld [vmem:[#allocation5 + $0x1eb4] ss:$36 sps:$4 sm:$0xff]  }
 0x296   :  { %12016 = vmatpush1.bf16.msra.mxu1 %v17702_v2  ;;  %v19735_v53 = vpop.f32.mrf.mxu0  ;;  %12052 = vmatprep.subr.bf16.mxu0 %v17713_v21  ;;  %v17731_v2 = vld [vmem:[#allocation5 + $0x2064] ss:$36 sps:$4 sm:$0xff]   ;;  %v17737_v21 = vld [vmem:[#allocation5 + $0x201c] ss:$36 sps:$4 sm:$0xff]  }
 0x297   :  { %20216 = vst [vmem:[#allocation21_spill] sm:$0xff] %v19733_v5  ;;  %12017 = vmatprep.subr.bf16.mxu1 %v17710_v25  ;;  %v17729_v25 = vld [vmem:[#allocation5 + $0x2060] ss:$36 sps:$4 sm:$0xff]  }
 0x298   :  { %v11744_v43 = vpop.f32.mrf.mxu0 }
 0x299   :  { %v19738_v8 = vadd.f32 %v11744_v43, %v11702_v10  ;;  %12053 = vmatpush1.bf16.msra.mxu0 %v17711_v30  ;;  %v17734_v10 = vld [vmem:[#allocation5 + $0x1efc] ss:$36 sps:$4 sm:$0xff]   ;;  %v17749_v43 = vld [vmem:[#allocation5 + $0x1f8c] ss:$36 sps:$4 sm:$0xff]  }
 0x29a   :  { %12018 = vmatpush1.bf16.msra.mxu1 %v17708_v26  ;;  %12054 = vmatprep.subr.bf16.mxu0 %v17719_v3  ;;  %v17732_v26 = vld [vmem:[#allocation5 + $0x1ef8] ss:$36 sps:$4 sm:$0xff]   ;;  %v17738_v3 = vld [vmem:[#allocation5 + $0x1eb0] ss:$36 sps:$4 sm:$0xff]  }
 0x29b   :  { %20217 = vst [vmem:[#allocation22_spill] sm:$0xff] %v19738_v8  ;;  %12019 = vmatprep.subr.bf16.mxu1 %v17716_v63  ;;  %v17735_v30 = vld [vmem:[#allocation5 + $0x2018] ss:$36 sps:$4 sm:$0xff]  }
 0x29c   :  { %v17743_v63 = vld [vmem:[#allocation5 + $0x1fd4] ss:$36 sps:$4 sm:$0xff]  }
 0x29d   :  { %12055 = vmatpush1.bf16.msra.mxu0 %v17717_v62  ;;  %v17746_v62 = vld [vmem:[#allocation5 + $0x1e6c] ss:$36 sps:$4 sm:$0xff]  }
 0x29e   :  { %12020 = vmatpush1.bf16.msra.mxu1 %v17714_v6  ;;  %12056 = vmatprep.subr.bf16.mxu0 %v17725_v18  ;;  %v17741_v6 = vld [vmem:[#allocation5 + $0x1fd0] ss:$36 sps:$4 sm:$0xff]   ;;  %v17747_v18 = vld [vmem:[#allocation5 + $0x1f88] ss:$36 sps:$4 sm:$0xff]  }
 0x29f   :  { %12021 = vmatprep.subr.bf16.mxu1 %v17722_v52  ;;  %v17744_v52 = vld [vmem:[#allocation5 + $0x1e68] ss:$36 sps:$4 sm:$0xff]  }
 0x2a1   :  { %12057 = vmatpush1.bf16.msra.mxu0 %v17723_v16  ;;  %v17755_v16 = vld [vmem:[#allocation5 + $0x23c4] ss:$36 sps:$4 sm:$0xff]  }
 0x2a2   :  { %12022 = vmatpush1.bf16.msra.mxu1 %v17720_v13  ;;  %12058 = vmatprep.subr.bf16.mxu0 %v17731_v2  ;;  %v17752_v13 = vld [vmem:[#allocation5 + $0x1e24] ss:$36 sps:$4 sm:$0xff]  }
 0x2a3   :  { %12023 = vmatprep.subr.bf16.mxu1 %v17728_v19  ;;  %v17750_v19 = vld [vmem:[#allocation5 + $0x1e20] ss:$36 sps:$4 sm:$0xff]  }
 0x2a4   :  { %v17753_v2 = vld [vmem:[#allocation5 + $0x23c0] ss:$36 sps:$4 sm:$0xff]  }
 0x2a5   :  { %12059 = vmatpush1.bf16.msra.mxu0 %v17729_v25  ;;  %v17761_v25 = vld [vmem:[#allocation5 + $0x237c] ss:$36 sps:$4 sm:$0xff]  }
 0x2a6   :  { %12024 = vmatpush2.bf16.msra.mxu1 %v17726_v22  ;;  %12060 = vmatprep.subr.bf16.mxu0 %v17737_v21  ;;  %v17758_v22 = vld [vmem:[#allocation5 + $0x1ddc] ss:$36 sps:$4 sm:$0xff]  }
 0x2a7   :  { %12025 = vmatprep.subr.bf16.mxu1 %v17734_v10  ;;  %v17756_v10 = vld [vmem:[#allocation5 + $0x1dd8] ss:$36 sps:$4 sm:$0xff]  }
 0x2a8   :  { %v17759_v21 = vld [vmem:[#allocation5 + $0x2378] ss:$36 sps:$4 sm:$0xff]  }
 0x2a9   :  { %12061 = vmatpush1.bf16.msra.mxu0 %v17735_v30  ;;  %v17767_v30 = vld [vmem:[#allocation5 + $0x2334] ss:$36 sps:$4 sm:$0xff]  }
 0x2aa   :  { %12026 = vmatpush2.bf16.msra.mxu1 %v17732_v26  ;;  %12062 = vmatprep.subr.bf16.mxu0 %v17743_v63  ;;  %v17764_v26 = vld [vmem:[#allocation5 + $0x1d94] ss:$36 sps:$4 sm:$0xff]  }
 0x2ab   :  { %12027 = vmatprep.subr.bf16.mxu1 %v17740_v45  ;;  %v17762_v45 = vld [vmem:[#allocation5 + $0x1d90] ss:$36 sps:$4 sm:$0xff]  }
 0x2ac   :  { %v17765_v63 = vld [vmem:[#allocation5 + $0x2330] ss:$36 sps:$4 sm:$0xff]  }
 0x2ad   :  { %12063 = vmatpush1.bf16.msra.mxu0 %v17741_v6  ;;  %v17773_v6 = vld [vmem:[#allocation5 + $0x22ec] ss:$36 sps:$4 sm:$0xff]  }
 0x2ae   :  { %12028 = vmatpush2.bf16.msra.mxu1 %v17738_v3  ;;  %12064 = vmatprep.subr.bf16.mxu0 %v17749_v43  ;;  %v17770_v3 = vld [vmem:[#allocation5 + $0x1d4c] ss:$36 sps:$4 sm:$0xff]  }
 0x2af   :  { %12029 = vmatprep.subr.bf16.mxu1 %v17746_v62  ;;  %v17768_v62 = vld [vmem:[#allocation5 + $0x1d48] ss:$36 sps:$4 sm:$0xff]  }
 0x2b0   :  { %v17771_v43 = vld [vmem:[#allocation5 + $0x22e8] ss:$36 sps:$4 sm:$0xff]  }
 0x2b1   :  { %12065 = vmatpush1.bf16.msra.mxu0 %v17747_v18  ;;  %v17779_v18 = vld [vmem:[#allocation5 + $0x2604] ss:$36 sps:$4 sm:$0xff]  }
 0x2b2   :  { %12030 = vmatpush2.bf16.msra.mxu1 %v17744_v52  ;;  %12066 = vmatprep.subr.bf16.mxu0 %v17755_v16  ;;  %v17776_v52 = vld [vmem:[#allocation5 + $0x22a4] ss:$36 sps:$4 sm:$0xff]  }
 0x2b3   :  { %12031 = vmatprep.subr.bf16.mxu1 %v17752_v13  ;;  %v17774_v13 = vld [vmem:[#allocation5 + $0x22a0] ss:$36 sps:$4 sm:$0xff]  }
 0x2b4   :  { %v17777_v16 = vld [vmem:[#allocation5 + $0x2600] ss:$36 sps:$4 sm:$0xff]  }
 0x2b5   :  { %12067 = vmatpush2.bf16.msra.mxu0 %v17753_v2  ;;  %v17785_v2 = vld [vmem:[#allocation5 + $0x25bc] ss:$36 sps:$4 sm:$0xff]  }
 0x2b6   :  { %12032 = vmatpush2.bf16.msra.mxu1 %v17750_v19  ;;  %12068 = vmatprep.subr.bf16.mxu0 %v17761_v25  ;;  %v17782_v19 = vld [vmem:[#allocation5 + $0x225c] ss:$36 sps:$4 sm:$0xff]  }
 0x2b7   :  { %12033 = vmatprep.subr.bf16.mxu1 %v17758_v22  ;;  %v17780_v22 = vld [vmem:[#allocation5 + $0x2258] ss:$36 sps:$4 sm:$0xff]  }
 0x2b8   :  { %v17783_v25 = vld [vmem:[#allocation5 + $0x25b8] ss:$36 sps:$4 sm:$0xff]  }
 0x2b9   :  { %12069 = vmatpush2.bf16.msra.mxu0 %v17759_v21  ;;  %v17791_v21 = vld [vmem:[#allocation5 + $0x2574] ss:$36 sps:$4 sm:$0xff]  }
 0x2ba   :  { %12034 = vmatpush2.bf16.msra.mxu1 %v17756_v10  ;;  %12070 = vmatprep.subr.bf16.mxu0 %v17767_v30  ;;  %v17788_v10 = vld [vmem:[#allocation5 + $0x2214] ss:$36 sps:$4 sm:$0xff]  }
 0x2bb   :  { %12035 = vmatprep.subr.bf16.mxu1 %v17764_v26  ;;  %v17786_v26 = vld [vmem:[#allocation5 + $0x2210] ss:$36 sps:$4 sm:$0xff]  }
 0x2bc   :  { %v17789_v30 = vld [vmem:[#allocation5 + $0x2570] ss:$36 sps:$4 sm:$0xff]  }
 0x2bd   :  { %12071 = vmatpush2.bf16.msra.mxu0 %v17765_v63 }
 0x2be   :  { %12036 = vmatpush2.bf16.msra.mxu1 %v17762_v45  ;;  %12072 = vmatprep.subr.bf16.mxu0 %v17773_v6  ;;  %v19742_v45 = vpop.f32.mrf.mxu1  ;;  %v17797_v6 = vld [vmem:[#allocation5 + $0x252c] ss:$36 sps:$4 sm:$0xff]  }
 0x2bf   :  { %12037 = vmatprep.subr.bf16.mxu1 %v17770_v3  ;;  %20218 = vst [vmem:[#allocation23_spill] sm:$0xff] %v19742_v45  ;;  %v17794_v3 = vld [vmem:[#allocation5 + $0x21cc] ss:$36 sps:$4 sm:$0xff]  }
 0x2c1   :  { %12073 = vmatpush2.bf16.msra.mxu0 %v17771_v43  ;;  %v17792_v43 = vld [vmem:[#allocation5 + $0x21c8] ss:$36 sps:$4 sm:$0xff]  }
 0x2c2   :  { %12038 = vmatpush2.bf16.msra.mxu1 %v17768_v62  ;;  %12074 = vmatprep.subr.bf16.mxu0 %v17776_v52  ;;  %v2135_v62 = vsub.s32 2, %v19606_v7  ;;  %v17795_v52 = vld [vmem:[#allocation5 + $0x2528] ss:$36 sps:$4 sm:$0xff]  }
 0x2c3   :  { %12093 = vmatprep.subr.bf16.mxu1 %v17779_v18 }
 0x2c5   :  { %12040 = vmatmul.mubr.bf16.vlgmr.msra.gmra.mxu1 %v19610_v27  ;;  %12075 = vmatpush2.bf16.msra.mxu0 %v17774_v13  ;;  %v11783_v63 = vpop.f32.mrf.mxu1  ;;  %v17800_v13 = vld [vmem:[#allocation5 + $0x24e4] ss:$36 sps:$4 sm:$0xff]  }
 0x2c6   :  { %12094 = vmatpush1.bf16.msra.mxu1 %v17777_v16  ;;  %12076 = vmatprep.subr.bf16.mxu0 %v17782_v19  ;;  %v17803_v16 = vld [vmem:[#allocation5 + $0x2a84] ss:$36 sps:$4 sm:$0xff]  }
 0x2c7   :  { %12095 = vmatprep.subr.bf16.mxu1 %v17785_v2  ;;  %12125 = vmatprep.mubr.bf16.mxu1 %v19616_v37  ;;  %v19745_v18 = vpop.f32.mrf.mxu1  ;;  %v19370_v19 = vld [vmem:[#allocation7] sm:$0xff] }
 0x2c8   :  { %v2136_v2 = vrot.slane %v19370_v19, %v2135_v62 }
 0x2c9   :  { %12077 = vmatpush2.bf16.msra.mxu0 %v17780_v22  ;;  %v17798_v22 = vld [vmem:[#allocation5 + $0x24e0] ss:$36 sps:$4 sm:$0xff]  }
 0x2ca   :  { %12096 = vmatpush1.bf16.msra.mxu1 %v17783_v25  ;;  %12078 = vmatprep.subr.bf16.mxu0 %v17788_v10  ;;  %v17801_v25 = vld [vmem:[#allocation5 + $0x2a80] ss:$36 sps:$4 sm:$0xff]   ;;  %v2139_v10 = vsub.s32 3, %v19606_v7  ;;  %v11784_v8 = vadd.f32 %v11783_v63, %v2136_v2  ;;  %v17810_v63 = vld [vmem:[#allocation5 + $0x2450] ss:$36 sps:$4 sm:$0xff]  }
 0x2cb   :  { %12097 = vmatprep.subr.bf16.mxu1 %v17791_v21  ;;  %v19748_v21 = vpop.f32.mrf.mxu0 }
 0x2cc   :  { %20219 = vst [vmem:[#allocation24_spill] sm:$0xff] %v19748_v21  ;;  %v19751_v62 = vrot.slane %v19370_v19, %v2139_v10 }
 0x2cd   :  { %12079 = vmatpush2.bf16.msra.mxu0 %v17786_v26  ;;  %v11787_v26 = vpop.f32.mrf.mxu1 }
 0x2ce   :  { %12098 = vmatpush1.bf16.msra.mxu1 %v17789_v30  ;;  %12080 = vmatprep.subr.bf16.mxu0 %v17794_v3  ;;  %v17806_v30 = vld [vmem:[#allocation5 + $0x249c] ss:$36 sps:$4 sm:$0xff]   ;;  %v11788_v21 = vadd.f32 %v11787_v26, %v2136_v2  ;;  %v17816_v2 = vld [vmem:[#allocation5 + $0x2408] ss:$36 sps:$4 sm:$0xff]  }
 0x2cf   :  { %12099 = vmatprep.subr.bf16.mxu1 %v17797_v6  ;;  %v17804_v3 = vld [vmem:[#allocation5 + $0x2498] ss:$36 sps:$4 sm:$0xff]   ;;  %v17824_v26 = vld [vmem:[#allocation5 + $0x2844] ss:$36 sps:$4 sm:$0xff]  }
 0x2d0   :  { %v17807_v6 = vld [vmem:[#allocation5 + $0x2a38] ss:$36 sps:$4 sm:$0xff]  }
 0x2d1   :  { %12081 = vmatpush2.bf16.msra.mxu0 %v17792_v43  ;;  %v11789_v43 = vpop.f32.mrf.mxu1 }
 0x2d2   :  { %12100 = vmatpush1.bf16.msra.mxu1 %v17795_v52  ;;  %12136 = vmatprep.subr.bf16.mxu0 %v17803_v16  ;;  %v17815_v16 = vld [vmem:[#allocation5 + $0x29f4] ss:$36 sps:$4 sm:$0xff]   ;;  %v11790_v19 = vadd.f32 %v11789_v43, %v19751_v62 }
 0x2d3   :  { %12101 = vmatprep.subr.bf16.mxu1 %v17800_v13  ;;  %v17812_v13 = vld [vmem:[#allocation5 + $0x2454] ss:$36 sps:$4 sm:$0xff]  }
 0x2d4   :  { %v11826_v5 = vpop.f32.mrf.mxu0  ;;  %12083 = vmatmul.mubr.bf16.vlgmr.msra.gmra.mxu0 %v19612_v29  ;;  %v17828_v43 = vld [vmem:[#allocation5 + $0x27f8] ss:$36 sps:$4 sm:$0xff]  }
 0x2d5   :  { %v19753_v45 = vadd.f32 %v11826_v5, %v11784_v8  ;;  %12137 = vmatpush1.bf16.msra.mxu0 %v17801_v25  ;;  %12168 = vmatprep.mubr.bf16.mxu0 %v19618_v38  ;;  %v17818_v8 = vld [vmem:[#allocation5 + $0x240c] ss:$36 sps:$4 sm:$0xff]  }
 0x2d6   :  { %12102 = vmatpush1.bf16.msra.mxu1 %v17798_v22  ;;  %v19755_v52 = vpop.f32.mrf.mxu0  ;;  %12138 = vmatprep.subr.bf16.mxu0 %v17809_v20  ;;  %v17821_v22 = vld [vmem:[#allocation5 + $0x29ac] ss:$36 sps:$4 sm:$0xff]  }
 0x2d7   :  { %12103 = vmatprep.subr.bf16.mxu1 %v17806_v30  ;;  %v17819_v25 = vld [vmem:[#allocation5 + $0x29a8] ss:$36 sps:$4 sm:$0xff]  }
 0x2d8   :  { %v11830_v4 = vpop.f32.mrf.mxu0  ;;  %v17827_v30 = vld [vmem:[#allocation5 + $0x2964] ss:$36 sps:$4 sm:$0xff]  }
 0x2d9   :  { %v19759_v10 = vadd.f32 %v11830_v4, %v11788_v21  ;;  %12139 = vmatpush1.bf16.msra.mxu0 %v17807_v6  ;;  %v17822_v4 = vld [vmem:[#allocation5 + $0x2840] ss:$36 sps:$4 sm:$0xff]  }
 0x2da   :  { %12104 = vmatpush1.bf16.msra.mxu1 %v17804_v3  ;;  %v11832_v5 = vpop.f32.mrf.mxu0  ;;  %12140 = vmatprep.subr.bf16.mxu0 %v17815_v16  ;;  %v17825_v21 = vld [vmem:[#allocation5 + $0x2960] ss:$36 sps:$4 sm:$0xff]   ;;  %v17839_v16 = vld [vmem:[#allocation5 + $0x28d4] ss:$36 sps:$4 sm:$0xff]  }
 0x2db   :  { %12105 = vmatprep.subr.bf16.mxu1 %v17812_v13  ;;  %v19761_v20 = vadd.f32 %v11832_v5, %v11790_v19  ;;  %v17830_v3 = vld [vmem:[#allocation5 + $0x27fc] ss:$36 sps:$4 sm:$0xff]   ;;  %v17837_v19 = vld [vmem:[#allocation5 + $0x28d0] ss:$36 sps:$4 sm:$0xff]  }
 0x2dc   :  { %v17833_v6 = vld [vmem:[#allocation5 + $0x291c] ss:$36 sps:$4 sm:$0xff]   ;;  %v17842_v5 = vld [vmem:[#allocation5 + $0x276c] ss:$36 sps:$4 sm:$0xff]  }
 0x2dd   :  { %12141 = vmatpush1.bf16.msra.mxu0 %v17813_v54  ;;  %v17831_v13 = vld [vmem:[#allocation5 + $0x2918] ss:$36 sps:$4 sm:$0xff]  }
 0x2de   :  { %12106 = vmatpush1.bf16.msra.mxu1 %v17810_v63  ;;  %12142 = vmatprep.subr.bf16.mxu0 %v17821_v22  ;;  %v17836_v54 = vld [vmem:[#allocation5 + $0x27b4] ss:$36 sps:$4 sm:$0xff]   ;;  %v17840_v22 = vld [vmem:[#allocation5 + $0x2768] ss:$36 sps:$4 sm:$0xff]  }
 0x2df   :  { %12107 = vmatprep.subr.bf16.mxu1 %v17818_v8  ;;  %v17834_v63 = vld [vmem:[#allocation5 + $0x27b0] ss:$36 sps:$4 sm:$0xff]  }
 0x2e0   :  { %v17845_v8 = vld [vmem:[#allocation5 + $0x288c] ss:$36 sps:$4 sm:$0xff]  }
 0x2e1   :  { %12143 = vmatpush1.bf16.msra.mxu0 %v17819_v25  ;;  %v17848_v25 = vld [vmem:[#allocation5 + $0x2724] ss:$36 sps:$4 sm:$0xff]  }
 0x2e2   :  { %12108 = vmatpush1.bf16.msra.mxu1 %v17816_v2  ;;  %12144 = vmatprep.subr.bf16.mxu0 %v17827_v30  ;;  %v17843_v2 = vld [vmem:[#allocation5 + $0x2888] ss:$36 sps:$4 sm:$0xff]   ;;  %v17846_v30 = vld [vmem:[#allocation5 + $0x2720] ss:$36 sps:$4 sm:$0xff]  }
 0x2e3   :  { %12109 = vmatprep.subr.bf16.mxu1 %v17824_v26  ;;  %v17851_v26 = vld [vmem:[#allocation5 + $0x2cc4] ss:$36 sps:$4 sm:$0xff]  }
 0x2e5   :  { %12145 = vmatpush1.bf16.msra.mxu0 %v17825_v21  ;;  %v17854_v21 = vld [vmem:[#allocation5 + $0x26dc] ss:$36 sps:$4 sm:$0xff]  }
 0x2e6   :  { %12110 = vmatpush2.bf16.msra.mxu1 %v17822_v4  ;;  %12146 = vmatprep.subr.bf16.mxu0 %v17833_v6  ;;  %v17849_v4 = vld [vmem:[#allocation5 + $0x2cc0] ss:$36 sps:$4 sm:$0xff]   ;;  %v17852_v6 = vld [vmem:[#allocation5 + $0x26d8] ss:$36 sps:$4 sm:$0xff]  }
 0x2e7   :  { %12111 = vmatprep.subr.bf16.mxu1 %v17830_v3  ;;  %v17857_v3 = vld [vmem:[#allocation5 + $0x2c7c] ss:$36 sps:$4 sm:$0xff]  }
 0x2e9   :  { %12147 = vmatpush1.bf16.msra.mxu0 %v17831_v13  ;;  %v17860_v13 = vld [vmem:[#allocation5 + $0x2694] ss:$36 sps:$4 sm:$0xff]  }
 0x2ea   :  { %12112 = vmatpush2.bf16.msra.mxu1 %v17828_v43  ;;  %12148 = vmatprep.subr.bf16.mxu0 %v17839_v16  ;;  %v17855_v43 = vld [vmem:[#allocation5 + $0x2c78] ss:$36 sps:$4 sm:$0xff]   ;;  %v17858_v16 = vld [vmem:[#allocation5 + $0x2690] ss:$36 sps:$4 sm:$0xff]  }
 0x2eb   :  { %12113 = vmatprep.subr.bf16.mxu1 %v17836_v54  ;;  %v17863_v54 = vld [vmem:[#allocation5 + $0x2c34] ss:$36 sps:$4 sm:$0xff]  }
 0x2ed   :  { %12149 = vmatpush1.bf16.msra.mxu0 %v17837_v19  ;;  %v17866_v19 = vld [vmem:[#allocation5 + $0x264c] ss:$36 sps:$4 sm:$0xff]  }
 0x2ee   :  { %12114 = vmatpush2.bf16.msra.mxu1 %v17834_v63  ;;  %12150 = vmatprep.subr.bf16.mxu0 %v17845_v8  ;;  %v17861_v63 = vld [vmem:[#allocation5 + $0x2c30] ss:$36 sps:$4 sm:$0xff]   ;;  %v17864_v8 = vld [vmem:[#allocation5 + $0x2648] ss:$36 sps:$4 sm:$0xff]  }
 0x2ef   :  { %12115 = vmatprep.subr.bf16.mxu1 %v17842_v5  ;;  %v17869_v5 = vld [vmem:[#allocation5 + $0x2bec] ss:$36 sps:$4 sm:$0xff]  }
 0x2f1   :  { %12151 = vmatpush1.bf16.msra.mxu0 %v17843_v2  ;;  %v17872_v2 = vld [vmem:[#allocation5 + $0x2ba4] ss:$36 sps:$4 sm:$0xff]  }
 0x2f2   :  { %12116 = vmatpush2.bf16.msra.mxu1 %v17840_v22  ;;  %12152 = vmatprep.subr.bf16.mxu0 %v17851_v26  ;;  %v17867_v22 = vld [vmem:[#allocation5 + $0x2be8] ss:$36 sps:$4 sm:$0xff]   ;;  %v17870_v26 = vld [vmem:[#allocation5 + $0x2ba0] ss:$36 sps:$4 sm:$0xff]  }
 0x2f3   :  { %12117 = vmatprep.subr.bf16.mxu1 %v17848_v25  ;;  %v17875_v25 = vld [vmem:[#allocation5 + $0x2f04] ss:$36 sps:$4 sm:$0xff]  }
 0x2f5   :  { %12153 = vmatpush2.bf16.msra.mxu0 %v17849_v4  ;;  %v17878_v4 = vld [vmem:[#allocation5 + $0x2b5c] ss:$36 sps:$4 sm:$0xff]  }
 0x2f6   :  { %12118 = vmatpush2.bf16.msra.mxu1 %v17846_v30  ;;  %12154 = vmatprep.subr.bf16.mxu0 %v17857_v3  ;;  %v17873_v30 = vld [vmem:[#allocation5 + $0x2f00] ss:$36 sps:$4 sm:$0xff]   ;;  %v11786_v3 = vadd.f32 %v19745_v18, %v19751_v62 }
 0x2f7   :  { %12119 = vmatprep.subr.bf16.mxu1 %v17854_v21  ;;  %v17881_v21 = vld [vmem:[#allocation5 + $0x2ebc] ss:$36 sps:$4 sm:$0xff]  }
 0x2f9   :  { %12155 = vmatpush2.bf16.msra.mxu0 %v17855_v43  ;;  %v17879_v43 = vld [vmem:[#allocation5 + $0x2eb8] ss:$36 sps:$4 sm:$0xff]  }
 0x2fa   :  { %12120 = vmatpush2.bf16.msra.mxu1 %v17852_v6  ;;  %12156 = vmatprep.subr.bf16.mxu0 %v17863_v54  ;;  %v17876_v6 = vld [vmem:[#allocation5 + $0x2b58] ss:$36 sps:$4 sm:$0xff]   ;;  %v11829_v54 = vadd.f32 %v19755_v52, %v11786_v3  ;;  %v17899_v3 = vld [vmem:[#allocation5 + $0x3384] ss:$36 sps:$4 sm:$0xff]  }
 0x2fb   :  { %12121 = vmatprep.subr.bf16.mxu1 %v17860_v13 }
 0x2fd   :  { %12157 = vmatpush2.bf16.msra.mxu0 %v17861_v63 }
 0x2fe   :  { %12122 = vmatpush2.bf16.msra.mxu1 %v17858_v16  ;;  %12158 = vmatprep.subr.bf16.mxu0 %v17869_v5  ;;  %v17887_v5 = vld [vmem:[#allocation5 + $0x2e74] ss:$36 sps:$4 sm:$0xff]  }
 0x2ff   :  { %12123 = vmatprep.subr.bf16.mxu1 %v17866_v19  ;;  %v17884_v19 = vld [vmem:[#allocation5 + $0x2b14] ss:$36 sps:$4 sm:$0xff]  }
 0x301   :  { %12159 = vmatpush2.bf16.msra.mxu0 %v17867_v22  ;;  %v17882_v22 = vld [vmem:[#allocation5 + $0x2b10] ss:$36 sps:$4 sm:$0xff]  }
 0x302   :  { %12124 = vmatpush2.bf16.msra.mxu1 %v17864_v8  ;;  %12160 = vmatprep.subr.bf16.mxu0 %v17872_v2  ;;  %v17885_v2 = vld [vmem:[#allocation5 + $0x2e70] ss:$36 sps:$4 sm:$0xff]  }
 0x303   :  { %12179 = vmatprep.subr.bf16.mxu1 %v17875_v25  ;;  %v17893_v25 = vld [vmem:[#allocation5 + $0x2e2c] ss:$36 sps:$4 sm:$0xff]  }
 0x305   :  { %v11869_v13 = vpop.f32.mrf.mxu1  ;;  %12126 = vmatmul.mubr.bf16.vlgmr.msra.gmra.mxu1 %v19631_v33  ;;  %12161 = vmatpush2.bf16.msra.mxu0 %v17870_v26 }
 0x306   :  { %v11870_v16 = vadd.f32 %v11869_v13, %v19753_v45  ;;  %12180 = vmatpush1.bf16.msra.mxu1 %v17873_v30  ;;  %12162 = vmatprep.subr.bf16.mxu0 %v17878_v4  ;;  %v17890_v45 = vld [vmem:[#allocation5 + $0x2acc] ss:$36 sps:$4 sm:$0xff]   ;;  %v17894_v13 = vld [vmem:[#allocation5 + $0x2de0] ss:$36 sps:$4 sm:$0xff]  }
 0x307   :  { %v11871_v63 = vpop.f32.mrf.mxu1  ;;  %12181 = vmatprep.subr.bf16.mxu1 %v17881_v21  ;;  %12211 = vmatprep.mubr.bf16.mxu1 %v19639_v48  ;;  %v17888_v30 = vld [vmem:[#allocation5 + $0x2ac8] ss:$36 sps:$4 sm:$0xff]  }
 0x308   :  { %v11872_v8 = vadd.f32 %v11871_v63, %v11829_v54  ;;  %v17891_v4 = vld [vmem:[#allocation5 + $0x2e28] ss:$36 sps:$4 sm:$0xff]   ;;  %v17897_v54 = vld [vmem:[#allocation5 + $0x3380] ss:$36 sps:$4 sm:$0xff]   ;;  %v17903_v63 = vld [vmem:[#allocation5 + $0x3338] ss:$36 sps:$4 sm:$0xff]  }
 0x309   :  { %v11873_v18 = vpop.f32.mrf.mxu1  ;;  %12163 = vmatpush2.bf16.msra.mxu0 %v17876_v6  ;;  %v17896_v21 = vld [vmem:[#allocation5 + $0x2de4] ss:$36 sps:$4 sm:$0xff]   ;;  %v17905_v6 = vld [vmem:[#allocation5 + $0x333c] ss:$36 sps:$4 sm:$0xff]  }
 0x30a   :  { %v11874_v62 = vadd.f32 %v11873_v18, %v19759_v10  ;;  %12182 = vmatpush1.bf16.msra.mxu1 %v17879_v43  ;;  %12164 = vmatprep.subr.bf16.mxu0 %v17884_v19  ;;  %v17902_v10 = vld [vmem:[#allocation5 + $0x2d9c] ss:$36 sps:$4 sm:$0xff]  }
 0x30b   :  { %v11875_v52 = vpop.f32.mrf.mxu1  ;;  %12183 = vmatprep.subr.bf16.mxu1 %v17887_v5  ;;  %v17900_v43 = vld [vmem:[#allocation5 + $0x2d98] ss:$36 sps:$4 sm:$0xff]  }
 0x30c   :  { %v11876_v26 = vadd.f32 %v11875_v52, %v19761_v20  ;;  %v17906_v52 = vld [vmem:[#allocation5 + $0x2d50] ss:$36 sps:$4 sm:$0xff]  }
 0x30d   :  { %12165 = vmatpush2.bf16.msra.mxu0 %v17882_v22  ;;  %v17908_v22 = vld [vmem:[#allocation5 + $0x2d54] ss:$36 sps:$4 sm:$0xff]  }
 0x30e   :  { %12184 = vmatpush1.bf16.msra.mxu1 %v17885_v2  ;;  %12166 = vmatprep.subr.bf16.mxu0 %v17890_v45  ;;  %v17911_v2 = vld [vmem:[#allocation5 + $0x32f4] ss:$36 sps:$4 sm:$0xff]  }
 0x30f   :  { %12185 = vmatprep.subr.bf16.mxu1 %v17893_v25  ;;  %v17909_v45 = vld [vmem:[#allocation5 + $0x32f0] ss:$36 sps:$4 sm:$0xff]  }
 0x311   :  { %12167 = vmatpush2.bf16.msra.mxu0 %v17888_v30 }
 0x312   :  { %12186 = vmatpush1.bf16.msra.mxu1 %v17891_v4  ;;  %12222 = vmatprep.subr.bf16.mxu0 %v17899_v3  ;;  %v17914_v4 = vld [vmem:[#allocation5 + $0x2d0c] ss:$36 sps:$4 sm:$0xff]  }
 0x313   :  { %12187 = vmatprep.subr.bf16.mxu1 %v17896_v21  ;;  %v17917_v21 = vld [vmem:[#allocation5 + $0x32ac] ss:$36 sps:$4 sm:$0xff]  }
 0x314   :  { %v11912_v19 = vpop.f32.mrf.mxu0  ;;  %12169 = vmatmul.mubr.bf16.vlgmr.msra.gmra.mxu0 %v19633_v34 }
 0x315   :  { %v19772_v20 = vadd.f32 %v11912_v19, %v11870_v16  ;;  %12223 = vmatpush1.bf16.msra.mxu0 %v17897_v54  ;;  %12254 = vmatprep.mubr.bf16.mxu0 %v19641_v49  ;;  %v17920_v54 = vld [vmem:[#allocation5 + $0x3144] ss:$36 sps:$4 sm:$0xff]   ;;  %v17927_v19 = vld [vmem:[#allocation5 + $0x3218] ss:$36 sps:$4 sm:$0xff]  }
 0x316   :  { %12188 = vmatpush1.bf16.msra.mxu1 %v17894_v13  ;;  %v11914_v5 = vpop.f32.mrf.mxu0  ;;  %12224 = vmatprep.subr.bf16.mxu0 %v17905_v6  ;;  %v17915_v13 = vld [vmem:[#allocation5 + $0x32a8] ss:$36 sps:$4 sm:$0xff]   ;;  %v17921_v6 = vld [vmem:[#allocation5 + $0x3260] ss:$36 sps:$4 sm:$0xff]  }
 0x317   :  { %12189 = vmatprep.subr.bf16.mxu1 %v17902_v10  ;;  %v19774_v18 = vadd.f32 %v11914_v5, %v11872_v8  ;;  %v17912_v8 = vld [vmem:[#allocation5 + $0x2d08] ss:$36 sps:$4 sm:$0xff]   ;;  %v17932_v5 = vld [vmem:[#allocation5 + $0x30b4] ss:$36 sps:$4 sm:$0xff]  }
 0x318   :  { %v11916_v25 = vpop.f32.mrf.mxu0  ;;  %v17923_v10 = vld [vmem:[#allocation5 + $0x3264] ss:$36 sps:$4 sm:$0xff]  }
 0x319   :  { %v19777_v30 = vadd.f32 %v11916_v25, %v11874_v62  ;;  %12225 = vmatpush1.bf16.msra.mxu0 %v17903_v63  ;;  %v17918_v62 = vld [vmem:[#allocation5 + $0x3140] ss:$36 sps:$4 sm:$0xff]   ;;  %v17941_v25 = vld [vmem:[#allocation5 + $0x318c] ss:$36 sps:$4 sm:$0xff]  }
 0x31a   :  { %12190 = vmatpush1.bf16.msra.mxu1 %v17900_v43  ;;  %v11918_v16 = vpop.f32.mrf.mxu0  ;;  %12226 = vmatprep.subr.bf16.mxu0 %v17911_v2  ;;  %v17926_v43 = vld [vmem:[#allocation5 + $0x30fc] ss:$36 sps:$4 sm:$0xff]   ;;  %v17930_v2 = vld [vmem:[#allocation5 + $0x30b0] ss:$36 sps:$4 sm:$0xff]  }
 0x31b   :  { %12191 = vmatprep.subr.bf16.mxu1 %v17908_v22  ;;  %v19779_v3 = vadd.f32 %v11918_v16, %v11876_v26  ;;  %v17929_v63 = vld [vmem:[#allocation5 + $0x321c] ss:$36 sps:$4 sm:$0xff]   ;;  %v17935_v22 = vld [vmem:[#allocation5 + $0x31d4] ss:$36 sps:$4 sm:$0xff]   ;;  %v17936_v16 = vld [vmem:[#allocation5 + $0x3068] ss:$36 sps:$4 sm:$0xff]  }
 0x31c   :  { %v17924_v26 = vld [vmem:[#allocation5 + $0x30f8] ss:$36 sps:$4 sm:$0xff]  }
 0x31d   :  { %12227 = vmatpush1.bf16.msra.mxu0 %v17909_v45  ;;  %v17938_v45 = vld [vmem:[#allocation5 + $0x306c] ss:$36 sps:$4 sm:$0xff]  }
 0x31e   :  { %12192 = vmatpush1.bf16.msra.mxu1 %v17906_v52  ;;  %12228 = vmatprep.subr.bf16.mxu0 %v17917_v21  ;;  %v17933_v52 = vld [vmem:[#allocation5 + $0x31d0] ss:$36 sps:$4 sm:$0xff]   ;;  %v17944_v21 = vld [vmem:[#allocation5 + $0x3024] ss:$36 sps:$4 sm:$0xff]  }
 0x31f   :  { %12193 = vmatprep.subr.bf16.mxu1 %v17914_v4  ;;  %v17939_v4 = vld [vmem:[#allocation5 + $0x3188] ss:$36 sps:$4 sm:$0xff]  }
 0x321   :  { %12229 = vmatpush1.bf16.msra.mxu0 %v17915_v13  ;;  %v17942_v13 = vld [vmem:[#allocation5 + $0x3020] ss:$36 sps:$4 sm:$0xff]  }
 0x322   :  { %12194 = vmatpush1.bf16.msra.mxu1 %v17912_v8  ;;  %12230 = vmatprep.subr.bf16.mxu0 %v17923_v10  ;;  %v17947_v8 = vld [vmem:[#allocation5 + $0x35c4] ss:$36 sps:$4 sm:$0xff]   ;;  %v17950_v10 = vld [vmem:[#allocation5 + $0x2fdc] ss:$36 sps:$4 sm:$0xff]  }
 0x323   :  { %12195 = vmatprep.subr.bf16.mxu1 %v17920_v54  ;;  %v17945_v54 = vld [vmem:[#allocation5 + $0x35c0] ss:$36 sps:$4 sm:$0xff]  }
 0x325   :  { %12231 = vmatpush1.bf16.msra.mxu0 %v17921_v6  ;;  %v17948_v6 = vld [vmem:[#allocation5 + $0x2fd8] ss:$36 sps:$4 sm:$0xff]  }
 0x326   :  { %12196 = vmatpush2.bf16.msra.mxu1 %v17918_v62  ;;  %12232 = vmatprep.subr.bf16.mxu0 %v17929_v63  ;;  %v17953_v62 = vld [vmem:[#allocation5 + $0x357c] ss:$36 sps:$4 sm:$0xff]   ;;  %v17956_v63 = vld [vmem:[#allocation5 + $0x2f94] ss:$36 sps:$4 sm:$0xff]  }
 0x327   :  { %12197 = vmatprep.subr.bf16.mxu1 %v17926_v43  ;;  %v17951_v43 = vld [vmem:[#allocation5 + $0x3578] ss:$36 sps:$4 sm:$0xff]  }
 0x329   :  { %12233 = vmatpush1.bf16.msra.mxu0 %v17927_v19  ;;  %v17954_v19 = vld [vmem:[#allocation5 + $0x2f90] ss:$36 sps:$4 sm:$0xff]  }
 0x32a   :  { %12198 = vmatpush2.bf16.msra.mxu1 %v17924_v26  ;;  %12234 = vmatprep.subr.bf16.mxu0 %v17935_v22  ;;  %v17959_v26 = vld [vmem:[#allocation5 + $0x3534] ss:$36 sps:$4 sm:$0xff]   ;;  %v17962_v22 = vld [vmem:[#allocation5 + $0x2f4c] ss:$36 sps:$4 sm:$0xff]  }
 0x32b   :  { %12199 = vmatprep.subr.bf16.mxu1 %v17932_v5  ;;  %v17957_v5 = vld [vmem:[#allocation5 + $0x3530] ss:$36 sps:$4 sm:$0xff]  }
 0x32d   :  { %12235 = vmatpush1.bf16.msra.mxu0 %v17933_v52  ;;  %v17960_v52 = vld [vmem:[#allocation5 + $0x2f48] ss:$36 sps:$4 sm:$0xff]  }
 0x32e   :  { %12200 = vmatpush2.bf16.msra.mxu1 %v17930_v2  ;;  %12236 = vmatprep.subr.bf16.mxu0 %v17941_v25  ;;  %v17965_v2 = vld [vmem:[#allocation5 + $0x34ec] ss:$36 sps:$4 sm:$0xff]   ;;  %v17968_v25 = vld [vmem:[#allocation5 + $0x34a4] ss:$36 sps:$4 sm:$0xff]  }
 0x32f   :  { %12201 = vmatprep.subr.bf16.mxu1 %v17938_v45  ;;  %v17963_v45 = vld [vmem:[#allocation5 + $0x34e8] ss:$36 sps:$4 sm:$0xff]  }
 0x331   :  { %12237 = vmatpush1.bf16.msra.mxu0 %v17939_v4  ;;  %v17966_v4 = vld [vmem:[#allocation5 + $0x34a0] ss:$36 sps:$4 sm:$0xff]  }
 0x332   :  { %12202 = vmatpush2.bf16.msra.mxu1 %v17936_v16  ;;  %12238 = vmatprep.subr.bf16.mxu0 %v17947_v8  ;;  %v17971_v16 = vld [vmem:[#allocation5 + $0x36e4] ss:$36 sps:$4 sm:$0xff]   ;;  %v17974_v8 = vld [vmem:[#allocation5 + $0x345c] ss:$36 sps:$4 sm:$0xff]  }
 0x333   :  { %12203 = vmatprep.subr.bf16.mxu1 %v17944_v21  ;;  %v17969_v21 = vld [vmem:[#allocation5 + $0x36e0] ss:$36 sps:$4 sm:$0xff]  }
 0x335   :  { %12239 = vmatpush2.bf16.msra.mxu0 %v17945_v54  ;;  %v17972_v54 = vld [vmem:[#allocation5 + $0x3458] ss:$36 sps:$4 sm:$0xff]  }
 0x336   :  { %12204 = vmatpush2.bf16.msra.mxu1 %v17942_v13  ;;  %12240 = vmatprep.subr.bf16.mxu0 %v17953_v62  ;;  %v17977_v13 = vld [vmem:[#allocation5 + $0x369c] ss:$36 sps:$4 sm:$0xff]  }
 0x337   :  { %12205 = vmatprep.subr.bf16.mxu1 %v17950_v10  ;;  %v17975_v10 = vld [vmem:[#allocation5 + $0x3698] ss:$36 sps:$4 sm:$0xff]  }
 0x339   :  { %12241 = vmatpush2.bf16.msra.mxu0 %v17951_v43 }
 0x33a   :  { %12206 = vmatpush2.bf16.msra.mxu1 %v17948_v6  ;;  %12242 = vmatprep.subr.bf16.mxu0 %v17959_v26  ;;  %v17983_v26 = vld [vmem:[#allocation5 + $0x3654] ss:$36 sps:$4 sm:$0xff]  }
 0x33b   :  { %12207 = vmatprep.subr.bf16.mxu1 %v17956_v63  ;;  %v17980_v63 = vld [vmem:[#allocation5 + $0x3414] ss:$36 sps:$4 sm:$0xff]  }
 0x33d   :  { %12243 = vmatpush2.bf16.msra.mxu0 %v17957_v5  ;;  %v17978_v5 = vld [vmem:[#allocation5 + $0x3410] ss:$36 sps:$4 sm:$0xff]  }
 0x33e   :  { %12208 = vmatpush2.bf16.msra.mxu1 %v17954_v19  ;;  %12244 = vmatprep.subr.bf16.mxu0 %v17965_v2  ;;  %v20220_v2 = vmov 0  }
 0x33f   :  { %12209 = vmatprep.subr.bf16.mxu1 %v17962_v22  ;;  %v17981_v22 = vld [vmem:[#allocation5 + $0x3650] ss:$36 sps:$4 sm:$0xff]  }
 0x341   :  { %12245 = vmatpush2.bf16.msra.mxu0 %v17963_v45 }
 0x342   :  { %12210 = vmatpush2.bf16.msra.mxu1 %v17960_v52  ;;  %12246 = vmatprep.subr.bf16.mxu0 %v17968_v25 }
 0x343   :  { %12273 = vmatprep.subr.bf16.mxu1 %v17971_v16  ;;  %v17989_v16 = vld [vmem:[#allocation5 + $0x360c] ss:$36 sps:$4 sm:$0xff]  }
 0x345   :  { %v11955_v62 = vpop.f32.mrf.mxu1  ;;  %12212 = vmatmul.mubr.bf16.vlgmr.msra.gmra.mxu1 %v19656_v56  ;;  %12247 = vmatpush2.bf16.msra.mxu0 %v17966_v4 }
 0x346   :  { %v11956_v6 = vadd.f32 %v11955_v62, %v19772_v20  ;;  %12274 = vmatpush1.bf16.msra.mxu1 %v17969_v21  ;;  %12248 = vmatprep.subr.bf16.mxu0 %v17974_v8  ;;  %v17986_v20 = vld [vmem:[#allocation5 + $0x33cc] ss:$36 sps:$4 sm:$0xff]  }
 0x347   :  { %v11957_v43 = vpop.f32.mrf.mxu1  ;;  %12275 = vmatprep.subr.bf16.mxu1 %v17977_v13  ;;  %12297 = vmatprep.mubr.bf16.mxu1 %v20220_v2  ;;  %v17984_v21 = vld [vmem:[#allocation5 + $0x33c8] ss:$36 sps:$4 sm:$0xff]  }
 0x348   :  { %v11958_v19 = vadd.f32 %v11957_v43, %v19774_v18  ;;  %v17987_v18 = vld [vmem:[#allocation5 + $0x3608] ss:$36 sps:$4 sm:$0xff]  }
 0x349   :  { %v11959_v52 = vpop.f32.mrf.mxu1  ;;  %12249 = vmatpush2.bf16.msra.mxu0 %v17972_v54  ;;  %v17992_v8 = vld [vmem:[#allocation5 + $0x20c] ss:$36 sps:$4 sm:$0xff]   ;;  %v18001_v54 = vld [vmem:[#allocation5 + $0x644] ss:$36 sps:$4 sm:$0xff]  }
 0x34a   :  { %v11960_v45 = vadd.f32 %v11959_v52, %v19777_v30  ;;  %12276 = vmatpush1.bf16.msra.mxu1 %v17975_v10  ;;  %12250 = vmatprep.subr.bf16.mxu0 %v17980_v63  ;;  %v17995_v13 = vld [vmem:[#allocation5 + $0x68c] ss:$36 sps:$4 sm:$0xff]   ;;  %v17998_v30 = vld [vmem:[#allocation5 + $0x1c4] ss:$36 sps:$4 sm:$0xff]   ;;  %v18007_v52 = vld [vmem:[#allocation5 + $0x5fc] ss:$36 sps:$4 sm:$0xff]  }
 0x34b   :  { %v11961_v25 = vpop.f32.mrf.mxu1  ;;  %12277 = vmatprep.subr.bf16.mxu1 %v17983_v26  ;;  %v17990_v62 = vld [vmem:[#allocation5 + $0x208] ss:$36 sps:$4 sm:$0xff]   ;;  %v17996_v10 = vld [vmem:[#allocation5 + $0x1c0] ss:$36 sps:$4 sm:$0xff]  }
 0x34c   :  { %v11962_v4 = vadd.f32 %v11961_v25, %v19779_v3  ;;  %v17993_v43 = vld [vmem:[#allocation5 + $0x688] ss:$36 sps:$4 sm:$0xff]   ;;  %v17999_v63 = vld [vmem:[#allocation5 + $0x640] ss:$36 sps:$4 sm:$0xff]  }
 0x34d   :  { %12251 = vmatpush2.bf16.msra.mxu0 %v17978_v5 }
 0x34e   :  { %12278 = vmatpush1.bf16.msra.mxu1 %v17981_v22  ;;  %12252 = vmatprep.subr.bf16.mxu0 %v17986_v20  ;;  %v18004_v22 = vld [vmem:[#allocation5 + $0x17c] ss:$36 sps:$4 sm:$0xff]  }
 0x34f   :  { %12279 = vmatprep.subr.bf16.mxu1 %v17989_v16  ;;  %v18002_v20 = vld [vmem:[#allocation5 + $0x178] ss:$36 sps:$4 sm:$0xff]  }
 0x350   :  { %v18005_v16 = vld [vmem:[#allocation5 + $0x5f8] ss:$36 sps:$4 sm:$0xff]  }
 0x351   :  { %12253 = vmatpush2.bf16.msra.mxu0 %v17984_v21 }
 0x352   :  { %12280 = vmatpush1.bf16.msra.mxu1 %v17987_v18  ;;  %12308 = vmatprep.subr.bf16.mxu0 %v17992_v8  ;;  %v18010_v8 = vld [vmem:[#allocation5 + $0x134] ss:$36 sps:$4 sm:$0xff]  }
 0x353   :  { %12351 = vmatprep.subr.bf16.mxu1 %v17995_v13  ;;  %v18013_v13 = vld [vmem:[#allocation5 + $0x5b4] ss:$36 sps:$4 sm:$0xff]  }
 0x354   :  { %v11998_v26 = vpop.f32.mrf.mxu0  ;;  %12255 = vmatmul.mubr.bf16.vlgmr.msra.gmra.mxu0 %v19658_v57 }
 0x355   :  { %16308 = vmatmul.mubr.msk.bf16.vlgmr.msra.gmra.mxu1 %vm11186_vm0, %v19677_v51  ;;  %v19790_v3 = vadd.f32 %v11998_v26, %v11956_v6  ;;  %12309 = vmatpush1.bf16.msra.mxu0 %v17990_v62  ;;  %v18025_v26 = vld [vmem:[#allocation5 + $0x524] ss:$36 sps:$4 sm:$0xff]  }
 0x356   :  { %12352 = vmatpush1.bf16.msra.mxu1 %v17993_v43  ;;  %v12000_v5 = vpop.f32.mrf.mxu0  ;;  %12310 = vmatprep.subr.bf16.mxu0 %v17998_v30  ;;  %v18011_v43 = vld [vmem:[#allocation5 + $0x5b0] ss:$36 sps:$4 sm:$0xff]  }
 0x357   :  { %12353 = vmatprep.subr.bf16.mxu1 %v18001_v54  ;;  %v19792_v25 = vadd.f32 %v12000_v5, %v11958_v19  ;;  %12340 = vmatprep.mubr.bf16.mxu0 %v19564_v50  ;;  %v18008_v19 = vld [vmem:[#allocation5 + $0x130] ss:$36 sps:$4 sm:$0xff]   ;;  %v18023_v5 = vld [vmem:[#allocation5 + $0x520] ss:$36 sps:$4 sm:$0xff]  }
 0x358   :  { %12383 = vmatprep.mubr.bf16.mxu1 %v19566_v55  ;;  %v12002_v21 = vpop.f32.mrf.mxu0  ;;  %v18016_v30 = vld [vmem:[#allocation5 + $0xec] ss:$36 sps:$4 sm:$0xff]  }
 0x359   :  { %v19796_v18 = vadd.f32 %v12002_v21, %v11960_v45  ;;  %12311 = vmatpush1.bf16.msra.mxu0 %v17996_v10  ;;  %v18019_v54 = vld [vmem:[#allocation5 + $0x56c] ss:$36 sps:$4 sm:$0xff]   ;;  %v18034_v21 = vld [vmem:[#allocation5 + $0x14] ss:$36 sps:$4 sm:$0xff]  }
 0x35a   :  { %12354 = vmatpush1.bf16.msra.mxu1 %v17999_v63  ;;  %v12004_v6 = vpop.f32.mrf.mxu0  ;;  %12312 = vmatprep.subr.bf16.mxu0 %v18004_v22  ;;  %v18014_v45 = vld [vmem:[#allocation5 + $0xe8] ss:$36 sps:$4 sm:$0xff]   ;;  %v18028_v22 = vld [vmem:[#allocation5 + $0x5c] ss:$36 sps:$4 sm:$0xff]  }
 0x35b   :  { %12355 = vmatprep.subr.bf16.mxu1 %v18007_v52  ;;  %v19798_v62 = vadd.f32 %v12004_v6, %v11962_v4  ;;  %v18017_v10 = vld [vmem:[#allocation5 + $0x568] ss:$36 sps:$4 sm:$0xff]   ;;  %v18020_v4 = vld [vmem:[#allocation5 + $0xa0] ss:$36 sps:$4 sm:$0xff]   ;;  %v18037_v6 = vld [vmem:[#allocation5 + $0x494] ss:$36 sps:$4 sm:$0xff]  }
 0x35c   :  { %v18022_v63 = vld [vmem:[#allocation5 + $0xa4] ss:$36 sps:$4 sm:$0xff]   ;;  %v18031_v52 = vld [vmem:[#allocation5 + $0x4dc] ss:$36 sps:$4 sm:$0xff]  }
 0x35d   :  { %12313 = vmatpush1.bf16.msra.mxu0 %v18002_v20  ;;  %v18026_v20 = vld [vmem:[#allocation5 + $0x58] ss:$36 sps:$4 sm:$0xff]  }
 0x35e   :  { %12356 = vmatpush1.bf16.msra.mxu1 %v18005_v16  ;;  %12314 = vmatprep.subr.bf16.mxu0 %v18010_v8  ;;  %v18029_v16 = vld [vmem:[#allocation5 + $0x4d8] ss:$36 sps:$4 sm:$0xff]   ;;  %v18032_v8 = vld [vmem:[#allocation5 + $0x10] ss:$36 sps:$4 sm:$0xff]  }
 0x35f   :  { %12357 = vmatprep.subr.bf16.mxu1 %v18013_v13  ;;  %v18035_v13 = vld [vmem:[#allocation5 + $0x490] ss:$36 sps:$4 sm:$0xff]  }
 0x361   :  { %12315 = vmatpush1.bf16.msra.mxu0 %v18008_v19  ;;  %v18040_v19 = vld [vmem:[#allocation5 + $0x44c] ss:$36 sps:$4 sm:$0xff]  }
 0x362   :  { %12358 = vmatpush1.bf16.msra.mxu1 %v18011_v43  ;;  %12316 = vmatprep.subr.bf16.mxu0 %v18016_v30  ;;  %v18043_v43 = vld [vmem:[#allocation5 + $0x8cc] ss:$36 sps:$4 sm:$0xff]  }
 0x363   :  { %12359 = vmatprep.subr.bf16.mxu1 %v18019_v54  ;;  %v18038_v30 = vld [vmem:[#allocation5 + $0x448] ss:$36 sps:$4 sm:$0xff]  }
 0x364   :  { %v18041_v54 = vld [vmem:[#allocation5 + $0x8c8] ss:$36 sps:$4 sm:$0xff]  }
 0x365   :  { %12317 = vmatpush1.bf16.msra.mxu0 %v18014_v45  ;;  %v18046_v45 = vld [vmem:[#allocation5 + $0x404] ss:$36 sps:$4 sm:$0xff]  }
 0x366   :  { %12360 = vmatpush1.bf16.msra.mxu1 %v18017_v10  ;;  %12318 = vmatprep.subr.bf16.mxu0 %v18022_v63  ;;  %v18049_v10 = vld [vmem:[#allocation5 + $0x884] ss:$36 sps:$4 sm:$0xff]  }
 0x367   :  { %12361 = vmatprep.subr.bf16.mxu1 %v18025_v26  ;;  %v18044_v63 = vld [vmem:[#allocation5 + $0x400] ss:$36 sps:$4 sm:$0xff]  }
 0x368   :  { %v18047_v26 = vld [vmem:[#allocation5 + $0x880] ss:$36 sps:$4 sm:$0xff]  }
 0x369   :  { %12319 = vmatpush1.bf16.msra.mxu0 %v18020_v4  ;;  %v18052_v4 = vld [vmem:[#allocation5 + $0x3bc] ss:$36 sps:$4 sm:$0xff]  }
 0x36a   :  { %12362 = vmatpush1.bf16.msra.mxu1 %v18023_v5  ;;  %12320 = vmatprep.subr.bf16.mxu0 %v18028_v22  ;;  %v18055_v5 = vld [vmem:[#allocation5 + $0x83c] ss:$36 sps:$4 sm:$0xff]  }
 0x36b   :  { %12363 = vmatprep.subr.bf16.mxu1 %v18031_v52  ;;  %v18050_v22 = vld [vmem:[#allocation5 + $0x3b8] ss:$36 sps:$4 sm:$0xff]  }
 0x36c   :  { %v18053_v52 = vld [vmem:[#allocation5 + $0x838] ss:$36 sps:$4 sm:$0xff]  }
 0x36d   :  { %12321 = vmatpush1.bf16.msra.mxu0 %v18026_v20  ;;  %v18058_v20 = vld [vmem:[#allocation5 + $0x374] ss:$36 sps:$4 sm:$0xff]  }
 0x36e   :  { %12364 = vmatpush1.bf16.msra.mxu1 %v18029_v16  ;;  %12322 = vmatprep.subr.bf16.mxu0 %v18034_v21  ;;  %v18061_v16 = vld [vmem:[#allocation5 + $0x7f4] ss:$36 sps:$4 sm:$0xff]  }
 0x36f   :  { %12365 = vmatprep.subr.bf16.mxu1 %v18037_v6  ;;  %v18056_v21 = vld [vmem:[#allocation5 + $0x370] ss:$36 sps:$4 sm:$0xff]  }
 0x370   :  { %v18059_v6 = vld [vmem:[#allocation5 + $0x7f0] ss:$36 sps:$4 sm:$0xff]  }
 0x371   :  { %12323 = vmatpush1.bf16.msra.mxu0 %v18032_v8  ;;  %v18064_v8 = vld [vmem:[#allocation5 + $0x32c] ss:$36 sps:$4 sm:$0xff]  }
 0x372   :  { %12366 = vmatpush1.bf16.msra.mxu1 %v18035_v13  ;;  %12324 = vmatprep.subr.bf16.mxu0 %v18040_v19  ;;  %v18067_v13 = vld [vmem:[#allocation5 + $0x7ac] ss:$36 sps:$4 sm:$0xff]  }
 0x373   :  { %12367 = vmatprep.subr.bf16.mxu1 %v18043_v43  ;;  %v18062_v19 = vld [vmem:[#allocation5 + $0x328] ss:$36 sps:$4 sm:$0xff]  }
 0x374   :  { %v18065_v43 = vld [vmem:[#allocation5 + $0x7a8] ss:$36 sps:$4 sm:$0xff]  }
 0x375   :  { %12325 = vmatpush2.bf16.msra.mxu0 %v18038_v30  ;;  %v18070_v30 = vld [vmem:[#allocation5 + $0x2e4] ss:$36 sps:$4 sm:$0xff]  }
 0x376   :  { %12368 = vmatpush2.bf16.msra.mxu1 %v18041_v54  ;;  %12326 = vmatprep.subr.bf16.mxu0 %v18046_v45  ;;  %v18073_v54 = vld [vmem:[#allocation5 + $0x764] ss:$36 sps:$4 sm:$0xff]  }
 0x377   :  { %12369 = vmatprep.subr.bf16.mxu1 %v18049_v10  ;;  %v18068_v45 = vld [vmem:[#allocation5 + $0x2e0] ss:$36 sps:$4 sm:$0xff]  }
 0x378   :  { %v18071_v10 = vld [vmem:[#allocation5 + $0x760] ss:$36 sps:$4 sm:$0xff]  }
 0x379   :  { %12327 = vmatpush2.bf16.msra.mxu0 %v18044_v63 }
 0x37a   :  { %12370 = vmatpush2.bf16.msra.mxu1 %v18047_v26  ;;  %12328 = vmatprep.subr.bf16.mxu0 %v18052_v4 }
 0x37b   :  { %12371 = vmatprep.subr.bf16.mxu1 %v18055_v5  ;;  %v18076_v5 = vld [vmem:[#allocation5 + $0x29c] ss:$36 sps:$4 sm:$0xff]  }
 0x37d   :  { %12329 = vmatpush2.bf16.msra.mxu0 %v18050_v22  ;;  %v18079_v22 = vld [vmem:[#allocation5 + $0x71c] ss:$36 sps:$4 sm:$0xff]  }
 0x37e   :  { %12372 = vmatpush2.bf16.msra.mxu1 %v18053_v52  ;;  %12330 = vmatprep.subr.bf16.mxu0 %v18058_v20  ;;  %v18074_v20 = vld [vmem:[#allocation5 + $0x298] ss:$36 sps:$4 sm:$0xff]  }
 0x37f   :  { %12373 = vmatprep.subr.bf16.mxu1 %v18061_v16  ;;  %v18077_v16 = vld [vmem:[#allocation5 + $0x718] ss:$36 sps:$4 sm:$0xff]  }
 0x381   :  { %12331 = vmatpush2.bf16.msra.mxu0 %v18056_v21 }
 0x382   :  { %12374 = vmatpush2.bf16.msra.mxu1 %v18059_v6  ;;  %12332 = vmatprep.subr.bf16.mxu0 %v18064_v8 }
 0x383   :  { %12375 = vmatprep.subr.bf16.mxu1 %v18067_v13  ;;  %v18085_v13 = vld [vmem:[#allocation5 + $0x6d4] ss:$36 sps:$4 sm:$0xff]  }
 0x385   :  { %v12041_v63 = vpop.f32.mrf.mxu1  ;;  %12333 = vmatpush2.bf16.msra.mxu0 %v18062_v19 }
 0x386   :  { %v12042_v26 = vadd.f32 %v12041_v63, %v19790_v3  ;;  %12376 = vmatpush2.bf16.msra.mxu1 %v18065_v43  ;;  %12334 = vmatprep.subr.bf16.mxu0 %v18070_v30  ;;  %v18082_v3 = vld [vmem:[#allocation5 + $0x254] ss:$36 sps:$4 sm:$0xff]   ;;  %v18086_v63 = vld [vmem:[#allocation5 + $0xb08] ss:$36 sps:$4 sm:$0xff]  }
 0x387   :  { %v12043_v4 = vpop.f32.mrf.mxu1  ;;  %12377 = vmatprep.subr.bf16.mxu1 %v18073_v54  ;;  %v18080_v43 = vld [vmem:[#allocation5 + $0x250] ss:$36 sps:$4 sm:$0xff]  }
 0x388   :  { %v12044_v52 = vadd.f32 %v12043_v4, %v19792_v25  ;;  %v18083_v30 = vld [vmem:[#allocation5 + $0x6d0] ss:$36 sps:$4 sm:$0xff]   ;;  %v18089_v4 = vld [vmem:[#allocation5 + $0xf88] ss:$36 sps:$4 sm:$0xff]  }
 0x389   :  { %v12045_v21 = vpop.f32.mrf.mxu1  ;;  %12335 = vmatpush2.bf16.msra.mxu0 %v18068_v45  ;;  %v18088_v25 = vld [vmem:[#allocation5 + $0xb0c] ss:$36 sps:$4 sm:$0xff]   ;;  %v18097_v45 = vld [vmem:[#allocation5 + $0xf44] ss:$36 sps:$4 sm:$0xff]  }
 0x38a   :  { %v12046_v6 = vadd.f32 %v12045_v21, %v19796_v18  ;;  %12378 = vmatpush2.bf16.msra.mxu1 %v18071_v10  ;;  %12336 = vmatprep.subr.bf16.mxu0 %v18076_v5  ;;  %v18091_v54 = vld [vmem:[#allocation5 + $0xf8c] ss:$36 sps:$4 sm:$0xff]   ;;  %v18094_v18 = vld [vmem:[#allocation5 + $0xac4] ss:$36 sps:$4 sm:$0xff]   ;;  %v18103_v21 = vld [vmem:[#allocation5 + $0xefc] ss:$36 sps:$4 sm:$0xff]  }
 0x38b   :  { %v12047_v8 = vpop.f32.mrf.mxu1  ;;  %12379 = vmatprep.subr.bf16.mxu1 %v18079_v22  ;;  %v18092_v10 = vld [vmem:[#allocation5 + $0xac0] ss:$36 sps:$4 sm:$0xff]  }
 0x38c   :  { %v12048_v19 = vadd.f32 %v12047_v8, %v19798_v62  ;;  %v18095_v5 = vld [vmem:[#allocation5 + $0xf40] ss:$36 sps:$4 sm:$0xff]  }
 0x38d   :  { %12337 = vmatpush2.bf16.msra.mxu0 %v18074_v20 }
 0x38e   :  { %12380 = vmatpush2.bf16.msra.mxu1 %v18077_v16  ;;  %12338 = vmatprep.subr.bf16.mxu0 %v18082_v3  ;;  %v18100_v16 = vld [vmem:[#allocation5 + $0xa7c] ss:$36 sps:$4 sm:$0xff]  }
 0x38f   :  { %12381 = vmatprep.subr.bf16.mxu1 %v18085_v13  ;;  %v18098_v3 = vld [vmem:[#allocation5 + $0xa78] ss:$36 sps:$4 sm:$0xff]  }
 0x390   :  { %v18101_v13 = vld [vmem:[#allocation5 + $0xef8] ss:$36 sps:$4 sm:$0xff]  }
 0x391   :  { %12339 = vmatpush2.bf16.msra.mxu0 %v18080_v43 }
 0x392   :  { %12382 = vmatpush2.bf16.msra.mxu1 %v18083_v30  ;;  %12394 = vmatprep.subr.bf16.mxu0 %v18088_v25  ;;  %v18106_v25 = vld [vmem:[#allocation5 + $0xa34] ss:$36 sps:$4 sm:$0xff]  }
 0x393   :  { %12437 = vmatprep.subr.bf16.mxu1 %v18091_v54  ;;  %v18109_v54 = vld [vmem:[#allocation5 + $0xeb4] ss:$36 sps:$4 sm:$0xff]  }
 0x394   :  { %v12084_v22 = vpop.f32.mrf.mxu0  ;;  %12341 = vmatmul.mubr.bf16.vlgmr.msra.gmra.mxu0 %v19570_v12 }
 0x395   :  { %12384 = vmatmul.mubr.bf16.vlgmr.msra.gmra.mxu1 %v19572_v15  ;;  %v19806_v62 = vadd.f32 %v12084_v22, %v12042_v26  ;;  %12395 = vmatpush1.bf16.msra.mxu0 %v18086_v63  ;;  %v18121_v22 = vld [vmem:[#allocation5 + $0xe24] ss:$36 sps:$4 sm:$0xff]  }
 0x396   :  { %12438 = vmatpush1.bf16.msra.mxu1 %v18089_v4  ;;  %v12086_v20 = vpop.f32.mrf.mxu0  ;;  %12396 = vmatprep.subr.bf16.mxu0 %v18094_v18  ;;  %v18107_v4 = vld [vmem:[#allocation5 + $0xeb0] ss:$36 sps:$4 sm:$0xff]  }
 0x397   :  { %12439 = vmatprep.subr.bf16.mxu1 %v18097_v45  ;;  %v19808_v8 = vadd.f32 %v12086_v20, %v12044_v52  ;;  %12426 = vmatprep.mubr.bf16.mxu0 %v19576_v44  ;;  %v18104_v52 = vld [vmem:[#allocation5 + $0xa30] ss:$36 sps:$4 sm:$0xff]   ;;  %v18119_v20 = vld [vmem:[#allocation5 + $0xe20] ss:$36 sps:$4 sm:$0xff]  }
 0x398   :  { %12469 = vmatprep.mubr.bf16.mxu1 %v19578_v47  ;;  %v12088_v43 = vpop.f32.mrf.mxu0  ;;  %v18112_v18 = vld [vmem:[#allocation5 + $0x9ec] ss:$36 sps:$4 sm:$0xff]  }
 0x399   :  { %v19812_v30 = vadd.f32 %v12088_v43, %v12046_v6  ;;  %12397 = vmatpush1.bf16.msra.mxu0 %v18092_v10  ;;  %v18115_v45 = vld [vmem:[#allocation5 + $0xe6c] ss:$36 sps:$4 sm:$0xff]   ;;  %v18130_v43 = vld [vmem:[#allocation5 + $0x914] ss:$36 sps:$4 sm:$0xff]  }
 0x39a   :  { %12440 = vmatpush1.bf16.msra.mxu1 %v18095_v5  ;;  %v12090_v26 = vpop.f32.mrf.mxu0  ;;  %12398 = vmatprep.subr.bf16.mxu0 %v18100_v16  ;;  %v18110_v6 = vld [vmem:[#allocation5 + $0x9e8] ss:$36 sps:$4 sm:$0xff]   ;;  %v18124_v16 = vld [vmem:[#allocation5 + $0x95c] ss:$36 sps:$4 sm:$0xff]  }
 0x39b   :  { %12441 = vmatprep.subr.bf16.mxu1 %v18103_v21  ;;  %v19814_v63 = vadd.f32 %v12090_v26, %v12048_v19  ;;  %v18113_v10 = vld [vmem:[#allocation5 + $0xe68] ss:$36 sps:$4 sm:$0xff]   ;;  %v18116_v19 = vld [vmem:[#allocation5 + $0x9a0] ss:$36 sps:$4 sm:$0xff]   ;;  %v18133_v26 = vld [vmem:[#allocation5 + $0xd94] ss:$36 sps:$4 sm:$0xff]  }
 0x39c   :  { %v18118_v5 = vld [vmem:[#allocation5 + $0x9a4] ss:$36 sps:$4 sm:$0xff]   ;;  %v18127_v21 = vld [vmem:[#allocation5 + $0xddc] ss:$36 sps:$4 sm:$0xff]  }
 0x39d   :  { %12399 = vmatpush1.bf16.msra.mxu0 %v18098_v3  ;;  %v18122_v3 = vld [vmem:[#allocation5 + $0x958] ss:$36 sps:$4 sm:$0xff]  }
 0x39e   :  { %12442 = vmatpush1.bf16.msra.mxu1 %v18101_v13  ;;  %12400 = vmatprep.subr.bf16.mxu0 %v18106_v25  ;;  %v18125_v13 = vld [vmem:[#allocation5 + $0xdd8] ss:$36 sps:$4 sm:$0xff]   ;;  %v18128_v25 = vld [vmem:[#allocation5 + $0x910] ss:$36 sps:$4 sm:$0xff]  }
 0x39f   :  { %12443 = vmatprep.subr.bf16.mxu1 %v18109_v54  ;;  %v18131_v54 = vld [vmem:[#allocation5 + $0xd90] ss:$36 sps:$4 sm:$0xff]  }
 0x3a1   :  { %12401 = vmatpush1.bf16.msra.mxu0 %v18104_v52  ;;  %v18136_v52 = vld [vmem:[#allocation5 + $0xd4c] ss:$36 sps:$4 sm:$0xff]  }
 0x3a2   :  { %12444 = vmatpush1.bf16.msra.mxu1 %v18107_v4  ;;  %12402 = vmatprep.subr.bf16.mxu0 %v18112_v18  ;;  %v18139_v4 = vld [vmem:[#allocation5 + $0x11cc] ss:$36 sps:$4 sm:$0xff]  }
 0x3a3   :  { %12445 = vmatprep.subr.bf16.mxu1 %v18115_v45  ;;  %v18134_v18 = vld [vmem:[#allocation5 + $0xd48] ss:$36 sps:$4 sm:$0xff]  }
 0x3a4   :  { %v18137_v45 = vld [vmem:[#allocation5 + $0x11c8] ss:$36 sps:$4 sm:$0xff]  }
 0x3a5   :  { %12403 = vmatpush1.bf16.msra.mxu0 %v18110_v6  ;;  %v18142_v6 = vld [vmem:[#allocation5 + $0xd04] ss:$36 sps:$4 sm:$0xff]  }
 0x3a6   :  { %12446 = vmatpush1.bf16.msra.mxu1 %v18113_v10  ;;  %12404 = vmatprep.subr.bf16.mxu0 %v18118_v5  ;;  %v18145_v10 = vld [vmem:[#allocation5 + $0x1184] ss:$36 sps:$4 sm:$0xff]  }
 0x3a7   :  { %12447 = vmatprep.subr.bf16.mxu1 %v18121_v22  ;;  %v18140_v5 = vld [vmem:[#allocation5 + $0xd00] ss:$36 sps:$4 sm:$0xff]  }
 0x3a8   :  { %v18143_v22 = vld [vmem:[#allocation5 + $0x1180] ss:$36 sps:$4 sm:$0xff]  }
 0x3a9   :  { %12405 = vmatpush1.bf16.msra.mxu0 %v18116_v19  ;;  %v18148_v19 = vld [vmem:[#allocation5 + $0xcbc] ss:$36 sps:$4 sm:$0xff]  }
 0x3aa   :  { %12448 = vmatpush1.bf16.msra.mxu1 %v18119_v20  ;;  %12406 = vmatprep.subr.bf16.mxu0 %v18124_v16  ;;  %v18151_v20 = vld [vmem:[#allocation5 + $0x113c] ss:$36 sps:$4 sm:$0xff]  }
 0x3ab   :  { %12449 = vmatprep.subr.bf16.mxu1 %v18127_v21  ;;  %v18146_v16 = vld [vmem:[#allocation5 + $0xcb8] ss:$36 sps:$4 sm:$0xff]  }
 0x3ac   :  { %v18149_v21 = vld [vmem:[#allocation5 + $0x1138] ss:$36 sps:$4 sm:$0xff]  }
 0x3ad   :  { %12407 = vmatpush1.bf16.msra.mxu0 %v18122_v3  ;;  %v18154_v3 = vld [vmem:[#allocation5 + $0xc74] ss:$36 sps:$4 sm:$0xff]  }
 0x3ae   :  { %12450 = vmatpush1.bf16.msra.mxu1 %v18125_v13  ;;  %12408 = vmatprep.subr.bf16.mxu0 %v18130_v43  ;;  %v18157_v13 = vld [vmem:[#allocation5 + $0x10f4] ss:$36 sps:$4 sm:$0xff]  }
 0x3af   :  { %12451 = vmatprep.subr.bf16.mxu1 %v18133_v26  ;;  %v18152_v43 = vld [vmem:[#allocation5 + $0xc70] ss:$36 sps:$4 sm:$0xff]  }
 0x3b0   :  { %v18155_v26 = vld [vmem:[#allocation5 + $0x10f0] ss:$36 sps:$4 sm:$0xff]  }
 0x3b1   :  { %12409 = vmatpush1.bf16.msra.mxu0 %v18128_v25  ;;  %v18160_v25 = vld [vmem:[#allocation5 + $0xc2c] ss:$36 sps:$4 sm:$0xff]  }
 0x3b2   :  { %12452 = vmatpush1.bf16.msra.mxu1 %v18131_v54  ;;  %12410 = vmatprep.subr.bf16.mxu0 %v18136_v52  ;;  %v18163_v54 = vld [vmem:[#allocation5 + $0x10ac] ss:$36 sps:$4 sm:$0xff]  }
 0x3b3   :  { %12453 = vmatprep.subr.bf16.mxu1 %v18139_v4  ;;  %v18158_v52 = vld [vmem:[#allocation5 + $0xc28] ss:$36 sps:$4 sm:$0xff]  }
 0x3b4   :  { %v18161_v4 = vld [vmem:[#allocation5 + $0x10a8] ss:$36 sps:$4 sm:$0xff]  }
 0x3b5   :  { %12411 = vmatpush2.bf16.msra.mxu0 %v18134_v18  ;;  %v18166_v18 = vld [vmem:[#allocation5 + $0xbe4] ss:$36 sps:$4 sm:$0xff]  }
 0x3b6   :  { %12454 = vmatpush2.bf16.msra.mxu1 %v18137_v45  ;;  %12412 = vmatprep.subr.bf16.mxu0 %v18142_v6  ;;  %v18169_v45 = vld [vmem:[#allocation5 + $0x1064] ss:$36 sps:$4 sm:$0xff]  }
 0x3b7   :  { %12455 = vmatprep.subr.bf16.mxu1 %v18145_v10 }
 0x3b9   :  { %12413 = vmatpush2.bf16.msra.mxu0 %v18140_v5  ;;  %v18164_v5 = vld [vmem:[#allocation5 + $0xbe0] ss:$36 sps:$4 sm:$0xff]  }
 0x3ba   :  { %12456 = vmatpush2.bf16.msra.mxu1 %v18143_v22  ;;  %12414 = vmatprep.subr.bf16.mxu0 %v18148_v19  ;;  %v18167_v22 = vld [vmem:[#allocation5 + $0x1060] ss:$36 sps:$4 sm:$0xff]  }
 0x3bb   :  { %12457 = vmatprep.subr.bf16.mxu1 %v18151_v20  ;;  %v18172_v20 = vld [vmem:[#allocation5 + $0xb9c] ss:$36 sps:$4 sm:$0xff]  }
 0x3bd   :  { %12415 = vmatpush2.bf16.msra.mxu0 %v18146_v16  ;;  %v18175_v16 = vld [vmem:[#allocation5 + $0x101c] ss:$36 sps:$4 sm:$0xff]  }
 0x3be   :  { %12458 = vmatpush2.bf16.msra.mxu1 %v18149_v21  ;;  %12416 = vmatprep.subr.bf16.mxu0 %v18154_v3 }
 0x3bf   :  { %12459 = vmatprep.subr.bf16.mxu1 %v18157_v13 }
 0x3c1   :  { %12417 = vmatpush2.bf16.msra.mxu0 %v18152_v43  ;;  %v18170_v43 = vld [vmem:[#allocation5 + $0xb98] ss:$36 sps:$4 sm:$0xff]  }
 0x3c2   :  { %12460 = vmatpush2.bf16.msra.mxu1 %v18155_v26  ;;  %12418 = vmatprep.subr.bf16.mxu0 %v18160_v25  ;;  %v18173_v26 = vld [vmem:[#allocation5 + $0x1018] ss:$36 sps:$4 sm:$0xff]  }
 0x3c3   :  { %12461 = vmatprep.subr.bf16.mxu1 %v18163_v54  ;;  %v18181_v54 = vld [vmem:[#allocation5 + $0xfd4] ss:$36 sps:$4 sm:$0xff]  }
 0x3c5   :  { %v12127_v6 = vpop.f32.mrf.mxu1  ;;  %12419 = vmatpush2.bf16.msra.mxu0 %v18158_v52 }
 0x3c6   :  { %v12128_v10 = vadd.f32 %v12127_v6, %v19806_v62  ;;  %12462 = vmatpush2.bf16.msra.mxu1 %v18161_v4  ;;  %12420 = vmatprep.subr.bf16.mxu0 %v18166_v18  ;;  %v18178_v62 = vld [vmem:[#allocation5 + $0xb54] ss:$36 sps:$4 sm:$0xff]   ;;  %v18185_v6 = vld [vmem:[#allocation5 + $0x1888] ss:$36 sps:$4 sm:$0xff]  }
 0x3c7   :  { %v12129_v19 = vpop.f32.mrf.mxu1  ;;  %12463 = vmatprep.subr.bf16.mxu1 %v18169_v45  ;;  %v18176_v4 = vld [vmem:[#allocation5 + $0xb50] ss:$36 sps:$4 sm:$0xff]  }
 0x3c8   :  { %v12130_v21 = vadd.f32 %v12129_v19, %v19808_v8  ;;  %v18179_v18 = vld [vmem:[#allocation5 + $0xfd0] ss:$36 sps:$4 sm:$0xff]   ;;  %v18188_v19 = vld [vmem:[#allocation5 + $0x13c0] ss:$36 sps:$4 sm:$0xff]  }
 0x3c9   :  { %v12131_v3 = vpop.f32.mrf.mxu1  ;;  %12421 = vmatpush2.bf16.msra.mxu0 %v18164_v5  ;;  %v18184_v8 = vld [vmem:[#allocation5 + $0x140c] ss:$36 sps:$4 sm:$0xff]   ;;  %v18190_v5 = vld [vmem:[#allocation5 + $0x13c4] ss:$36 sps:$4 sm:$0xff]  }
 0x3ca   :  { %v12132_v13 = vadd.f32 %v12131_v3, %v19812_v30  ;;  %12464 = vmatpush2.bf16.msra.mxu1 %v18167_v22  ;;  %12422 = vmatprep.subr.bf16.mxu0 %v18172_v20  ;;  %v18187_v45 = vld [vmem:[#allocation5 + $0x188c] ss:$36 sps:$4 sm:$0xff]   ;;  %v18193_v22 = vld [vmem:[#allocation5 + $0x1844] ss:$36 sps:$4 sm:$0xff]  }
 0x3cb   :  { %v12133_v25 = vpop.f32.mrf.mxu1  ;;  %12465 = vmatprep.subr.bf16.mxu1 %v18175_v16  ;;  %v18182_v30 = vld [vmem:[#allocation5 + $0x1408] ss:$36 sps:$4 sm:$0xff]   ;;  %v18191_v20 = vld [vmem:[#allocation5 + $0x1840] ss:$36 sps:$4 sm:$0xff]  }
 0x3cc   :  { %v12134_v52 = vadd.f32 %v12133_v25, %v19814_v63 }
 0x3cd   :  { %12423 = vmatpush2.bf16.msra.mxu0 %v18170_v43  ;;  %v18196_v43 = vld [vmem:[#allocation5 + $0x137c] ss:$36 sps:$4 sm:$0xff]  }
 0x3ce   :  { %12466 = vmatpush2.bf16.msra.mxu1 %v18173_v26  ;;  %12424 = vmatprep.subr.bf16.mxu0 %v18178_v62  ;;  %v18199_v26 = vld [vmem:[#allocation5 + $0x17fc] ss:$36 sps:$4 sm:$0xff]  }
 0x3cf   :  { %12467 = vmatprep.subr.bf16.mxu1 %v18181_v54  ;;  %v18194_v62 = vld [vmem:[#allocation5 + $0x1378] ss:$36 sps:$4 sm:$0xff]  }
 0x3d0   :  { %v18197_v54 = vld [vmem:[#allocation5 + $0x17f8] ss:$36 sps:$4 sm:$0xff]  }
 0x3d1   :  { %12425 = vmatpush2.bf16.msra.mxu0 %v18176_v4 }
 0x3d2   :  { %12468 = vmatpush2.bf16.msra.mxu1 %v18179_v18  ;;  %12480 = vmatprep.subr.bf16.mxu0 %v18184_v8  ;;  %v18202_v8 = vld [vmem:[#allocation5 + $0x1334] ss:$36 sps:$4 sm:$0xff]  }
 0x3d3   :  { %12523 = vmatprep.subr.bf16.mxu1 %v18187_v45  ;;  %v18205_v45 = vld [vmem:[#allocation5 + $0x17b4] ss:$36 sps:$4 sm:$0xff]  }
 0x3d4   :  { %v12170_v16 = vpop.f32.mrf.mxu0  ;;  %12427 = vmatmul.mubr.bf16.vlgmr.msra.gmra.mxu0 %v19582_v28 }
 0x3d5   :  { %12470 = vmatmul.mubr.bf16.vlgmr.msra.gmra.mxu1 %v19584_v31  ;;  %v19822_v63 = vadd.f32 %v12170_v16, %v12128_v10  ;;  %12481 = vmatpush1.bf16.msra.mxu0 %v18182_v30  ;;  %v18217_v16 = vld [vmem:[#allocation5 + $0x1724] ss:$36 sps:$4 sm:$0xff]  }
 0x3d6   :  { %12524 = vmatpush1.bf16.msra.mxu1 %v18185_v6  ;;  %v12172_v3 = vpop.f32.mrf.mxu0  ;;  %12482 = vmatprep.subr.bf16.mxu0 %v18190_v5  ;;  %v18203_v6 = vld [vmem:[#allocation5 + $0x17b0] ss:$36 sps:$4 sm:$0xff]  }
 0x3d7   :  { %12525 = vmatprep.subr.bf16.mxu1 %v18193_v22  ;;  %v19824_v25 = vadd.f32 %v12172_v3, %v12130_v21  ;;  %12512 = vmatprep.mubr.bf16.mxu0 %v19588_v40  ;;  %v18200_v21 = vld [vmem:[#allocation5 + $0x1330] ss:$36 sps:$4 sm:$0xff]   ;;  %v18215_v3 = vld [vmem:[#allocation5 + $0x1720] ss:$36 sps:$4 sm:$0xff]  }
 0x3d8   :  { %12555 = vmatprep.mubr.bf16.mxu1 %v19590_v46  ;;  %v12174_v4 = vpop.f32.mrf.mxu0  ;;  %v18208_v5 = vld [vmem:[#allocation5 + $0x12ec] ss:$36 sps:$4 sm:$0xff]  }
 0x3d9   :  { %v19828_v18 = vadd.f32 %v12174_v4, %v12132_v13  ;;  %12483 = vmatpush1.bf16.msra.mxu0 %v18188_v19  ;;  %v18211_v22 = vld [vmem:[#allocation5 + $0x176c] ss:$36 sps:$4 sm:$0xff]   ;;  %v18226_v4 = vld [vmem:[#allocation5 + $0x1214] ss:$36 sps:$4 sm:$0xff]  }
 0x3da   :  { %12526 = vmatpush1.bf16.msra.mxu1 %v18191_v20  ;;  %v12176_v10 = vpop.f32.mrf.mxu0  ;;  %12484 = vmatprep.subr.bf16.mxu0 %v18196_v43  ;;  %v18206_v13 = vld [vmem:[#allocation5 + $0x12e8] ss:$36 sps:$4 sm:$0xff]   ;;  %v18220_v43 = vld [vmem:[#allocation5 + $0x125c] ss:$36 sps:$4 sm:$0xff]  }
 0x3db   :  { %12527 = vmatprep.subr.bf16.mxu1 %v18199_v26  ;;  %v19830_v30 = vadd.f32 %v12176_v10, %v12134_v52  ;;  %v18209_v19 = vld [vmem:[#allocation5 + $0x1768] ss:$36 sps:$4 sm:$0xff]   ;;  %v18212_v52 = vld [vmem:[#allocation5 + $0x12a0] ss:$36 sps:$4 sm:$0xff]   ;;  %v18229_v10 = vld [vmem:[#allocation5 + $0x1694] ss:$36 sps:$4 sm:$0xff]  }
 0x3dc   :  { %v18214_v20 = vld [vmem:[#allocation5 + $0x12a4] ss:$36 sps:$4 sm:$0xff]   ;;  %v18223_v26 = vld [vmem:[#allocation5 + $0x16dc] ss:$36 sps:$4 sm:$0xff]  }
 0x3dd   :  { %12485 = vmatpush1.bf16.msra.mxu0 %v18194_v62  ;;  %v18218_v62 = vld [vmem:[#allocation5 + $0x1258] ss:$36 sps:$4 sm:$0xff]  }
 0x3de   :  { %12528 = vmatpush1.bf16.msra.mxu1 %v18197_v54  ;;  %12486 = vmatprep.subr.bf16.mxu0 %v18202_v8  ;;  %v18221_v54 = vld [vmem:[#allocation5 + $0x16d8] ss:$36 sps:$4 sm:$0xff]   ;;  %v18224_v8 = vld [vmem:[#allocation5 + $0x1210] ss:$36 sps:$4 sm:$0xff]  }
 0x3df   :  { %12529 = vmatprep.subr.bf16.mxu1 %v18205_v45  ;;  %v18227_v45 = vld [vmem:[#allocation5 + $0x1690] ss:$36 sps:$4 sm:$0xff]  }
 0x3e1   :  { %12487 = vmatpush1.bf16.msra.mxu0 %v18200_v21  ;;  %v18232_v21 = vld [vmem:[#allocation5 + $0x164c] ss:$36 sps:$4 sm:$0xff]  }
 0x3e2   :  { %12530 = vmatpush1.bf16.msra.mxu1 %v18203_v6  ;;  %12488 = vmatprep.subr.bf16.mxu0 %v18208_v5  ;;  %v18235_v6 = vld [vmem:[#allocation5 + $0x1acc] ss:$36 sps:$4 sm:$0xff]  }
 0x3e3   :  { %12531 = vmatprep.subr.bf16.mxu1 %v18211_v22  ;;  %v18230_v5 = vld [vmem:[#allocation5 + $0x1648] ss:$36 sps:$4 sm:$0xff]  }
 0x3e4   :  { %v18233_v22 = vld [vmem:[#allocation5 + $0x1ac8] ss:$36 sps:$4 sm:$0xff]  }
 0x3e5   :  { %12489 = vmatpush1.bf16.msra.mxu0 %v18206_v13  ;;  %v18238_v13 = vld [vmem:[#allocation5 + $0x1604] ss:$36 sps:$4 sm:$0xff]  }
 0x3e6   :  { %12532 = vmatpush1.bf16.msra.mxu1 %v18209_v19  ;;  %12490 = vmatprep.subr.bf16.mxu0 %v18214_v20  ;;  %v18241_v19 = vld [vmem:[#allocation5 + $0x1a84] ss:$36 sps:$4 sm:$0xff]  }
 0x3e7   :  { %12533 = vmatprep.subr.bf16.mxu1 %v18217_v16  ;;  %v18236_v20 = vld [vmem:[#allocation5 + $0x1600] ss:$36 sps:$4 sm:$0xff]  }
 0x3e8   :  { %v18239_v16 = vld [vmem:[#allocation5 + $0x1a80] ss:$36 sps:$4 sm:$0xff]  }
 0x3e9   :  { %12491 = vmatpush1.bf16.msra.mxu0 %v18212_v52  ;;  %v18244_v52 = vld [vmem:[#allocation5 + $0x15bc] ss:$36 sps:$4 sm:$0xff]  }
 0x3ea   :  { %12534 = vmatpush1.bf16.msra.mxu1 %v18215_v3  ;;  %12492 = vmatprep.subr.bf16.mxu0 %v18220_v43  ;;  %v18247_v3 = vld [vmem:[#allocation5 + $0x1a3c] ss:$36 sps:$4 sm:$0xff]  }
 0x3eb   :  { %12535 = vmatprep.subr.bf16.mxu1 %v18223_v26  ;;  %v18242_v43 = vld [vmem:[#allocation5 + $0x15b8] ss:$36 sps:$4 sm:$0xff]  }
 0x3ec   :  { %v18245_v26 = vld [vmem:[#allocation5 + $0x1a38] ss:$36 sps:$4 sm:$0xff]  }
 0x3ed   :  { %12493 = vmatpush1.bf16.msra.mxu0 %v18218_v62  ;;  %v18250_v62 = vld [vmem:[#allocation5 + $0x1574] ss:$36 sps:$4 sm:$0xff]  }
 0x3ee   :  { %12536 = vmatpush1.bf16.msra.mxu1 %v18221_v54  ;;  %12494 = vmatprep.subr.bf16.mxu0 %v18226_v4  ;;  %v18253_v54 = vld [vmem:[#allocation5 + $0x19f4] ss:$36 sps:$4 sm:$0xff]  }
 0x3ef   :  { %12537 = vmatprep.subr.bf16.mxu1 %v18229_v10  ;;  %v18248_v4 = vld [vmem:[#allocation5 + $0x1570] ss:$36 sps:$4 sm:$0xff]  }
 0x3f0   :  { %v18251_v10 = vld [vmem:[#allocation5 + $0x19f0] ss:$36 sps:$4 sm:$0xff]  }
 0x3f1   :  { %12495 = vmatpush1.bf16.msra.mxu0 %v18224_v8  ;;  %v18256_v8 = vld [vmem:[#allocation5 + $0x152c] ss:$36 sps:$4 sm:$0xff]  }
 0x3f2   :  { %12538 = vmatpush1.bf16.msra.mxu1 %v18227_v45  ;;  %12496 = vmatprep.subr.bf16.mxu0 %v18232_v21  ;;  %v18259_v45 = vld [vmem:[#allocation5 + $0x19ac] ss:$36 sps:$4 sm:$0xff]  }
 0x3f3   :  { %12539 = vmatprep.subr.bf16.mxu1 %v18235_v6  ;;  %v18254_v21 = vld [vmem:[#allocation5 + $0x1528] ss:$36 sps:$4 sm:$0xff]  }
 0x3f4   :  { %v18257_v6 = vld [vmem:[#allocation5 + $0x19a8] ss:$36 sps:$4 sm:$0xff]  }
 0x3f5   :  { %12497 = vmatpush2.bf16.msra.mxu0 %v18230_v5  ;;  %v18262_v5 = vld [vmem:[#allocation5 + $0x14e4] ss:$36 sps:$4 sm:$0xff]  }
 0x3f6   :  { %12540 = vmatpush2.bf16.msra.mxu1 %v18233_v22  ;;  %12498 = vmatprep.subr.bf16.mxu0 %v18238_v13  ;;  %v18265_v22 = vld [vmem:[#allocation5 + $0x1964] ss:$36 sps:$4 sm:$0xff]  }
 0x3f7   :  { %12541 = vmatprep.subr.bf16.mxu1 %v18241_v19 }
 0x3f9   :  { %12499 = vmatpush2.bf16.msra.mxu0 %v18236_v20  ;;  %v18260_v20 = vld [vmem:[#allocation5 + $0x14e0] ss:$36 sps:$4 sm:$0xff]  }
 0x3fa   :  { %12542 = vmatpush2.bf16.msra.mxu1 %v18239_v16  ;;  %12500 = vmatprep.subr.bf16.mxu0 %v18244_v52  ;;  %v18263_v16 = vld [vmem:[#allocation5 + $0x1960] ss:$36 sps:$4 sm:$0xff]  }
 0x3fb   :  { %12543 = vmatprep.subr.bf16.mxu1 %v18247_v3  ;;  %v18268_v3 = vld [vmem:[#allocation5 + $0x149c] ss:$36 sps:$4 sm:$0xff]  }
 0x3fd   :  { %12501 = vmatpush2.bf16.msra.mxu0 %v18242_v43  ;;  %v18271_v43 = vld [vmem:[#allocation5 + $0x191c] ss:$36 sps:$4 sm:$0xff]  }
 0x3fe   :  { %12544 = vmatpush2.bf16.msra.mxu1 %v18245_v26  ;;  %12502 = vmatprep.subr.bf16.mxu0 %v18250_v62 }
 0x3ff   :  { %12545 = vmatprep.subr.bf16.mxu1 %v18253_v54 }
 0x401   :  { %12503 = vmatpush2.bf16.msra.mxu0 %v18248_v4  ;;  %v18266_v4 = vld [vmem:[#allocation5 + $0x1498] ss:$36 sps:$4 sm:$0xff]  }
 0x402   :  { %12546 = vmatpush2.bf16.msra.mxu1 %v18251_v10  ;;  %12504 = vmatprep.subr.bf16.mxu0 %v18256_v8  ;;  %v18269_v10 = vld [vmem:[#allocation5 + $0x1918] ss:$36 sps:$4 sm:$0xff]  }
 0x403   :  { %12547 = vmatprep.subr.bf16.mxu1 %v18259_v45  ;;  %v18277_v45 = vld [vmem:[#allocation5 + $0x18d4] ss:$36 sps:$4 sm:$0xff]  }
 0x405   :  { %v12213_v13 = vpop.f32.mrf.mxu1  ;;  %12505 = vmatpush2.bf16.msra.mxu0 %v18254_v21 }
 0x406   :  { %v12214_v19 = vadd.f32 %v12213_v13, %v19822_v63  ;;  %12548 = vmatpush2.bf16.msra.mxu1 %v18257_v6  ;;  %12506 = vmatprep.subr.bf16.mxu0 %v18262_v5  ;;  %v18274_v63 = vld [vmem:[#allocation5 + $0x1454] ss:$36 sps:$4 sm:$0xff]   ;;  %v18281_v13 = vld [vmem:[#allocation5 + $0x2188] ss:$36 sps:$4 sm:$0xff]  }
 0x407   :  { %v12215_v52 = vpop.f32.mrf.mxu1  ;;  %12549 = vmatprep.subr.bf16.mxu1 %v18265_v22  ;;  %v18272_v6 = vld [vmem:[#allocation5 + $0x1450] ss:$36 sps:$4 sm:$0xff]  }
 0x408   :  { %v12216_v26 = vadd.f32 %v12215_v52, %v19824_v25  ;;  %v18275_v5 = vld [vmem:[#allocation5 + $0x18d0] ss:$36 sps:$4 sm:$0xff]   ;;  %v18284_v52 = vld [vmem:[#allocation5 + $0x1cc0] ss:$36 sps:$4 sm:$0xff]  }
 0x409   :  { %v12217_v62 = vpop.f32.mrf.mxu1  ;;  %12507 = vmatpush2.bf16.msra.mxu0 %v18260_v20  ;;  %v18280_v25 = vld [vmem:[#allocation5 + $0x1d0c] ss:$36 sps:$4 sm:$0xff]   ;;  %v18286_v20 = vld [vmem:[#allocation5 + $0x1cc4] ss:$36 sps:$4 sm:$0xff]  }
 0x40a   :  { %v12218_v54 = vadd.f32 %v12217_v62, %v19828_v18  ;;  %12550 = vmatpush2.bf16.msra.mxu1 %v18263_v16  ;;  %12508 = vmatprep.subr.bf16.mxu0 %v18268_v3  ;;  %v18283_v22 = vld [vmem:[#allocation5 + $0x218c] ss:$36 sps:$4 sm:$0xff]   ;;  %v18289_v16 = vld [vmem:[#allocation5 + $0x2144] ss:$36 sps:$4 sm:$0xff]  }
 0x40b   :  { %v12219_v8 = vpop.f32.mrf.mxu1  ;;  %12551 = vmatprep.subr.bf16.mxu1 %v18271_v43  ;;  %v18278_v18 = vld [vmem:[#allocation5 + $0x1d08] ss:$36 sps:$4 sm:$0xff]   ;;  %v18287_v3 = vld [vmem:[#allocation5 + $0x2140] ss:$36 sps:$4 sm:$0xff]  }
 0x40c   :  { %v12220_v21 = vadd.f32 %v12219_v8, %v19830_v30  ;;  %v18292_v8 = vld [vmem:[#allocation5 + $0x1c7c] ss:$36 sps:$4 sm:$0xff]  }
 0x40d   :  { %12509 = vmatpush2.bf16.msra.mxu0 %v18266_v4 }
 0x40e   :  { %12552 = vmatpush2.bf16.msra.mxu1 %v18269_v10  ;;  %12510 = vmatprep.subr.bf16.mxu0 %v18274_v63  ;;  %v18295_v63 = vld [vmem:[#allocation5 + $0x20fc] ss:$36 sps:$4 sm:$0xff]  }
 0x40f   :  { %12553 = vmatprep.subr.bf16.mxu1 %v18277_v45 }
 0x411   :  { %12511 = vmatpush2.bf16.msra.mxu0 %v18272_v6 }
 0x412   :  { %12554 = vmatpush2.bf16.msra.mxu1 %v18275_v5  ;;  %12566 = vmatprep.subr.bf16.mxu0 %v18280_v25  ;;  %v18290_v5 = vld [vmem:[#allocation5 + $0x1c78] ss:$36 sps:$4 sm:$0xff]  }
 0x413   :  { %12609 = vmatprep.subr.bf16.mxu1 %v18283_v22 }
 0x414   :  { %v12256_v43 = vpop.f32.mrf.mxu0  ;;  %12513 = vmatmul.mubr.bf16.vlgmr.msra.gmra.mxu0 %v19594_v58 }
 0x415   :  { %12556 = vmatmul.mubr.bf16.vlgmr.msra.gmra.mxu1 %v19596_v59  ;;  %v12299_v30 = vpop.f32.mrf.mxu1  ;;  %v12257_v62 = vadd.f32 %v12256_v43, %v12214_v19  ;;  %12567 = vmatpush1.bf16.msra.mxu0 %v18278_v18  ;;  %v18293_v18 = vld [vmem:[#allocation5 + $0x20f8] ss:$36 sps:$4 sm:$0xff]  }
 0x416   :  { %12610 = vmatpush1.bf16.msra.mxu1 %v18281_v13  ;;  %v12258_v4 = vpop.f32.mrf.mxu0  ;;  %12568 = vmatprep.subr.bf16.mxu0 %v18286_v20 }
 0x417   :  { %v12301_v10 = vpop.f32.mrf.mxu1  ;;  %12611 = vmatprep.subr.bf16.mxu1 %v18289_v16  ;;  %v12259_v45 = vadd.f32 %v12258_v4, %v12216_v26  ;;  %v19838_v6 = vadd.f32 %v12299_v30, %v12257_v62  ;;  %12598 = vmatprep.mubr.bf16.mxu0 %v19598_v0  ;;  %v18298_v26 = vld [vmem:[#allocation5 + $0x1c34] ss:$36 sps:$4 sm:$0xff]  }
 0x418   :  { %12641 = vmatprep.mubr.bf16.mxu1 %v19600_v1  ;;  %v12260_v25 = vpop.f32.mrf.mxu0  ;;  %v18301_v16 = vld [vmem:[#allocation5 + $0x20b4] ss:$36 sps:$4 sm:$0xff]  }
 0x419   :  { %20221 = vst [vmem:[#allocation25_spill] sm:$0xff] %v19838_v6  ;;  %v12303_v22 = vpop.f32.mrf.mxu1  ;;  %v12261_v14 = vadd.f32 %v12260_v25, %v12218_v54  ;;  %v19842_v19 = vadd.f32 %v12301_v10, %v12259_v45  ;;  %12569 = vmatpush1.bf16.msra.mxu0 %v18284_v52  ;;  %v18296_v4 = vld [vmem:[#allocation5 + $0x1c30] ss:$36 sps:$4 sm:$0xff]   ;;  %v18302_v10 = vld [vmem:[#allocation5 + $0x1be8] ss:$36 sps:$4 sm:$0xff]  }
 0x41a   :  { %12612 = vmatpush1.bf16.msra.mxu1 %v18287_v3  ;;  %v12262_v13 = vpop.f32.mrf.mxu0  ;;  %12570 = vmatprep.subr.bf16.mxu0 %v18292_v8  ;;  %v18299_v54 = vld [vmem:[#allocation5 + $0x20b0] ss:$36 sps:$4 sm:$0xff]   ;;  %v18305_v8 = vld [vmem:[#allocation5 + $0x2068] ss:$36 sps:$4 sm:$0xff]   ;;  %v18311_v45 = vld [vmem:[#allocation5 + $0x2020] ss:$36 sps:$4 sm:$0xff]  }
 0x41b   :  { %20222 = vst [vmem:[#allocation26_spill] sm:$0xff] %v19842_v19  ;;  %v12305_v20 = vpop.f32.mrf.mxu1  ;;  %12613 = vmatprep.subr.bf16.mxu1 %v18295_v63  ;;  %v12263_v43 = vadd.f32 %v12262_v13, %v12220_v21  ;;  %v19844_v30 = vadd.f32 %v12303_v22, %v12261_v14  ;;  %v18304_v52 = vld [vmem:[#allocation5 + $0x1bec] ss:$36 sps:$4 sm:$0xff]   ;;  %v18310_v63 = vld [vmem:[#allocation5 + $0x1ba4] ss:$36 sps:$4 sm:$0xff]  }
 0x41c   :  { %v18307_v3 = vld [vmem:[#allocation5 + $0x206c] ss:$36 sps:$4 sm:$0xff]   ;;  %v18313_v21 = vld [vmem:[#allocation5 + $0x2024] ss:$36 sps:$4 sm:$0xff]   ;;  %v18319_v25 = vld [vmem:[#allocation5 + $0x1fdc] ss:$36 sps:$4 sm:$0xff]  }
 0x41d   :  { %20223 = vst [vmem:[#allocation27_spill] sm:$0xff] %v19844_v30  ;;  %v19846_v62 = vadd.f32 %v12305_v20, %v12263_v43  ;;  %12571 = vmatpush1.bf16.msra.mxu0 %v18290_v5  ;;  %v18308_v14 = vld [vmem:[#allocation5 + $0x1ba0] ss:$36 sps:$4 sm:$0xff]   ;;  %v18314_v22 = vld [vmem:[#allocation5 + $0x1b58] ss:$36 sps:$4 sm:$0xff]  }
 0x41e   :  { %12614 = vmatpush1.bf16.msra.mxu1 %v18293_v18  ;;  %12572 = vmatprep.subr.bf16.mxu0 %v18298_v26  ;;  %v18316_v5 = vld [vmem:[#allocation5 + $0x1b5c] ss:$36 sps:$4 sm:$0xff]   ;;  %v18322_v13 = vld [vmem:[#allocation5 + $0x1b14] ss:$36 sps:$4 sm:$0xff]   ;;  %v18328_v43 = vld [vmem:[#allocation5 + $0x1f4c] ss:$36 sps:$4 sm:$0xff]  }
 0x41f   :  { %20224 = vst [vmem:[#allocation28_spill] sm:$0xff] %v19846_v62  ;;  %12615 = vmatprep.subr.bf16.mxu1 %v18301_v16  ;;  %v18317_v18 = vld [vmem:[#allocation5 + $0x1fd8] ss:$36 sps:$4 sm:$0xff]   ;;  %v18320_v26 = vld [vmem:[#allocation5 + $0x1b10] ss:$36 sps:$4 sm:$0xff]  }
 0x420   :  { %v18325_v20 = vld [vmem:[#allocation5 + $0x1f94] ss:$36 sps:$4 sm:$0xff]  }
 0x421   :  { %12573 = vmatpush1.bf16.msra.mxu0 %v18296_v4  ;;  %v18323_v16 = vld [vmem:[#allocation5 + $0x1f90] ss:$36 sps:$4 sm:$0xff]  }
 0x422   :  { %12616 = vmatpush1.bf16.msra.mxu1 %v18299_v54  ;;  %12574 = vmatprep.subr.bf16.mxu0 %v18304_v52  ;;  %v18331_v4 = vld [vmem:[#allocation5 + $0x23cc] ss:$36 sps:$4 sm:$0xff]  }
 0x423   :  { %12617 = vmatprep.subr.bf16.mxu1 %v18307_v3  ;;  %v18326_v54 = vld [vmem:[#allocation5 + $0x1f48] ss:$36 sps:$4 sm:$0xff]   ;;  %v18392_v19 = vld [vmem:[#allocation5 + $0x2530] ss:$36 sps:$4 sm:$0xff]  }
 0x424   :  { %v18329_v52 = vld [vmem:[#allocation5 + $0x23c8] ss:$36 sps:$4 sm:$0xff]  }
 0x425   :  { %12575 = vmatpush1.bf16.msra.mxu0 %v18302_v10  ;;  %v18334_v3 = vld [vmem:[#allocation5 + $0x1f04] ss:$36 sps:$4 sm:$0xff]  }
 0x426   :  { %12618 = vmatpush1.bf16.msra.mxu1 %v18305_v8  ;;  %12576 = vmatprep.subr.bf16.mxu0 %v18310_v63  ;;  %v18337_v10 = vld [vmem:[#allocation5 + $0x2384] ss:$36 sps:$4 sm:$0xff]  }
 0x427   :  { %12619 = vmatprep.subr.bf16.mxu1 %v18313_v21  ;;  %v18332_v8 = vld [vmem:[#allocation5 + $0x1f00] ss:$36 sps:$4 sm:$0xff]  }
 0x428   :  { %v18335_v63 = vld [vmem:[#allocation5 + $0x2380] ss:$36 sps:$4 sm:$0xff]  }
 0x429   :  { %12577 = vmatpush1.bf16.msra.mxu0 %v18308_v14  ;;  %v18340_v21 = vld [vmem:[#allocation5 + $0x1ebc] ss:$36 sps:$4 sm:$0xff]  }
 0x42a   :  { %12620 = vmatpush1.bf16.msra.mxu1 %v18311_v45  ;;  %12578 = vmatprep.subr.bf16.mxu0 %v18316_v5  ;;  %v18343_v14 = vld [vmem:[#allocation5 + $0x233c] ss:$36 sps:$4 sm:$0xff]  }
 0x42b   :  { %12621 = vmatprep.subr.bf16.mxu1 %v18319_v25  ;;  %v18338_v45 = vld [vmem:[#allocation5 + $0x1eb8] ss:$36 sps:$4 sm:$0xff]  }
 0x42c   :  { %v18341_v5 = vld [vmem:[#allocation5 + $0x2338] ss:$36 sps:$4 sm:$0xff]  }
 0x42d   :  { %12579 = vmatpush1.bf16.msra.mxu0 %v18314_v22  ;;  %v18346_v25 = vld [vmem:[#allocation5 + $0x1e74] ss:$36 sps:$4 sm:$0xff]  }
 0x42e   :  { %12622 = vmatpush1.bf16.msra.mxu1 %v18317_v18  ;;  %12580 = vmatprep.subr.bf16.mxu0 %v18322_v13  ;;  %v18349_v22 = vld [vmem:[#allocation5 + $0x22f4] ss:$36 sps:$4 sm:$0xff]  }
 0x42f   :  { %12623 = vmatprep.subr.bf16.mxu1 %v18325_v20  ;;  %v18344_v18 = vld [vmem:[#allocation5 + $0x1e70] ss:$36 sps:$4 sm:$0xff]  }
 0x430   :  { %v18347_v13 = vld [vmem:[#allocation5 + $0x22f0] ss:$36 sps:$4 sm:$0xff]  }
 0x431   :  { %12581 = vmatpush1.bf16.msra.mxu0 %v18320_v26  ;;  %v18352_v20 = vld [vmem:[#allocation5 + $0x1e2c] ss:$36 sps:$4 sm:$0xff]  }
 0x432   :  { %12624 = vmatpush1.bf16.msra.mxu1 %v18323_v16  ;;  %12582 = vmatprep.subr.bf16.mxu0 %v18328_v43  ;;  %v18355_v26 = vld [vmem:[#allocation5 + $0x22ac] ss:$36 sps:$4 sm:$0xff]  }
 0x433   :  { %12625 = vmatprep.subr.bf16.mxu1 %v18331_v4  ;;  %v18350_v16 = vld [vmem:[#allocation5 + $0x1e28] ss:$36 sps:$4 sm:$0xff]  }
 0x434   :  { %v18353_v43 = vld [vmem:[#allocation5 + $0x22a8] ss:$36 sps:$4 sm:$0xff]  }
 0x435   :  { %12583 = vmatpush2.bf16.msra.mxu0 %v18326_v54  ;;  %v18358_v4 = vld [vmem:[#allocation5 + $0x1de4] ss:$36 sps:$4 sm:$0xff]  }
 0x436   :  { %12626 = vmatpush2.bf16.msra.mxu1 %v18329_v52  ;;  %12584 = vmatprep.subr.bf16.mxu0 %v18334_v3  ;;  %v18361_v54 = vld [vmem:[#allocation5 + $0x2264] ss:$36 sps:$4 sm:$0xff]  }
 0x437   :  { %12627 = vmatprep.subr.bf16.mxu1 %v18337_v10  ;;  %v18356_v52 = vld [vmem:[#allocation5 + $0x1de0] ss:$36 sps:$4 sm:$0xff]  }
 0x438   :  { %v18359_v3 = vld [vmem:[#allocation5 + $0x2260] ss:$36 sps:$4 sm:$0xff]  }
 0x439   :  { %12585 = vmatpush2.bf16.msra.mxu0 %v18332_v8  ;;  %v18364_v10 = vld [vmem:[#allocation5 + $0x1d9c] ss:$36 sps:$4 sm:$0xff]  }
 0x43a   :  { %12628 = vmatpush2.bf16.msra.mxu1 %v18335_v63  ;;  %12586 = vmatprep.subr.bf16.mxu0 %v18340_v21  ;;  %v18367_v8 = vld [vmem:[#allocation5 + $0x221c] ss:$36 sps:$4 sm:$0xff]  }
 0x43b   :  { %12629 = vmatprep.subr.bf16.mxu1 %v18343_v14  ;;  %v18362_v63 = vld [vmem:[#allocation5 + $0x1d98] ss:$36 sps:$4 sm:$0xff]  }
 0x43c   :  { %v18365_v21 = vld [vmem:[#allocation5 + $0x2218] ss:$36 sps:$4 sm:$0xff]  }
 0x43d   :  { %12587 = vmatpush2.bf16.msra.mxu0 %v18338_v45  ;;  %v18370_v14 = vld [vmem:[#allocation5 + $0x1d54] ss:$36 sps:$4 sm:$0xff]  }
 0x43e   :  { %12630 = vmatpush2.bf16.msra.mxu1 %v18341_v5  ;;  %12588 = vmatprep.subr.bf16.mxu0 %v18346_v25  ;;  %v18373_v45 = vld [vmem:[#allocation5 + $0x21d4] ss:$36 sps:$4 sm:$0xff]  }
 0x43f   :  { %12631 = vmatprep.subr.bf16.mxu1 %v18349_v22  ;;  %v18368_v5 = vld [vmem:[#allocation5 + $0x1d50] ss:$36 sps:$4 sm:$0xff]   ;;  %v2143_v22 = vsub.s32 4, %v19606_v7 }
 0x440   :  { %v18371_v25 = vld [vmem:[#allocation5 + $0x21d0] ss:$36 sps:$4 sm:$0xff]  }
 0x441   :  { %12589 = vmatpush2.bf16.msra.mxu0 %v18344_v18  ;;  %v18376_v18 = vld [vmem:[#allocation5 + $0x260c] ss:$36 sps:$4 sm:$0xff]  }
 0x442   :  { %12632 = vmatpush2.bf16.msra.mxu1 %v18347_v13  ;;  %12590 = vmatprep.subr.bf16.mxu0 %v18352_v20  ;;  %v18379_v13 = vld [vmem:[#allocation5 + $0x2a8c] ss:$36 sps:$4 sm:$0xff]   ;;  %v2147_v20 = vsub.s32 5, %v19606_v7 }
 0x443   :  { %12633 = vmatprep.subr.bf16.mxu1 %v18355_v26  ;;  %v18374_v26 = vld [vmem:[#allocation5 + $0x2608] ss:$36 sps:$4 sm:$0xff]  }
 0x445   :  { %12591 = vmatpush2.bf16.msra.mxu0 %v18350_v16  ;;  %v18377_v16 = vld [vmem:[#allocation5 + $0x2a88] ss:$36 sps:$4 sm:$0xff]  }
 0x446   :  { %12634 = vmatpush2.bf16.msra.mxu1 %v18353_v43  ;;  %12592 = vmatprep.subr.bf16.mxu0 %v18358_v4  ;;  %v19371_v43 = vld [vmem:[#allocation7] sm:$0xff] }
 0x447   :  { %12635 = vmatprep.subr.bf16.mxu1 %v18361_v54  ;;  %v2144_v4 = vrot.slane %v19371_v43, %v2143_v22  ;;  %v18382_v54 = vld [vmem:[#allocation5 + $0x25c4] ss:$36 sps:$4 sm:$0xff]  }
 0x449   :  { %12593 = vmatpush2.bf16.msra.mxu0 %v18356_v52  ;;  %v18385_v52 = vld [vmem:[#allocation5 + $0x2a44] ss:$36 sps:$4 sm:$0xff]  }
 0x44a   :  { %12636 = vmatpush2.bf16.msra.mxu1 %v18359_v3  ;;  %12594 = vmatprep.subr.bf16.mxu0 %v18364_v10  ;;  %v18380_v3 = vld [vmem:[#allocation5 + $0x25c0] ss:$36 sps:$4 sm:$0xff]  }
 0x44b   :  { %12637 = vmatprep.subr.bf16.mxu1 %v18367_v8  ;;  %v18383_v10 = vld [vmem:[#allocation5 + $0x2a40] ss:$36 sps:$4 sm:$0xff]  }
 0x44d   :  { %12595 = vmatpush2.bf16.msra.mxu0 %v18362_v63 }
 0x44e   :  { %12638 = vmatpush2.bf16.msra.mxu1 %v18365_v21  ;;  %12596 = vmatprep.subr.bf16.mxu0 %v18370_v14 }
 0x44f   :  { %12639 = vmatprep.subr.bf16.mxu1 %v18373_v45 }
 0x451   :  { %12597 = vmatpush2.bf16.msra.mxu0 %v18368_v5  ;;  %v18388_v5 = vld [vmem:[#allocation5 + $0x257c] ss:$36 sps:$4 sm:$0xff]  }
 0x452   :  { %12640 = vmatpush2.bf16.msra.mxu1 %v18371_v25  ;;  %12652 = vmatprep.subr.bf16.mxu0 %v18376_v18  ;;  %v18391_v25 = vld [vmem:[#allocation5 + $0x29fc] ss:$36 sps:$4 sm:$0xff]  }
 0x453   :  { %12695 = vmatprep.subr.bf16.mxu1 %v18379_v13  ;;  %v18386_v18 = vld [vmem:[#allocation5 + $0x2578] ss:$36 sps:$4 sm:$0xff]  }
 0x454   :  { %v12342_v8 = vpop.f32.mrf.mxu0  ;;  %12599 = vmatmul.mubr.bf16.vlgmr.msra.gmra.mxu0 %v19610_v27  ;;  %v18389_v13 = vld [vmem:[#allocation5 + $0x29f8] ss:$36 sps:$4 sm:$0xff]  }
 0x455   :  { %12642 = vmatmul.mubr.bf16.vlgmr.msra.gmra.mxu1 %v19612_v29  ;;  %v12385_v63 = vpop.f32.mrf.mxu1  ;;  %v12343_v21 = vadd.f32 %v12342_v8, %v2144_v4  ;;  %12653 = vmatpush1.bf16.msra.mxu0 %v18374_v26  ;;  %v19860_v26 = vrot.slane %v19371_v43, %v2147_v20  ;;  %v18395_v20 = vld [vmem:[#allocation5 + $0x29b0] ss:$36 sps:$4 sm:$0xff]  }
 0x456   :  { %12696 = vmatpush1.bf16.msra.mxu1 %v18377_v16  ;;  %v19852_v14 = vpop.f32.mrf.mxu0  ;;  %12654 = vmatprep.subr.bf16.mxu0 %v18382_v54  ;;  %v18403_v43 = vld [vmem:[#allocation5 + $0x296c] ss:$36 sps:$4 sm:$0xff]  }
 0x457   :  { %v19854_v45 = vpop.f32.mrf.mxu1  ;;  %12697 = vmatprep.subr.bf16.mxu1 %v18385_v52  ;;  %v19856_v22 = vadd.f32 %v12385_v63, %v12343_v21  ;;  %12684 = vmatprep.mubr.bf16.mxu0 %v19616_v37  ;;  %v18394_v52 = vld [vmem:[#allocation5 + $0x2534] ss:$36 sps:$4 sm:$0xff]  }
 0x458   :  { %12727 = vmatprep.mubr.bf16.mxu1 %v19618_v38  ;;  %v12346_v30 = vpop.f32.mrf.mxu0  ;;  %v18397_v63 = vld [vmem:[#allocation5 + $0x29b4] ss:$36 sps:$4 sm:$0xff]  }
 0x459   :  { %v12389_v8 = vpop.f32.mrf.mxu1  ;;  %v12347_v16 = vadd.f32 %v12346_v30, %v2144_v4  ;;  %12655 = vmatpush1.bf16.msra.mxu0 %v18380_v3  ;;  %v18400_v30 = vld [vmem:[#allocation5 + $0x24ec] ss:$36 sps:$4 sm:$0xff]  }
 0x45a   :  { %12698 = vmatpush1.bf16.msra.mxu1 %v18383_v10  ;;  %v12348_v62 = vpop.f32.mrf.mxu0  ;;  %12656 = vmatprep.subr.bf16.mxu0 %v18388_v5  ;;  %v18398_v4 = vld [vmem:[#allocation5 + $0x24e8] ss:$36 sps:$4 sm:$0xff]   ;;  %v18404_v5 = vld [vmem:[#allocation5 + $0x24a0] ss:$36 sps:$4 sm:$0xff]  }
 0x45b   :  { %v12391_v54 = vpop.f32.mrf.mxu1  ;;  %12699 = vmatprep.subr.bf16.mxu1 %v18391_v25  ;;  %v12349_v21 = vadd.f32 %v12348_v62, %v19860_v26  ;;  %v19863_v6 = vadd.f32 %v12389_v8, %v12347_v16  ;;  %v18401_v3 = vld [vmem:[#allocation5 + $0x2968] ss:$36 sps:$4 sm:$0xff]   ;;  %v18407_v25 = vld [vmem:[#allocation5 + $0x2920] ss:$36 sps:$4 sm:$0xff]   ;;  %v18410_v8 = vld [vmem:[#allocation5 + $0x2458] ss:$36 sps:$4 sm:$0xff]  }
 0x45c   :  { %v18406_v10 = vld [vmem:[#allocation5 + $0x24a4] ss:$36 sps:$4 sm:$0xff]   ;;  %v18413_v16 = vld [vmem:[#allocation5 + $0x28d8] ss:$36 sps:$4 sm:$0xff]  }
 0x45d   :  { %v19865_v7 = vadd.f32 %v12391_v54, %v12349_v21  ;;  %12657 = vmatpush1.bf16.msra.mxu0 %v18386_v18  ;;  %v18409_v62 = vld [vmem:[#allocation5 + $0x2924] ss:$36 sps:$4 sm:$0xff]   ;;  %v18412_v18 = vld [vmem:[#allocation5 + $0x245c] ss:$36 sps:$4 sm:$0xff]   ;;  %v18421_v54 = vld [vmem:[#allocation5 + $0x2894] ss:$36 sps:$4 sm:$0xff]  }
 0x45e   :  { %12700 = vmatpush1.bf16.msra.mxu1 %v18389_v13  ;;  %12658 = vmatprep.subr.bf16.mxu0 %v18394_v52  ;;  %v18415_v13 = vld [vmem:[#allocation5 + $0x28dc] ss:$36 sps:$4 sm:$0xff]   ;;  %v18416_v52 = vld [vmem:[#allocation5 + $0x2410] ss:$36 sps:$4 sm:$0xff]  }
 0x45f   :  { %12701 = vmatprep.subr.bf16.mxu1 %v18397_v63  ;;  %v18419_v63 = vld [vmem:[#allocation5 + $0x2890] ss:$36 sps:$4 sm:$0xff]  }
 0x460   :  { %v18424_v21 = vld [vmem:[#allocation5 + $0x284c] ss:$36 sps:$4 sm:$0xff]  }
 0x461   :  { %12659 = vmatpush1.bf16.msra.mxu0 %v18392_v19  ;;  %v18418_v19 = vld [vmem:[#allocation5 + $0x2414] ss:$36 sps:$4 sm:$0xff]  }
 0x462   :  { %12702 = vmatpush1.bf16.msra.mxu1 %v18395_v20  ;;  %12660 = vmatprep.subr.bf16.mxu0 %v18400_v30  ;;  %v18427_v20 = vld [vmem:[#allocation5 + $0x2ccc] ss:$36 sps:$4 sm:$0xff]  }
 0x463   :  { %12703 = vmatprep.subr.bf16.mxu1 %v18403_v43  ;;  %v18422_v30 = vld [vmem:[#allocation5 + $0x2848] ss:$36 sps:$4 sm:$0xff]  }
 0x464   :  { %v18425_v43 = vld [vmem:[#allocation5 + $0x2cc8] ss:$36 sps:$4 sm:$0xff]  }
 0x465   :  { %12661 = vmatpush1.bf16.msra.mxu0 %v18398_v4  ;;  %v18430_v4 = vld [vmem:[#allocation5 + $0x2804] ss:$36 sps:$4 sm:$0xff]  }
 0x466   :  { %12704 = vmatpush1.bf16.msra.mxu1 %v18401_v3  ;;  %12662 = vmatprep.subr.bf16.mxu0 %v18406_v10  ;;  %v18433_v3 = vld [vmem:[#allocation5 + $0x2c84] ss:$36 sps:$4 sm:$0xff]  }
 0x467   :  { %12705 = vmatprep.subr.bf16.mxu1 %v18409_v62  ;;  %v18428_v10 = vld [vmem:[#allocation5 + $0x2800] ss:$36 sps:$4 sm:$0xff]  }
 0x468   :  { %v18431_v62 = vld [vmem:[#allocation5 + $0x2c80] ss:$36 sps:$4 sm:$0xff]  }
 0x469   :  { %12663 = vmatpush1.bf16.msra.mxu0 %v18404_v5  ;;  %v18436_v5 = vld [vmem:[#allocation5 + $0x27bc] ss:$36 sps:$4 sm:$0xff]  }
 0x46a   :  { %12706 = vmatpush1.bf16.msra.mxu1 %v18407_v25  ;;  %12664 = vmatprep.subr.bf16.mxu0 %v18412_v18  ;;  %v18439_v25 = vld [vmem:[#allocation5 + $0x2c3c] ss:$36 sps:$4 sm:$0xff]  }
 0x46b   :  { %12707 = vmatprep.subr.bf16.mxu1 %v18415_v13  ;;  %v18434_v18 = vld [vmem:[#allocation5 + $0x27b8] ss:$36 sps:$4 sm:$0xff]  }
 0x46c   :  { %v18437_v13 = vld [vmem:[#allocation5 + $0x2c38] ss:$36 sps:$4 sm:$0xff]  }
 0x46d   :  { %12665 = vmatpush1.bf16.msra.mxu0 %v18410_v8  ;;  %v18442_v8 = vld [vmem:[#allocation5 + $0x2774] ss:$36 sps:$4 sm:$0xff]  }
 0x46e   :  { %12708 = vmatpush1.bf16.msra.mxu1 %v18413_v16  ;;  %12666 = vmatprep.subr.bf16.mxu0 %v18418_v19  ;;  %v18445_v16 = vld [vmem:[#allocation5 + $0x2bf4] ss:$36 sps:$4 sm:$0xff]  }
 0x46f   :  { %12709 = vmatprep.subr.bf16.mxu1 %v18421_v54  ;;  %v18440_v19 = vld [vmem:[#allocation5 + $0x2770] ss:$36 sps:$4 sm:$0xff]  }
 0x470   :  { %v18443_v54 = vld [vmem:[#allocation5 + $0x2bf0] ss:$36 sps:$4 sm:$0xff]  }
 0x471   :  { %12667 = vmatpush1.bf16.msra.mxu0 %v18416_v52  ;;  %v18448_v52 = vld [vmem:[#allocation5 + $0x272c] ss:$36 sps:$4 sm:$0xff]  }
 0x472   :  { %12710 = vmatpush1.bf16.msra.mxu1 %v18419_v63  ;;  %12668 = vmatprep.subr.bf16.mxu0 %v18424_v21  ;;  %v18451_v63 = vld [vmem:[#allocation5 + $0x2bac] ss:$36 sps:$4 sm:$0xff]  }
 0x473   :  { %12711 = vmatprep.subr.bf16.mxu1 %v18427_v20  ;;  %v18446_v21 = vld [vmem:[#allocation5 + $0x2728] ss:$36 sps:$4 sm:$0xff]  }
 0x474   :  { %v18449_v20 = vld [vmem:[#allocation5 + $0x2ba8] ss:$36 sps:$4 sm:$0xff]  }
 0x475   :  { %12669 = vmatpush2.bf16.msra.mxu0 %v18422_v30  ;;  %v18454_v30 = vld [vmem:[#allocation5 + $0x26e4] ss:$36 sps:$4 sm:$0xff]  }
 0x476   :  { %12712 = vmatpush2.bf16.msra.mxu1 %v18425_v43  ;;  %12670 = vmatprep.subr.bf16.mxu0 %v18430_v4  ;;  %v18457_v43 = vld [vmem:[#allocation5 + $0x2b64] ss:$36 sps:$4 sm:$0xff]  }
 0x477   :  { %12713 = vmatprep.subr.bf16.mxu1 %v18433_v3  ;;  %v18452_v4 = vld [vmem:[#allocation5 + $0x26e0] ss:$36 sps:$4 sm:$0xff]  }
 0x478   :  { %v18455_v3 = vld [vmem:[#allocation5 + $0x2b60] ss:$36 sps:$4 sm:$0xff]  }
 0x479   :  { %12671 = vmatpush2.bf16.msra.mxu0 %v18428_v10  ;;  %v18460_v10 = vld [vmem:[#allocation5 + $0x269c] ss:$36 sps:$4 sm:$0xff]  }
 0x47a   :  { %12714 = vmatpush2.bf16.msra.mxu1 %v18431_v62  ;;  %12672 = vmatprep.subr.bf16.mxu0 %v18436_v5  ;;  %v18463_v62 = vld [vmem:[#allocation5 + $0x2b1c] ss:$36 sps:$4 sm:$0xff]  }
 0x47b   :  { %12715 = vmatprep.subr.bf16.mxu1 %v18439_v25  ;;  %v18458_v5 = vld [vmem:[#allocation5 + $0x2698] ss:$36 sps:$4 sm:$0xff]  }
 0x47c   :  { %v18461_v25 = vld [vmem:[#allocation5 + $0x2b18] ss:$36 sps:$4 sm:$0xff]  }
 0x47d   :  { %12673 = vmatpush2.bf16.msra.mxu0 %v18434_v18  ;;  %v18466_v18 = vld [vmem:[#allocation5 + $0x2654] ss:$36 sps:$4 sm:$0xff]  }
 0x47e   :  { %12716 = vmatpush2.bf16.msra.mxu1 %v18437_v13  ;;  %12674 = vmatprep.subr.bf16.mxu0 %v18442_v8  ;;  %v18469_v13 = vld [vmem:[#allocation5 + $0x2ad4] ss:$36 sps:$4 sm:$0xff]  }
 0x47f   :  { %12717 = vmatprep.subr.bf16.mxu1 %v18445_v16  ;;  %v18464_v8 = vld [vmem:[#allocation5 + $0x2650] ss:$36 sps:$4 sm:$0xff]  }
 0x480   :  { %v18467_v16 = vld [vmem:[#allocation5 + $0x2ad0] ss:$36 sps:$4 sm:$0xff]  }
 0x481   :  { %12675 = vmatpush2.bf16.msra.mxu0 %v18440_v19  ;;  %v18472_v19 = vld [vmem:[#allocation5 + $0x2f0c] ss:$36 sps:$4 sm:$0xff]  }
 0x482   :  { %12718 = vmatpush2.bf16.msra.mxu1 %v18443_v54  ;;  %12676 = vmatprep.subr.bf16.mxu0 %v18448_v52  ;;  %v18475_v54 = vld [vmem:[#allocation5 + $0x338c] ss:$36 sps:$4 sm:$0xff]  }
 0x483   :  { %12719 = vmatprep.subr.bf16.mxu1 %v18451_v63  ;;  %v18470_v52 = vld [vmem:[#allocation5 + $0x2f08] ss:$36 sps:$4 sm:$0xff]  }
 0x484   :  { %v18473_v63 = vld [vmem:[#allocation5 + $0x3388] ss:$36 sps:$4 sm:$0xff]  }
 0x485   :  { %12677 = vmatpush2.bf16.msra.mxu0 %v18446_v21  ;;  %v18478_v21 = vld [vmem:[#allocation5 + $0x2ec4] ss:$36 sps:$4 sm:$0xff]  }
 0x486   :  { %12720 = vmatpush2.bf16.msra.mxu1 %v18449_v20  ;;  %12678 = vmatprep.subr.bf16.mxu0 %v18454_v30  ;;  %v18481_v20 = vld [vmem:[#allocation5 + $0x3344] ss:$36 sps:$4 sm:$0xff]  }
 0x487   :  { %12721 = vmatprep.subr.bf16.mxu1 %v18457_v43 }
 0x489   :  { %12679 = vmatpush2.bf16.msra.mxu0 %v18452_v4 }
 0x48a   :  { %12722 = vmatpush2.bf16.msra.mxu1 %v18455_v3  ;;  %12680 = vmatprep.subr.bf16.mxu0 %v18460_v10  ;;  %v18476_v3 = vld [vmem:[#allocation5 + $0x2ec0] ss:$36 sps:$4 sm:$0xff]  }
 0x48b   :  { %12723 = vmatprep.subr.bf16.mxu1 %v18463_v62  ;;  %v18479_v10 = vld [vmem:[#allocation5 + $0x3340] ss:$36 sps:$4 sm:$0xff]  }
 0x48d   :  { %12681 = vmatpush2.bf16.msra.mxu0 %v18458_v5 }
 0x48e   :  { %12724 = vmatpush2.bf16.msra.mxu1 %v18461_v25  ;;  %12682 = vmatprep.subr.bf16.mxu0 %v18466_v18  ;;  %v18484_v25 = vld [vmem:[#allocation5 + $0x2e7c] ss:$36 sps:$4 sm:$0xff]  }
 0x48f   :  { %12725 = vmatprep.subr.bf16.mxu1 %v18469_v13  ;;  %v18487_v18 = vld [vmem:[#allocation5 + $0x32fc] ss:$36 sps:$4 sm:$0xff]  }
 0x491   :  { %12683 = vmatpush2.bf16.msra.mxu0 %v18464_v8 }
 0x492   :  { %12726 = vmatpush2.bf16.msra.mxu1 %v18467_v16  ;;  %12738 = vmatprep.subr.bf16.mxu0 %v18472_v19  ;;  %v18482_v19 = vld [vmem:[#allocation5 + $0x2e78] ss:$36 sps:$4 sm:$0xff]  }
 0x493   :  { %12781 = vmatprep.subr.bf16.mxu1 %v18475_v54  ;;  %v18485_v54 = vld [vmem:[#allocation5 + $0x32f8] ss:$36 sps:$4 sm:$0xff]  }
 0x494   :  { %v12428_v30 = vpop.f32.mrf.mxu0  ;;  %12685 = vmatmul.mubr.bf16.vlgmr.msra.gmra.mxu0 %v19631_v33 }
 0x495   :  { %12728 = vmatmul.mubr.bf16.vlgmr.msra.gmra.mxu1 %v19633_v34  ;;  %v12471_v43 = vpop.f32.mrf.mxu1  ;;  %v12429_v4 = vadd.f32 %v12428_v30, %v19856_v22  ;;  %12739 = vmatpush1.bf16.msra.mxu0 %v18470_v52 }
 0x496   :  { %12782 = vmatpush1.bf16.msra.mxu1 %v18473_v63  ;;  %v19870_v62 = vpop.f32.mrf.mxu0  ;;  %12740 = vmatprep.subr.bf16.mxu0 %v18478_v21  ;;  %v18490_v21 = vld [vmem:[#allocation5 + $0x2e34] ss:$36 sps:$4 sm:$0xff]  }
 0x497   :  { %v19872_v5 = vpop.f32.mrf.mxu1  ;;  %12783 = vmatprep.subr.bf16.mxu1 %v18481_v20  ;;  %v19874_v13 = vadd.f32 %v12471_v43, %v12429_v4  ;;  %12770 = vmatprep.mubr.bf16.mxu0 %v19639_v48  ;;  %v18493_v20 = vld [vmem:[#allocation5 + $0x32b4] ss:$36 sps:$4 sm:$0xff]  }
 0x498   :  { %12813 = vmatprep.mubr.bf16.mxu1 %v19641_v49  ;;  %v12432_v8 = vpop.f32.mrf.mxu0 }
 0x499   :  { %v12475_v22 = vpop.f32.mrf.mxu1  ;;  %v12433_v16 = vadd.f32 %v12432_v8, %v19863_v6  ;;  %12741 = vmatpush1.bf16.msra.mxu0 %v18476_v3  ;;  %v18491_v6 = vld [vmem:[#allocation5 + $0x32b0] ss:$36 sps:$4 sm:$0xff]   ;;  %v18502_v8 = vld [vmem:[#allocation5 + $0x2da4] ss:$36 sps:$4 sm:$0xff]  }
 0x49a   :  { %12784 = vmatpush1.bf16.msra.mxu1 %v18479_v10  ;;  %v12434_v52 = vpop.f32.mrf.mxu0  ;;  %12742 = vmatprep.subr.bf16.mxu0 %v18484_v25  ;;  %v18496_v3 = vld [vmem:[#allocation5 + $0x2dec] ss:$36 sps:$4 sm:$0xff]  }
 0x49b   :  { %v12477_v63 = vpop.f32.mrf.mxu1  ;;  %12785 = vmatprep.subr.bf16.mxu1 %v18487_v18  ;;  %v12435_v30 = vadd.f32 %v12434_v52, %v19865_v7  ;;  %v19880_v43 = vadd.f32 %v12475_v22, %v12433_v16  ;;  %v18499_v10 = vld [vmem:[#allocation5 + $0x326c] ss:$36 sps:$4 sm:$0xff]   ;;  %v18505_v7 = vld [vmem:[#allocation5 + $0x3224] ss:$36 sps:$4 sm:$0xff]   ;;  %v18506_v52 = vld [vmem:[#allocation5 + $0x2d58] ss:$36 sps:$4 sm:$0xff]  }
 0x49c   :  { %v18494_v25 = vld [vmem:[#allocation5 + $0x2de8] ss:$36 sps:$4 sm:$0xff]   ;;  %v18500_v22 = vld [vmem:[#allocation5 + $0x2da0] ss:$36 sps:$4 sm:$0xff]  }
 0x49d   :  { %v19882_v4 = vadd.f32 %v12477_v63, %v12435_v30  ;;  %12743 = vmatpush1.bf16.msra.mxu0 %v18482_v19  ;;  %v18497_v18 = vld [vmem:[#allocation5 + $0x3268] ss:$36 sps:$4 sm:$0xff]   ;;  %v18503_v16 = vld [vmem:[#allocation5 + $0x3220] ss:$36 sps:$4 sm:$0xff]   ;;  %v18509_v63 = vld [vmem:[#allocation5 + $0x31d8] ss:$36 sps:$4 sm:$0xff]  }
 0x49e   :  { %12786 = vmatpush1.bf16.msra.mxu1 %v18485_v54  ;;  %12744 = vmatprep.subr.bf16.mxu0 %v18490_v21  ;;  %v18508_v19 = vld [vmem:[#allocation5 + $0x2d5c] ss:$36 sps:$4 sm:$0xff]   ;;  %v18517_v21 = vld [vmem:[#allocation5 + $0x3194] ss:$36 sps:$4 sm:$0xff]  }
 0x49f   :  { %12787 = vmatprep.subr.bf16.mxu1 %v18493_v20  ;;  %v18511_v54 = vld [vmem:[#allocation5 + $0x31dc] ss:$36 sps:$4 sm:$0xff]   ;;  %v18512_v20 = vld [vmem:[#allocation5 + $0x2d10] ss:$36 sps:$4 sm:$0xff]  }
 0x4a0   :  { %v18515_v30 = vld [vmem:[#allocation5 + $0x3190] ss:$36 sps:$4 sm:$0xff]  }
 0x4a1   :  { %12745 = vmatpush1.bf16.msra.mxu0 %v18488_v17  ;;  %v18514_v17 = vld [vmem:[#allocation5 + $0x2d14] ss:$36 sps:$4 sm:$0xff]  }
 0x4a2   :  { %12788 = vmatpush1.bf16.msra.mxu1 %v18491_v6  ;;  %12746 = vmatprep.subr.bf16.mxu0 %v18496_v3  ;;  %v18520_v6 = vld [vmem:[#allocation5 + $0x314c] ss:$36 sps:$4 sm:$0xff]  }
 0x4a3   :  { %12789 = vmatprep.subr.bf16.mxu1 %v18499_v10  ;;  %v18523_v3 = vld [vmem:[#allocation5 + $0x35cc] ss:$36 sps:$4 sm:$0xff]  }
 0x4a4   :  { %v18518_v10 = vld [vmem:[#allocation5 + $0x3148] ss:$36 sps:$4 sm:$0xff]  }
 0x4a5   :  { %12747 = vmatpush1.bf16.msra.mxu0 %v18494_v25  ;;  %v18521_v25 = vld [vmem:[#allocation5 + $0x35c8] ss:$36 sps:$4 sm:$0xff]  }
 0x4a6   :  { %12790 = vmatpush1.bf16.msra.mxu1 %v18497_v18  ;;  %12748 = vmatprep.subr.bf16.mxu0 %v18502_v8  ;;  %v18526_v18 = vld [vmem:[#allocation5 + $0x3104] ss:$36 sps:$4 sm:$0xff]  }
 0x4a7   :  { %12791 = vmatprep.subr.bf16.mxu1 %v18505_v7  ;;  %v18529_v8 = vld [vmem:[#allocation5 + $0x3584] ss:$36 sps:$4 sm:$0xff]  }
 0x4a8   :  { %v18524_v7 = vld [vmem:[#allocation5 + $0x3100] ss:$36 sps:$4 sm:$0xff]  }
 0x4a9   :  { %12749 = vmatpush1.bf16.msra.mxu0 %v18500_v22  ;;  %v18527_v22 = vld [vmem:[#allocation5 + $0x3580] ss:$36 sps:$4 sm:$0xff]  }
 0x4aa   :  { %12792 = vmatpush1.bf16.msra.mxu1 %v18503_v16  ;;  %12750 = vmatprep.subr.bf16.mxu0 %v18508_v19  ;;  %v18532_v16 = vld [vmem:[#allocation5 + $0x30bc] ss:$36 sps:$4 sm:$0xff]  }
 0x4ab   :  { %12793 = vmatprep.subr.bf16.mxu1 %v18511_v54  ;;  %v18535_v19 = vld [vmem:[#allocation5 + $0x353c] ss:$36 sps:$4 sm:$0xff]  }
 0x4ac   :  { %v18530_v54 = vld [vmem:[#allocation5 + $0x30b8] ss:$36 sps:$4 sm:$0xff]  }
 0x4ad   :  { %12751 = vmatpush1.bf16.msra.mxu0 %v18506_v52  ;;  %v18533_v52 = vld [vmem:[#allocation5 + $0x3538] ss:$36 sps:$4 sm:$0xff]  }
 0x4ae   :  { %12794 = vmatpush1.bf16.msra.mxu1 %v18509_v63  ;;  %12752 = vmatprep.subr.bf16.mxu0 %v18514_v17  ;;  %v18538_v63 = vld [vmem:[#allocation5 + $0x3074] ss:$36 sps:$4 sm:$0xff]  }
 0x4af   :  { %12795 = vmatprep.subr.bf16.mxu1 %v18517_v21  ;;  %v18541_v17 = vld [vmem:[#allocation5 + $0x34f4] ss:$36 sps:$4 sm:$0xff]  }
 0x4b0   :  { %v18536_v21 = vld [vmem:[#allocation5 + $0x3070] ss:$36 sps:$4 sm:$0xff]  }
 0x4b1   :  { %12753 = vmatpush1.bf16.msra.mxu0 %v18512_v20  ;;  %v18539_v20 = vld [vmem:[#allocation5 + $0x34f0] ss:$36 sps:$4 sm:$0xff]  }
 0x4b2   :  { %12796 = vmatpush1.bf16.msra.mxu1 %v18515_v30  ;;  %12754 = vmatprep.subr.bf16.mxu0 %v18520_v6  ;;  %v18544_v30 = vld [vmem:[#allocation5 + $0x302c] ss:$36 sps:$4 sm:$0xff]  }
 0x4b3   :  { %12797 = vmatprep.subr.bf16.mxu1 %v18523_v3  ;;  %v18547_v6 = vld [vmem:[#allocation5 + $0x34ac] ss:$36 sps:$4 sm:$0xff]  }
 0x4b4   :  { %v18542_v3 = vld [vmem:[#allocation5 + $0x3028] ss:$36 sps:$4 sm:$0xff]  }
 0x4b5   :  { %12755 = vmatpush2.bf16.msra.mxu0 %v18518_v10  ;;  %v18545_v10 = vld [vmem:[#allocation5 + $0x34a8] ss:$36 sps:$4 sm:$0xff]  }
 0x4b6   :  { %12798 = vmatpush2.bf16.msra.mxu1 %v18521_v25  ;;  %12756 = vmatprep.subr.bf16.mxu0 %v18526_v18  ;;  %v18550_v25 = vld [vmem:[#allocation5 + $0x2fe4] ss:$36 sps:$4 sm:$0xff]  }
 0x4b7   :  { %12799 = vmatprep.subr.bf16.mxu1 %v18529_v8  ;;  %v18553_v18 = vld [vmem:[#allocation5 + $0x3464] ss:$36 sps:$4 sm:$0xff]  }
 0x4b8   :  { %v18548_v8 = vld [vmem:[#allocation5 + $0x2fe0] ss:$36 sps:$4 sm:$0xff]  }
 0x4b9   :  { %12757 = vmatpush2.bf16.msra.mxu0 %v18524_v7  ;;  %v18551_v7 = vld [vmem:[#allocation5 + $0x3460] ss:$36 sps:$4 sm:$0xff]  }
 0x4ba   :  { %12800 = vmatpush2.bf16.msra.mxu1 %v18527_v22  ;;  %12758 = vmatprep.subr.bf16.mxu0 %v18532_v16  ;;  %v18556_v22 = vld [vmem:[#allocation5 + $0x2f9c] ss:$36 sps:$4 sm:$0xff]  }
 0x4bb   :  { %12801 = vmatprep.subr.bf16.mxu1 %v18535_v19  ;;  %v18559_v16 = vld [vmem:[#allocation5 + $0x341c] ss:$36 sps:$4 sm:$0xff]  }
 0x4bc   :  { %v18554_v19 = vld [vmem:[#allocation5 + $0x2f98] ss:$36 sps:$4 sm:$0xff]  }
 0x4bd   :  { %12759 = vmatpush2.bf16.msra.mxu0 %v18530_v54  ;;  %v18557_v54 = vld [vmem:[#allocation5 + $0x3418] ss:$36 sps:$4 sm:$0xff]  }
 0x4be   :  { %12802 = vmatpush2.bf16.msra.mxu1 %v18533_v52  ;;  %12760 = vmatprep.subr.bf16.mxu0 %v18538_v63  ;;  %v18562_v52 = vld [vmem:[#allocation5 + $0x2f54] ss:$36 sps:$4 sm:$0xff]  }
 0x4bf   :  { %12803 = vmatprep.subr.bf16.mxu1 %v18541_v17  ;;  %v18565_v63 = vld [vmem:[#allocation5 + $0x33d4] ss:$36 sps:$4 sm:$0xff]  }
 0x4c0   :  { %v18560_v17 = vld [vmem:[#allocation5 + $0x2f50] ss:$36 sps:$4 sm:$0xff]  }
 0x4c1   :  { %12761 = vmatpush2.bf16.msra.mxu0 %v18536_v21  ;;  %v18563_v21 = vld [vmem:[#allocation5 + $0x33d0] ss:$36 sps:$4 sm:$0xff]  }
 0x4c2   :  { %12804 = vmatpush2.bf16.msra.mxu1 %v18539_v20  ;;  %12762 = vmatprep.subr.bf16.mxu0 %v18544_v30  ;;  %v18568_v20 = vld [vmem:[#allocation5 + $0x36ec] ss:$36 sps:$4 sm:$0xff]   ;;  %v18571_v30 = vld [vmem:[#allocation5 + $0x214] ss:$36 sps:$4 sm:$0xff]  }
 0x4c3   :  { %12805 = vmatprep.subr.bf16.mxu1 %v18547_v6  ;;  %v18566_v6 = vld [vmem:[#allocation5 + $0x36e8] ss:$36 sps:$4 sm:$0xff]  }
 0x4c5   :  { %12763 = vmatpush2.bf16.msra.mxu0 %v18542_v3  ;;  %v18569_v3 = vld [vmem:[#allocation5 + $0x210] ss:$36 sps:$4 sm:$0xff]  }
 0x4c6   :  { %12806 = vmatpush2.bf16.msra.mxu1 %v18545_v10  ;;  %12764 = vmatprep.subr.bf16.mxu0 %v18550_v25  ;;  %v18574_v10 = vld [vmem:[#allocation5 + $0x36a4] ss:$36 sps:$4 sm:$0xff]   ;;  %v18577_v25 = vld [vmem:[#allocation5 + $0x1cc] ss:$36 sps:$4 sm:$0xff]  }
 0x4c7   :  { %12807 = vmatprep.subr.bf16.mxu1 %v18553_v18 }
 0x4c9   :  { %12765 = vmatpush2.bf16.msra.mxu0 %v18548_v8 }
 0x4ca   :  { %12808 = vmatpush2.bf16.msra.mxu1 %v18551_v7  ;;  %12766 = vmatprep.subr.bf16.mxu0 %v18556_v22  ;;  %v18572_v22 = vld [vmem:[#allocation5 + $0x36a0] ss:$36 sps:$4 sm:$0xff]  }
 0x4cb   :  { %12809 = vmatprep.subr.bf16.mxu1 %v18559_v16  ;;  %v18575_v16 = vld [vmem:[#allocation5 + $0x1c8] ss:$36 sps:$4 sm:$0xff]  }
 0x4cd   :  { %12767 = vmatpush2.bf16.msra.mxu0 %v18554_v19 }
 0x4ce   :  { %12810 = vmatpush2.bf16.msra.mxu1 %v18557_v54  ;;  %12768 = vmatprep.subr.bf16.mxu0 %v18562_v52  ;;  %v18580_v52 = vld [vmem:[#allocation5 + $0x365c] ss:$36 sps:$4 sm:$0xff]  }
 0x4cf   :  { %12811 = vmatprep.subr.bf16.mxu1 %v18565_v63  ;;  %v18583_v63 = vld [vmem:[#allocation5 + $0x184] ss:$36 sps:$4 sm:$0xff]  }
 0x4d1   :  { %12769 = vmatpush2.bf16.msra.mxu0 %v18560_v17 }
 0x4d2   :  { %12812 = vmatpush2.bf16.msra.mxu1 %v18563_v21  ;;  %12832 = vmatprep.subr.bf16.mxu0 %v18568_v20 }
 0x4d3   :  { %12867 = vmatprep.subr.bf16.mxu1 %v18571_v30  ;;  %v18578_v30 = vld [vmem:[#allocation5 + $0x3658] ss:$36 sps:$4 sm:$0xff]  }
 0x4d4   :  { %v12514_v18 = vpop.f32.mrf.mxu0  ;;  %12771 = vmatmul.mubr.bf16.vlgmr.msra.gmra.mxu0 %v19656_v56 }
 0x4d5   :  { %12814 = vmatmul.mubr.bf16.vlgmr.msra.gmra.mxu1 %v19658_v57  ;;  %v12557_v8 = vpop.f32.mrf.mxu1  ;;  %v12515_v7 = vadd.f32 %v12514_v18, %v19874_v13  ;;  %12833 = vmatpush1.bf16.msra.mxu0 %v18566_v6  ;;  %v18581_v6 = vld [vmem:[#allocation5 + $0x180] ss:$36 sps:$4 sm:$0xff]  }
 0x4d6   :  { %12868 = vmatpush1.bf16.msra.mxu1 %v18569_v3  ;;  %v19887_v19 = vpop.f32.mrf.mxu0  ;;  %12834 = vmatprep.subr.bf16.mxu0 %v18574_v10  ;;  %v18586_v10 = vld [vmem:[#allocation5 + $0x3614] ss:$36 sps:$4 sm:$0xff]  }
 0x4d7   :  { %20225 = vst [vmem:[#allocation29_spill] sm:$0xff] %v19887_v19  ;;  %v19889_v54 = vpop.f32.mrf.mxu1  ;;  %12869 = vmatprep.subr.bf16.mxu1 %v18577_v25  ;;  %v19891_v17 = vadd.f32 %v12557_v8, %v12515_v7  ;;  %12856 = vmatprep.mubr.bf16.mxu0 %v20220_v2  ;;  %v18589_v25 = vld [vmem:[#allocation5 + $0x13c] ss:$36 sps:$4 sm:$0xff]   ;;  %v18584_v19 = vld [vmem:[#allocation5 + $0x3610] ss:$36 sps:$4 sm:$0xff]  }
 0x4d8   :  { %20226 = vst [vmem:[#allocation30_spill] sm:$0xff] %v19889_v54  ;;  %12899 = vmatprep.mubr.bf16.mxu1 %v19564_v50  ;;  %v12518_v21 = vpop.f32.mrf.mxu0 }
 0x4d9   :  { %v12561_v13 = vpop.f32.mrf.mxu1  ;;  %v12519_v20 = vadd.f32 %v12518_v21, %v19880_v43  ;;  %12835 = vmatpush1.bf16.msra.mxu0 %v18572_v22  ;;  %v18587_v43 = vld [vmem:[#allocation5 + $0x138] ss:$36 sps:$4 sm:$0xff]   ;;  %v18598_v21 = vld [vmem:[#allocation5 + $0xac] ss:$36 sps:$4 sm:$0xff]  }
 0x4da   :  { %12870 = vmatpush1.bf16.msra.mxu1 %v18575_v16  ;;  %v12520_v3 = vpop.f32.mrf.mxu0  ;;  %12836 = vmatprep.subr.bf16.mxu0 %v18580_v52  ;;  %v18592_v22 = vld [vmem:[#allocation5 + $0xf4] ss:$36 sps:$4 sm:$0xff]  }
 0x4db   :  { %v12563_v18 = vpop.f32.mrf.mxu1  ;;  %12871 = vmatprep.subr.bf16.mxu1 %v18583_v63  ;;  %v12521_v8 = vadd.f32 %v12520_v3, %v19882_v4  ;;  %v19897_v7 = vadd.f32 %v12561_v13, %v12519_v20  ;;  %v18595_v16 = vld [vmem:[#allocation5 + $0x694] ss:$36 sps:$4 sm:$0xff]   ;;  %v18601_v4 = vld [vmem:[#allocation5 + $0x64c] ss:$36 sps:$4 sm:$0xff]   ;;  %v18605_v3 = vld [vmem:[#allocation5 + $0x600] ss:$36 sps:$4 sm:$0xff]  }
 0x4dc   :  { %v18590_v52 = vld [vmem:[#allocation5 + $0xf0] ss:$36 sps:$4 sm:$0xff]   ;;  %v18596_v13 = vld [vmem:[#allocation5 + $0xa8] ss:$36 sps:$4 sm:$0xff]  }
 0x4dd   :  { %v19899_v54 = vadd.f32 %v12563_v18, %v12521_v8  ;;  %12837 = vmatpush1.bf16.msra.mxu0 %v18578_v30  ;;  %v18593_v63 = vld [vmem:[#allocation5 + $0x690] ss:$36 sps:$4 sm:$0xff]   ;;  %v18599_v20 = vld [vmem:[#allocation5 + $0x648] ss:$36 sps:$4 sm:$0xff]   ;;  %v18610_v18 = vld [vmem:[#allocation5 + $0x1c] ss:$36 sps:$4 sm:$0xff]  }
 0x4de   :  { %12872 = vmatpush1.bf16.msra.mxu1 %v18581_v6  ;;  %12838 = vmatprep.subr.bf16.mxu0 %v18586_v10  ;;  %v18604_v30 = vld [vmem:[#allocation5 + $0x64] ss:$36 sps:$4 sm:$0xff]   ;;  %v18613_v10 = vld [vmem:[#allocation5 + $0x5bc] ss:$36 sps:$4 sm:$0xff]  }
 0x4df   :  { %12873 = vmatprep.subr.bf16.mxu1 %v18589_v25  ;;  %v18607_v6 = vld [vmem:[#allocation5 + $0x604] ss:$36 sps:$4 sm:$0xff]   ;;  %v18608_v25 = vld [vmem:[#allocation5 + $0x18] ss:$36 sps:$4 sm:$0xff]  }
 0x4e0   :  { %v18611_v8 = vld [vmem:[#allocation5 + $0x5b8] ss:$36 sps:$4 sm:$0xff]  }
 0x4e1   :  { %12839 = vmatpush1.bf16.msra.mxu0 %v18584_v19  ;;  %v18602_v19 = vld [vmem:[#allocation5 + $0x60] ss:$36 sps:$4 sm:$0xff]  }
 0x4e2   :  { %12874 = vmatpush1.bf16.msra.mxu1 %v18587_v43  ;;  %12910 = vmatprep.subr.bf16.mxu0 %v18595_v16  ;;  %v18616_v43 = vld [vmem:[#allocation5 + $0x454] ss:$36 sps:$4 sm:$0xff]  }
 0x4e3   :  { %12875 = vmatprep.subr.bf16.mxu1 %v18592_v22  ;;  %v18619_v22 = vld [vmem:[#allocation5 + $0x574] ss:$36 sps:$4 sm:$0xff]  }
 0x4e4   :  { %16309 = vmatmul.mubr.msk.bf16.vlgmr.msra.gmra.mxu0 %vm11186_vm0, %v19677_v51  ;;  %v18614_v16 = vld [vmem:[#allocation5 + $0x450] ss:$36 sps:$4 sm:$0xff]  }
 0x4e5   :  { %12911 = vmatpush1.bf16.msra.mxu0 %v18593_v63  ;;  %12942 = vmatprep.mubr.bf16.mxu0 %v19566_v55  ;;  %v18622_v63 = vld [vmem:[#allocation5 + $0x40c] ss:$36 sps:$4 sm:$0xff]  }
 0x4e6   :  { %12876 = vmatpush1.bf16.msra.mxu1 %v18590_v52  ;;  %12912 = vmatprep.subr.bf16.mxu0 %v18601_v4  ;;  %v18617_v52 = vld [vmem:[#allocation5 + $0x570] ss:$36 sps:$4 sm:$0xff]   ;;  %v18620_v4 = vld [vmem:[#allocation5 + $0x408] ss:$36 sps:$4 sm:$0xff]  }
 0x4e7   :  { %12877 = vmatprep.subr.bf16.mxu1 %v18598_v21  ;;  %v18625_v21 = vld [vmem:[#allocation5 + $0x52c] ss:$36 sps:$4 sm:$0xff]  }
 0x4e9   :  { %12913 = vmatpush1.bf16.msra.mxu0 %v18599_v20  ;;  %v18628_v20 = vld [vmem:[#allocation5 + $0x3c4] ss:$36 sps:$4 sm:$0xff]  }
 0x4ea   :  { %12878 = vmatpush1.bf16.msra.mxu1 %v18596_v13  ;;  %12914 = vmatprep.subr.bf16.mxu0 %v18607_v6  ;;  %v18623_v13 = vld [vmem:[#allocation5 + $0x528] ss:$36 sps:$4 sm:$0xff]   ;;  %v18626_v6 = vld [vmem:[#allocation5 + $0x3c0] ss:$36 sps:$4 sm:$0xff]  }
 0x4eb   :  { %12879 = vmatprep.subr.bf16.mxu1 %v18604_v30  ;;  %v18631_v30 = vld [vmem:[#allocation5 + $0x4e4] ss:$36 sps:$4 sm:$0xff]  }
 0x4ed   :  { %12915 = vmatpush1.bf16.msra.mxu0 %v18605_v3  ;;  %v18634_v3 = vld [vmem:[#allocation5 + $0x37c] ss:$36 sps:$4 sm:$0xff]  }
 0x4ee   :  { %12880 = vmatpush1.bf16.msra.mxu1 %v18602_v19  ;;  %12916 = vmatprep.subr.bf16.mxu0 %v18613_v10  ;;  %v18629_v19 = vld [vmem:[#allocation5 + $0x4e0] ss:$36 sps:$4 sm:$0xff]   ;;  %v18632_v10 = vld [vmem:[#allocation5 + $0x378] ss:$36 sps:$4 sm:$0xff]  }
 0x4ef   :  { %12881 = vmatprep.subr.bf16.mxu1 %v18610_v18  ;;  %v18637_v18 = vld [vmem:[#allocation5 + $0x49c] ss:$36 sps:$4 sm:$0xff]  }
 0x4f1   :  { %12917 = vmatpush1.bf16.msra.mxu0 %v18611_v8  ;;  %v18640_v8 = vld [vmem:[#allocation5 + $0x334] ss:$36 sps:$4 sm:$0xff]  }
 0x4f2   :  { %12882 = vmatpush1.bf16.msra.mxu1 %v18608_v25  ;;  %12918 = vmatprep.subr.bf16.mxu0 %v18619_v22  ;;  %v18635_v25 = vld [vmem:[#allocation5 + $0x498] ss:$36 sps:$4 sm:$0xff]   ;;  %v18638_v22 = vld [vmem:[#allocation5 + $0x330] ss:$36 sps:$4 sm:$0xff]  }
 0x4f3   :  { %12883 = vmatprep.subr.bf16.mxu1 %v18616_v43  ;;  %v18643_v43 = vld [vmem:[#allocation5 + $0x8d4] ss:$36 sps:$4 sm:$0xff]  }
 0x4f5   :  { %12919 = vmatpush1.bf16.msra.mxu0 %v18617_v52  ;;  %v18646_v52 = vld [vmem:[#allocation5 + $0x2ec] ss:$36 sps:$4 sm:$0xff]  }
 0x4f6   :  { %12884 = vmatpush2.bf16.msra.mxu1 %v18614_v16  ;;  %12920 = vmatprep.subr.bf16.mxu0 %v18625_v21  ;;  %v18641_v16 = vld [vmem:[#allocation5 + $0x8d0] ss:$36 sps:$4 sm:$0xff]   ;;  %v18644_v21 = vld [vmem:[#allocation5 + $0x2e8] ss:$36 sps:$4 sm:$0xff]  }
 0x4f7   :  { %12885 = vmatprep.subr.bf16.mxu1 %v18622_v63  ;;  %v18649_v63 = vld [vmem:[#allocation5 + $0x88c] ss:$36 sps:$4 sm:$0xff]  }
 0x4f9   :  { %12921 = vmatpush1.bf16.msra.mxu0 %v18623_v13  ;;  %v18652_v13 = vld [vmem:[#allocation5 + $0x2a4] ss:$36 sps:$4 sm:$0xff]  }
 0x4fa   :  { %12886 = vmatpush2.bf16.msra.mxu1 %v18620_v4  ;;  %12922 = vmatprep.subr.bf16.mxu0 %v18631_v30  ;;  %v18647_v4 = vld [vmem:[#allocation5 + $0x888] ss:$36 sps:$4 sm:$0xff]   ;;  %v18650_v30 = vld [vmem:[#allocation5 + $0x2a0] ss:$36 sps:$4 sm:$0xff]  }
 0x4fb   :  { %12887 = vmatprep.subr.bf16.mxu1 %v18628_v20  ;;  %v18655_v20 = vld [vmem:[#allocation5 + $0x844] ss:$36 sps:$4 sm:$0xff]  }
 0x4fd   :  { %12923 = vmatpush1.bf16.msra.mxu0 %v18629_v19  ;;  %v18658_v19 = vld [vmem:[#allocation5 + $0x25c] ss:$36 sps:$4 sm:$0xff]  }
 0x4fe   :  { %12888 = vmatpush2.bf16.msra.mxu1 %v18626_v6  ;;  %12924 = vmatprep.subr.bf16.mxu0 %v18637_v18  ;;  %v18653_v6 = vld [vmem:[#allocation5 + $0x840] ss:$36 sps:$4 sm:$0xff]   ;;  %v18656_v18 = vld [vmem:[#allocation5 + $0x258] ss:$36 sps:$4 sm:$0xff]  }
 0x4ff   :  { %12889 = vmatprep.subr.bf16.mxu1 %v18634_v3  ;;  %v18661_v3 = vld [vmem:[#allocation5 + $0x7fc] ss:$36 sps:$4 sm:$0xff]  }
 0x501   :  { %12925 = vmatpush1.bf16.msra.mxu0 %v18635_v25  ;;  %v18664_v25 = vld [vmem:[#allocation5 + $0x7b4] ss:$36 sps:$4 sm:$0xff]  }
 0x502   :  { %12890 = vmatpush2.bf16.msra.mxu1 %v18632_v10  ;;  %12926 = vmatprep.subr.bf16.mxu0 %v18643_v43  ;;  %v18659_v10 = vld [vmem:[#allocation5 + $0x7f8] ss:$36 sps:$4 sm:$0xff]   ;;  %v18662_v43 = vld [vmem:[#allocation5 + $0x7b0] ss:$36 sps:$4 sm:$0xff]  }
 0x503   :  { %12891 = vmatprep.subr.bf16.mxu1 %v18640_v8  ;;  %v18667_v8 = vld [vmem:[#allocation5 + $0xb14] ss:$36 sps:$4 sm:$0xff]  }
 0x505   :  { %12927 = vmatpush2.bf16.msra.mxu0 %v18641_v16  ;;  %v18670_v16 = vld [vmem:[#allocation5 + $0x76c] ss:$36 sps:$4 sm:$0xff]  }
 0x506   :  { %12892 = vmatpush2.bf16.msra.mxu1 %v18638_v22  ;;  %12928 = vmatprep.subr.bf16.mxu0 %v18649_v63  ;;  %v18665_v22 = vld [vmem:[#allocation5 + $0xb10] ss:$36 sps:$4 sm:$0xff]  }
 0x507   :  { %12893 = vmatprep.subr.bf16.mxu1 %v18646_v52  ;;  %v18673_v52 = vld [vmem:[#allocation5 + $0xacc] ss:$36 sps:$4 sm:$0xff]  }
 0x509   :  { %12929 = vmatpush2.bf16.msra.mxu0 %v18647_v4 }
 0x50a   :  { %12894 = vmatpush2.bf16.msra.mxu1 %v18644_v21  ;;  %12930 = vmatprep.subr.bf16.mxu0 %v18655_v20  ;;  %v18671_v20 = vld [vmem:[#allocation5 + $0xac8] ss:$36 sps:$4 sm:$0xff]  }
 0x50b   :  { %12895 = vmatprep.subr.bf16.mxu1 %v18652_v13  ;;  %v18668_v13 = vld [vmem:[#allocation5 + $0x768] ss:$36 sps:$4 sm:$0xff]  }
 0x50d   :  { %12931 = vmatpush2.bf16.msra.mxu0 %v18653_v6 }
 0x50e   :  { %12896 = vmatpush2.bf16.msra.mxu1 %v18650_v30  ;;  %12932 = vmatprep.subr.bf16.mxu0 %v18661_v3  ;;  %v18679_v3 = vld [vmem:[#allocation5 + $0xa84] ss:$36 sps:$4 sm:$0xff]  }
 0x50f   :  { %12897 = vmatprep.subr.bf16.mxu1 %v18658_v19  ;;  %v18676_v19 = vld [vmem:[#allocation5 + $0x724] ss:$36 sps:$4 sm:$0xff]  }
 0x511   :  { %12933 = vmatpush2.bf16.msra.mxu0 %v18659_v10 }
 0x512   :  { %12898 = vmatpush2.bf16.msra.mxu1 %v18656_v18  ;;  %12934 = vmatprep.subr.bf16.mxu0 %v18664_v25 }
 0x513   :  { %12953 = vmatprep.subr.bf16.mxu1 %v18667_v8  ;;  %v18674_v8 = vld [vmem:[#allocation5 + $0x720] ss:$36 sps:$4 sm:$0xff]  }
 0x514   :  { %v12600_v63 = vpop.f32.mrf.mxu0 }
 0x515   :  { %12900 = vmatmul.mubr.bf16.vlgmr.msra.gmra.mxu1 %v19570_v12  ;;  %v12643_v21 = vpop.f32.mrf.mxu1  ;;  %v12601_v4 = vadd.f32 %v12600_v63, %v19891_v17  ;;  %12935 = vmatpush2.bf16.msra.mxu0 %v18662_v43  ;;  %v18677_v43 = vld [vmem:[#allocation5 + $0xa80] ss:$36 sps:$4 sm:$0xff]  }
 0x516   :  { %12954 = vmatpush1.bf16.msra.mxu1 %v18665_v22  ;;  %v19906_v30 = vpop.f32.mrf.mxu0  ;;  %12936 = vmatprep.subr.bf16.mxu0 %v18670_v16  ;;  %v18682_v16 = vld [vmem:[#allocation5 + $0x6dc] ss:$36 sps:$4 sm:$0xff]  }
 0x517   :  { %20227 = vst [vmem:[#allocation31_spill] sm:$0xff] %v19906_v30  ;;  %v19908_v6 = vpop.f32.mrf.mxu1  ;;  %12955 = vmatprep.subr.bf16.mxu1 %v18673_v52  ;;  %v19910_v18 = vadd.f32 %v12643_v21, %v12601_v4  ;;  %12985 = vmatprep.mubr.bf16.mxu1 %v19576_v44  ;;  %v18685_v52 = vld [vmem:[#allocation5 + $0xa3c] ss:$36 sps:$4 sm:$0xff]  }
 0x518   :  { %20228 = vst [vmem:[#allocation32_spill] sm:$0xff] %v19908_v6  ;;  %v12604_v10 = vpop.f32.mrf.mxu0  ;;  %v18680_v30 = vld [vmem:[#allocation5 + $0x6d8] ss:$36 sps:$4 sm:$0xff]  }
 0x519   :  { %v12647_v25 = vpop.f32.mrf.mxu1  ;;  %v12605_v17 = vadd.f32 %v12604_v10, %v19897_v7  ;;  %12937 = vmatpush2.bf16.msra.mxu0 %v18668_v13  ;;  %v18683_v7 = vld [vmem:[#allocation5 + $0xa38] ss:$36 sps:$4 sm:$0xff]   ;;  %v18694_v10 = vld [vmem:[#allocation5 + $0x9ac] ss:$36 sps:$4 sm:$0xff]  }
 0x51a   :  { %12956 = vmatpush1.bf16.msra.mxu1 %v18671_v20  ;;  %v12606_v22 = vpop.f32.mrf.mxu0  ;;  %12938 = vmatprep.subr.bf16.mxu0 %v18676_v19  ;;  %v18688_v13 = vld [vmem:[#allocation5 + $0x9f4] ss:$36 sps:$4 sm:$0xff]  }
 0x51b   :  { %v12649_v63 = vpop.f32.mrf.mxu1  ;;  %12957 = vmatprep.subr.bf16.mxu1 %v18679_v3  ;;  %v12607_v6 = vadd.f32 %v12606_v22, %v19899_v54  ;;  %v19915_v21 = vadd.f32 %v12647_v25, %v12605_v17  ;;  %v18691_v20 = vld [vmem:[#allocation5 + $0xf94] ss:$36 sps:$4 sm:$0xff]   ;;  %v18697_v54 = vld [vmem:[#allocation5 + $0xf4c] ss:$36 sps:$4 sm:$0xff]   ;;  %v18700_v17 = vld [vmem:[#allocation5 + $0x964] ss:$36 sps:$4 sm:$0xff]  }
 0x51c   :  { %v18686_v19 = vld [vmem:[#allocation5 + $0x9f0] ss:$36 sps:$4 sm:$0xff]   ;;  %v18695_v25 = vld [vmem:[#allocation5 + $0xf48] ss:$36 sps:$4 sm:$0xff]   ;;  %v18706_v22 = vld [vmem:[#allocation5 + $0x91c] ss:$36 sps:$4 sm:$0xff]  }
 0x51d   :  { %v19917_v4 = vadd.f32 %v12649_v63, %v12607_v6  ;;  %12939 = vmatpush2.bf16.msra.mxu0 %v18674_v8  ;;  %v18689_v3 = vld [vmem:[#allocation5 + $0xf90] ss:$36 sps:$4 sm:$0xff]   ;;  %v18692_v6 = vld [vmem:[#allocation5 + $0x9a8] ss:$36 sps:$4 sm:$0xff]   ;;  %v18709_v63 = vld [vmem:[#allocation5 + $0xebc] ss:$36 sps:$4 sm:$0xff]  }
 0x51e   :  { %12958 = vmatpush1.bf16.msra.mxu1 %v18677_v43  ;;  %12940 = vmatprep.subr.bf16.mxu0 %v18682_v16  ;;  %v18703_v8 = vld [vmem:[#allocation5 + $0xf04] ss:$36 sps:$4 sm:$0xff]   ;;  %v18704_v16 = vld [vmem:[#allocation5 + $0x918] ss:$36 sps:$4 sm:$0xff]  }
 0x51f   :  { %12959 = vmatprep.subr.bf16.mxu1 %v18685_v52  ;;  %v18701_v43 = vld [vmem:[#allocation5 + $0xf00] ss:$36 sps:$4 sm:$0xff]   ;;  %v18707_v52 = vld [vmem:[#allocation5 + $0xeb8] ss:$36 sps:$4 sm:$0xff]  }
 0x521   :  { %12941 = vmatpush2.bf16.msra.mxu0 %v18680_v30  ;;  %v18698_v30 = vld [vmem:[#allocation5 + $0x960] ss:$36 sps:$4 sm:$0xff]  }
 0x522   :  { %12960 = vmatpush1.bf16.msra.mxu1 %v18683_v7  ;;  %12996 = vmatprep.subr.bf16.mxu0 %v18691_v20  ;;  %v18712_v7 = vld [vmem:[#allocation5 + $0xd54] ss:$36 sps:$4 sm:$0xff]  }
 0x523   :  { %12961 = vmatprep.subr.bf16.mxu1 %v18688_v13  ;;  %v18715_v13 = vld [vmem:[#allocation5 + $0xe74] ss:$36 sps:$4 sm:$0xff]  }
 0x524   :  { %12943 = vmatmul.mubr.bf16.vlgmr.msra.gmra.mxu0 %v19572_v15  ;;  %v18710_v20 = vld [vmem:[#allocation5 + $0xd50] ss:$36 sps:$4 sm:$0xff]  }
 0x525   :  { %12997 = vmatpush1.bf16.msra.mxu0 %v18689_v3  ;;  %13028 = vmatprep.mubr.bf16.mxu0 %v19578_v47  ;;  %v18718_v3 = vld [vmem:[#allocation5 + $0xd0c] ss:$36 sps:$4 sm:$0xff]  }
 0x526   :  { %12962 = vmatpush1.bf16.msra.mxu1 %v18686_v19  ;;  %12998 = vmatprep.subr.bf16.mxu0 %v18697_v54  ;;  %v18713_v19 = vld [vmem:[#allocation5 + $0xe70] ss:$36 sps:$4 sm:$0xff]   ;;  %v18716_v54 = vld [vmem:[#allocation5 + $0xd08] ss:$36 sps:$4 sm:$0xff]  }
 0x527   :  { %12963 = vmatprep.subr.bf16.mxu1 %v18694_v10  ;;  %v18721_v10 = vld [vmem:[#allocation5 + $0xe2c] ss:$36 sps:$4 sm:$0xff]  }
 0x529   :  { %12999 = vmatpush1.bf16.msra.mxu0 %v18695_v25  ;;  %v18724_v25 = vld [vmem:[#allocation5 + $0xcc4] ss:$36 sps:$4 sm:$0xff]  }
 0x52a   :  { %12964 = vmatpush1.bf16.msra.mxu1 %v18692_v6  ;;  %13000 = vmatprep.subr.bf16.mxu0 %v18703_v8  ;;  %v18719_v6 = vld [vmem:[#allocation5 + $0xe28] ss:$36 sps:$4 sm:$0xff]   ;;  %v18722_v8 = vld [vmem:[#allocation5 + $0xcc0] ss:$36 sps:$4 sm:$0xff]  }
 0x52b   :  { %12965 = vmatprep.subr.bf16.mxu1 %v18700_v17  ;;  %v18727_v17 = vld [vmem:[#allocation5 + $0xde4] ss:$36 sps:$4 sm:$0xff]  }
 0x52d   :  { %13001 = vmatpush1.bf16.msra.mxu0 %v18701_v43  ;;  %v18730_v43 = vld [vmem:[#allocation5 + $0xc7c] ss:$36 sps:$4 sm:$0xff]  }
 0x52e   :  { %12966 = vmatpush1.bf16.msra.mxu1 %v18698_v30  ;;  %13002 = vmatprep.subr.bf16.mxu0 %v18709_v63  ;;  %v18725_v30 = vld [vmem:[#allocation5 + $0xde0] ss:$36 sps:$4 sm:$0xff]   ;;  %v18728_v63 = vld [vmem:[#allocation5 + $0xc78] ss:$36 sps:$4 sm:$0xff]  }
 0x52f   :  { %12967 = vmatprep.subr.bf16.mxu1 %v18706_v22  ;;  %v18733_v22 = vld [vmem:[#allocation5 + $0xd9c] ss:$36 sps:$4 sm:$0xff]  }
 0x531   :  { %13003 = vmatpush1.bf16.msra.mxu0 %v18707_v52  ;;  %v18736_v52 = vld [vmem:[#allocation5 + $0xc34] ss:$36 sps:$4 sm:$0xff]  }
 0x532   :  { %12968 = vmatpush1.bf16.msra.mxu1 %v18704_v16  ;;  %13004 = vmatprep.subr.bf16.mxu0 %v18715_v13  ;;  %v18731_v16 = vld [vmem:[#allocation5 + $0xd98] ss:$36 sps:$4 sm:$0xff]   ;;  %v18734_v13 = vld [vmem:[#allocation5 + $0xc30] ss:$36 sps:$4 sm:$0xff]  }
 0x533   :  { %12969 = vmatprep.subr.bf16.mxu1 %v18712_v7  ;;  %v18739_v7 = vld [vmem:[#allocation5 + $0x11d4] ss:$36 sps:$4 sm:$0xff]  }
 0x535   :  { %13005 = vmatpush1.bf16.msra.mxu0 %v18713_v19  ;;  %v18742_v19 = vld [vmem:[#allocation5 + $0xbec] ss:$36 sps:$4 sm:$0xff]  }
 0x536   :  { %12970 = vmatpush2.bf16.msra.mxu1 %v18710_v20  ;;  %13006 = vmatprep.subr.bf16.mxu0 %v18721_v10  ;;  %v18737_v20 = vld [vmem:[#allocation5 + $0x11d0] ss:$36 sps:$4 sm:$0xff]   ;;  %v18740_v10 = vld [vmem:[#allocation5 + $0xbe8] ss:$36 sps:$4 sm:$0xff]  }
 0x537   :  { %12971 = vmatprep.subr.bf16.mxu1 %v18718_v3  ;;  %v18745_v3 = vld [vmem:[#allocation5 + $0x118c] ss:$36 sps:$4 sm:$0xff]  }
 0x539   :  { %13007 = vmatpush1.bf16.msra.mxu0 %v18719_v6  ;;  %v18748_v6 = vld [vmem:[#allocation5 + $0xba4] ss:$36 sps:$4 sm:$0xff]  }
 0x53a   :  { %12972 = vmatpush2.bf16.msra.mxu1 %v18716_v54  ;;  %13008 = vmatprep.subr.bf16.mxu0 %v18727_v17  ;;  %v18743_v54 = vld [vmem:[#allocation5 + $0x1188] ss:$36 sps:$4 sm:$0xff]   ;;  %v18746_v17 = vld [vmem:[#allocation5 + $0xba0] ss:$36 sps:$4 sm:$0xff]  }
 0x53b   :  { %12973 = vmatprep.subr.bf16.mxu1 %v18724_v25  ;;  %v18751_v25 = vld [vmem:[#allocation5 + $0x1144] ss:$36 sps:$4 sm:$0xff]  }
 0x53d   :  { %13009 = vmatpush1.bf16.msra.mxu0 %v18725_v30  ;;  %v18754_v30 = vld [vmem:[#allocation5 + $0xb5c] ss:$36 sps:$4 sm:$0xff]  }
 0x53e   :  { %12974 = vmatpush2.bf16.msra.mxu1 %v18722_v8  ;;  %13010 = vmatprep.subr.bf16.mxu0 %v18733_v22  ;;  %v18749_v8 = vld [vmem:[#allocation5 + $0x1140] ss:$36 sps:$4 sm:$0xff]   ;;  %v18752_v22 = vld [vmem:[#allocation5 + $0xb58] ss:$36 sps:$4 sm:$0xff]  }
 0x53f   :  { %12975 = vmatprep.subr.bf16.mxu1 %v18730_v43  ;;  %v18757_v43 = vld [vmem:[#allocation5 + $0x10fc] ss:$36 sps:$4 sm:$0xff]  }
 0x541   :  { %13011 = vmatpush1.bf16.msra.mxu0 %v18731_v16  ;;  %v18760_v16 = vld [vmem:[#allocation5 + $0x10b4] ss:$36 sps:$4 sm:$0xff]  }
 0x542   :  { %12976 = vmatpush2.bf16.msra.mxu1 %v18728_v63  ;;  %13012 = vmatprep.subr.bf16.mxu0 %v18739_v7  ;;  %v18755_v63 = vld [vmem:[#allocation5 + $0x10f8] ss:$36 sps:$4 sm:$0xff]   ;;  %v18758_v7 = vld [vmem:[#allocation5 + $0x10b0] ss:$36 sps:$4 sm:$0xff]  }
 0x543   :  { %12977 = vmatprep.subr.bf16.mxu1 %v18736_v52  ;;  %v18763_v52 = vld [vmem:[#allocation5 + $0x1414] ss:$36 sps:$4 sm:$0xff]  }
 0x545   :  { %13013 = vmatpush2.bf16.msra.mxu0 %v18737_v20  ;;  %v18766_v20 = vld [vmem:[#allocation5 + $0x106c] ss:$36 sps:$4 sm:$0xff]  }
 0x546   :  { %12978 = vmatpush2.bf16.msra.mxu1 %v18734_v13  ;;  %13014 = vmatprep.subr.bf16.mxu0 %v18745_v3  ;;  %v18761_v13 = vld [vmem:[#allocation5 + $0x1410] ss:$36 sps:$4 sm:$0xff]  }
 0x547   :  { %12979 = vmatprep.subr.bf16.mxu1 %v18742_v19  ;;  %v18769_v19 = vld [vmem:[#allocation5 + $0x13cc] ss:$36 sps:$4 sm:$0xff]  }
 0x549   :  { %13015 = vmatpush2.bf16.msra.mxu0 %v18743_v54 }
 0x54a   :  { %12980 = vmatpush2.bf16.msra.mxu1 %v18740_v10  ;;  %13016 = vmatprep.subr.bf16.mxu0 %v18751_v25  ;;  %v18767_v25 = vld [vmem:[#allocation5 + $0x13c8] ss:$36 sps:$4 sm:$0xff]  }
 0x54b   :  { %12981 = vmatprep.subr.bf16.mxu1 %v18748_v6  ;;  %v18764_v6 = vld [vmem:[#allocation5 + $0x1068] ss:$36 sps:$4 sm:$0xff]  }
 0x54d   :  { %13017 = vmatpush2.bf16.msra.mxu0 %v18749_v8 }
 0x54e   :  { %12982 = vmatpush2.bf16.msra.mxu1 %v18746_v17  ;;  %13018 = vmatprep.subr.bf16.mxu0 %v18757_v43  ;;  %v18775_v43 = vld [vmem:[#allocation5 + $0x1384] ss:$36 sps:$4 sm:$0xff]  }
 0x54f   :  { %12983 = vmatprep.subr.bf16.mxu1 %v18754_v30  ;;  %v18772_v30 = vld [vmem:[#allocation5 + $0x1024] ss:$36 sps:$4 sm:$0xff]  }
 0x551   :  { %13019 = vmatpush2.bf16.msra.mxu0 %v18755_v63 }
 0x552   :  { %12984 = vmatpush2.bf16.msra.mxu1 %v18752_v22  ;;  %13020 = vmatprep.subr.bf16.mxu0 %v18760_v16 }
 0x553   :  { %13039 = vmatprep.subr.bf16.mxu1 %v18763_v52  ;;  %v18770_v52 = vld [vmem:[#allocation5 + $0x1020] ss:$36 sps:$4 sm:$0xff]  }
 0x554   :  { %v12686_v3 = vpop.f32.mrf.mxu0 }
 0x555   :  { %12986 = vmatmul.mubr.bf16.vlgmr.msra.gmra.mxu1 %v19582_v28  ;;  %v12729_v10 = vpop.f32.mrf.mxu1  ;;  %v12687_v54 = vadd.f32 %v12686_v3, %v19910_v18  ;;  %13021 = vmatpush2.bf16.msra.mxu0 %v18758_v7  ;;  %v18773_v7 = vld [vmem:[#allocation5 + $0x1380] ss:$36 sps:$4 sm:$0xff]  }
 0x556   :  { %13040 = vmatpush1.bf16.msra.mxu1 %v18761_v13  ;;  %v19923_v17 = vpop.f32.mrf.mxu0  ;;  %13022 = vmatprep.subr.bf16.mxu0 %v18766_v20  ;;  %v18778_v20 = vld [vmem:[#allocation5 + $0xfdc] ss:$36 sps:$4 sm:$0xff]  }
 0x557   :  { %20229 = vst [vmem:[#allocation33_spill] sm:$0xff] %v19923_v17  ;;  %v19925_v8 = vpop.f32.mrf.mxu1  ;;  %13041 = vmatprep.subr.bf16.mxu1 %v18769_v19  ;;  %v19927_v22 = vadd.f32 %v12729_v10, %v12687_v54  ;;  %13071 = vmatprep.mubr.bf16.mxu1 %v19588_v40  ;;  %v18781_v19 = vld [vmem:[#allocation5 + $0x133c] ss:$36 sps:$4 sm:$0xff]  }
 0x558   :  { %20230 = vst [vmem:[#allocation34_spill] sm:$0xff] %v19925_v8  ;;  %v12690_v63 = vpop.f32.mrf.mxu0  ;;  %v18776_v17 = vld [vmem:[#allocation5 + $0xfd8] ss:$36 sps:$4 sm:$0xff]  }
 0x559   :  { %v12733_v16 = vpop.f32.mrf.mxu1  ;;  %v12691_v18 = vadd.f32 %v12690_v63, %v19915_v21  ;;  %13023 = vmatpush2.bf16.msra.mxu0 %v18764_v6  ;;  %v18779_v21 = vld [vmem:[#allocation5 + $0x1338] ss:$36 sps:$4 sm:$0xff]   ;;  %v18790_v63 = vld [vmem:[#allocation5 + $0x12ac] ss:$36 sps:$4 sm:$0xff]  }
 0x55a   :  { %13042 = vmatpush1.bf16.msra.mxu1 %v18767_v25  ;;  %v12692_v13 = vpop.f32.mrf.mxu0  ;;  %13024 = vmatprep.subr.bf16.mxu0 %v18772_v30  ;;  %v18784_v6 = vld [vmem:[#allocation5 + $0x12f4] ss:$36 sps:$4 sm:$0xff]  }
 0x55b   :  { %v12735_v3 = vpop.f32.mrf.mxu1  ;;  %13043 = vmatprep.subr.bf16.mxu1 %v18775_v43  ;;  %v12693_v8 = vadd.f32 %v12692_v13, %v19917_v4  ;;  %v19932_v10 = vadd.f32 %v12733_v16, %v12691_v18  ;;  %v18787_v25 = vld [vmem:[#allocation5 + $0x1894] ss:$36 sps:$4 sm:$0xff]   ;;  %v18793_v4 = vld [vmem:[#allocation5 + $0x184c] ss:$36 sps:$4 sm:$0xff]   ;;  %v18796_v18 = vld [vmem:[#allocation5 + $0x1264] ss:$36 sps:$4 sm:$0xff]  }
 0x55c   :  { %v18782_v30 = vld [vmem:[#allocation5 + $0x12f0] ss:$36 sps:$4 sm:$0xff]   ;;  %v18791_v16 = vld [vmem:[#allocation5 + $0x1848] ss:$36 sps:$4 sm:$0xff]   ;;  %v18802_v13 = vld [vmem:[#allocation5 + $0x121c] ss:$36 sps:$4 sm:$0xff]  }
 0x55d   :  { %v19934_v54 = vadd.f32 %v12735_v3, %v12693_v8  ;;  %13025 = vmatpush2.bf16.msra.mxu0 %v18770_v52  ;;  %v18785_v43 = vld [vmem:[#allocation5 + $0x1890] ss:$36 sps:$4 sm:$0xff]   ;;  %v18788_v8 = vld [vmem:[#allocation5 + $0x12a8] ss:$36 sps:$4 sm:$0xff]   ;;  %v18805_v3 = vld [vmem:[#allocation5 + $0x17bc] ss:$36 sps:$4 sm:$0xff]  }
 0x55e   :  { %13044 = vmatpush1.bf16.msra.mxu1 %v18773_v7  ;;  %13026 = vmatprep.subr.bf16.mxu0 %v18778_v20  ;;  %v18799_v52 = vld [vmem:[#allocation5 + $0x1804] ss:$36 sps:$4 sm:$0xff]   ;;  %v18800_v20 = vld [vmem:[#allocation5 + $0x1218] ss:$36 sps:$4 sm:$0xff]  }
 0x55f   :  { %13045 = vmatprep.subr.bf16.mxu1 %v18781_v19  ;;  %v18797_v7 = vld [vmem:[#allocation5 + $0x1800] ss:$36 sps:$4 sm:$0xff]   ;;  %v18803_v19 = vld [vmem:[#allocation5 + $0x17b8] ss:$36 sps:$4 sm:$0xff]  }
 0x561   :  { %13027 = vmatpush2.bf16.msra.mxu0 %v18776_v17  ;;  %v18794_v17 = vld [vmem:[#allocation5 + $0x1260] ss:$36 sps:$4 sm:$0xff]  }
 0x562   :  { %13046 = vmatpush1.bf16.msra.mxu1 %v18779_v21  ;;  %13082 = vmatprep.subr.bf16.mxu0 %v18787_v25  ;;  %v18808_v21 = vld [vmem:[#allocation5 + $0x1654] ss:$36 sps:$4 sm:$0xff]  }
 0x563   :  { %13047 = vmatprep.subr.bf16.mxu1 %v18784_v6  ;;  %v18811_v6 = vld [vmem:[#allocation5 + $0x1774] ss:$36 sps:$4 sm:$0xff]  }
 0x564   :  { %13029 = vmatmul.mubr.bf16.vlgmr.msra.gmra.mxu0 %v19584_v31  ;;  %v18806_v25 = vld [vmem:[#allocation5 + $0x1650] ss:$36 sps:$4 sm:$0xff]  }
 0x565   :  { %13083 = vmatpush1.bf16.msra.mxu0 %v18785_v43  ;;  %13114 = vmatprep.mubr.bf16.mxu0 %v19590_v46  ;;  %v18814_v43 = vld [vmem:[#allocation5 + $0x160c] ss:$36 sps:$4 sm:$0xff]  }
 0x566   :  { %13048 = vmatpush1.bf16.msra.mxu1 %v18782_v30  ;;  %13084 = vmatprep.subr.bf16.mxu0 %v18793_v4  ;;  %v18809_v30 = vld [vmem:[#allocation5 + $0x1770] ss:$36 sps:$4 sm:$0xff]   ;;  %v18812_v4 = vld [vmem:[#allocation5 + $0x1608] ss:$36 sps:$4 sm:$0xff]  }
 0x567   :  { %13049 = vmatprep.subr.bf16.mxu1 %v18790_v63  ;;  %v18817_v63 = vld [vmem:[#allocation5 + $0x172c] ss:$36 sps:$4 sm:$0xff]  }
 0x569   :  { %13085 = vmatpush1.bf16.msra.mxu0 %v18791_v16  ;;  %v18820_v16 = vld [vmem:[#allocation5 + $0x15c4] ss:$36 sps:$4 sm:$0xff]  }
 0x56a   :  { %13050 = vmatpush1.bf16.msra.mxu1 %v18788_v8  ;;  %13086 = vmatprep.subr.bf16.mxu0 %v18799_v52  ;;  %v18815_v8 = vld [vmem:[#allocation5 + $0x1728] ss:$36 sps:$4 sm:$0xff]   ;;  %v18818_v52 = vld [vmem:[#allocation5 + $0x15c0] ss:$36 sps:$4 sm:$0xff]  }
 0x56b   :  { %13051 = vmatprep.subr.bf16.mxu1 %v18796_v18  ;;  %v18823_v18 = vld [vmem:[#allocation5 + $0x16e4] ss:$36 sps:$4 sm:$0xff]  }
 0x56d   :  { %13087 = vmatpush1.bf16.msra.mxu0 %v18797_v7  ;;  %v18826_v7 = vld [vmem:[#allocation5 + $0x157c] ss:$36 sps:$4 sm:$0xff]  }
 0x56e   :  { %13052 = vmatpush1.bf16.msra.mxu1 %v18794_v17  ;;  %13088 = vmatprep.subr.bf16.mxu0 %v18805_v3  ;;  %v18821_v17 = vld [vmem:[#allocation5 + $0x16e0] ss:$36 sps:$4 sm:$0xff]   ;;  %v18824_v3 = vld [vmem:[#allocation5 + $0x1578] ss:$36 sps:$4 sm:$0xff]  }
 0x56f   :  { %13053 = vmatprep.subr.bf16.mxu1 %v18802_v13  ;;  %v18829_v13 = vld [vmem:[#allocation5 + $0x169c] ss:$36 sps:$4 sm:$0xff]  }
 0x571   :  { %13089 = vmatpush1.bf16.msra.mxu0 %v18803_v19  ;;  %v18832_v19 = vld [vmem:[#allocation5 + $0x1534] ss:$36 sps:$4 sm:$0xff]  }
 0x572   :  { %13054 = vmatpush1.bf16.msra.mxu1 %v18800_v20  ;;  %13090 = vmatprep.subr.bf16.mxu0 %v18811_v6  ;;  %v18827_v20 = vld [vmem:[#allocation5 + $0x1698] ss:$36 sps:$4 sm:$0xff]   ;;  %v18830_v6 = vld [vmem:[#allocation5 + $0x1530] ss:$36 sps:$4 sm:$0xff]  }
 0x573   :  { %13055 = vmatprep.subr.bf16.mxu1 %v18808_v21  ;;  %v18835_v21 = vld [vmem:[#allocation5 + $0x1ad4] ss:$36 sps:$4 sm:$0xff]  }
 0x575   :  { %13091 = vmatpush1.bf16.msra.mxu0 %v18809_v30  ;;  %v18838_v30 = vld [vmem:[#allocation5 + $0x14ec] ss:$36 sps:$4 sm:$0xff]  }
 0x576   :  { %13056 = vmatpush2.bf16.msra.mxu1 %v18806_v25  ;;  %13092 = vmatprep.subr.bf16.mxu0 %v18817_v63  ;;  %v18833_v25 = vld [vmem:[#allocation5 + $0x1ad0] ss:$36 sps:$4 sm:$0xff]   ;;  %v18836_v63 = vld [vmem:[#allocation5 + $0x14e8] ss:$36 sps:$4 sm:$0xff]  }
 0x577   :  { %13057 = vmatprep.subr.bf16.mxu1 %v18814_v43  ;;  %v18841_v43 = vld [vmem:[#allocation5 + $0x1a8c] ss:$36 sps:$4 sm:$0xff]  }
 0x579   :  { %13093 = vmatpush1.bf16.msra.mxu0 %v18815_v8  ;;  %v18844_v8 = vld [vmem:[#allocation5 + $0x14a4] ss:$36 sps:$4 sm:$0xff]  }
 0x57a   :  { %13058 = vmatpush2.bf16.msra.mxu1 %v18812_v4  ;;  %13094 = vmatprep.subr.bf16.mxu0 %v18823_v18  ;;  %v18839_v4 = vld [vmem:[#allocation5 + $0x1a88] ss:$36 sps:$4 sm:$0xff]   ;;  %v18842_v18 = vld [vmem:[#allocation5 + $0x14a0] ss:$36 sps:$4 sm:$0xff]  }
 0x57b   :  { %13059 = vmatprep.subr.bf16.mxu1 %v18820_v16  ;;  %v18847_v16 = vld [vmem:[#allocation5 + $0x1a44] ss:$36 sps:$4 sm:$0xff]  }
 0x57d   :  { %13095 = vmatpush1.bf16.msra.mxu0 %v18821_v17  ;;  %v18850_v17 = vld [vmem:[#allocation5 + $0x145c] ss:$36 sps:$4 sm:$0xff]  }
 0x57e   :  { %13060 = vmatpush2.bf16.msra.mxu1 %v18818_v52  ;;  %13096 = vmatprep.subr.bf16.mxu0 %v18829_v13  ;;  %v18845_v52 = vld [vmem:[#allocation5 + $0x1a40] ss:$36 sps:$4 sm:$0xff]   ;;  %v18848_v13 = vld [vmem:[#allocation5 + $0x1458] ss:$36 sps:$4 sm:$0xff]  }
 0x57f   :  { %13061 = vmatprep.subr.bf16.mxu1 %v18826_v7  ;;  %v18853_v7 = vld [vmem:[#allocation5 + $0x19fc] ss:$36 sps:$4 sm:$0xff]  }
 0x581   :  { %13097 = vmatpush1.bf16.msra.mxu0 %v18827_v20  ;;  %v18856_v20 = vld [vmem:[#allocation5 + $0x19b4] ss:$36 sps:$4 sm:$0xff]  }
 0x582   :  { %13062 = vmatpush2.bf16.msra.mxu1 %v18824_v3  ;;  %13098 = vmatprep.subr.bf16.mxu0 %v18835_v21  ;;  %v18851_v3 = vld [vmem:[#allocation5 + $0x19f8] ss:$36 sps:$4 sm:$0xff]   ;;  %v18854_v21 = vld [vmem:[#allocation5 + $0x19b0] ss:$36 sps:$4 sm:$0xff]  }
 0x583   :  { %13063 = vmatprep.subr.bf16.mxu1 %v18832_v19  ;;  %v18859_v19 = vld [vmem:[#allocation5 + $0x1d14] ss:$36 sps:$4 sm:$0xff]  }
 0x585   :  { %13099 = vmatpush2.bf16.msra.mxu0 %v18833_v25  ;;  %v18862_v25 = vld [vmem:[#allocation5 + $0x196c] ss:$36 sps:$4 sm:$0xff]  }
 0x586   :  { %13064 = vmatpush2.bf16.msra.mxu1 %v18830_v6  ;;  %13100 = vmatprep.subr.bf16.mxu0 %v18841_v43  ;;  %v18857_v6 = vld [vmem:[#allocation5 + $0x1d10] ss:$36 sps:$4 sm:$0xff]  }
 0x587   :  { %13065 = vmatprep.subr.bf16.mxu1 %v18838_v30  ;;  %v18865_v30 = vld [vmem:[#allocation5 + $0x1ccc] ss:$36 sps:$4 sm:$0xff]  }
 0x589   :  { %13101 = vmatpush2.bf16.msra.mxu0 %v18839_v4 }
 0x58a   :  { %13066 = vmatpush2.bf16.msra.mxu1 %v18836_v63  ;;  %13102 = vmatprep.subr.bf16.mxu0 %v18847_v16  ;;  %v18863_v16 = vld [vmem:[#allocation5 + $0x1cc8] ss:$36 sps:$4 sm:$0xff]  }
 0x58b   :  { %13067 = vmatprep.subr.bf16.mxu1 %v18844_v8  ;;  %v18860_v8 = vld [vmem:[#allocation5 + $0x1968] ss:$36 sps:$4 sm:$0xff]  }
 0x58d   :  { %13103 = vmatpush2.bf16.msra.mxu0 %v18845_v52 }
 0x58e   :  { %13068 = vmatpush2.bf16.msra.mxu1 %v18842_v18  ;;  %13104 = vmatprep.subr.bf16.mxu0 %v18853_v7  ;;  %v18871_v7 = vld [vmem:[#allocation5 + $0x1c84] ss:$36 sps:$4 sm:$0xff]  }
 0x58f   :  { %13069 = vmatprep.subr.bf16.mxu1 %v18850_v17  ;;  %v18868_v17 = vld [vmem:[#allocation5 + $0x1924] ss:$36 sps:$4 sm:$0xff]  }
 0x591   :  { %13105 = vmatpush2.bf16.msra.mxu0 %v18851_v3 }
 0x592   :  { %13070 = vmatpush2.bf16.msra.mxu1 %v18848_v13  ;;  %13106 = vmatprep.subr.bf16.mxu0 %v18856_v20 }
 0x593   :  { %13125 = vmatprep.subr.bf16.mxu1 %v18859_v19  ;;  %v18866_v19 = vld [vmem:[#allocation5 + $0x1920] ss:$36 sps:$4 sm:$0xff]  }
 0x594   :  { %v12772_v43 = vpop.f32.mrf.mxu0 }
 0x595   :  { %13072 = vmatmul.mubr.bf16.vlgmr.msra.gmra.mxu1 %v19594_v58  ;;  %v12815_v63 = vpop.f32.mrf.mxu1  ;;  %v12773_v4 = vadd.f32 %v12772_v43, %v19927_v22  ;;  %13107 = vmatpush2.bf16.msra.mxu0 %v18854_v21  ;;  %v18869_v21 = vld [vmem:[#allocation5 + $0x1c80] ss:$36 sps:$4 sm:$0xff]  }
 0x596   :  { %13126 = vmatpush1.bf16.msra.mxu1 %v18857_v6  ;;  %v19940_v18 = vpop.f32.mrf.mxu0  ;;  %13108 = vmatprep.subr.bf16.mxu0 %v18862_v25  ;;  %v18874_v6 = vld [vmem:[#allocation5 + $0x18dc] ss:$36 sps:$4 sm:$0xff]  }
 0x597   :  { %v19942_v52 = vpop.f32.mrf.mxu1  ;;  %13127 = vmatprep.subr.bf16.mxu1 %v18865_v30  ;;  %v19944_v13 = vadd.f32 %v12815_v63, %v12773_v4  ;;  %13157 = vmatprep.mubr.bf16.mxu1 %v19598_v0  ;;  %v18877_v43 = vld [vmem:[#allocation5 + $0x1c3c] ss:$36 sps:$4 sm:$0xff]   ;;  %v18880_v4 = vld [vmem:[#allocation5 + $0x1bf4] ss:$36 sps:$4 sm:$0xff]  }
 0x598   :  { %v12776_v3 = vpop.f32.mrf.mxu0  ;;  %v18872_v30 = vld [vmem:[#allocation5 + $0x18d8] ss:$36 sps:$4 sm:$0xff]  }
 0x599   :  { %20231 = vst [vmem:[#allocation35_spill] sm:$0xff] %v19944_v13  ;;  %v12819_v20 = vpop.f32.mrf.mxu1  ;;  %v12777_v22 = vadd.f32 %v12776_v3, %v19932_v10  ;;  %13109 = vmatpush2.bf16.msra.mxu0 %v18860_v8  ;;  %v18875_v63 = vld [vmem:[#allocation5 + $0x1c38] ss:$36 sps:$4 sm:$0xff]   ;;  %v18878_v10 = vld [vmem:[#allocation5 + $0x1bf0] ss:$36 sps:$4 sm:$0xff]  }
 0x59a   :  { %13128 = vmatpush1.bf16.msra.mxu1 %v18863_v16  ;;  %13110 = vmatprep.subr.bf16.mxu0 %v18868_v17  ;;  %v18883_v13 = vld [vmem:[#allocation5 + $0x2194] ss:$36 sps:$4 sm:$0xff]   ;;  %v18886_v16 = vld [vmem:[#allocation5 + $0x1bac] ss:$36 sps:$4 sm:$0xff]  }
 0x59b   :  { %13129 = vmatprep.subr.bf16.mxu1 %v18871_v7  ;;  %v19948_v25 = vadd.f32 %v12819_v20, %v12777_v22  ;;  %v18881_v8 = vld [vmem:[#allocation5 + $0x2190] ss:$36 sps:$4 sm:$0xff]   ;;  %v18884_v7 = vld [vmem:[#allocation5 + $0x1ba8] ss:$36 sps:$4 sm:$0xff]  }
 0x59c   :  { %v18889_v17 = vld [vmem:[#allocation5 + $0x214c] ss:$36 sps:$4 sm:$0xff]   ;;  %v18892_v20 = vld [vmem:[#allocation5 + $0x1b64] ss:$36 sps:$4 sm:$0xff]  }
 0x59d   :  { %13111 = vmatpush2.bf16.msra.mxu0 %v18866_v19  ;;  %v18887_v3 = vld [vmem:[#allocation5 + $0x2148] ss:$36 sps:$4 sm:$0xff]   ;;  %v18890_v19 = vld [vmem:[#allocation5 + $0x1b60] ss:$36 sps:$4 sm:$0xff]  }
 0x59e   :  { %13130 = vmatpush1.bf16.msra.mxu1 %v18869_v21  ;;  %13112 = vmatprep.subr.bf16.mxu0 %v18874_v6  ;;  %v18895_v22 = vld [vmem:[#allocation5 + $0x2104] ss:$36 sps:$4 sm:$0xff]   ;;  %v18901_v6 = vld [vmem:[#allocation5 + $0x20bc] ss:$36 sps:$4 sm:$0xff]  }
 0x59f   :  { %13131 = vmatprep.subr.bf16.mxu1 %v18877_v43  ;;  %v18893_v21 = vld [vmem:[#allocation5 + $0x2100] ss:$36 sps:$4 sm:$0xff]   ;;  %v18896_v43 = vld [vmem:[#allocation5 + $0x1b18] ss:$36 sps:$4 sm:$0xff]  }
 0x5a1   :  { %13113 = vmatpush2.bf16.msra.mxu0 %v18872_v30  ;;  %v18899_v30 = vld [vmem:[#allocation5 + $0x20b8] ss:$36 sps:$4 sm:$0xff]  }
 0x5a2   :  { %13132 = vmatpush1.bf16.msra.mxu1 %v18875_v63  ;;  %13168 = vmatprep.subr.bf16.mxu0 %v18883_v13  ;;  %v18898_v13 = vld [vmem:[#allocation5 + $0x1b1c] ss:$36 sps:$4 sm:$0xff]   ;;  %v18904_v63 = vld [vmem:[#allocation5 + $0x1f54] ss:$36 sps:$4 sm:$0xff]  }
 0x5a3   :  { %13133 = vmatprep.subr.bf16.mxu1 %v18880_v4  ;;  %v18907_v4 = vld [vmem:[#allocation5 + $0x2074] ss:$36 sps:$4 sm:$0xff]  }
 0x5a4   :  { %13115 = vmatmul.mubr.bf16.vlgmr.msra.gmra.mxu0 %v19596_v59 }
 0x5a5   :  { %13169 = vmatpush1.bf16.msra.mxu0 %v18881_v8  ;;  %13200 = vmatprep.mubr.bf16.mxu0 %v19600_v1  ;;  %v18905_v8 = vld [vmem:[#allocation5 + $0x2070] ss:$36 sps:$4 sm:$0xff]  }
 0x5a6   :  { %13134 = vmatpush1.bf16.msra.mxu1 %v18878_v10  ;;  %13170 = vmatprep.subr.bf16.mxu0 %v18889_v17  ;;  %v18902_v10 = vld [vmem:[#allocation5 + $0x1f50] ss:$36 sps:$4 sm:$0xff]  }
 0x5a7   :  { %13135 = vmatprep.subr.bf16.mxu1 %v18886_v16  ;;  %v18910_v16 = vld [vmem:[#allocation5 + $0x1f0c] ss:$36 sps:$4 sm:$0xff]  }
 0x5a8   :  { %v18913_v17 = vld [vmem:[#allocation5 + $0x202c] ss:$36 sps:$4 sm:$0xff]  }
 0x5a9   :  { %13171 = vmatpush1.bf16.msra.mxu0 %v18887_v3  ;;  %v18911_v3 = vld [vmem:[#allocation5 + $0x2028] ss:$36 sps:$4 sm:$0xff]  }
 0x5aa   :  { %13136 = vmatpush1.bf16.msra.mxu1 %v18884_v7  ;;  %13172 = vmatprep.subr.bf16.mxu0 %v18895_v22  ;;  %v18908_v7 = vld [vmem:[#allocation5 + $0x1f08] ss:$36 sps:$4 sm:$0xff]  }
 0x5ab   :  { %13137 = vmatprep.subr.bf16.mxu1 %v18892_v20  ;;  %v18916_v20 = vld [vmem:[#allocation5 + $0x1ec4] ss:$36 sps:$4 sm:$0xff]  }
 0x5ac   :  { %v18919_v22 = vld [vmem:[#allocation5 + $0x1fe4] ss:$36 sps:$4 sm:$0xff]  }
 0x5ad   :  { %13173 = vmatpush1.bf16.msra.mxu0 %v18893_v21  ;;  %v18917_v21 = vld [vmem:[#allocation5 + $0x1fe0] ss:$36 sps:$4 sm:$0xff]  }
 0x5ae   :  { %13138 = vmatpush1.bf16.msra.mxu1 %v18890_v19  ;;  %13174 = vmatprep.subr.bf16.mxu0 %v18901_v6  ;;  %v18914_v19 = vld [vmem:[#allocation5 + $0x1ec0] ss:$36 sps:$4 sm:$0xff]  }
 0x5af   :  { %13139 = vmatprep.subr.bf16.mxu1 %v18898_v13  ;;  %v18922_v13 = vld [vmem:[#allocation5 + $0x1e7c] ss:$36 sps:$4 sm:$0xff]  }
 0x5b0   :  { %v18925_v6 = vld [vmem:[#allocation5 + $0x1f9c] ss:$36 sps:$4 sm:$0xff]  }
 0x5b1   :  { %13175 = vmatpush1.bf16.msra.mxu0 %v18899_v30  ;;  %v18923_v30 = vld [vmem:[#allocation5 + $0x1f98] ss:$36 sps:$4 sm:$0xff]  }
 0x5b2   :  { %13140 = vmatpush1.bf16.msra.mxu1 %v18896_v43  ;;  %13176 = vmatprep.subr.bf16.mxu0 %v18907_v4  ;;  %v18920_v43 = vld [vmem:[#allocation5 + $0x1e78] ss:$36 sps:$4 sm:$0xff]  }
 0x5b3   :  { %13141 = vmatprep.subr.bf16.mxu1 %v18904_v63  ;;  %v18928_v63 = vld [vmem:[#allocation5 + $0x1e34] ss:$36 sps:$4 sm:$0xff]  }
 0x5b4   :  { %v18931_v4 = vld [vmem:[#allocation5 + $0x23d4] ss:$36 sps:$4 sm:$0xff]  }
 0x5b5   :  { %13177 = vmatpush1.bf16.msra.mxu0 %v18905_v8  ;;  %v18929_v8 = vld [vmem:[#allocation5 + $0x23d0] ss:$36 sps:$4 sm:$0xff]  }
 0x5b6   :  { %13142 = vmatpush2.bf16.msra.mxu1 %v18902_v10  ;;  %13178 = vmatprep.subr.bf16.mxu0 %v18913_v17  ;;  %v18926_v10 = vld [vmem:[#allocation5 + $0x1e30] ss:$36 sps:$4 sm:$0xff]  }
 0x5b7   :  { %13143 = vmatprep.subr.bf16.mxu1 %v18910_v16  ;;  %v18934_v16 = vld [vmem:[#allocation5 + $0x1dec] ss:$36 sps:$4 sm:$0xff]  }
 0x5b8   :  { %v18937_v17 = vld [vmem:[#allocation5 + $0x238c] ss:$36 sps:$4 sm:$0xff]  }
 0x5b9   :  { %13179 = vmatpush1.bf16.msra.mxu0 %v18911_v3  ;;  %v18935_v3 = vld [vmem:[#allocation5 + $0x2388] ss:$36 sps:$4 sm:$0xff]  }
 0x5ba   :  { %13144 = vmatpush2.bf16.msra.mxu1 %v18908_v7  ;;  %13180 = vmatprep.subr.bf16.mxu0 %v18919_v22  ;;  %v18932_v7 = vld [vmem:[#allocation5 + $0x1de8] ss:$36 sps:$4 sm:$0xff]  }
 0x5bb   :  { %13145 = vmatprep.subr.bf16.mxu1 %v18916_v20  ;;  %v18940_v20 = vld [vmem:[#allocation5 + $0x1da4] ss:$36 sps:$4 sm:$0xff]  }
 0x5bc   :  { %v18943_v22 = vld [vmem:[#allocation5 + $0x2344] ss:$36 sps:$4 sm:$0xff]  }
 0x5bd   :  { %13181 = vmatpush1.bf16.msra.mxu0 %v18917_v21  ;;  %v18941_v21 = vld [vmem:[#allocation5 + $0x2340] ss:$36 sps:$4 sm:$0xff]  }
 0x5be   :  { %13146 = vmatpush2.bf16.msra.mxu1 %v18914_v19  ;;  %13182 = vmatprep.subr.bf16.mxu0 %v18925_v6  ;;  %v18938_v19 = vld [vmem:[#allocation5 + $0x1da0] ss:$36 sps:$4 sm:$0xff]  }
 0x5bf   :  { %13147 = vmatprep.subr.bf16.mxu1 %v18922_v13  ;;  %v18946_v13 = vld [vmem:[#allocation5 + $0x1d5c] ss:$36 sps:$4 sm:$0xff]  }
 0x5c0   :  { %v18949_v6 = vld [vmem:[#allocation5 + $0x22fc] ss:$36 sps:$4 sm:$0xff]  }
 0x5c1   :  { %13183 = vmatpush1.bf16.msra.mxu0 %v18923_v30  ;;  %v18947_v30 = vld [vmem:[#allocation5 + $0x22f8] ss:$36 sps:$4 sm:$0xff]  }
 0x5c2   :  { %13148 = vmatpush2.bf16.msra.mxu1 %v18920_v43  ;;  %13184 = vmatprep.subr.bf16.mxu0 %v18931_v4  ;;  %v18944_v43 = vld [vmem:[#allocation5 + $0x1d58] ss:$36 sps:$4 sm:$0xff]  }
 0x5c3   :  { %13149 = vmatprep.subr.bf16.mxu1 %v18928_v63  ;;  %v18952_v63 = vld [vmem:[#allocation5 + $0x22b4] ss:$36 sps:$4 sm:$0xff]  }
 0x5c4   :  { %v18955_v4 = vld [vmem:[#allocation5 + $0x2614] ss:$36 sps:$4 sm:$0xff]  }
 0x5c5   :  { %13185 = vmatpush2.bf16.msra.mxu0 %v18929_v8  ;;  %v18953_v8 = vld [vmem:[#allocation5 + $0x2610] ss:$36 sps:$4 sm:$0xff]  }
 0x5c6   :  { %13150 = vmatpush2.bf16.msra.mxu1 %v18926_v10  ;;  %13186 = vmatprep.subr.bf16.mxu0 %v18937_v17  ;;  %v18950_v10 = vld [vmem:[#allocation5 + $0x22b0] ss:$36 sps:$4 sm:$0xff]  }
 0x5c7   :  { %13151 = vmatprep.subr.bf16.mxu1 %v18934_v16  ;;  %v18958_v16 = vld [vmem:[#allocation5 + $0x226c] ss:$36 sps:$4 sm:$0xff]  }
 0x5c8   :  { %v18961_v17 = vld [vmem:[#allocation5 + $0x25cc] ss:$36 sps:$4 sm:$0xff]  }
 0x5c9   :  { %13187 = vmatpush2.bf16.msra.mxu0 %v18935_v3  ;;  %v18959_v3 = vld [vmem:[#allocation5 + $0x25c8] ss:$36 sps:$4 sm:$0xff]  }
 0x5ca   :  { %13152 = vmatpush2.bf16.msra.mxu1 %v18932_v7  ;;  %13188 = vmatprep.subr.bf16.mxu0 %v18943_v22  ;;  %v18956_v7 = vld [vmem:[#allocation5 + $0x2268] ss:$36 sps:$4 sm:$0xff]  }
 0x5cb   :  { %13153 = vmatprep.subr.bf16.mxu1 %v18940_v20  ;;  %v18964_v20 = vld [vmem:[#allocation5 + $0x2224] ss:$36 sps:$4 sm:$0xff]  }
 0x5cc   :  { %v18967_v22 = vld [vmem:[#allocation5 + $0x2584] ss:$36 sps:$4 sm:$0xff]  }
 0x5cd   :  { %13189 = vmatpush2.bf16.msra.mxu0 %v18941_v21  ;;  %v18965_v21 = vld [vmem:[#allocation5 + $0x2580] ss:$36 sps:$4 sm:$0xff]  }
 0x5ce   :  { %13154 = vmatpush2.bf16.msra.mxu1 %v18938_v19  ;;  %13190 = vmatprep.subr.bf16.mxu0 %v18949_v6  ;;  %v18962_v19 = vld [vmem:[#allocation5 + $0x2220] ss:$36 sps:$4 sm:$0xff]  }
 0x5cf   :  { %13155 = vmatprep.subr.bf16.mxu1 %v18946_v13  ;;  %v18970_v13 = vld [vmem:[#allocation5 + $0x21dc] ss:$36 sps:$4 sm:$0xff]  }
 0x5d0   :  { %v18973_v6 = vld [vmem:[#allocation5 + $0x253c] ss:$36 sps:$4 sm:$0xff]  }
 0x5d1   :  { %13191 = vmatpush2.bf16.msra.mxu0 %v18947_v30  ;;  %v18971_v30 = vld [vmem:[#allocation5 + $0x2538] ss:$36 sps:$4 sm:$0xff]  }
 0x5d2   :  { %13156 = vmatpush2.bf16.msra.mxu1 %v18944_v43  ;;  %13192 = vmatprep.subr.bf16.mxu0 %v18952_v63  ;;  %v18968_v43 = vld [vmem:[#allocation5 + $0x21d8] ss:$36 sps:$4 sm:$0xff]  }
 0x5d3   :  { %13211 = vmatprep.subr.bf16.mxu1 %v18955_v4  ;;  %v18976_v63 = vld [vmem:[#allocation5 + $0x24f4] ss:$36 sps:$4 sm:$0xff]  }
 0x5d4   :  { %v18979_v4 = vld [vmem:[#allocation5 + $0x2a94] ss:$36 sps:$4 sm:$0xff]  }
 0x5d5   :  { %13158 = vmatmul.mubr.bf16.vlgmr.msra.gmra.mxu1 %v19610_v27  ;;  %13193 = vmatpush2.bf16.msra.mxu0 %v18950_v10  ;;  %v18974_v10 = vld [vmem:[#allocation5 + $0x24f0] ss:$36 sps:$4 sm:$0xff]  }
 0x5d6   :  { %13212 = vmatpush1.bf16.msra.mxu1 %v18953_v8  ;;  %13194 = vmatprep.subr.bf16.mxu0 %v18958_v16  ;;  %v18977_v8 = vld [vmem:[#allocation5 + $0x2a90] ss:$36 sps:$4 sm:$0xff]  }
 0x5d7   :  { %13213 = vmatprep.subr.bf16.mxu1 %v18961_v17  ;;  %13243 = vmatprep.mubr.bf16.mxu1 %v19616_v37  ;;  %v18982_v16 = vld [vmem:[#allocation5 + $0x24ac] ss:$36 sps:$4 sm:$0xff]  }
 0x5d8   :  { %v18985_v17 = vld [vmem:[#allocation5 + $0x2a4c] ss:$36 sps:$4 sm:$0xff]  }
 0x5d9   :  { %13195 = vmatpush2.bf16.msra.mxu0 %v18956_v7  ;;  %v18980_v7 = vld [vmem:[#allocation5 + $0x24a8] ss:$36 sps:$4 sm:$0xff]  }
 0x5da   :  { %13214 = vmatpush1.bf16.msra.mxu1 %v18959_v3  ;;  %13196 = vmatprep.subr.bf16.mxu0 %v18964_v20  ;;  %v18983_v3 = vld [vmem:[#allocation5 + $0x2a48] ss:$36 sps:$4 sm:$0xff]  }
 0x5db   :  { %13215 = vmatprep.subr.bf16.mxu1 %v18967_v22  ;;  %v18988_v20 = vld [vmem:[#allocation5 + $0x2464] ss:$36 sps:$4 sm:$0xff]  }
 0x5dc   :  { %v18991_v22 = vld [vmem:[#allocation5 + $0x2a04] ss:$36 sps:$4 sm:$0xff]  }
 0x5dd   :  { %13197 = vmatpush2.bf16.msra.mxu0 %v18962_v19  ;;  %v18986_v19 = vld [vmem:[#allocation5 + $0x2460] ss:$36 sps:$4 sm:$0xff]  }
 0x5de   :  { %13216 = vmatpush1.bf16.msra.mxu1 %v18965_v21  ;;  %13198 = vmatprep.subr.bf16.mxu0 %v18970_v13  ;;  %v18989_v21 = vld [vmem:[#allocation5 + $0x2a00] ss:$36 sps:$4 sm:$0xff]  }
 0x5df   :  { %13217 = vmatprep.subr.bf16.mxu1 %v18973_v6  ;;  %v18994_v13 = vld [vmem:[#allocation5 + $0x241c] ss:$36 sps:$4 sm:$0xff]  }
 0x5e0   :  { %v18997_v6 = vld [vmem:[#allocation5 + $0x29bc] ss:$36 sps:$4 sm:$0xff]  }
 0x5e1   :  { %13199 = vmatpush2.bf16.msra.mxu0 %v18968_v43  ;;  %v18992_v43 = vld [vmem:[#allocation5 + $0x2418] ss:$36 sps:$4 sm:$0xff]  }
 0x5e2   :  { %13218 = vmatpush1.bf16.msra.mxu1 %v18971_v30  ;;  %13254 = vmatprep.subr.bf16.mxu0 %v18979_v4  ;;  %v18995_v30 = vld [vmem:[#allocation5 + $0x29b8] ss:$36 sps:$4 sm:$0xff]  }
 0x5e3   :  { %13219 = vmatprep.subr.bf16.mxu1 %v18976_v63  ;;  %v19000_v63 = vld [vmem:[#allocation5 + $0x2854] ss:$36 sps:$4 sm:$0xff]  }
 0x5e4   :  { %13201 = vmatmul.mubr.bf16.vlgmr.msra.gmra.mxu0 %v19612_v29  ;;  %v19003_v4 = vld [vmem:[#allocation5 + $0x2974] ss:$36 sps:$4 sm:$0xff]  }
 0x5e5   :  { %13255 = vmatpush1.bf16.msra.mxu0 %v18977_v8  ;;  %13286 = vmatprep.mubr.bf16.mxu0 %v19618_v38  ;;  %v19001_v8 = vld [vmem:[#allocation5 + $0x2970] ss:$36 sps:$4 sm:$0xff]  }
 0x5e6   :  { %13220 = vmatpush1.bf16.msra.mxu1 %v18974_v10  ;;  %13256 = vmatprep.subr.bf16.mxu0 %v18985_v17  ;;  %v18998_v10 = vld [vmem:[#allocation5 + $0x2850] ss:$36 sps:$4 sm:$0xff]  }
 0x5e7   :  { %13221 = vmatprep.subr.bf16.mxu1 %v18982_v16  ;;  %v19006_v16 = vld [vmem:[#allocation5 + $0x280c] ss:$36 sps:$4 sm:$0xff]  }
 0x5e8   :  { %v19009_v17 = vld [vmem:[#allocation5 + $0x292c] ss:$36 sps:$4 sm:$0xff]  }
 0x5e9   :  { %13257 = vmatpush1.bf16.msra.mxu0 %v18983_v3  ;;  %v19007_v3 = vld [vmem:[#allocation5 + $0x2928] ss:$36 sps:$4 sm:$0xff]  }
 0x5ea   :  { %13222 = vmatpush1.bf16.msra.mxu1 %v18980_v7  ;;  %13258 = vmatprep.subr.bf16.mxu0 %v18991_v22  ;;  %v19004_v7 = vld [vmem:[#allocation5 + $0x2808] ss:$36 sps:$4 sm:$0xff]  }
 0x5eb   :  { %13223 = vmatprep.subr.bf16.mxu1 %v18988_v20  ;;  %v19012_v20 = vld [vmem:[#allocation5 + $0x27c4] ss:$36 sps:$4 sm:$0xff]  }
 0x5ec   :  { %v19015_v22 = vld [vmem:[#allocation5 + $0x28e4] ss:$36 sps:$4 sm:$0xff]  }
 0x5ed   :  { %13259 = vmatpush1.bf16.msra.mxu0 %v18989_v21  ;;  %v19013_v21 = vld [vmem:[#allocation5 + $0x28e0] ss:$36 sps:$4 sm:$0xff]  }
 0x5ee   :  { %13224 = vmatpush1.bf16.msra.mxu1 %v18986_v19  ;;  %13260 = vmatprep.subr.bf16.mxu0 %v18997_v6  ;;  %v19010_v19 = vld [vmem:[#allocation5 + $0x27c0] ss:$36 sps:$4 sm:$0xff]  }
 0x5ef   :  { %13225 = vmatprep.subr.bf16.mxu1 %v18994_v13  ;;  %v19018_v13 = vld [vmem:[#allocation5 + $0x277c] ss:$36 sps:$4 sm:$0xff]  }
 0x5f0   :  { %v19021_v6 = vld [vmem:[#allocation5 + $0x289c] ss:$36 sps:$4 sm:$0xff]  }
 0x5f1   :  { %13261 = vmatpush1.bf16.msra.mxu0 %v18995_v30  ;;  %v19019_v30 = vld [vmem:[#allocation5 + $0x2898] ss:$36 sps:$4 sm:$0xff]  }
 0x5f2   :  { %13226 = vmatpush1.bf16.msra.mxu1 %v18992_v43  ;;  %13262 = vmatprep.subr.bf16.mxu0 %v19003_v4  ;;  %v19016_v43 = vld [vmem:[#allocation5 + $0x2778] ss:$36 sps:$4 sm:$0xff]  }
 0x5f3   :  { %13227 = vmatprep.subr.bf16.mxu1 %v19000_v63  ;;  %v19024_v63 = vld [vmem:[#allocation5 + $0x2734] ss:$36 sps:$4 sm:$0xff]  }
 0x5f4   :  { %v19027_v4 = vld [vmem:[#allocation5 + $0x2cd4] ss:$36 sps:$4 sm:$0xff]  }
 0x5f5   :  { %13263 = vmatpush1.bf16.msra.mxu0 %v19001_v8  ;;  %v19025_v8 = vld [vmem:[#allocation5 + $0x2cd0] ss:$36 sps:$4 sm:$0xff]  }
 0x5f6   :  { %13228 = vmatpush2.bf16.msra.mxu1 %v18998_v10  ;;  %13264 = vmatprep.subr.bf16.mxu0 %v19009_v17  ;;  %v19022_v10 = vld [vmem:[#allocation5 + $0x2730] ss:$36 sps:$4 sm:$0xff]  }
 0x5f7   :  { %13229 = vmatprep.subr.bf16.mxu1 %v19006_v16  ;;  %v19030_v16 = vld [vmem:[#allocation5 + $0x26ec] ss:$36 sps:$4 sm:$0xff]  }
 0x5f8   :  { %v19033_v17 = vld [vmem:[#allocation5 + $0x2c8c] ss:$36 sps:$4 sm:$0xff]  }
 0x5f9   :  { %13265 = vmatpush1.bf16.msra.mxu0 %v19007_v3  ;;  %v19031_v3 = vld [vmem:[#allocation5 + $0x2c88] ss:$36 sps:$4 sm:$0xff]  }
 0x5fa   :  { %13230 = vmatpush2.bf16.msra.mxu1 %v19004_v7  ;;  %13266 = vmatprep.subr.bf16.mxu0 %v19015_v22  ;;  %v19028_v7 = vld [vmem:[#allocation5 + $0x26e8] ss:$36 sps:$4 sm:$0xff]  }
 0x5fb   :  { %13231 = vmatprep.subr.bf16.mxu1 %v19012_v20  ;;  %v19036_v20 = vld [vmem:[#allocation5 + $0x26a4] ss:$36 sps:$4 sm:$0xff]  }
 0x5fc   :  { %v19039_v22 = vld [vmem:[#allocation5 + $0x2c44] ss:$36 sps:$4 sm:$0xff]  }
 0x5fd   :  { %13267 = vmatpush1.bf16.msra.mxu0 %v19013_v21  ;;  %v19037_v21 = vld [vmem:[#allocation5 + $0x2c40] ss:$36 sps:$4 sm:$0xff]  }
 0x5fe   :  { %13232 = vmatpush2.bf16.msra.mxu1 %v19010_v19  ;;  %13268 = vmatprep.subr.bf16.mxu0 %v19021_v6  ;;  %v19034_v19 = vld [vmem:[#allocation5 + $0x26a0] ss:$36 sps:$4 sm:$0xff]  }
 0x5ff   :  { %13233 = vmatprep.subr.bf16.mxu1 %v19018_v13  ;;  %v19042_v13 = vld [vmem:[#allocation5 + $0x265c] ss:$36 sps:$4 sm:$0xff]  }
 0x600   :  { %v19045_v6 = vld [vmem:[#allocation5 + $0x2bfc] ss:$36 sps:$4 sm:$0xff]  }
 0x601   :  { %13269 = vmatpush1.bf16.msra.mxu0 %v19019_v30  ;;  %v19043_v30 = vld [vmem:[#allocation5 + $0x2bf8] ss:$36 sps:$4 sm:$0xff]  }
 0x602   :  { %13234 = vmatpush2.bf16.msra.mxu1 %v19016_v43  ;;  %13270 = vmatprep.subr.bf16.mxu0 %v19027_v4  ;;  %v19040_v43 = vld [vmem:[#allocation5 + $0x2658] ss:$36 sps:$4 sm:$0xff]  }
 0x603   :  { %13235 = vmatprep.subr.bf16.mxu1 %v19024_v63  ;;  %v19048_v63 = vld [vmem:[#allocation5 + $0x2bb4] ss:$36 sps:$4 sm:$0xff]  }
 0x604   :  { %v19051_v4 = vld [vmem:[#allocation5 + $0x2f14] ss:$36 sps:$4 sm:$0xff]  }
 0x605   :  { %13271 = vmatpush2.bf16.msra.mxu0 %v19025_v8  ;;  %v19049_v8 = vld [vmem:[#allocation5 + $0x2f10] ss:$36 sps:$4 sm:$0xff]  }
 0x606   :  { %13236 = vmatpush2.bf16.msra.mxu1 %v19022_v10  ;;  %13272 = vmatprep.subr.bf16.mxu0 %v19033_v17  ;;  %v19046_v10 = vld [vmem:[#allocation5 + $0x2bb0] ss:$36 sps:$4 sm:$0xff]  }
 0x607   :  { %13237 = vmatprep.subr.bf16.mxu1 %v19030_v16  ;;  %v19054_v16 = vld [vmem:[#allocation5 + $0x2b6c] ss:$36 sps:$4 sm:$0xff]  }
 0x608   :  { %v19057_v17 = vld [vmem:[#allocation5 + $0x2ecc] ss:$36 sps:$4 sm:$0xff]  }
 0x609   :  { %13273 = vmatpush2.bf16.msra.mxu0 %v19031_v3  ;;  %v19055_v3 = vld [vmem:[#allocation5 + $0x2ec8] ss:$36 sps:$4 sm:$0xff]  }
 0x60a   :  { %13238 = vmatpush2.bf16.msra.mxu1 %v19028_v7  ;;  %13274 = vmatprep.subr.bf16.mxu0 %v19039_v22  ;;  %v19052_v7 = vld [vmem:[#allocation5 + $0x2b68] ss:$36 sps:$4 sm:$0xff]  }
 0x60b   :  { %13239 = vmatprep.subr.bf16.mxu1 %v19036_v20  ;;  %v19060_v20 = vld [vmem:[#allocation5 + $0x2b24] ss:$36 sps:$4 sm:$0xff]  }
 0x60c   :  { %v19063_v22 = vld [vmem:[#allocation5 + $0x2e84] ss:$36 sps:$4 sm:$0xff]  }
 0x60d   :  { %13275 = vmatpush2.bf16.msra.mxu0 %v19037_v21  ;;  %v19061_v21 = vld [vmem:[#allocation5 + $0x2e80] ss:$36 sps:$4 sm:$0xff]  }
 0x60e   :  { %13240 = vmatpush2.bf16.msra.mxu1 %v19034_v19  ;;  %13276 = vmatprep.subr.bf16.mxu0 %v19045_v6  ;;  %v19058_v19 = vld [vmem:[#allocation5 + $0x2b20] ss:$36 sps:$4 sm:$0xff]  }
 0x60f   :  { %13241 = vmatprep.subr.bf16.mxu1 %v19042_v13  ;;  %v19066_v13 = vld [vmem:[#allocation5 + $0x2adc] ss:$36 sps:$4 sm:$0xff]  }
 0x610   :  { %v19069_v6 = vld [vmem:[#allocation5 + $0x2e3c] ss:$36 sps:$4 sm:$0xff]  }
 0x611   :  { %13277 = vmatpush2.bf16.msra.mxu0 %v19043_v30  ;;  %v19067_v30 = vld [vmem:[#allocation5 + $0x2e38] ss:$36 sps:$4 sm:$0xff]  }
 0x612   :  { %13242 = vmatpush2.bf16.msra.mxu1 %v19040_v43  ;;  %13278 = vmatprep.subr.bf16.mxu0 %v19048_v63  ;;  %v19064_v43 = vld [vmem:[#allocation5 + $0x2ad8] ss:$36 sps:$4 sm:$0xff]  }
 0x613   :  { %13297 = vmatprep.subr.bf16.mxu1 %v19051_v4  ;;  %v19072_v63 = vld [vmem:[#allocation5 + $0x2df4] ss:$36 sps:$4 sm:$0xff]  }
 0x614   :  { %v19075_v4 = vld [vmem:[#allocation5 + $0x3394] ss:$36 sps:$4 sm:$0xff]  }
 0x615   :  { %13244 = vmatmul.mubr.bf16.vlgmr.msra.gmra.mxu1 %v19631_v33  ;;  %13279 = vmatpush2.bf16.msra.mxu0 %v19046_v10  ;;  %v19070_v10 = vld [vmem:[#allocation5 + $0x2df0] ss:$36 sps:$4 sm:$0xff]  }
 0x616   :  { %13298 = vmatpush1.bf16.msra.mxu1 %v19049_v8  ;;  %13280 = vmatprep.subr.bf16.mxu0 %v19054_v16  ;;  %v19073_v8 = vld [vmem:[#allocation5 + $0x3390] ss:$36 sps:$4 sm:$0xff]  }
 0x617   :  { %13299 = vmatprep.subr.bf16.mxu1 %v19057_v17  ;;  %13329 = vmatprep.mubr.bf16.mxu1 %v19639_v48  ;;  %v19078_v16 = vld [vmem:[#allocation5 + $0x2dac] ss:$36 sps:$4 sm:$0xff]  }
 0x618   :  { %v19081_v17 = vld [vmem:[#allocation5 + $0x334c] ss:$36 sps:$4 sm:$0xff]  }
 0x619   :  { %13281 = vmatpush2.bf16.msra.mxu0 %v19052_v7  ;;  %v19076_v7 = vld [vmem:[#allocation5 + $0x2da8] ss:$36 sps:$4 sm:$0xff]  }
 0x61a   :  { %13300 = vmatpush1.bf16.msra.mxu1 %v19055_v3  ;;  %13282 = vmatprep.subr.bf16.mxu0 %v19060_v20  ;;  %v19079_v3 = vld [vmem:[#allocation5 + $0x3348] ss:$36 sps:$4 sm:$0xff]  }
 0x61b   :  { %13301 = vmatprep.subr.bf16.mxu1 %v19063_v22  ;;  %v19084_v20 = vld [vmem:[#allocation5 + $0x2d64] ss:$36 sps:$4 sm:$0xff]  }
 0x61c   :  { %v19087_v22 = vld [vmem:[#allocation5 + $0x3304] ss:$36 sps:$4 sm:$0xff]  }
 0x61d   :  { %13283 = vmatpush2.bf16.msra.mxu0 %v19058_v19  ;;  %v19082_v19 = vld [vmem:[#allocation5 + $0x2d60] ss:$36 sps:$4 sm:$0xff]  }
 0x61e   :  { %13302 = vmatpush1.bf16.msra.mxu1 %v19061_v21  ;;  %13284 = vmatprep.subr.bf16.mxu0 %v19066_v13  ;;  %v19085_v21 = vld [vmem:[#allocation5 + $0x3300] ss:$36 sps:$4 sm:$0xff]  }
 0x61f   :  { %13303 = vmatprep.subr.bf16.mxu1 %v19069_v6  ;;  %v19090_v13 = vld [vmem:[#allocation5 + $0x2d1c] ss:$36 sps:$4 sm:$0xff]  }
 0x620   :  { %v19093_v6 = vld [vmem:[#allocation5 + $0x32bc] ss:$36 sps:$4 sm:$0xff]  }
 0x621   :  { %13285 = vmatpush2.bf16.msra.mxu0 %v19064_v43  ;;  %v19088_v43 = vld [vmem:[#allocation5 + $0x2d18] ss:$36 sps:$4 sm:$0xff]  }
 0x622   :  { %13304 = vmatpush1.bf16.msra.mxu1 %v19067_v30  ;;  %13340 = vmatprep.subr.bf16.mxu0 %v19075_v4  ;;  %v19091_v30 = vld [vmem:[#allocation5 + $0x32b8] ss:$36 sps:$4 sm:$0xff]  }
 0x623   :  { %13305 = vmatprep.subr.bf16.mxu1 %v19072_v63  ;;  %v19096_v63 = vld [vmem:[#allocation5 + $0x3154] ss:$36 sps:$4 sm:$0xff]  }
 0x624   :  { %13287 = vmatmul.mubr.bf16.vlgmr.msra.gmra.mxu0 %v19633_v34  ;;  %v19099_v4 = vld [vmem:[#allocation5 + $0x3274] ss:$36 sps:$4 sm:$0xff]  }
 0x625   :  { %13341 = vmatpush1.bf16.msra.mxu0 %v19073_v8  ;;  %13372 = vmatprep.mubr.bf16.mxu0 %v19641_v49  ;;  %v19097_v8 = vld [vmem:[#allocation5 + $0x3270] ss:$36 sps:$4 sm:$0xff]  }
 0x626   :  { %13306 = vmatpush1.bf16.msra.mxu1 %v19070_v10  ;;  %13342 = vmatprep.subr.bf16.mxu0 %v19081_v17  ;;  %v19094_v10 = vld [vmem:[#allocation5 + $0x3150] ss:$36 sps:$4 sm:$0xff]  }
 0x627   :  { %13307 = vmatprep.subr.bf16.mxu1 %v19078_v16  ;;  %v19102_v16 = vld [vmem:[#allocation5 + $0x310c] ss:$36 sps:$4 sm:$0xff]  }
 0x628   :  { %v19105_v17 = vld [vmem:[#allocation5 + $0x322c] ss:$36 sps:$4 sm:$0xff]  }
 0x629   :  { %13343 = vmatpush1.bf16.msra.mxu0 %v19079_v3  ;;  %v19103_v3 = vld [vmem:[#allocation5 + $0x3228] ss:$36 sps:$4 sm:$0xff]  }
 0x62a   :  { %13308 = vmatpush1.bf16.msra.mxu1 %v19076_v7  ;;  %13344 = vmatprep.subr.bf16.mxu0 %v19087_v22  ;;  %v19100_v7 = vld [vmem:[#allocation5 + $0x3108] ss:$36 sps:$4 sm:$0xff]  }
 0x62b   :  { %13309 = vmatprep.subr.bf16.mxu1 %v19084_v20  ;;  %v19108_v20 = vld [vmem:[#allocation5 + $0x30c4] ss:$36 sps:$4 sm:$0xff]  }
 0x62c   :  { %v19111_v22 = vld [vmem:[#allocation5 + $0x31e4] ss:$36 sps:$4 sm:$0xff]  }
 0x62d   :  { %13345 = vmatpush1.bf16.msra.mxu0 %v19085_v21  ;;  %v19109_v21 = vld [vmem:[#allocation5 + $0x31e0] ss:$36 sps:$4 sm:$0xff]  }
 0x62e   :  { %13310 = vmatpush1.bf16.msra.mxu1 %v19082_v19  ;;  %13346 = vmatprep.subr.bf16.mxu0 %v19093_v6  ;;  %v19106_v19 = vld [vmem:[#allocation5 + $0x30c0] ss:$36 sps:$4 sm:$0xff]  }
 0x62f   :  { %13311 = vmatprep.subr.bf16.mxu1 %v19090_v13  ;;  %v19114_v13 = vld [vmem:[#allocation5 + $0x307c] ss:$36 sps:$4 sm:$0xff]  }
 0x630   :  { %v19117_v6 = vld [vmem:[#allocation5 + $0x319c] ss:$36 sps:$4 sm:$0xff]  }
 0x631   :  { %13347 = vmatpush1.bf16.msra.mxu0 %v19091_v30  ;;  %v19115_v30 = vld [vmem:[#allocation5 + $0x3198] ss:$36 sps:$4 sm:$0xff]  }
 0x632   :  { %13312 = vmatpush1.bf16.msra.mxu1 %v19088_v43  ;;  %13348 = vmatprep.subr.bf16.mxu0 %v19099_v4  ;;  %v19112_v43 = vld [vmem:[#allocation5 + $0x3078] ss:$36 sps:$4 sm:$0xff]  }
 0x633   :  { %13313 = vmatprep.subr.bf16.mxu1 %v19096_v63  ;;  %v19120_v63 = vld [vmem:[#allocation5 + $0x3034] ss:$36 sps:$4 sm:$0xff]  }
 0x634   :  { %v19123_v4 = vld [vmem:[#allocation5 + $0x35d4] ss:$36 sps:$4 sm:$0xff]  }
 0x635   :  { %13349 = vmatpush1.bf16.msra.mxu0 %v19097_v8  ;;  %v19121_v8 = vld [vmem:[#allocation5 + $0x35d0] ss:$36 sps:$4 sm:$0xff]  }
 0x636   :  { %13314 = vmatpush2.bf16.msra.mxu1 %v19094_v10  ;;  %13350 = vmatprep.subr.bf16.mxu0 %v19105_v17  ;;  %v19118_v10 = vld [vmem:[#allocation5 + $0x3030] ss:$36 sps:$4 sm:$0xff]  }
 0x637   :  { %13315 = vmatprep.subr.bf16.mxu1 %v19102_v16  ;;  %v19126_v16 = vld [vmem:[#allocation5 + $0x2fec] ss:$36 sps:$4 sm:$0xff]  }
 0x638   :  { %v19129_v17 = vld [vmem:[#allocation5 + $0x358c] ss:$36 sps:$4 sm:$0xff]  }
 0x639   :  { %13351 = vmatpush1.bf16.msra.mxu0 %v19103_v3  ;;  %v19127_v3 = vld [vmem:[#allocation5 + $0x3588] ss:$36 sps:$4 sm:$0xff]  }
 0x63a   :  { %13316 = vmatpush2.bf16.msra.mxu1 %v19100_v7  ;;  %13352 = vmatprep.subr.bf16.mxu0 %v19111_v22  ;;  %v19124_v7 = vld [vmem:[#allocation5 + $0x2fe8] ss:$36 sps:$4 sm:$0xff]  }
 0x63b   :  { %13317 = vmatprep.subr.bf16.mxu1 %v19108_v20  ;;  %v19132_v20 = vld [vmem:[#allocation5 + $0x2fa4] ss:$36 sps:$4 sm:$0xff]  }
 0x63c   :  { %v19135_v22 = vld [vmem:[#allocation5 + $0x3544] ss:$36 sps:$4 sm:$0xff]  }
 0x63d   :  { %13353 = vmatpush1.bf16.msra.mxu0 %v19109_v21  ;;  %v19133_v21 = vld [vmem:[#allocation5 + $0x3540] ss:$36 sps:$4 sm:$0xff]  }
 0x63e   :  { %13318 = vmatpush2.bf16.msra.mxu1 %v19106_v19  ;;  %13354 = vmatprep.subr.bf16.mxu0 %v19117_v6  ;;  %v19130_v19 = vld [vmem:[#allocation5 + $0x2fa0] ss:$36 sps:$4 sm:$0xff]  }
 0x63f   :  { %13319 = vmatprep.subr.bf16.mxu1 %v19114_v13  ;;  %v19138_v13 = vld [vmem:[#allocation5 + $0x2f5c] ss:$36 sps:$4 sm:$0xff]  }
 0x640   :  { %v19141_v6 = vld [vmem:[#allocation5 + $0x34fc] ss:$36 sps:$4 sm:$0xff]  }
 0x641   :  { %13355 = vmatpush1.bf16.msra.mxu0 %v19115_v30  ;;  %v19139_v30 = vld [vmem:[#allocation5 + $0x34f8] ss:$36 sps:$4 sm:$0xff]  }
 0x642   :  { %13320 = vmatpush2.bf16.msra.mxu1 %v19112_v43  ;;  %13356 = vmatprep.subr.bf16.mxu0 %v19123_v4  ;;  %v19136_v43 = vld [vmem:[#allocation5 + $0x2f58] ss:$36 sps:$4 sm:$0xff]  }
 0x643   :  { %13321 = vmatprep.subr.bf16.mxu1 %v19120_v63  ;;  %v19144_v63 = vld [vmem:[#allocation5 + $0x34b4] ss:$36 sps:$4 sm:$0xff]  }
 0x644   :  { %v19147_v4 = vld [vmem:[#allocation5 + $0x36f4] ss:$36 sps:$4 sm:$0xff]  }
 0x645   :  { %13357 = vmatpush2.bf16.msra.mxu0 %v19121_v8  ;;  %v19145_v8 = vld [vmem:[#allocation5 + $0x36f0] ss:$36 sps:$4 sm:$0xff]  }
 0x646   :  { %13322 = vmatpush2.bf16.msra.mxu1 %v19118_v10  ;;  %13358 = vmatprep.subr.bf16.mxu0 %v19129_v17  ;;  %v19142_v10 = vld [vmem:[#allocation5 + $0x34b0] ss:$36 sps:$4 sm:$0xff]  }
 0x647   :  { %13323 = vmatprep.subr.bf16.mxu1 %v19126_v16  ;;  %v19150_v16 = vld [vmem:[#allocation5 + $0x346c] ss:$36 sps:$4 sm:$0xff]  }
 0x648   :  { %v19153_v17 = vld [vmem:[#allocation5 + $0x36ac] ss:$36 sps:$4 sm:$0xff]  }
 0x649   :  { %13359 = vmatpush2.bf16.msra.mxu0 %v19127_v3  ;;  %v19151_v3 = vld [vmem:[#allocation5 + $0x36a8] ss:$36 sps:$4 sm:$0xff]  }
 0x64a   :  { %13324 = vmatpush2.bf16.msra.mxu1 %v19124_v7  ;;  %13360 = vmatprep.subr.bf16.mxu0 %v19135_v22  ;;  %v19148_v7 = vld [vmem:[#allocation5 + $0x3468] ss:$36 sps:$4 sm:$0xff]  }
 0x64b   :  { %13325 = vmatprep.subr.bf16.mxu1 %v19132_v20  ;;  %v19156_v20 = vld [vmem:[#allocation5 + $0x3424] ss:$36 sps:$4 sm:$0xff]  }
 0x64c   :  { %v19159_v22 = vld [vmem:[#allocation5 + $0x3664] ss:$36 sps:$4 sm:$0xff]  }
 0x64d   :  { %13361 = vmatpush2.bf16.msra.mxu0 %v19133_v21  ;;  %v19157_v21 = vld [vmem:[#allocation5 + $0x3660] ss:$36 sps:$4 sm:$0xff]  }
 0x64e   :  { %13326 = vmatpush2.bf16.msra.mxu1 %v19130_v19  ;;  %13362 = vmatprep.subr.bf16.mxu0 %v19141_v6  ;;  %v19154_v19 = vld [vmem:[#allocation5 + $0x3420] ss:$36 sps:$4 sm:$0xff]  }
 0x64f   :  { %13327 = vmatprep.subr.bf16.mxu1 %v19138_v13  ;;  %v19162_v13 = vld [vmem:[#allocation5 + $0x33dc] ss:$36 sps:$4 sm:$0xff]  }
 0x650   :  { %v19165_v6 = vld [vmem:[#allocation5 + $0x361c] ss:$36 sps:$4 sm:$0xff]  }
 0x651   :  { %13363 = vmatpush2.bf16.msra.mxu0 %v19139_v30  ;;  %v19163_v30 = vld [vmem:[#allocation5 + $0x3618] ss:$36 sps:$4 sm:$0xff]  }
 0x652   :  { %13328 = vmatpush2.bf16.msra.mxu1 %v19136_v43  ;;  %13364 = vmatprep.subr.bf16.mxu0 %v19144_v63  ;;  %v19160_v43 = vld [vmem:[#allocation5 + $0x33d8] ss:$36 sps:$4 sm:$0xff]  }
 0x653   :  { %13391 = vmatprep.subr.bf16.mxu1 %v19147_v4  ;;  %v19166_v63 = vld [vmem:[#allocation5 + $0x458] ss:$36 sps:$4 sm:$0xff]  }
 0x654   :  { %v19167_v4 = vld [vmem:[#allocation5 + $0x8d8] ss:$36 sps:$4 sm:$0xff]  }
 0x655   :  { %13330 = vmatmul.mubr.bf16.vlgmr.msra.gmra.mxu1 %v19656_v56  ;;  %13365 = vmatpush2.bf16.msra.mxu0 %v19142_v10  ;;  %v19168_v10 = vld [vmem:[#allocation5 + $0x218] ss:$36 sps:$4 sm:$0xff]  }
 0x656   :  { %13392 = vmatpush1.bf16.msra.mxu1 %v19145_v8  ;;  %13366 = vmatprep.subr.bf16.mxu0 %v19150_v16  ;;  %v19170_v8 = vld [vmem:[#allocation5 + $0x410] ss:$36 sps:$4 sm:$0xff]  }
 0x657   :  { %13393 = vmatprep.subr.bf16.mxu1 %v19153_v17  ;;  %13415 = vmatprep.mubr.bf16.mxu1 %v20220_v2  ;;  %v19169_v2 = vld [vmem:[#allocation5 + $0x698] ss:$36 sps:$4 sm:$0xff]   ;;  %v19171_v16 = vld [vmem:[#allocation5 + $0x890] ss:$36 sps:$4 sm:$0xff]  }
 0x658   :  { %v19172_v17 = vld [vmem:[#allocation5 + $0x1d0] ss:$36 sps:$4 sm:$0xff]  }
 0x659   :  { %13367 = vmatpush2.bf16.msra.mxu0 %v19148_v7  ;;  %v19173_v7 = vld [vmem:[#allocation5 + $0x650] ss:$36 sps:$4 sm:$0xff]  }
 0x65a   :  { %13394 = vmatpush1.bf16.msra.mxu1 %v19151_v3  ;;  %13368 = vmatprep.subr.bf16.mxu0 %v19156_v20  ;;  %v19174_v3 = vld [vmem:[#allocation5 + $0x3c8] ss:$36 sps:$4 sm:$0xff]  }
 0x65b   :  { %13395 = vmatprep.subr.bf16.mxu1 %v19159_v22  ;;  %v19175_v20 = vld [vmem:[#allocation5 + $0x848] ss:$36 sps:$4 sm:$0xff]  }
 0x65c   :  { %v19176_v22 = vld [vmem:[#allocation5 + $0x188] ss:$36 sps:$4 sm:$0xff]  }
 0x65d   :  { %13369 = vmatpush2.bf16.msra.mxu0 %v19154_v19  ;;  %v19177_v19 = vld [vmem:[#allocation5 + $0x608] ss:$36 sps:$4 sm:$0xff]  }
 0x65e   :  { %13396 = vmatpush1.bf16.msra.mxu1 %v19157_v21  ;;  %13370 = vmatprep.subr.bf16.mxu0 %v19162_v13  ;;  %v19178_v21 = vld [vmem:[#allocation5 + $0x380] ss:$36 sps:$4 sm:$0xff]  }
 0x65f   :  { %13397 = vmatprep.subr.bf16.mxu1 %v19165_v6  ;;  %v19179_v13 = vld [vmem:[#allocation5 + $0x800] ss:$36 sps:$4 sm:$0xff]  }
 0x660   :  { %v19180_v6 = vld [vmem:[#allocation5 + $0x140] ss:$36 sps:$4 sm:$0xff]  }
 0x661   :  { %13371 = vmatpush2.bf16.msra.mxu0 %v19160_v43  ;;  %v19181_v43 = vld [vmem:[#allocation5 + $0x5c0] ss:$36 sps:$4 sm:$0xff]  }
 0x662   :  { %13398 = vmatpush1.bf16.msra.mxu1 %v19163_v30  ;;  %16313 = vmatprep.subr.bf16.mxu0 %v19166_v63  ;;  %v19182_v30 = vld [vmem:[#allocation5 + $0x338] ss:$36 sps:$4 sm:$0xff]  }
 0x663   :  { %16335 = vmatprep.subr.bf16.mxu1 %v19167_v4  ;;  %v19183_v63 = vld [vmem:[#allocation5 + $0x7b8] ss:$36 sps:$4 sm:$0xff]   ;;  %v19186_v4 = vld [vmem:[#allocation5 + $0x2f0] ss:$36 sps:$4 sm:$0xff]  }
 0x664   :  { %13373 = vmatmul.mubr.bf16.vlgmr.msra.gmra.mxu0 %v19658_v57 }
 0x665   :  { %16310 = vmatmul.mubr.msk.bf16.vlgmr.msra.gmra.mxu1 %vm11186_vm0, %v19677_v51  ;;  %16314 = vmatpush3.bf16.msra.mxu0 %v19168_v10  ;;  %v19187_v10 = vld [vmem:[#allocation5 + $0x770] ss:$36 sps:$4 sm:$0xff]  }
 0x666   :  { %16336 = vmatpush3.bf16.msra.mxu1 %v19169_v2  ;;  %16315 = vmatprep.subr.bf16.mxu0 %v19170_v8  ;;  %v19188_v2 = vld [vmem:[#allocation5 + $0xb0] ss:$36 sps:$4 sm:$0xff]  }
 0x667   :  { %16337 = vmatprep.subr.bf16.mxu1 %v19171_v16  ;;  %13458 = vmatprep.mubr.bf16.mxu0 %v19564_v50  ;;  %v19184_v50 = vld [vmem:[#allocation5 + $0xf8] ss:$36 sps:$4 sm:$0xff]   ;;  %v19189_v8 = vld [vmem:[#allocation5 + $0x530] ss:$36 sps:$4 sm:$0xff]   ;;  %v19190_v16 = vld [vmem:[#allocation5 + $0x2a8] ss:$36 sps:$4 sm:$0xff]  }
 0x668   :  { %13499 = vmatprep.mubr.bf16.mxu1 %v19566_v55  ;;  %v19185_v55 = vld [vmem:[#allocation5 + $0x578] ss:$36 sps:$4 sm:$0xff]  }
 0x669   :  { %16316 = vmatpush3.bf16.msra.mxu0 %v19172_v17  ;;  %v19191_v17 = vld [vmem:[#allocation5 + $0x728] ss:$36 sps:$4 sm:$0xff]  }
 0x66a   :  { %16338 = vmatpush3.bf16.msra.mxu1 %v19173_v7  ;;  %16317 = vmatprep.subr.bf16.mxu0 %v19174_v3  ;;  %v19192_v7 = vld [vmem:[#allocation5 + $0x68] ss:$36 sps:$4 sm:$0xff]  }
 0x66b   :  { %16339 = vmatprep.subr.bf16.mxu1 %v19175_v20  ;;  %v19193_v3 = vld [vmem:[#allocation5 + $0x4e8] ss:$36 sps:$4 sm:$0xff]   ;;  %v19194_v20 = vld [vmem:[#allocation5 + $0x260] ss:$36 sps:$4 sm:$0xff]  }
 0x66d   :  { %16318 = vmatpush3.bf16.msra.mxu0 %v19176_v22  ;;  %v19195_v22 = vld [vmem:[#allocation5 + $0x6e0] ss:$36 sps:$4 sm:$0xff]  }
 0x66e   :  { %16340 = vmatpush3.bf16.msra.mxu1 %v19177_v19  ;;  %16319 = vmatprep.subr.bf16.mxu0 %v19178_v21  ;;  %v19196_v19 = vld [vmem:[#allocation5 + $0x20] ss:$36 sps:$4 sm:$0xff]  }
 0x66f   :  { %16341 = vmatprep.subr.bf16.mxu1 %v19179_v13  ;;  %v19197_v21 = vld [vmem:[#allocation5 + $0x4a0] ss:$36 sps:$4 sm:$0xff]   ;;  %v19198_v13 = vld [vmem:[#allocation5 + $0xd58] ss:$36 sps:$4 sm:$0xff]  }
 0x671   :  { %16320 = vmatpush3.bf16.msra.mxu0 %v19180_v6  ;;  %v19199_v6 = vld [vmem:[#allocation5 + $0x11d8] ss:$36 sps:$4 sm:$0xff]  }
 0x672   :  { %16342 = vmatpush3.bf16.msra.mxu1 %v19181_v43  ;;  %16321 = vmatprep.subr.bf16.mxu0 %v19182_v30  ;;  %v19200_v43 = vld [vmem:[#allocation5 + $0xb18] ss:$36 sps:$4 sm:$0xff]  }
 0x673   :  { %16343 = vmatprep.subr.bf16.mxu1 %v19183_v63  ;;  %v19201_v30 = vld [vmem:[#allocation5 + $0xf98] ss:$36 sps:$4 sm:$0xff]   ;;  %v19202_v63 = vld [vmem:[#allocation5 + $0xd10] ss:$36 sps:$4 sm:$0xff]  }
 0x675   :  { %16322 = vmatpush3.bf16.msra.mxu0 %v19184_v50  ;;  %v19203_v50 = vld [vmem:[#allocation5 + $0x1190] ss:$36 sps:$4 sm:$0xff]  }
 0x676   :  { %16344 = vmatpush3.bf16.msra.mxu1 %v19185_v55  ;;  %16323 = vmatprep.subr.bf16.mxu0 %v19186_v4  ;;  %v19204_v55 = vld [vmem:[#allocation5 + $0xad0] ss:$36 sps:$4 sm:$0xff]  }
 0x677   :  { %16345 = vmatprep.subr.bf16.mxu1 %v19187_v10  ;;  %v19205_v4 = vld [vmem:[#allocation5 + $0xf50] ss:$36 sps:$4 sm:$0xff]   ;;  %v19206_v10 = vld [vmem:[#allocation5 + $0xcc8] ss:$36 sps:$4 sm:$0xff]  }
 0x679   :  { %16324 = vmatpush3.bf16.msra.mxu0 %v19188_v2  ;;  %v19207_v2 = vld [vmem:[#allocation5 + $0x1148] ss:$36 sps:$4 sm:$0xff]  }
 0x67a   :  { %16346 = vmatpush3.bf16.msra.mxu1 %v19189_v8  ;;  %16325 = vmatprep.subr.bf16.mxu0 %v19190_v16  ;;  %v19208_v8 = vld [vmem:[#allocation5 + $0xa88] ss:$36 sps:$4 sm:$0xff]  }
 0x67b   :  { %16347 = vmatprep.subr.bf16.mxu1 %v19191_v17  ;;  %v19209_v16 = vld [vmem:[#allocation5 + $0xf08] ss:$36 sps:$4 sm:$0xff]   ;;  %v19212_v17 = vld [vmem:[#allocation5 + $0xa40] ss:$36 sps:$4 sm:$0xff]  }
 0x67d   :  { %16326 = vmatpush3.bf16.msra.mxu0 %v19192_v7  ;;  %v19213_v7 = vld [vmem:[#allocation5 + $0xec0] ss:$36 sps:$4 sm:$0xff]  }
 0x67e   :  { %16348 = vmatpush3.bf16.msra.mxu1 %v19193_v3  ;;  %16327 = vmatprep.subr.bf16.mxu0 %v19194_v20  ;;  %v19214_v3 = vld [vmem:[#allocation5 + $0xc38] ss:$36 sps:$4 sm:$0xff]  }
 0x67f   :  { %16349 = vmatprep.subr.bf16.mxu1 %v19195_v22  ;;  %v19215_v20 = vld [vmem:[#allocation5 + $0x10b8] ss:$36 sps:$4 sm:$0xff]   ;;  %v19218_v22 = vld [vmem:[#allocation5 + $0xbf0] ss:$36 sps:$4 sm:$0xff]  }
 0x681   :  { %16328 = vmatpush3.bf16.msra.mxu0 %v19196_v19  ;;  %v19219_v19 = vld [vmem:[#allocation5 + $0x1070] ss:$36 sps:$4 sm:$0xff]  }
 0x682   :  { %16350 = vmatpush3.bf16.msra.mxu1 %v19197_v21  ;;  %16357 = vmatprep.subr.bf16.mxu0 %v19198_v13  ;;  %v19220_v21 = vld [vmem:[#allocation5 + $0x9b0] ss:$36 sps:$4 sm:$0xff]  }
 0x683   :  { %16379 = vmatprep.subr.bf16.mxu1 %v19199_v6  ;;  %v19221_v13 = vld [vmem:[#allocation5 + $0xe30] ss:$36 sps:$4 sm:$0xff]   ;;  %v19222_v6 = vld [vmem:[#allocation5 + $0xba8] ss:$36 sps:$4 sm:$0xff]  }
 0x684   :  { %13459 = vmatmul.mubr.bf16.vlgmr.msra.gmra.mxu0 %v19570_v12  ;;  %v19210_v12 = vld [vmem:[#allocation5 + $0xc80] ss:$36 sps:$4 sm:$0xff]  }
 0x685   :  { %13500 = vmatmul.mubr.bf16.vlgmr.msra.gmra.mxu1 %v19572_v15  ;;  %16358 = vmatpush3.bf16.msra.mxu0 %v19200_v43  ;;  %v19211_v15 = vld [vmem:[#allocation5 + $0x1100] ss:$36 sps:$4 sm:$0xff]   ;;  %v19223_v43 = vld [vmem:[#allocation5 + $0x1028] ss:$36 sps:$4 sm:$0xff]  }
 0x686   :  { %16380 = vmatpush3.bf16.msra.mxu1 %v19201_v30  ;;  %16359 = vmatprep.subr.bf16.mxu0 %v19202_v63  ;;  %v19224_v30 = vld [vmem:[#allocation5 + $0x968] ss:$36 sps:$4 sm:$0xff]  }
 0x687   :  { %16381 = vmatprep.subr.bf16.mxu1 %v19203_v50  ;;  %13540 = vmatprep.mubr.bf16.mxu0 %v19576_v44  ;;  %v19216_v44 = vld [vmem:[#allocation5 + $0x9f8] ss:$36 sps:$4 sm:$0xff]   ;;  %v19225_v63 = vld [vmem:[#allocation5 + $0xde8] ss:$36 sps:$4 sm:$0xff]   ;;  %v19226_v50 = vld [vmem:[#allocation5 + $0xb60] ss:$36 sps:$4 sm:$0xff]  }
 0x688   :  { %13581 = vmatprep.mubr.bf16.mxu1 %v19578_v47  ;;  %v19217_v47 = vld [vmem:[#allocation5 + $0xe78] ss:$36 sps:$4 sm:$0xff]  }
 0x689   :  { %16360 = vmatpush3.bf16.msra.mxu0 %v19204_v55  ;;  %v19227_v55 = vld [vmem:[#allocation5 + $0xfe0] ss:$36 sps:$4 sm:$0xff]  }
 0x68a   :  { %16382 = vmatpush3.bf16.msra.mxu1 %v19205_v4  ;;  %16361 = vmatprep.subr.bf16.mxu0 %v19206_v10  ;;  %v19228_v4 = vld [vmem:[#allocation5 + $0x920] ss:$36 sps:$4 sm:$0xff]  }
 0x68b   :  { %16383 = vmatprep.subr.bf16.mxu1 %v19207_v2  ;;  %v19229_v10 = vld [vmem:[#allocation5 + $0xda0] ss:$36 sps:$4 sm:$0xff]   ;;  %v19230_v2 = vld [vmem:[#allocation5 + $0x1658] ss:$36 sps:$4 sm:$0xff]  }
 0x68d   :  { %16362 = vmatpush3.bf16.msra.mxu0 %v19208_v8  ;;  %v19231_v8 = vld [vmem:[#allocation5 + $0x1ad8] ss:$36 sps:$4 sm:$0xff]  }
 0x68e   :  { %16384 = vmatpush3.bf16.msra.mxu1 %v19209_v16  ;;  %16363 = vmatprep.subr.bf16.mxu0 %v19210_v12  ;;  %v19232_v16 = vld [vmem:[#allocation5 + $0x1418] ss:$36 sps:$4 sm:$0xff]  }
 0x68f   :  { %16385 = vmatprep.subr.bf16.mxu1 %v19211_v15  ;;  %v19233_v12 = vld [vmem:[#allocation5 + $0x1898] ss:$36 sps:$4 sm:$0xff]   ;;  %v19234_v15 = vld [vmem:[#allocation5 + $0x1610] ss:$36 sps:$4 sm:$0xff]  }
 0x691   :  { %16364 = vmatpush3.bf16.msra.mxu0 %v19212_v17  ;;  %v19235_v17 = vld [vmem:[#allocation5 + $0x1a90] ss:$36 sps:$4 sm:$0xff]  }
 0x692   :  { %16386 = vmatpush3.bf16.msra.mxu1 %v19213_v7  ;;  %16365 = vmatprep.subr.bf16.mxu0 %v19214_v3  ;;  %v19236_v7 = vld [vmem:[#allocation5 + $0x13d0] ss:$36 sps:$4 sm:$0xff]  }
 0x693   :  { %16387 = vmatprep.subr.bf16.mxu1 %v19215_v20  ;;  %v19237_v3 = vld [vmem:[#allocation5 + $0x1850] ss:$36 sps:$4 sm:$0xff]   ;;  %v19238_v20 = vld [vmem:[#allocation5 + $0x15c8] ss:$36 sps:$4 sm:$0xff]  }
 0x695   :  { %16366 = vmatpush3.bf16.msra.mxu0 %v19216_v44  ;;  %v19239_v44 = vld [vmem:[#allocation5 + $0x1a48] ss:$36 sps:$4 sm:$0xff]  }
 0x696   :  { %16388 = vmatpush3.bf16.msra.mxu1 %v19217_v47  ;;  %16367 = vmatprep.subr.bf16.mxu0 %v19218_v22  ;;  %v19240_v47 = vld [vmem:[#allocation5 + $0x1388] ss:$36 sps:$4 sm:$0xff]  }
 0x697   :  { %16389 = vmatprep.subr.bf16.mxu1 %v19219_v19  ;;  %v19241_v22 = vld [vmem:[#allocation5 + $0x1808] ss:$36 sps:$4 sm:$0xff]   ;;  %v19244_v19 = vld [vmem:[#allocation5 + $0x1340] ss:$36 sps:$4 sm:$0xff]  }
 0x699   :  { %16368 = vmatpush3.bf16.msra.mxu0 %v19220_v21  ;;  %v19245_v21 = vld [vmem:[#allocation5 + $0x17c0] ss:$36 sps:$4 sm:$0xff]  }
 0x69a   :  { %16390 = vmatpush3.bf16.msra.mxu1 %v19221_v13  ;;  %16369 = vmatprep.subr.bf16.mxu0 %v19222_v6  ;;  %v19246_v13 = vld [vmem:[#allocation5 + $0x1538] ss:$36 sps:$4 sm:$0xff]  }
 0x69b   :  { %16391 = vmatprep.subr.bf16.mxu1 %v19223_v43  ;;  %v19247_v6 = vld [vmem:[#allocation5 + $0x19b8] ss:$36 sps:$4 sm:$0xff]   ;;  %v19250_v43 = vld [vmem:[#allocation5 + $0x14f0] ss:$36 sps:$4 sm:$0xff]  }
 0x69d   :  { %16370 = vmatpush3.bf16.msra.mxu0 %v19224_v30  ;;  %v19251_v30 = vld [vmem:[#allocation5 + $0x1970] ss:$36 sps:$4 sm:$0xff]  }
 0x69e   :  { %16392 = vmatpush3.bf16.msra.mxu1 %v19225_v63  ;;  %16371 = vmatprep.subr.bf16.mxu0 %v19226_v50  ;;  %v19252_v63 = vld [vmem:[#allocation5 + $0x12b0] ss:$36 sps:$4 sm:$0xff]  }
 0x69f   :  { %16393 = vmatprep.subr.bf16.mxu1 %v19227_v55  ;;  %v19253_v50 = vld [vmem:[#allocation5 + $0x1730] ss:$36 sps:$4 sm:$0xff]   ;;  %v19254_v55 = vld [vmem:[#allocation5 + $0x14a8] ss:$36 sps:$4 sm:$0xff]  }
 0x6a1   :  { %16372 = vmatpush3.bf16.msra.mxu0 %v19228_v4  ;;  %v19255_v4 = vld [vmem:[#allocation5 + $0x1928] ss:$36 sps:$4 sm:$0xff]  }
 0x6a2   :  { %16394 = vmatpush3.bf16.msra.mxu1 %v19229_v10  ;;  %16401 = vmatprep.subr.bf16.mxu0 %v19230_v2  ;;  %v19256_v10 = vld [vmem:[#allocation5 + $0x1268] ss:$36 sps:$4 sm:$0xff]  }
 0x6a3   :  { %16423 = vmatprep.subr.bf16.mxu1 %v19231_v8  ;;  %v19257_v2 = vld [vmem:[#allocation5 + $0x16e8] ss:$36 sps:$4 sm:$0xff]   ;;  %v19258_v8 = vld [vmem:[#allocation5 + $0x1460] ss:$36 sps:$4 sm:$0xff]  }
 0x6a4   :  { %13541 = vmatmul.mubr.bf16.vlgmr.msra.gmra.mxu0 %v19582_v28  ;;  %v19242_v28 = vld [vmem:[#allocation5 + $0x1580] ss:$36 sps:$4 sm:$0xff]  }
 0x6a5   :  { %13582 = vmatmul.mubr.bf16.vlgmr.msra.gmra.mxu1 %v19584_v31  ;;  %16402 = vmatpush3.bf16.msra.mxu0 %v19232_v16  ;;  %v19243_v31 = vld [vmem:[#allocation5 + $0x1a00] ss:$36 sps:$4 sm:$0xff]  }
 0x6a6   :  { %16424 = vmatpush3.bf16.msra.mxu1 %v19233_v12  ;;  %16403 = vmatprep.subr.bf16.mxu0 %v19234_v15  ;;  %v19259_v16 = vld [vmem:[#allocation5 + $0x18e0] ss:$36 sps:$4 sm:$0xff]  }
 0x6a7   :  { %16425 = vmatprep.subr.bf16.mxu1 %v19235_v17  ;;  %13622 = vmatprep.mubr.bf16.mxu0 %v19588_v40  ;;  %v19248_v40 = vld [vmem:[#allocation5 + $0x12f8] ss:$36 sps:$4 sm:$0xff]   ;;  %v19260_v12 = vld [vmem:[#allocation5 + $0x1220] ss:$36 sps:$4 sm:$0xff]  }
 0x6a8   :  { %13663 = vmatprep.mubr.bf16.mxu1 %v19590_v46  ;;  %v19249_v46 = vld [vmem:[#allocation5 + $0x1778] ss:$36 sps:$4 sm:$0xff]   ;;  %v19261_v15 = vld [vmem:[#allocation5 + $0x16a0] ss:$36 sps:$4 sm:$0xff]  }
 0x6a9   :  { %16404 = vmatpush3.bf16.msra.mxu0 %v19236_v7  ;;  %v19262_v17 = vld [vmem:[#allocation5 + $0x1f58] ss:$36 sps:$4 sm:$0xff]  }
 0x6aa   :  { %16426 = vmatpush3.bf16.msra.mxu1 %v19237_v3  ;;  %16405 = vmatprep.subr.bf16.mxu0 %v19238_v20  ;;  %v19263_v7 = vld [vmem:[#allocation5 + $0x23d8] ss:$36 sps:$4 sm:$0xff]  }
 0x6ab   :  { %16427 = vmatprep.subr.bf16.mxu1 %v19239_v44  ;;  %v19264_v3 = vld [vmem:[#allocation5 + $0x1d18] ss:$36 sps:$4 sm:$0xff]   ;;  %v19266_v44 = vld [vmem:[#allocation5 + $0x1f10] ss:$36 sps:$4 sm:$0xff]  }
 0x6ac   :  { %v19265_v20 = vld [vmem:[#allocation5 + $0x2198] ss:$36 sps:$4 sm:$0xff]  }
 0x6ad   :  { %16406 = vmatpush3.bf16.msra.mxu0 %v19240_v47  ;;  %v19267_v47 = vld [vmem:[#allocation5 + $0x2390] ss:$36 sps:$4 sm:$0xff]  }
 0x6ae   :  { %16428 = vmatpush3.bf16.msra.mxu1 %v19241_v22  ;;  %16407 = vmatprep.subr.bf16.mxu0 %v19242_v28  ;;  %v19268_v22 = vld [vmem:[#allocation5 + $0x1cd0] ss:$36 sps:$4 sm:$0xff]  }
 0x6af   :  { %16429 = vmatprep.subr.bf16.mxu1 %v19243_v31  ;;  %v19269_v28 = vld [vmem:[#allocation5 + $0x2150] ss:$36 sps:$4 sm:$0xff]   ;;  %v19270_v31 = vld [vmem:[#allocation5 + $0x1ec8] ss:$36 sps:$4 sm:$0xff]  }
 0x6b1   :  { %16408 = vmatpush3.bf16.msra.mxu0 %v19244_v19  ;;  %v19271_v19 = vld [vmem:[#allocation5 + $0x2348] ss:$36 sps:$4 sm:$0xff]  }
 0x6b2   :  { %16430 = vmatpush3.bf16.msra.mxu1 %v19245_v21  ;;  %16409 = vmatprep.subr.bf16.mxu0 %v19246_v13  ;;  %v19272_v21 = vld [vmem:[#allocation5 + $0x1c88] ss:$36 sps:$4 sm:$0xff]  }
 0x6b3   :  { %16431 = vmatprep.subr.bf16.mxu1 %v19247_v6  ;;  %v19273_v13 = vld [vmem:[#allocation5 + $0x2108] ss:$36 sps:$4 sm:$0xff]   ;;  %v19276_v6 = vld [vmem:[#allocation5 + $0x1c40] ss:$36 sps:$4 sm:$0xff]  }
 0x6b5   :  { %16410 = vmatpush3.bf16.msra.mxu0 %v19248_v40  ;;  %v19277_v40 = vld [vmem:[#allocation5 + $0x20c0] ss:$36 sps:$4 sm:$0xff]  }
 0x6b6   :  { %16432 = vmatpush3.bf16.msra.mxu1 %v19249_v46  ;;  %16411 = vmatprep.subr.bf16.mxu0 %v19250_v43  ;;  %v19278_v46 = vld [vmem:[#allocation5 + $0x1e38] ss:$36 sps:$4 sm:$0xff]  }
 0x6b7   :  { %16433 = vmatprep.subr.bf16.mxu1 %v19251_v30  ;;  %v19279_v43 = vld [vmem:[#allocation5 + $0x22b8] ss:$36 sps:$4 sm:$0xff]   ;;  %v19282_v30 = vld [vmem:[#allocation5 + $0x1df0] ss:$36 sps:$4 sm:$0xff]  }
 0x6b9   :  { %16412 = vmatpush3.bf16.msra.mxu0 %v19252_v63  ;;  %v19283_v63 = vld [vmem:[#allocation5 + $0x2270] ss:$36 sps:$4 sm:$0xff]  }
 0x6ba   :  { %16434 = vmatpush3.bf16.msra.mxu1 %v19253_v50  ;;  %16413 = vmatprep.subr.bf16.mxu0 %v19254_v55  ;;  %v19284_v50 = vld [vmem:[#allocation5 + $0x1bb0] ss:$36 sps:$4 sm:$0xff]  }
 0x6bb   :  { %16435 = vmatprep.subr.bf16.mxu1 %v19255_v4  ;;  %v19285_v55 = vld [vmem:[#allocation5 + $0x2030] ss:$36 sps:$4 sm:$0xff]   ;;  %v19286_v4 = vld [vmem:[#allocation5 + $0x1da8] ss:$36 sps:$4 sm:$0xff]  }
 0x6bd   :  { %16414 = vmatpush3.bf16.msra.mxu0 %v19256_v10  ;;  %v19287_v10 = vld [vmem:[#allocation5 + $0x2228] ss:$36 sps:$4 sm:$0xff]  }
 0x6be   :  { %16436 = vmatpush3.bf16.msra.mxu1 %v19257_v2  ;;  %16415 = vmatprep.subr.bf16.mxu0 %v19258_v8  ;;  %v19288_v2 = vld [vmem:[#allocation5 + $0x1b68] ss:$36 sps:$4 sm:$0xff]  }
 0x6bf   :  { %16437 = vmatprep.subr.bf16.mxu1 %v19259_v16  ;;  %v19289_v8 = vld [vmem:[#allocation5 + $0x1fe8] ss:$36 sps:$4 sm:$0xff]   ;;  %v19290_v16 = vld [vmem:[#allocation5 + $0x1d60] ss:$36 sps:$4 sm:$0xff]  }
 0x6c1   :  { %16416 = vmatpush3.bf16.msra.mxu0 %v19260_v12  ;;  %v19291_v12 = vld [vmem:[#allocation5 + $0x21e0] ss:$36 sps:$4 sm:$0xff]  }
 0x6c2   :  { %16438 = vmatpush3.bf16.msra.mxu1 %v19261_v15  ;;  %16445 = vmatprep.subr.bf16.mxu0 %v19262_v17  ;;  %v19292_v15 = vld [vmem:[#allocation5 + $0x1b20] ss:$36 sps:$4 sm:$0xff]  }
 0x6c3   :  { %16467 = vmatprep.subr.bf16.mxu1 %v19263_v7  ;;  %v19293_v17 = vld [vmem:[#allocation5 + $0x1fa0] ss:$36 sps:$4 sm:$0xff]   ;;  %v19294_v7 = vld [vmem:[#allocation5 + $0x2858] ss:$36 sps:$4 sm:$0xff]  }
 0x6c4   :  { %13623 = vmatmul.mubr.bf16.vlgmr.msra.gmra.mxu0 %v19594_v58  ;;  %v19274_v58 = vld [vmem:[#allocation5 + $0x1e80] ss:$36 sps:$4 sm:$0xff]  }
 0x6c5   :  { %13664 = vmatmul.mubr.bf16.vlgmr.msra.gmra.mxu1 %v19596_v59  ;;  %16446 = vmatpush3.bf16.msra.mxu0 %v19264_v3  ;;  %v19275_v59 = vld [vmem:[#allocation5 + $0x2300] ss:$36 sps:$4 sm:$0xff]   ;;  %v19295_v3 = vld [vmem:[#allocation5 + $0x2cd8] ss:$36 sps:$4 sm:$0xff]  }
 0x6c6   :  { %16468 = vmatpush3.bf16.msra.mxu1 %v19265_v20  ;;  %16447 = vmatprep.subr.bf16.mxu0 %v19266_v44  ;;  %v19296_v20 = vld [vmem:[#allocation5 + $0x2618] ss:$36 sps:$4 sm:$0xff]  }
 0x6c7   :  { %16469 = vmatprep.subr.bf16.mxu1 %v19267_v47  ;;  %13704 = vmatprep.mubr.bf16.mxu0 %v19598_v0  ;;  %v19280_v0 = vld [vmem:[#allocation5 + $0x1bf8] ss:$36 sps:$4 sm:$0xff]   ;;  %v19298_v47 = vld [vmem:[#allocation5 + $0x2810] ss:$36 sps:$4 sm:$0xff]  }
 0x6c8   :  { %13745 = vmatprep.mubr.bf16.mxu1 %v19600_v1  ;;  %v19281_v1 = vld [vmem:[#allocation5 + $0x2078] ss:$36 sps:$4 sm:$0xff]  }
 0x6c9   :  { %16448 = vmatpush3.bf16.msra.mxu0 %v19268_v22  ;;  %v19297_v44 = vld [vmem:[#allocation5 + $0x2a98] ss:$36 sps:$4 sm:$0xff]   ;;  %v19299_v22 = vld [vmem:[#allocation5 + $0x2c90] ss:$36 sps:$4 sm:$0xff]  }
 0x6ca   :  { %16470 = vmatpush3.bf16.msra.mxu1 %v19269_v28  ;;  %16449 = vmatprep.subr.bf16.mxu0 %v19270_v31  ;;  %v19300_v28 = vld [vmem:[#allocation5 + $0x25d0] ss:$36 sps:$4 sm:$0xff]  }
 0x6cb   :  { %16471 = vmatprep.subr.bf16.mxu1 %v19271_v19  ;;  %v19301_v31 = vld [vmem:[#allocation5 + $0x2a50] ss:$36 sps:$4 sm:$0xff]   ;;  %v19302_v19 = vld [vmem:[#allocation5 + $0x27c8] ss:$36 sps:$4 sm:$0xff]  }
 0x6cd   :  { %16450 = vmatpush3.bf16.msra.mxu0 %v19272_v21  ;;  %v19303_v21 = vld [vmem:[#allocation5 + $0x2c48] ss:$36 sps:$4 sm:$0xff]  }
 0x6ce   :  { %16472 = vmatpush3.bf16.msra.mxu1 %v19273_v13  ;;  %16451 = vmatprep.subr.bf16.mxu0 %v19274_v58  ;;  %v19304_v13 = vld [vmem:[#allocation5 + $0x2588] ss:$36 sps:$4 sm:$0xff]  }
 0x6cf   :  { %16473 = vmatprep.subr.bf16.mxu1 %v19275_v59  ;;  %v19305_v58 = vld [vmem:[#allocation5 + $0x2a08] ss:$36 sps:$4 sm:$0xff]   ;;  %v19308_v59 = vld [vmem:[#allocation5 + $0x2540] ss:$36 sps:$4 sm:$0xff]  }
 0x6d1   :  { %16452 = vmatpush3.bf16.msra.mxu0 %v19276_v6  ;;  %v19309_v6 = vld [vmem:[#allocation5 + $0x29c0] ss:$36 sps:$4 sm:$0xff]  }
 0x6d2   :  { %16474 = vmatpush3.bf16.msra.mxu1 %v19277_v40  ;;  %16453 = vmatprep.subr.bf16.mxu0 %v19278_v46  ;;  %v19310_v40 = vld [vmem:[#allocation5 + $0x2738] ss:$36 sps:$4 sm:$0xff]  }
 0x6d3   :  { %16475 = vmatprep.subr.bf16.mxu1 %v19279_v43  ;;  %v19311_v46 = vld [vmem:[#allocation5 + $0x2bb8] ss:$36 sps:$4 sm:$0xff]   ;;  %v19314_v43 = vld [vmem:[#allocation5 + $0x26f0] ss:$36 sps:$4 sm:$0xff]  }
 0x6d5   :  { %16454 = vmatpush3.bf16.msra.mxu0 %v19280_v0  ;;  %v19315_v0 = vld [vmem:[#allocation5 + $0x2b70] ss:$36 sps:$4 sm:$0xff]  }
 0x6d6   :  { %16476 = vmatpush3.bf16.msra.mxu1 %v19281_v1  ;;  %16455 = vmatprep.subr.bf16.mxu0 %v19282_v30  ;;  %v19316_v1 = vld [vmem:[#allocation5 + $0x24b0] ss:$36 sps:$4 sm:$0xff]  }
 0x6d7   :  { %16477 = vmatprep.subr.bf16.mxu1 %v19283_v63  ;;  %v19317_v30 = vld [vmem:[#allocation5 + $0x2930] ss:$36 sps:$4 sm:$0xff]   ;;  %v19318_v63 = vld [vmem:[#allocation5 + $0x26a8] ss:$36 sps:$4 sm:$0xff]  }
 0x6d9   :  { %16456 = vmatpush3.bf16.msra.mxu0 %v19284_v50  ;;  %v19319_v50 = vld [vmem:[#allocation5 + $0x2b28] ss:$36 sps:$4 sm:$0xff]  }
 0x6da   :  { %16478 = vmatpush3.bf16.msra.mxu1 %v19285_v55  ;;  %16457 = vmatprep.subr.bf16.mxu0 %v19286_v4  ;;  %v19983_v55 = vpop.f32.mrf.mxu0 }
 0x6db   :  { %16479 = vmatprep.subr.bf16.mxu1 %v19287_v10  ;;  %v19320_v10 = vld [vmem:[#allocation5 + $0x2468] ss:$36 sps:$4 sm:$0xff]  }
 0x6dc   :  { %v19985_v4 = vpop.f32.mrf.mxu0 }
 0x6dd   :  { %16458 = vmatpush3.bf16.msra.mxu0 %v19288_v2  ;;  %v19321_v2 = vld [vmem:[#allocation5 + $0x28e8] ss:$36 sps:$4 sm:$0xff]  }
 0x6de   :  { %16480 = vmatpush3.bf16.msra.mxu1 %v19289_v8  ;;  %16459 = vmatprep.subr.bf16.mxu0 %v19290_v16  ;;  %v19322_v8 = vld [vmem:[#allocation5 + $0x2660] ss:$36 sps:$4 sm:$0xff]  }
 0x6df   :  { %16481 = vmatprep.subr.bf16.mxu1 %v19291_v12  ;;  %v19323_v16 = vld [vmem:[#allocation5 + $0x2ae0] ss:$36 sps:$4 sm:$0xff]   ;;  %v19987_v12 = vpop.f32.mrf.mxu1 }
 0x6e1   :  { %16460 = vmatpush3.bf16.msra.mxu0 %v19292_v15  ;;  %v19989_v15 = vpop.f32.mrf.mxu0 }
 0x6e2   :  { %16482 = vmatpush3.bf16.msra.mxu1 %v19293_v17  ;;  %16489 = vmatprep.subr.bf16.mxu0 %v19294_v7  ;;  %v19991_v17 = vpop.f32.mrf.mxu1  ;;  %v19324_v7 = vld [vmem:[#allocation5 + $0x2420] ss:$36 sps:$4 sm:$0xff]  }
 0x6e3   :  { %16511 = vmatprep.subr.bf16.mxu1 %v19295_v3  ;;  %v19325_v3 = vld [vmem:[#allocation5 + $0x28a0] ss:$36 sps:$4 sm:$0xff]  }
 0x6e4   :  { %13705 = vmatmul.mubr.bf16.vlgmr.msra.gmra.mxu0 %v19610_v27  ;;  %v19306_v27 = vld [vmem:[#allocation5 + $0x2780] ss:$36 sps:$4 sm:$0xff]  }
 0x6e5   :  { %13746 = vmatmul.mubr.bf16.vlgmr.msra.gmra.mxu1 %v19612_v29  ;;  %16490 = vmatpush3.bf16.msra.mxu0 %v19296_v20  ;;  %v19307_v29 = vld [vmem:[#allocation5 + $0x2c00] ss:$36 sps:$4 sm:$0xff]   ;;  %v19326_v20 = vld [vmem:[#allocation5 + $0x3158] ss:$36 sps:$4 sm:$0xff]  }
 0x6e6   :  { %16512 = vmatpush3.bf16.msra.mxu1 %v19297_v44  ;;  %16491 = vmatprep.subr.bf16.mxu0 %v19298_v47  ;;  %v19327_v44 = vld [vmem:[#allocation5 + $0x35d8] ss:$36 sps:$4 sm:$0xff]   ;;  %v19993_v47 = vpop.f32.mrf.mxu0 }
 0x6e7   :  { %16513 = vmatprep.subr.bf16.mxu1 %v19299_v22  ;;  %13786 = vmatprep.mubr.bf16.mxu0 %v19616_v37  ;;  %v19312_v37 = vld [vmem:[#allocation5 + $0x24f8] ss:$36 sps:$4 sm:$0xff]   ;;  %v19995_v22 = vpop.f32.mrf.mxu1 }
 0x6e8   :  { %13827 = vmatprep.mubr.bf16.mxu1 %v19618_v38  ;;  %v19313_v38 = vld [vmem:[#allocation5 + $0x2978] ss:$36 sps:$4 sm:$0xff]  }
 0x6e9   :  { %16492 = vmatpush3.bf16.msra.mxu0 %v19300_v28  ;;  %v19328_v28 = vld [vmem:[#allocation5 + $0x2f18] ss:$36 sps:$4 sm:$0xff]  }
 0x6ea   :  { %16514 = vmatpush3.bf16.msra.mxu1 %v19301_v31  ;;  %16493 = vmatprep.subr.bf16.mxu0 %v19302_v19  ;;  %v19329_v31 = vld [vmem:[#allocation5 + $0x3398] ss:$36 sps:$4 sm:$0xff]   ;;  %v19330_v19 = vld [vmem:[#allocation5 + $0x3110] ss:$36 sps:$4 sm:$0xff]  }
 0x6eb   :  { %16515 = vmatprep.subr.bf16.mxu1 %v19303_v21  ;;  %v19331_v21 = vld [vmem:[#allocation5 + $0x3590] ss:$36 sps:$4 sm:$0xff]  }
 0x6ed   :  { %16494 = vmatpush3.bf16.msra.mxu0 %v19304_v13  ;;  %v19999_v13 = vpop.f32.mrf.mxu0 }
 0x6ee   :  { %16516 = vmatpush3.bf16.msra.mxu1 %v19305_v58  ;;  %16495 = vmatprep.subr.bf16.mxu0 %v19306_v27  ;;  %v20001_v58 = vpop.f32.mrf.mxu1  ;;  %v19332_v27 = vld [vmem:[#allocation5 + $0x2ed0] ss:$36 sps:$4 sm:$0xff]  }
 0x6ef   :  { %16517 = vmatprep.subr.bf16.mxu1 %v19307_v29  ;;  %v19333_v29 = vld [vmem:[#allocation5 + $0x3350] ss:$36 sps:$4 sm:$0xff]  }
 0x6f1   :  { %16496 = vmatpush3.bf16.msra.mxu0 %v19308_v59  ;;  %v19334_v59 = vld [vmem:[#allocation5 + $0x30c8] ss:$36 sps:$4 sm:$0xff]  }
 0x6f2   :  { %16518 = vmatpush3.bf16.msra.mxu1 %v19309_v6  ;;  %16497 = vmatprep.subr.bf16.mxu0 %v19310_v40  ;;  %v19335_v6 = vld [vmem:[#allocation5 + $0x3548] ss:$36 sps:$4 sm:$0xff]   ;;  %v20003_v40 = vpop.f32.mrf.mxu0 }
 0x6f3   :  { %16519 = vmatprep.subr.bf16.mxu1 %v19311_v46  ;;  %v19337_v46 = vld [vmem:[#allocation5 + $0x3308] ss:$36 sps:$4 sm:$0xff]  }
 0x6f5   :  { %16498 = vmatpush3.bf16.msra.mxu0 %v19312_v37  ;;  %v19338_v37 = vld [vmem:[#allocation5 + $0x3080] ss:$36 sps:$4 sm:$0xff]  }
 0x6f6   :  { %16520 = vmatpush3.bf16.msra.mxu1 %v19313_v38  ;;  %16499 = vmatprep.subr.bf16.mxu0 %v19314_v43  ;;  %v19339_v38 = vld [vmem:[#allocation5 + $0x3500] ss:$36 sps:$4 sm:$0xff]   ;;  %v20009_v43 = vpop.f32.mrf.mxu0 }
 0x6f7   :  { %16521 = vmatprep.subr.bf16.mxu1 %v19315_v0 }
 0x6f9   :  { %16500 = vmatpush3.bf16.msra.mxu0 %v19316_v1  ;;  %v19340_v1 = vld [vmem:[#allocation5 + $0x2e40] ss:$36 sps:$4 sm:$0xff]  }
 0x6fa   :  { %16522 = vmatpush3.bf16.msra.mxu1 %v19317_v30  ;;  %16501 = vmatprep.subr.bf16.mxu0 %v19318_v63  ;;  %v19343_v30 = vld [vmem:[#allocation5 + $0x34b8] ss:$36 sps:$4 sm:$0xff]   ;;  %v20013_v63 = vpop.f32.mrf.mxu0 }
 0x6fb   :  { %16523 = vmatprep.subr.bf16.mxu1 %v19319_v50 }
 0x6fd   :  { %16502 = vmatpush3.bf16.msra.mxu0 %v19320_v10  ;;  %v19344_v10 = vld [vmem:[#allocation5 + $0x2df8] ss:$36 sps:$4 sm:$0xff]  }
 0x6fe   :  { %16524 = vmatpush3.bf16.msra.mxu1 %v19321_v2  ;;  %16503 = vmatprep.subr.bf16.mxu0 %v19322_v8  ;;  %v19345_v2 = vld [vmem:[#allocation5 + $0x3278] ss:$36 sps:$4 sm:$0xff]   ;;  %v19346_v8 = vld [vmem:[#allocation5 + $0x2ff0] ss:$36 sps:$4 sm:$0xff]  }
 0x6ff   :  { %16525 = vmatprep.subr.bf16.mxu1 %v19323_v16  ;;  %v19347_v16 = vld [vmem:[#allocation5 + $0x3470] ss:$36 sps:$4 sm:$0xff]  }
 0x701   :  { %16504 = vmatpush3.bf16.msra.mxu0 %v19324_v7  ;;  %v20017_v7 = vpop.f32.mrf.mxu0 }
 0x702   :  { %16526 = vmatpush3.bf16.msra.mxu1 %v19325_v3  ;;  %16533 = vmatprep.subr.bf16.mxu0 %v19326_v20 }
 0x703   :  { %16555 = vmatprep.subr.bf16.mxu1 %v19327_v44  ;;  %v20021_v20 = vpop.f32.mrf.mxu0  ;;  %v19348_v44 = vld [vmem:[#allocation5 + $0x2db0] ss:$36 sps:$4 sm:$0xff]  }
 0x704   :  { %13787 = vmatmul.mubr.bf16.vlgmr.msra.gmra.mxu0 %v19631_v33  ;;  %v20007_v33 = vpop.f32.mrf.mxu1 }
 0x705   :  { %13828 = vmatmul.mubr.bf16.vlgmr.msra.gmra.mxu1 %v19633_v34  ;;  %16534 = vmatpush3.bf16.msra.mxu0 %v19328_v28  ;;  %v19336_v34 = vld [vmem:[#allocation5 + $0x2e88] ss:$36 sps:$4 sm:$0xff]   ;;  %v19349_v28 = vld [vmem:[#allocation5 + $0x3230] ss:$36 sps:$4 sm:$0xff]  }
 0x706   :  { %16556 = vmatpush3.bf16.msra.mxu1 %v19329_v31  ;;  %16535 = vmatprep.subr.bf16.mxu0 %v19330_v19  ;;  %v20011_v0 = vpop.f32.mrf.mxu1  ;;  %v19350_v31 = vld [vmem:[#allocation5 + $0x2fa8] ss:$36 sps:$4 sm:$0xff]  }
 0x707   :  { %16557 = vmatprep.subr.bf16.mxu1 %v19331_v21  ;;  %13868 = vmatprep.mubr.bf16.mxu0 %v19639_v48  ;;  %v19341_v48 = vld [vmem:[#allocation5 + $0x32c0] ss:$36 sps:$4 sm:$0xff]   ;;  %v19351_v19 = vld [vmem:[#allocation5 + $0x3428] ss:$36 sps:$4 sm:$0xff]  }
 0x708   :  { %13909 = vmatprep.mubr.bf16.mxu1 %v19641_v49  ;;  %v19342_v49 = vld [vmem:[#allocation5 + $0x3038] ss:$36 sps:$4 sm:$0xff]   ;;  %v20015_v50 = vpop.f32.mrf.mxu1 }
 0x709   :  { %16536 = vmatpush3.bf16.msra.mxu0 %v19332_v27  ;;  %v11614_v27 = vadd.f32 %v19705_v32, %v19708_v11  ;;  %v19356_v11 = vld [vmem:[#allocation5 + $0x2d20] ss:$36 sps:$4 sm:$0xff]  }
 0x70a   :  { %16558 = vmatpush3.bf16.msra.mxu1 %v19333_v29  ;;  %16537 = vmatprep.subr.bf16.mxu0 %v19334_v59  ;;  %v20019_v3 = vpop.f32.mrf.mxu1  ;;  %v20027_v29 = vpop.f32.mrf.mxu0 }
 0x70b   :  { %16559 = vmatprep.subr.bf16.mxu1 %v19335_v6  ;;  %v19352_v6 = vld [vmem:[#allocation5 + $0x2d68] ss:$36 sps:$4 sm:$0xff]  }
 0x70c   :  { %v20023_v21 = vpop.f32.mrf.mxu1 }
 0x70d   :  { %16538 = vmatpush3.bf16.msra.mxu0 %v19336_v34  ;;  %v19353_v34 = vld [vmem:[#allocation5 + $0x31e8] ss:$36 sps:$4 sm:$0xff]  }
 0x70e   :  { %16560 = vmatpush3.bf16.msra.mxu1 %v19337_v46  ;;  %16539 = vmatprep.subr.bf16.mxu0 %v19338_v37  ;;  %v20029_v59 = vpop.f32.mrf.mxu1  ;;  %v11657_v46 = vadd.f32 %v19724_v41, %v11614_v27  ;;  %v19354_v37 = vld [vmem:[#allocation5 + $0x2f60] ss:$36 sps:$4 sm:$0xff]  }
 0x70f   :  { %16561 = vmatprep.subr.bf16.mxu1 %v19339_v38  ;;  %v19355_v38 = vld [vmem:[#allocation5 + $0x33e0] ss:$36 sps:$4 sm:$0xff]  }
 0x710   :  { %v20036_v32 = vpop.f32.mrf.mxu1  ;;  %v14008_v41 = vld [vmem:[#allocation8 + $0xf8] sm:$0xff] }
 0x711   :  { %16540 = vmatpush3.bf16.msra.mxu0 %v19340_v1  ;;  %v11231_v1 = vadd.f32 %v19635_v35, %v19614_v36  ;;  %v19358_v35 = vld [vmem:[#allocation5 + $0x36f8] ss:$36 sps:$4 sm:$0xff]  }
 0x712   :  { %16562 = vmatpush3.bf16.msra.mxu1 %v19341_v48  ;;  %16541 = vmatprep.subr.bf16.mxu0 %v19342_v49  ;;  %v20034_v48 = vpop.f32.mrf.mxu0  ;;  %v19357_v49 = vld [vmem:[#allocation5 + $0x31a0] ss:$36 sps:$4 sm:$0xff]   ;;  %v20043_v36 = vpop.f32.mrf.mxu1 }
 0x713   :  { %16563 = vmatprep.subr.bf16.mxu1 %v19343_v30  ;;  %v11700_v30 = vadd.f32 %v19726_v42, %v11657_v46  ;;  %v19513_v42 = vmov 0.0  }
 0x714   :  { %v20052_v27 = vpop.f32.mrf.mxu1 }
 0x715   :  { %16542 = vmatpush3.bf16.msra.mxu0 %v19344_v10  ;;  %v11274_v10 = vadd.f32 %v19637_v39, %v11231_v1  ;;  %v14007_v39 = vld [vmem:[#allocation8 + $0xf0] sm:$0xff]  ;;  %v13989_v1 = vld [vmem:[#allocation8 + $0x60] sm:$0xff] }
 0x716   :  { %16564 = vmatpush3.bf16.msra.mxu1 %v19345_v2  ;;  %16543 = vmatprep.subr.bf16.mxu0 %v19346_v8  ;;  %v11743_v2 = vadd.f32 %v19735_v53, %v11700_v30  ;;  %v20041_v8 = vpop.f32.mrf.mxu0 }
 0x717   :  { %16565 = vmatprep.subr.bf16.mxu1 %v19347_v16  ;;  %v11317_v16 = vadd.f32 %v19660_v60, %v11274_v10  ;;  %v14006_v60 = vld [vmem:[#allocation8 + $0xe8] sm:$0xff]  ;;  %v13987_v10 = vld [vmem:[#allocation8 + $0x50] sm:$0xff] }
 0x718   :  { %v13960_v53 = vmax.f32 %v11743_v2, 0.0  ;;  %v14002_v2 = vld [vmem:[#allocation8 + $0xc8] sm:$0xff] }
 0x719   :  { %16544 = vmatpush3.bf16.msra.mxu0 %v19348_v44  ;;  %v12345_v44 = vadd.f32 %v19852_v14, %v19860_v26  ;;  %v11360_v14 = vadd.f32 %v19662_v61, %v11317_v16  ;;  %v14004_v61 = vld [vmem:[#allocation8 + $0xd8] sm:$0xff] }
 0x71a   :  { %16566 = vmatpush3.bf16.msra.mxu1 %v19349_v28  ;;  %16545 = vmatprep.subr.bf16.mxu0 %v19350_v31  ;;  %v13992_v28 = vld [vmem:[#allocation8 + $0x78] sm:$0xff]  ;;  %v20048_v31 = vpop.f32.mrf.mxu0 }
 0x71b   :  { %16567 = vmatprep.subr.bf16.mxu1 %v19351_v19  ;;  %v13991_v19 = vld [vmem:[#allocation8 + $0x70] sm:$0xff]  ;;  %v12388_v26 = vadd.f32 %v19854_v45, %v12345_v44  ;;  %v19360_v45 = vld [vmem:[#allocation5 + $0x3668] ss:$36 sps:$4 sm:$0xff]  }
 0x71c   :  { %v20056_v46 = vpop.f32.mrf.mxu0  ;;  %v20232_v44 = vld [vmem:[#allocation29_spill] sm:$0xff] }
 0x71d   :  { %16546 = vmatpush3.bf16.msra.mxu0 %v19352_v6  ;;  %v19359_v6 = vld [vmem:[#allocation5 + $0x36b0] ss:$36 sps:$4 sm:$0xff]  }
 0x71e   :  { %16568 = vmatpush3.bf16.msra.mxu1 %v19353_v34  ;;  %16547 = vmatprep.subr.bf16.mxu0 %v19354_v37  ;;  %v13990_v34 = vld [vmem:[#allocation8 + $0x68] sm:$0xff]  ;;  %v20058_v37 = vpop.f32.mrf.mxu1 }
 0x71f   :  { %16569 = vmatprep.subr.bf16.mxu1 %v19355_v38  ;;  %v12431_v38 = vadd.f32 %v19870_v62, %v12388_v26 }
 0x720   :  { %v20064_v30 = vpop.f32.mrf.mxu1 }
 0x721   :  { %16548 = vmatpush3.bf16.msra.mxu0 %v19356_v11  ;;  %v13988_v11 = vld [vmem:[#allocation8 + $0x58] sm:$0xff]  ;;  %v12474_v62 = vadd.f32 %v19872_v5, %v12431_v38 }
 0x722   :  { %16570 = vmatpush3.bf16.msra.mxu1 %v19357_v49  ;;  %16752 = vmatprep.subr.bf16.mxu0 %v19513_v42  ;;  %v20062_v49 = vpop.f32.mrf.mxu0  ;;  %v14040_v5 = vld [vmem:[#allocation8 + $0x1f8] sm:$0xff] }
 0x723   :  { %16582 = vmatprep.subr.mxu1 %v14008_v41  ;;  %v14003_v41 = vld [vmem:[#allocation8 + $0xd0] sm:$0xff] }
 0x724   :  { %13869 = vmatmul.mubr.bf16.vlgmr.msra.gmra.mxu0 %v19656_v56  ;;  %v14005_v56 = vld [vmem:[#allocation8 + $0xe0] sm:$0xff] }
 0x725   :  { %13910 = vmatmul.mubr.bf16.vlgmr.msra.gmra.mxu1 %v19658_v57  ;;  %16753 = vmatpush3.bf16.msra.mxu0 %v19358_v35  ;;  %v11403_v57 = vadd.f32 %v19682_v9, %v11360_v14  ;;  %v19361_v35 = vld [vmem:[#allocation5 + $0x3620] ss:$36 sps:$4 sm:$0xff]  }
 0x726   :  { %16583 = vmatpush3.msra.mxu1 %v13992_v28  ;;  %14192 = vmatprep.mubr.f32.mxu1 %v13960_v53  ;;  %v12517_v28 = vadd.f32 %v20232_v44, %v12474_v62  ;;  %v20070_v53 = vpop.f32.mrf.mxu0  ;;  %v14000_v14 = vld [vmem:[#allocation8 + $0xb8] sm:$0xff]  ;;  %v14023_v44 = vld [vmem:[#allocation8 + $0x170] sm:$0xff] }
 0x727   :  { %16584 = vmatprep.subr.mxu1 %v14007_v39  ;;  %16754 = vmatprep.subr.bf16.mxu0 %v19513_v42  ;;  %v11446_v9 = vadd.f32 %v19684_v24, %v11403_v57  ;;  %v13986_v39 = vld [vmem:[#allocation8 + $0x48] sm:$0xff]  ;;  %v14001_v24 = vld [vmem:[#allocation8 + $0xc0] sm:$0xff]  ;;  %v14024_v57 = vld [vmem:[#allocation8 + $0x178] sm:$0xff] }
 0x728   :  { %16585 = vmatpush3.msra.mxu1 %v13991_v19  ;;  %16760 = vmatprep.mubr.msk.bf16.mxu0 %vm19514_vm1, %v19513_v42  ;;  %v20072_v19 = vpop.f32.mrf.mxu1 }
 0x729   :  { %16586 = vmatprep.subr.mxu1 %v14006_v60  ;;  %16755 = vmatpush3.bf16.msra.mxu0 %v19359_v6  ;;  %v11489_v16 = vadd.f32 %v19699_v23, %v11446_v9  ;;  %20233 = vst [vmem:[#allocation29_spill] sm:$0xff] %v20072_v19  ;;  %v13985_v60 = vld [vmem:[#allocation8 + $0x40] sm:$0xff]  ;;  %v20074_v6 = vpop.f32.mrf.mxu0  ;;  %v20238_v9 = vld [vmem:[#allocation31_spill] sm:$0xff]  ;;  %v20098_v19 = vld [vmem:[#allocation7] sm:$0xff] }
 0x72a   :  { %16587 = vmatpush3.msra.mxu1 %v13990_v34  ;;  %16756 = vmatprep.subr.bf16.mxu0 %v19513_v42  ;;  %v20234_v23 = vld [vmem:[#allocation17_spill] sm:$0xff]  ;;  %v20235_v34 = vld [vmem:[#allocation30_spill] sm:$0xff]  ;;  %v20078_v38 = vpop.f32.mrf.mxu1 }
 0x72b   :  { %16588 = vmatprep.subr.mxu1 %v14005_v56  ;;  %v11532_v26 = vadd.f32 %v20234_v23, %v11489_v16  ;;  %v12560_v56 = vadd.f32 %v20235_v34, %v12517_v28  ;;  %v13998_v28 = vld [vmem:[#allocation8 + $0xa8] sm:$0xff]  ;;  %v20242_v34 = vld [vmem:[#allocation32_spill] sm:$0xff] }
 0x72c   :  { %16589 = vmatpush3.msra.mxu1 %v13989_v1  ;;  %v13999_v1 = vld [vmem:[#allocation8 + $0xb0] sm:$0xff]  ;;  %v20087_v16 = vpop.f32.mrf.mxu1 }
 0x72d   :  { %16590 = vmatprep.subr.mxu1 %v14004_v61  ;;  %16757 = vmatpush3.bf16.msra.mxu0 %v19360_v45  ;;  %v20236_v61 = vld [vmem:[#allocation18_spill] sm:$0xff]  ;;  %v12603_v62 = vadd.f32 %v20238_v9, %v12560_v56  ;;  %20239 = vst [vmem:[#allocation17_spill] sm:$0xff] %v20087_v16  ;;  %v20241_v23 = vld [vmem:[#allocation19_spill] sm:$0xff]  ;;  %v20244_v9 = vld [vmem:[#allocation20_spill] sm:$0xff] }
 0x72e   :  { %16591 = vmatpush3.msra.mxu1 %v13988_v11  ;;  %16758 = vmatprep.subr.bf16.mxu0 %v19513_v42  ;;  %v13984_v42 = vld [vmem:[#allocation8 + $0x38] sm:$0xff]  ;;  %v11575_v45 = vadd.f32 %v20236_v61, %v11532_v26  ;;  %v20237_v11 = vld [vmem:[#allocation26_spill] sm:$0xff] }
 0x72f   :  { %16592 = vmatprep.subr.mxu1 %v14003_v41  ;;  %v13962_v41 = vmax.f32 %v20237_v11, 0.0  ;;  %v12646_v56 = vadd.f32 %v20242_v34, %v12603_v62  ;;  %v20094_v11 = vpop.f32.mrf.mxu1  ;;  %v14036_v62 = vld [vmem:[#allocation8 + $0x1d8] sm:$0xff] }
 0x730   :  { %16593 = vmatpush3.msra.mxu1 %v13987_v10  ;;  %v14039_v10 = vld [vmem:[#allocation8 + $0x1f0] sm:$0xff]  ;;  %v11618_v26 = vadd.f32 %v20241_v23, %v11575_v45 }
 0x731   :  { %16594 = vmatprep.subr.mxu1 %v14002_v2  ;;  %16759 = vmatpush3.bf16.msra.mxu0 %v19361_v35  ;;  %v13983_v2 = vld [vmem:[#allocation8 + $0x30] sm:$0xff]  ;;  %v20085_v35 = vpop.f32.mrf.mxu0  ;;  %v20105_v34 = vpop.f32.mrf.mxu1 }
 0x732   :  { %16595 = vmatpush3.msra.mxu1 %v13986_v39  ;;  %16620 = vmatprep.subr.mxu0 %v14040_v5  ;;  %v20240_v39 = vld [vmem:[#allocation16_spill] sm:$0xff]  ;;  %v14038_v5 = vld [vmem:[#allocation8 + $0x1e8] sm:$0xff]  ;;  %20247 = vst [vmem:[#allocation26_spill] sm:$0xff] %v20105_v34 }
 0x733   :  { %16596 = vmatprep.subr.mxu1 %v14001_v24  ;;  %v2155_v24 = vsub.s32 7, %v20240_v39  ;;  %v20092_v61 = vpop.f32.mrf.mxu0  ;;  %v13979_v23 = vld [vmem:[#allocation8 + $0x10] sm:$0xff]  ;;  %v14018_v34 = vld [vmem:[#allocation8 + $0x148] sm:$0xff] }
 0x734   :  { %16597 = vmatpush3.msra.mxu1 %v13985_v60  ;;  %16761 = vmatmul.mubr.msk.bf16.vlgmr.msra.gmra.mxu0 %vm11186_vm0, %v19677_v51  ;;  %v13982_v60 = vld [vmem:[#allocation8 + $0x28] sm:$0xff]  ;;  %20243 = vst [vmem:[#allocation30_spill] sm:$0xff] %v20092_v61 }
 0x735   :  { %16598 = vmatprep.subr.mxu1 %v14000_v14  ;;  %16621 = vmatpush3.msra.mxu0 %v14024_v57  ;;  %v14022_v51 = vld [vmem:[#allocation8 + $0x168] sm:$0xff]  ;;  %v13997_v14 = vld [vmem:[#allocation8 + $0xa0] sm:$0xff]  ;;  %v20101_v45 = vrot.slane %v20098_v19, %v2155_v24  ;;  %v14019_v24 = vld [vmem:[#allocation8 + $0x150] sm:$0xff] }
 0x736   :  { %16599 = vmatpush3.msra.mxu1 %v13984_v42  ;;  %14267 = vmatprep.mubr.f32.mxu0 %v13962_v41  ;;  %v14037_v42 = vld [vmem:[#allocation8 + $0x1e0] sm:$0xff]  ;;  %v13996_v41 = vld [vmem:[#allocation8 + $0x98] sm:$0xff] }
 0x737   :  { %16600 = vmatprep.subr.mxu1 %v13999_v1  ;;  %16622 = vmatprep.subr.mxu0 %v14039_v10  ;;  %v13981_v57 = vld [vmem:[#allocation8 + $0x20] sm:$0xff]  ;;  %v11661_v10 = vadd.f32 %v20244_v9, %v11618_v26  ;;  %v20103_v26 = vpop.f32.mrf.mxu0 }
 0x738   :  { %16601 = vmatpush3.msra.mxu1 %v13983_v2  ;;  %16623 = vmatpush3.msra.mxu0 %v14023_v44  ;;  %v14021_v1 = vld [vmem:[#allocation8 + $0x160] sm:$0xff]  ;;  %v13980_v44 = vld [vmem:[#allocation8 + $0x18] sm:$0xff]  ;;  %20246 = vst [vmem:[#allocation18_spill] sm:$0xff] %v20103_v26 }
 0x739   :  { %16602 = vmatprep.subr.mxu1 %v13998_v28  ;;  %16624 = vmatprep.subr.mxu0 %v14038_v5  ;;  %v20245_v2 = vld [vmem:[#allocation33_spill] sm:$0xff]  ;;  %v13995_v5 = vld [vmem:[#allocation8 + $0x90] sm:$0xff]  ;;  %v20249_v9 = vld [vmem:[#allocation34_spill] sm:$0xff] }
 0x73a   :  { %16603 = vmatpush3.msra.mxu1 %v13982_v60  ;;  %v12689_v16 = vadd.f32 %v20245_v2, %v12646_v56  ;;  %16625 = vmatpush3.msra.mxu0 %v14022_v51  ;;  %v14020_v28 = vld [vmem:[#allocation8 + $0x158] sm:$0xff]  ;;  %v14035_v60 = vld [vmem:[#allocation8 + $0x1d0] sm:$0xff]  ;;  %v13994_v56 = vld [vmem:[#allocation8 + $0x88] sm:$0xff] }
 0x73b   :  { %16604 = vmatprep.subr.mxu1 %v13997_v14  ;;  %16626 = vmatprep.subr.mxu0 %v14037_v42  ;;  %v20248_v51 = vld [vmem:[#allocation23_spill] sm:$0xff]  ;;  %v12904_v42 = vadd.f32 %v19995_v22, %v20101_v45  ;;  %v13977_v22 = vld [vmem:[#allocation8] sm:$0xff] }
 0x73c   :  { %16605 = vmatpush3.msra.mxu1 %v13981_v57  ;;  %16627 = vmatpush3.msra.mxu0 %v14021_v1  ;;  %v11704_v14 = vadd.f32 %v20248_v51, %v11661_v10  ;;  %v12732_v2 = vadd.f32 %v20249_v9, %v12689_v16  ;;  %v14034_v57 = vld [vmem:[#allocation8 + $0x1c8] sm:$0xff]  ;;  %v14033_v16 = vld [vmem:[#allocation8 + $0x1c0] sm:$0xff]  ;;  %v14072_v9 = vld [vmem:[#allocation8 + $0x2f8] sm:$0xff] }
 0x73d   :  { %16606 = vmatprep.subr.mxu1 %v13996_v41  ;;  %16628 = vmatprep.subr.mxu0 %v14036_v62  ;;  %v13978_v1 = vld [vmem:[#allocation8 + $0x8] sm:$0xff]  ;;  %v20111_v41 = vpop.f32.mrf.mxu0  ;;  %v13993_v62 = vld [vmem:[#allocation8 + $0x80] sm:$0xff]  ;;  %v12947_v10 = vadd.f32 %v20009_v43, %v12904_v42 }
 0x73e   :  { %16607 = vmatpush3.msra.mxu1 %v13980_v44  ;;  %16629 = vmatpush3.msra.mxu0 %v14020_v28  ;;  %v20250_v44 = vld [vmem:[#allocation24_spill] sm:$0xff]  ;;  %v12775_v26 = vadd.f32 %v19940_v18, %v12732_v2  ;;  %v20116_v28 = vpop.f32.mrf.mxu1  ;;  %v20251_v51 = vld [vmem:[#allocation21_spill] sm:$0xff] }
 0x73f   :  { %16608 = vmatprep.subr.mxu1 %v13995_v5  ;;  %16630 = vmatprep.subr.mxu0 %v14035_v60  ;;  %v11747_v61 = vadd.f32 %v20250_v44, %v11704_v14  ;;  %v14017_v5 = vld [vmem:[#allocation8 + $0x140] sm:$0xff]  ;;  %v13959_v60 = vmax.f32 %v20251_v51, 0.0  ;;  %v14032_v14 = vld [vmem:[#allocation8 + $0x1b8] sm:$0xff]  ;;  %v20120_v18 = vpop.f32.mrf.mxu0  ;;  %v14014_v51 = vld [vmem:[#allocation8 + $0x128] sm:$0xff] }
 0x740   :  { %16609 = vmatpush3.msra.mxu1 %v13979_v23  ;;  %16631 = vmatpush3.msra.mxu0 %v14019_v24  ;;  %v12990_v23 = vadd.f32 %v20015_v50, %v12947_v10  ;;  %v20122_v43 = vpop.f32.mrf.mxu1  ;;  %v14016_v24 = vld [vmem:[#allocation8 + $0x138] sm:$0xff]  ;;  %v12818_v2 = vadd.f32 %v19942_v52, %v12775_v26  ;;  %v14031_v50 = vld [vmem:[#allocation8 + $0x1b0] sm:$0xff]  ;;  %v20252_v26 = vld [vmem:[#allocation22_spill] sm:$0xff] }
 0x741   :  { %16610 = vmatprep.subr.mxu1 %v13994_v56  ;;  %16632 = vmatprep.subr.mxu0 %v14034_v57  ;;  %v13969_v56 = vmax.f32 %v11747_v61, 0.0  ;;  %v14056_v57 = vld [vmem:[#allocation8 + $0x278] sm:$0xff]  ;;  %v14055_v10 = vld [vmem:[#allocation8 + $0x270] sm:$0xff]  ;;  %v14030_v61 = vld [vmem:[#allocation8 + $0x1a8] sm:$0xff] }
 0x742   :  { %16611 = vmatpush3.msra.mxu1 %v13978_v1  ;;  %16633 = vmatpush3.msra.mxu0 %v14018_v34  ;;  %v13033_v42 = vadd.f32 %v20027_v29, %v12990_v23  ;;  %v14071_v34 = vld [vmem:[#allocation8 + $0x2f0] sm:$0xff]  ;;  %v13333_v52 = vpop.f32.mrf.mxu1  ;;  %v14070_v29 = vld [vmem:[#allocation8 + $0x2e8] sm:$0xff] }
 0x743   :  { %16612 = vmatprep.subr.mxu1 %v13993_v62  ;;  %16634 = vmatprep.subr.mxu0 %v14033_v16  ;;  %v14015_v1 = vld [vmem:[#allocation8 + $0x130] sm:$0xff]  ;;  %v12861_v62 = vadd.f32 %v19989_v15, %v12818_v2  ;;  %v20128_v16 = vpop.f32.mrf.mxu0  ;;  %v14054_v15 = vld [vmem:[#allocation8 + $0x268] sm:$0xff]  ;;  %v14028_v2 = vld [vmem:[#allocation8 + $0x198] sm:$0xff] }
 0x744   :  { %16613 = vmatpush3.msra.mxu1 %v13977_v22  ;;  %16635 = vmatpush3.msra.mxu0 %v14017_v5  ;;  %v13076_v44 = vadd.f32 %v20036_v32, %v13033_v42  ;;  %v13968_v22 = vmax.f32 %v20252_v26, 0.0  ;;  %v14029_v32 = vld [vmem:[#allocation8 + $0x1a0] sm:$0xff] }
 0x745   :  { %14193 = vmatmul.mubr.f32.vlgmr.msra.gmra.mxu1 %v13959_v60  ;;  %16636 = vmatprep.subr.mxu0 %v14032_v14  ;;  %v13964_v60 = vmax.f32 %v12861_v62, 0.0  ;;  %v14069_v14 = vld [vmem:[#allocation8 + $0x2e0] sm:$0xff] }
 0x746   :  { %16658 = vmatprep.subr.mxu1 %v14072_v9  ;;  %14197 = vmatprep.mubr.f32.mxu1 %v13969_v56  ;;  %v13119_v5 = vadd.f32 %v20056_v46, %v13076_v44  ;;  %v14013_v9 = vld [vmem:[#allocation8 + $0x120] sm:$0xff]  ;;  %v20135_v56 = vpop.f32.mrf.mxu1  ;;  %v14067_v44 = vld [vmem:[#allocation8 + $0x2d0] sm:$0xff] }
 0x747   :  { %16637 = vmatpush3.msra.mxu0 %v14016_v24  ;;  %16659 = vmatpush3.msra.mxu1 %v14056_v57  ;;  %v20133_v24 = vpop.f32.mrf.mxu0  ;;  %v14053_v46 = vld [vmem:[#allocation8 + $0x260] sm:$0xff]  ;;  %v14068_v57 = vld [vmem:[#allocation8 + $0x2d8] sm:$0xff] }
 0x748   :  { %16638 = vmatprep.subr.mxu0 %v14031_v50  ;;  %16660 = vmatprep.subr.mxu1 %v14071_v34  ;;  %v13162_v23 = vadd.f32 %v20064_v30, %v13119_v5  ;;  %v14012_v50 = vld [vmem:[#allocation8 + $0x118] sm:$0xff]  ;;  %v14010_v5 = vld [vmem:[#allocation8 + $0x108] sm:$0xff] }
 0x749   :  { %16639 = vmatpush3.msra.mxu0 %v14015_v1  ;;  %16661 = vmatpush3.msra.mxu1 %v14055_v10  ;;  %v20138_v34 = vpop.f32.mrf.mxu0  ;;  %v14052_v30 = vld [vmem:[#allocation8 + $0x258] sm:$0xff]  ;;  %v14027_v1 = vld [vmem:[#allocation8 + $0x190] sm:$0xff] }
 0x74a   :  { %16640 = vmatprep.subr.mxu0 %v14030_v61  ;;  %14198 = vmatmul.mubr.f32.gmra.mxu1 %v13968_v22  ;;  %v13205_v42 = vadd.f32 %v20085_v35, %v13162_v23  ;;  %v14011_v10 = vld [vmem:[#allocation8 + $0x110] sm:$0xff]  ;;  %v20141_v61 = vpop.f32.mrf.mxu1  ;;  %v14066_v22 = vld [vmem:[#allocation8 + $0x2c8] sm:$0xff] }
 0x74b   :  { %16662 = vmatprep.subr.mxu1 %v14070_v29  ;;  %16641 = vmatpush3.msra.mxu0 %v14014_v51  ;;  %v14051_v35 = vld [vmem:[#allocation8 + $0x250] sm:$0xff]  ;;  %v14026_v29 = vld [vmem:[#allocation8 + $0x188] sm:$0xff]  ;;  %v2151_v51 = vsub.s32 6, %v20240_v39  ;;  %v14064_v39 = vld [vmem:[#allocation8 + $0x2b8] sm:$0xff] }
 0x74c   :  { %16663 = vmatpush3.msra.mxu1 %v14054_v15  ;;  %14342 = vmatprep.mubr.f32.mxu1 %v13964_v60  ;;  %v13248_v62 = vadd.f32 %v20094_v11, %v13205_v42  ;;  %v13376_v15 = vpop.f32.mrf.mxu0  ;;  %v20145_v11 = vpop.f32.mrf.mxu1  ;;  %v14025_v60 = vld [vmem:[#allocation8 + $0x180] sm:$0xff] }
 0x74d   :  { %16642 = vmatprep.subr.mxu0 %v14029_v32  ;;  %16664 = vmatprep.subr.mxu1 %v14069_v14  ;;  %v14050_v32 = vld [vmem:[#allocation8 + $0x248] sm:$0xff]  ;;  %v14065_v14 = vld [vmem:[#allocation8 + $0x2c0] sm:$0xff] }
 0x74e   :  { %16643 = vmatpush3.msra.mxu0 %v14013_v9  ;;  %16665 = vmatpush3.msra.mxu1 %v14053_v46  ;;  %v13291_v26 = vadd.f32 %v20120_v18, %v13248_v62  ;;  %v14009_v9 = vld [vmem:[#allocation8 + $0x100] sm:$0xff] }
 0x74f   :  { %16644 = vmatprep.subr.mxu0 %v14028_v2  ;;  %16666 = vmatprep.subr.mxu1 %v14068_v57  ;;  %v14049_v18 = vld [vmem:[#allocation8 + $0x240] sm:$0xff]  ;;  %v14104_v57 = vld [vmem:[#allocation8 + $0x3f8] sm:$0xff] }
 0x750   :  { %16645 = vmatpush3.msra.mxu0 %v14012_v50  ;;  %16667 = vmatpush3.msra.mxu1 %v14052_v30  ;;  %v13334_v23 = vadd.f32 %v13333_v52, %v13291_v26  ;;  %v20253_v46 = vld [vmem:[#allocation25_spill] sm:$0xff]  ;;  %v2152_v50 = vrot.slane %v20098_v19, %v2151_v51  ;;  %v13419_v30 = vpop.f32.mrf.mxu1  ;;  %v14102_v51 = vld [vmem:[#allocation8 + $0x3e8] sm:$0xff] }
 0x751   :  { %16646 = vmatprep.subr.mxu0 %v14027_v1  ;;  %16668 = vmatprep.subr.mxu1 %v14067_v44  ;;  %v13961_v2 = vmax.f32 %v20253_v46, 0.0  ;;  %v14048_v52 = vld [vmem:[#allocation8 + $0x238] sm:$0xff] }
 0x752   :  { %16647 = vmatpush3.msra.mxu0 %v14011_v10  ;;  %16669 = vmatpush3.msra.mxu1 %v14051_v35  ;;  %v13377_v42 = vadd.f32 %v13376_v15, %v13334_v23  ;;  %v20254_v1 = vld [vmem:[#allocation28_spill] sm:$0xff]  ;;  %v12902_v19 = vadd.f32 %v19991_v17, %v2152_v50  ;;  %v20255_v15 = vld [vmem:[#allocation27_spill] sm:$0xff] }
 0x753   :  { %16648 = vmatprep.subr.mxu0 %v14026_v29  ;;  %16670 = vmatprep.subr.mxu1 %v14066_v22  ;;  %v13971_v62 = vmax.f32 %v20254_v1, 0.0  ;;  %v14088_v44 = vld [vmem:[#allocation8 + $0x378] sm:$0xff]  ;;  %v14063_v10 = vld [vmem:[#allocation8 + $0x2b0] sm:$0xff]  ;;  %v14046_v23 = vld [vmem:[#allocation8 + $0x228] sm:$0xff] }
 0x754   :  { %16649 = vmatpush3.msra.mxu0 %v14010_v5  ;;  %16671 = vmatpush3.msra.mxu1 %v14050_v32  ;;  %v14103_v35 = vld [vmem:[#allocation8 + $0x3f0] sm:$0xff]  ;;  %v13420_v26 = vadd.f32 %v13419_v30, %v13377_v42  ;;  %v14062_v5 = vld [vmem:[#allocation8 + $0x2a8] sm:$0xff]  ;;  %v13970_v32 = vmax.f32 %v20255_v15, 0.0  ;;  %v14045_v42 = vld [vmem:[#allocation8 + $0x220] sm:$0xff] }
 0x755   :  { %16650 = vmatprep.subr.mxu0 %v14025_v60  ;;  %16672 = vmatprep.subr.mxu1 %v14065_v14  ;;  %v14047_v29 = vld [vmem:[#allocation8 + $0x230] sm:$0xff]  ;;  %v12908_v60 = vadd.f32 %v20007_v33, %v20101_v45  ;;  %v14086_v14 = vld [vmem:[#allocation8 + $0x368] sm:$0xff]  ;;  %v12906_v33 = vadd.f32 %v20001_v58, %v2152_v50 }
 0x756   :  { %16651 = vmatpush3.msra.mxu0 %v14009_v9  ;;  %16673 = vmatpush3.msra.mxu1 %v14049_v18  ;;  %v14087_v22 = vld [vmem:[#allocation8 + $0x370] sm:$0xff]  ;;  %v12945_v9 = vadd.f32 %v20003_v40, %v12902_v19  ;;  %v14061_v18 = vld [vmem:[#allocation8 + $0x2a0] sm:$0xff]  ;;  %v13966_v17 = vmax.f32 %v13420_v26, 0.0 }
 0x757   :  { %14268 = vmatmul.mubr.f32.vlgmr.msra.gmra.mxu0 %v13961_v2  ;;  %16674 = vmatprep.subr.mxu1 %v14064_v39  ;;  %v12951_v46 = vadd.f32 %v20017_v7, %v12908_v60  ;;  %v14101_v2 = vld [vmem:[#allocation8 + $0x3e0] sm:$0xff]  ;;  %v12779_v39 = vadd.f32 %v19983_v55, %v19934_v54  ;;  %v14100_v7 = vld [vmem:[#allocation8 + $0x3d8] sm:$0xff]  ;;  %v12949_v1 = vadd.f32 %v20013_v63, %v12906_v33  ;;  %v14059_v55 = vld [vmem:[#allocation8 + $0x290] sm:$0xff] }
 0x758   :  { %16696 = vmatprep.subr.mxu0 %v14104_v57  ;;  %14272 = vmatprep.mubr.f32.mxu0 %v13971_v62  ;;  %v12988_v45 = vadd.f32 %v20011_v0, %v12945_v9  ;;  %v14085_v40 = vld [vmem:[#allocation8 + $0x360] sm:$0xff]  ;;  %v14060_v57 = vld [vmem:[#allocation8 + $0x298] sm:$0xff]  ;;  %v14099_v0 = vld [vmem:[#allocation8 + $0x3d0] sm:$0xff] }
 0x759   :  { %16675 = vmatpush3.msra.mxu1 %v14048_v52  ;;  %16697 = vmatpush3.msra.mxu0 %v14088_v44  ;;  %v12994_v30 = vadd.f32 %v20023_v21, %v12951_v46  ;;  %v14044_v52 = vld [vmem:[#allocation8 + $0x218] sm:$0xff]  ;;  %v14043_v50 = vld [vmem:[#allocation8 + $0x210] sm:$0xff]  ;;  %v12822_v21 = vadd.f32 %v19987_v12, %v12779_v39  ;;  %v12992_v44 = vadd.f32 %v20019_v3, %v12949_v1  ;;  %v14057_v19 = vld [vmem:[#allocation8 + $0x280] sm:$0xff] }
 0x75a   :  { %16676 = vmatprep.subr.mxu1 %v14063_v10  ;;  %16698 = vmatprep.subr.mxu0 %v14103_v35  ;;  %v13031_v62 = vadd.f32 %v20021_v20, %v12988_v45  ;;  %v14084_v54 = vld [vmem:[#allocation8 + $0x358] sm:$0xff]  ;;  %v14083_v63 = vld [vmem:[#allocation8 + $0x350] sm:$0xff]  ;;  %v14058_v20 = vld [vmem:[#allocation8 + $0x288] sm:$0xff] }
 0x75b   :  { %16677 = vmatpush3.msra.mxu1 %v14047_v29  ;;  %16699 = vmatpush3.msra.mxu0 %v14087_v22  ;;  %v13037_v58 = vadd.f32 %v20041_v8, %v12994_v30  ;;  %v20256_v35 = vld [vmem:[#allocation35_spill] sm:$0xff]  ;;  %v13035_v12 = vadd.f32 %v20034_v48, %v12992_v44  ;;  %v14093_v1 = vld [vmem:[#allocation8 + $0x3a0] sm:$0xff] }
 0x75c   :  { %16678 = vmatprep.subr.mxu1 %v14062_v5  ;;  %14273 = vmatmul.mubr.f32.gmra.mxu0 %v13970_v32  ;;  %v13074_v10 = vadd.f32 %v20029_v59, %v13031_v62  ;;  %v12859_v29 = vadd.f32 %v19985_v4, %v20256_v35  ;;  %v14098_v8 = vld [vmem:[#allocation8 + $0x3c8] sm:$0xff]  ;;  %v12865_v5 = vadd.f32 %v19999_v13, %v12822_v21  ;;  %v14097_v4 = vld [vmem:[#allocation8 + $0x3c0] sm:$0xff]  ;;  %v14079_v39 = vld [vmem:[#allocation8 + $0x330] sm:$0xff] }
 0x75d   :  { %16700 = vmatprep.subr.mxu0 %v14102_v51  ;;  %16679 = vmatpush3.msra.mxu1 %v14046_v23  ;;  %v13080_v26 = vadd.f32 %v20052_v27, %v13037_v58  ;;  %v14042_v22 = vld [vmem:[#allocation8 + $0x208] sm:$0xff]  ;;  %v14041_v27 = vld [vmem:[#allocation8 + $0x200] sm:$0xff]  ;;  %v13078_v15 = vadd.f32 %v20043_v36, %v13035_v12  ;;  %v14080_v36 = vld [vmem:[#allocation8 + $0x338] sm:$0xff] }
 0x75e   :  { %16701 = vmatpush3.msra.mxu0 %v14086_v14  ;;  %14417 = vmatprep.mubr.f32.mxu0 %v13966_v17  ;;  %v13117_v3 = vadd.f32 %v20048_v31, %v13074_v10  ;;  %v14082_v59 = vld [vmem:[#allocation8 + $0x348] sm:$0xff]  ;;  %v14081_v13 = vld [vmem:[#allocation8 + $0x340] sm:$0xff]  ;;  %v13963_v48 = vmax.f32 %v12859_v29, 0.0  ;;  %v12863_v31 = vadd.f32 %v19993_v47, %v19948_v25  ;;  %v13973_v23 = vmax.f32 %v12865_v5, 0.0  ;;  %v14095_v17 = vld [vmem:[#allocation8 + $0x3b0] sm:$0xff] }
 0x75f   :  { %16680 = vmatprep.subr.mxu1 %v14061_v18  ;;  %16702 = vmatprep.subr.mxu0 %v14101_v2  ;;  %v13123_v51 = vadd.f32 %v20070_v53, %v13080_v26  ;;  %v14096_v53 = vld [vmem:[#allocation8 + $0x3b8] sm:$0xff]  ;;  %v13121_v14 = vadd.f32 %v20062_v49, %v13078_v15  ;;  %v20257_v18 = vld [vmem:[#allocation18_spill] sm:$0xff]  ;;  %v14119_v45 = vld [vmem:[#allocation8 + $0x470] sm:$0xff] }
 0x760   :  { %16681 = vmatpush3.msra.mxu1 %v14045_v42  ;;  %16703 = vmatpush3.msra.mxu0 %v14085_v40  ;;  %v13160_v32 = vadd.f32 %v20058_v37, %v13117_v3  ;;  %v14120_v37 = vld [vmem:[#allocation8 + $0x478] sm:$0xff]  ;;  %v13378_v42 = vpop.f32.mrf.mxu0  ;;  %v13972_v49 = vmax.f32 %v12863_v31, 0.0  ;;  %v14094_v33 = vld [vmem:[#allocation8 + $0x3a8] sm:$0xff]  ;;  %v14117_v44 = vld [vmem:[#allocation8 + $0x460] sm:$0xff] }
 0x761   :  { %16682 = vmatprep.subr.mxu1 %v14060_v57  ;;  %16704 = vmatprep.subr.mxu0 %v14100_v7  ;;  %v13166_v60 = vadd.f32 %v20078_v38, %v13123_v51  ;;  %v20258_v25 = vld [vmem:[#allocation29_spill] sm:$0xff]  ;;  %v20260_v40 = vld [vmem:[#allocation30_spill] sm:$0xff]  ;;  %v14111_v15 = vld [vmem:[#allocation8 + $0x430] sm:$0xff] }
 0x762   :  { %16683 = vmatpush3.msra.mxu1 %v14044_v52  ;;  %16705 = vmatpush3.msra.mxu0 %v14084_v54  ;;  %v13203_v9 = vadd.f32 %v20074_v6, %v13160_v32  ;;  %v13164_v47 = vadd.f32 %v20258_v25, %v13121_v14  ;;  %v20259_v38 = vld [vmem:[#allocation17_spill] sm:$0xff]  ;;  %v14078_v7 = vld [vmem:[#allocation8 + $0x328] sm:$0xff]  ;;  %v13380_v58 = vpop.f32.mrf.mxu0 }
 0x763   :  { %16684 = vmatprep.subr.mxu1 %v14059_v55  ;;  %16706 = vmatprep.subr.mxu0 %v14099_v0  ;;  %v13209_v46 = vadd.f32 %v20257_v18, %v13166_v60  ;;  %v14118_v62 = vld [vmem:[#allocation8 + $0x468] sm:$0xff]  ;;  %v13421_v0 = vpop.f32.mrf.mxu1  ;;  %v14092_v21 = vld [vmem:[#allocation8 + $0x398] sm:$0xff]  ;;  %v14089_v3 = vld [vmem:[#allocation8 + $0x380] sm:$0xff] }
 0x764   :  { %16685 = vmatpush3.msra.mxu1 %v14043_v50  ;;  %16707 = vmatpush3.msra.mxu0 %v14083_v63  ;;  %v13246_v2 = vadd.f32 %v20259_v38, %v13203_v9  ;;  %v13207_v57 = vadd.f32 %v20260_v40, %v13164_v47  ;;  %v20261_v54 = vld [vmem:[#allocation26_spill] sm:$0xff]  ;;  %v14076_v63 = vld [vmem:[#allocation8 + $0x318] sm:$0xff]  ;;  %v14107_v60 = vld [vmem:[#allocation8 + $0x410] sm:$0xff]  ;;  %v16329_v14 = vpop.f32.mrf.mxu0 }
 0x765   :  { %16686 = vmatprep.subr.mxu1 %v14058_v20  ;;  %16708 = vmatprep.subr.mxu0 %v14098_v8  ;;  %v13252_v6 = vadd.f32 %v20116_v28, %v13209_v46  ;;  %v14077_v50 = vld [vmem:[#allocation8 + $0x320] sm:$0xff]  ;;  %v14116_v35 = vld [vmem:[#allocation8 + $0x458] sm:$0xff]  ;;  %v13423_v26 = vpop.f32.mrf.mxu1  ;;  %v14090_v8 = vld [vmem:[#allocation8 + $0x388] sm:$0xff] }
 0x766   :  { %16687 = vmatpush3.msra.mxu1 %v14042_v22  ;;  %16709 = vmatpush3.msra.mxu0 %v14082_v59  ;;  %v13289_v30 = vadd.f32 %v20111_v41, %v13246_v2  ;;  %v13250_v55 = vadd.f32 %v20261_v54, %v13207_v57  ;;  %v14074_v5 = vld [vmem:[#allocation8 + $0x308] sm:$0xff]  ;;  %v14108_v31 = vld [vmem:[#allocation8 + $0x418] sm:$0xff] }
 0x767   :  { %16688 = vmatprep.subr.mxu1 %v14057_v19  ;;  %16710 = vmatprep.subr.mxu0 %v14097_v4  ;;  %v13295_v52 = vadd.f32 %v20133_v24, %v13252_v6  ;;  %v14114_v59 = vld [vmem:[#allocation8 + $0x448] sm:$0xff]  ;;  %v14113_v19 = vld [vmem:[#allocation8 + $0x440] sm:$0xff]  ;;  %v16351_v9 = vpop.f32.mrf.mxu1 }
 0x768   :  { %16689 = vmatpush3.msra.mxu1 %v14041_v27  ;;  %16711 = vmatpush3.msra.mxu0 %v14081_v13  ;;  %v13332_v28 = vadd.f32 %v20122_v43, %v13289_v30  ;;  %v13293_v24 = vadd.f32 %v20128_v16, %v13250_v55  ;;  %v14091_v43 = vld [vmem:[#allocation8 + $0x390] sm:$0xff]  ;;  %v14112_v27 = vld [vmem:[#allocation8 + $0x438] sm:$0xff]  ;;  %v14110_v13 = vld [vmem:[#allocation8 + $0x428] sm:$0xff] }
 0x769   :  { %14343 = vmatmul.mubr.f32.vlgmr.msra.gmra.mxu1 %v13963_v48  ;;  %16712 = vmatprep.subr.mxu0 %v14096_v53  ;;  %v13338_v41 = vadd.f32 %v20141_v61, %v13295_v52  ;;  %v14075_v61 = vld [vmem:[#allocation8 + $0x310] sm:$0xff]  ;;  %v14109_v48 = vld [vmem:[#allocation8 + $0x420] sm:$0xff]  ;;  %v14106_v53 = vld [vmem:[#allocation8 + $0x408] sm:$0xff] }
 0x76a   :  { %14347 = vmatprep.mubr.f32.mxu1 %v13973_v23  ;;  %16713 = vmatpush3.msra.mxu0 %v14080_v36  ;;  %v13375_v10 = vadd.f32 %v20138_v34, %v13332_v28  ;;  %v13336_v29 = vadd.f32 %v20135_v56, %v13293_v24  ;;  %v14115_v16 = vld [vmem:[#allocation8 + $0x450] sm:$0xff]  ;;  %v14073_v56 = vld [vmem:[#allocation8 + $0x300] sm:$0xff]  ;;  %v16330_v36 = vpop.f32.mrf.mxu0 }
 0x76b   :  { %16764 = vmatprep.subr.mxu1 %v14120_v37  ;;  %16714 = vmatprep.subr.mxu0 %v14095_v17  ;;  %v13381_v20 = vadd.f32 %v13380_v58, %v13338_v41  ;;  %v14105_v23 = vld [vmem:[#allocation8 + $0x400] sm:$0xff] }
 0x76c   :  { %16765 = vmatpush3.msra.mxu1 %v14120_v37  ;;  %16715 = vmatpush3.msra.mxu0 %v14079_v39  ;;  %v13418_v34 = vadd.f32 %v20145_v11, %v13375_v10  ;;  %v13379_v22 = vadd.f32 %v13378_v42, %v13336_v29  ;;  %v16352_v37 = vpop.f32.mrf.mxu1  ;;  %v16332_v18 = vpop.f32.mrf.mxu0 }
 0x76d   :  { %14348 = vmatmul.mubr.f32.gmra.mxu1 %v13972_v49  ;;  %16716 = vmatprep.subr.mxu0 %v14094_v33  ;;  %v13424_v12 = vadd.f32 %v13423_v26, %v13381_v20  ;;  %v16353_v24 = vadd.f32 %v16352_v37, %v16351_v9 }
 0x76e   :  { %16766 = vmatprep.subr.mxu1 %v14119_v45  ;;  %16717 = vmatpush3.msra.mxu0 %v14078_v7  ;;  %v13965_v51 = vmax.f32 %v13418_v34, 0.0  ;;  %v13422_v4 = vadd.f32 %v13421_v0, %v13379_v22  ;;  %v16354_v46 = vpop.f32.mrf.mxu1  ;;  %v16333_v17 = vpop.f32.mrf.mxu0  ;;  %v16331_v0 = vadd.f32 %v16330_v36, %v16329_v14 }
 0x76f   :  { %16767 = vmatpush3.msra.mxu1 %v14119_v45  ;;  %16718 = vmatprep.subr.mxu0 %v14093_v1  ;;  %v13975_v11 = vmax.f32 %v13424_v12, 0.0  ;;  %v16334_v10 = vadd.f32 %v16333_v17, %v16332_v18 }
 0x770   :  { %16768 = vmatprep.subr.mxu1 %v14118_v62  ;;  %16719 = vmatpush3.msra.mxu0 %v14077_v50  ;;  %v13974_v32 = vmax.f32 %v13422_v4, 0.0  ;;  %v16355_v25 = vpop.f32.mrf.mxu1  ;;  %v16373_v47 = vpop.f32.mrf.mxu0  ;;  %v14542_v50 = vld [vmem:[#allocation7 + $0x8] ss:$0 sm:$0xff] }
 0x771   :  { %16769 = vmatpush3.msra.mxu1 %v14118_v62  ;;  %16720 = vmatprep.subr.mxu0 %v14092_v21  ;;  %v13464_v29 = vadd.f32 %v16334_v10, %v14542_v50  ;;  %v16356_v26 = vadd.f32 %v16355_v25, %v16354_v46 }
 0x772   :  { %16770 = vmatprep.subr.mxu1 %v14117_v44  ;;  %16721 = vmatpush3.msra.mxu0 %v14076_v63  ;;  %v16395_v38 = vpop.f32.mrf.mxu1  ;;  %v16374_v2 = vpop.f32.mrf.mxu0 }
 0x773   :  { %16771 = vmatpush3.msra.mxu1 %v14117_v44  ;;  %16722 = vmatprep.subr.mxu0 %v14091_v43  ;;  %v13461_v44 = vadd.f32 %v16331_v0, %v14542_v50  ;;  %v16375_v63 = vadd.f32 %v16374_v2, %v16373_v47 }
 0x774   :  { %16772 = vmatprep.subr.mxu1 %v14116_v35  ;;  %16723 = vmatpush3.msra.mxu0 %v14075_v61  ;;  %v16396_v42 = vpop.f32.mrf.mxu1  ;;  %v16376_v39 = vpop.f32.mrf.mxu0 }
 0x775   :  { %16773 = vmatpush3.msra.mxu1 %v14116_v35  ;;  %16724 = vmatprep.subr.mxu0 %v14090_v8  ;;  %v13502_v35 = vadd.f32 %v16353_v24, %v13461_v44  ;;  %v16397_v34 = vadd.f32 %v16396_v42, %v16395_v38 }
 0x776   :  { %16774 = vmatprep.subr.mxu1 %v14115_v16  ;;  %16725 = vmatpush3.msra.mxu0 %v14074_v5  ;;  %v16398_v49 = vpop.f32.mrf.mxu1  ;;  %v16377_v6 = vpop.f32.mrf.mxu0  ;;  %v13505_v5 = vadd.f32 %v16356_v26, %v13464_v29 }
 0x777   :  { %16775 = vmatpush3.msra.mxu1 %v14115_v16  ;;  %16726 = vmatprep.subr.mxu0 %v14089_v3  ;;  %v13543_v16 = vadd.f32 %v16375_v63, %v13502_v35  ;;  %v16378_v22 = vadd.f32 %v16377_v6, %v16376_v39 }
 0x778   :  { %16776 = vmatprep.subr.mxu1 %v14114_v59  ;;  %16727 = vmatpush3.msra.mxu0 %v14073_v56  ;;  %v16399_v33 = vpop.f32.mrf.mxu1 }
 0x779   :  { %16777 = vmatpush3.msra.mxu1 %v14114_v59  ;;  %14418 = vmatmul.mubr.f32.vlgmr.msra.gmra.mxu0 %v13965_v51  ;;  %v13584_v56 = vadd.f32 %v16397_v34, %v13543_v16  ;;  %v16400_v51 = vadd.f32 %v16399_v33, %v16398_v49 }
 0x77a   :  { %16778 = vmatprep.subr.mxu1 %v14113_v19  ;;  %14422 = vmatprep.mubr.f32.mxu0 %v13975_v11 }
 0x77b   :  { %16779 = vmatpush3.msra.mxu1 %v14113_v19  ;;  %v13546_v19 = vadd.f32 %v16378_v22, %v13505_v5 }
 0x77c   :  { %16780 = vmatprep.subr.mxu1 %v14112_v27 }
 0x77d   :  { %16781 = vmatpush3.msra.mxu1 %v14112_v27  ;;  %14423 = vmatmul.mubr.f32.gmra.mxu0 %v13974_v32 }
 0x77e   :  { %16782 = vmatprep.subr.mxu1 %v14111_v15 }
 0x77f   :  { %16783 = vmatpush3.msra.mxu1 %v14111_v15 }
 0x780   :  { %16784 = vmatprep.subr.mxu1 %v14110_v13 }
 0x781   :  { %16785 = vmatpush3.msra.mxu1 %v14110_v13  ;;  %v13587_v13 = vadd.f32 %v16400_v51, %v13546_v19 }
 0x782   :  { %16786 = vmatprep.subr.mxu1 %v14109_v48 }
 0x783   :  { %16787 = vmatpush3.msra.mxu1 %v14109_v48 }
 0x784   :  { %16788 = vmatprep.subr.mxu1 %v14108_v31  ;;  %v16417_v45 = vpop.f32.mrf.mxu0 }
 0x785   :  { %16789 = vmatpush3.msra.mxu1 %v14108_v31  ;;  %v16439_v40 = vpop.f32.mrf.mxu1 }
 0x786   :  { %16790 = vmatprep.subr.mxu1 %v14107_v60  ;;  %v16418_v57 = vpop.f32.mrf.mxu0 }
 0x787   :  { %16791 = vmatpush3.msra.mxu1 %v14107_v60  ;;  %v16440_v30 = vpop.f32.mrf.mxu1  ;;  %v16419_v12 = vadd.f32 %v16418_v57, %v16417_v45 }
 0x788   :  { %16792 = vmatprep.subr.mxu1 %v14106_v53  ;;  %v16420_v7 = vpop.f32.mrf.mxu0  ;;  %v16441_v11 = vadd.f32 %v16440_v30, %v16439_v40 }
 0x789   :  { %16793 = vmatpush3.msra.mxu1 %v14106_v53  ;;  %v16442_v52 = vpop.f32.mrf.mxu1  ;;  %v13625_v4 = vadd.f32 %v16419_v12, %v13584_v56 }
 0x78a   :  { %16794 = vmatprep.subr.mxu1 %v14105_v23  ;;  %v16421_v1 = vpop.f32.mrf.mxu0 }
 0x78b   :  { %16795 = vmatpush3.msra.mxu1 %v14105_v23  ;;  %v16443_v62 = vpop.f32.mrf.mxu1  ;;  %v16422_v27 = vadd.f32 %v16421_v1, %v16420_v7  ;;  %v13666_v31 = vadd.f32 %v16441_v11, %v13625_v4  ;;  %v16312_v11 = vld [vmem:[#allocation10] ss:$0 sm:$0xff] }
 0x78c   :  { %v16444_v53 = vadd.f32 %v16443_v62, %v16442_v52 }
 0x78d   :  { %v13628_v60 = vadd.f32 %v16422_v27, %v13587_v13 }
 0x78f   :  { %v13669_v17 = vadd.f32 %v16444_v53, %v13628_v60 }
 0x7a4   :  { %v16461_v54 = vpop.f32.mrf.mxu0 }
 0x7a5   :  { %v16483_v55 = vpop.f32.mrf.mxu1 }
 0x7a6   :  { %v16462_v28 = vpop.f32.mrf.mxu0 }
 0x7a7   :  { %v16484_v58 = vpop.f32.mrf.mxu1  ;;  %v16463_v48 = vadd.f32 %v16462_v28, %v16461_v54 }
 0x7a8   :  { %v16464_v41 = vpop.f32.mrf.mxu0  ;;  %v16485_v36 = vadd.f32 %v16484_v58, %v16483_v55 }
 0x7a9   :  { %v16486_v21 = vpop.f32.mrf.mxu1  ;;  %v13707_v9 = vadd.f32 %v16463_v48, %v13666_v31 }
 0x7aa   :  { %v16465_v20 = vpop.f32.mrf.mxu0 }
 0x7ab   :  { %v16487_v43 = vpop.f32.mrf.mxu1  ;;  %v16466_v37 = vadd.f32 %v16465_v20, %v16464_v41  ;;  %v13748_v38 = vadd.f32 %v16485_v36, %v13707_v9 }
 0x7ac   :  { %v16488_v42 = vadd.f32 %v16487_v43, %v16486_v21 }
 0x7ad   :  { %v13710_v2 = vadd.f32 %v16466_v37, %v13669_v17 }
 0x7af   :  { %v13751_v40 = vadd.f32 %v16488_v42, %v13710_v2 }
 0x7c4   :  { %v16505_v61 = vpop.f32.mrf.mxu0 }
 0x7c5   :  { %v16527_v8 = vpop.f32.mrf.mxu1 }
 0x7c6   :  { %v16506_v3 = vpop.f32.mrf.mxu0 }
 0x7c7   :  { %v16528_v59 = vpop.f32.mrf.mxu1  ;;  %v16507_v25 = vadd.f32 %v16506_v3, %v16505_v61 }
 0x7c8   :  { %v16508_v15 = vpop.f32.mrf.mxu0  ;;  %v16529_v33 = vadd.f32 %v16528_v59, %v16527_v8 }
 0x7c9   :  { %v16530_v32 = vpop.f32.mrf.mxu1  ;;  %v13789_v6 = vadd.f32 %v16507_v25, %v13748_v38 }
 0x7ca   :  { %v16509_v23 = vpop.f32.mrf.mxu0 }
 0x7cb   :  { %v16531_v14 = vpop.f32.mrf.mxu1  ;;  %v16510_v45 = vadd.f32 %v16509_v23, %v16508_v15  ;;  %v13830_v52 = vadd.f32 %v16529_v33, %v13789_v6 }
 0x7cc   :  { %v16532_v62 = vadd.f32 %v16531_v14, %v16530_v32 }
 0x7cd   :  { %v13792_v1 = vadd.f32 %v16510_v45, %v13751_v40 }
 0x7cf   :  { %v13833_v0 = vadd.f32 %v16532_v62, %v13792_v1 }
 0x7e4   :  { %v16549_v18 = vpop.f32.mrf.mxu0 }
 0x7e5   :  { %v16571_v46 = vpop.f32.mrf.mxu1 }
 0x7e6   :  { %v16550_v47 = vpop.f32.mrf.mxu0 }
 0x7e7   :  { %v16572_v49 = vpop.f32.mrf.mxu1  ;;  %v16551_v57 = vadd.f32 %v16550_v47, %v16549_v18 }
 0x7e8   :  { %v16552_v39 = vpop.f32.mrf.mxu0  ;;  %v16573_v55 = vadd.f32 %v16572_v49, %v16571_v46 }
 0x7e9   :  { %v16574_v7 = vpop.f32.mrf.mxu1  ;;  %v13871_v54 = vadd.f32 %v16551_v57, %v13830_v52 }
 0x7ea   :  { %v16553_v30 = vpop.f32.mrf.mxu0 }
 0x7eb   :  { %v16554_v28 = vadd.f32 %v16553_v30, %v16552_v39  ;;  %v16575_v58 = vpop.f32.mrf.mxu1  ;;  %v13912_v21 = vadd.f32 %v16573_v55, %v13871_v54 }
 0x7ec   :  { %v16576_v41 = vadd.f32 %v16575_v58, %v16574_v7 }
 0x7ed   :  { %v13874_v50 = vadd.f32 %v16554_v28, %v13833_v0 }
 0x7ef   :  { %v13915_v20 = vadd.f32 %v16576_v41, %v13874_v50 }
 0x7f4   :  { %v13952_v44 = vpop.f32.mrf.mxu0 }
 0x7f5   :  { %v13953_v24 = vadd.f32 %v13952_v44, %v13912_v21 }
 0x7f6   :  { %v16762_v10 = vpop.f32.mrf.mxu0 }
 0x7f7   :  { %v13967_v63 = vmax.f32 %v13953_v24, 0.0 }
 0x7f8   :  { %v13955_v43 = vpop.f32.mrf.mxu0 }
 0x7f9   :  { %v13956_v35 = vadd.f32 %v13955_v43, %v13915_v20  ;;  %16796 = vmatprep.mubr.f32.mxu1 %v13967_v63 }
 0x7fa   :  { %v16763_v29 = vpop.f32.mrf.mxu0 }
 0x7fb   :  { %v13976_v26 = vmax.f32 %v13956_v35, 0.0 }
 0x7fd   :  { %16797 = vmatmul.mubr.f32.vlgmr.msra.gmra.mxu1 %v13976_v26 }
 0x805   :  { %v16614_v61 = vpop.f32.mrf.mxu1 }
 0x807   :  { %v16615_v16 = vpop.f32.mrf.mxu1 }
 0x808   :  { %v16616_v4 = vadd.f32 %v16615_v16, %v16614_v61 }
 0x80a   :  { %v16617_v22 = vpop.f32.mrf.mxu1  ;;  %v14195_v13 = vadd.f32 %v16616_v4, %v16312_v11 }
 0x80c   :  { %v16618_v12 = vpop.f32.mrf.mxu1 }
 0x80d   :  { %v16619_v48 = vadd.f32 %v16618_v12, %v16617_v22 }
 0x80f   :  { %v14200_v36 = vadd.f32 %v16619_v48, %v16312_v11 }
 0x817   :  { %v16652_v8 = vpop.f32.mrf.mxu0 }
 0x819   :  { %v16653_v34 = vpop.f32.mrf.mxu0 }
 0x81a   :  { %v16654_v15 = vadd.f32 %v16653_v34, %v16652_v8 }
 0x81c   :  { %v16655_v5 = vpop.f32.mrf.mxu0  ;;  %v14270_v53 = vadd.f32 %v16654_v15, %v14195_v13 }
 0x81e   :  { %v16656_v3 = vpop.f32.mrf.mxu0 }
 0x81f   :  { %v16657_v23 = vadd.f32 %v16656_v3, %v16655_v5 }
 0x821   :  { %v14275_v17 = vadd.f32 %v16657_v23, %v14200_v36 }
 0x829   :  { %v16690_v59 = vpop.f32.mrf.mxu1 }
 0x82b   :  { %v16691_v19 = vpop.f32.mrf.mxu1 }
 0x82c   :  { %v16692_v31 = vadd.f32 %v16691_v19, %v16690_v59 }
 0x82d   :  { %v16693_v27 = vpop.f32.mrf.mxu1 }
 0x82e   :  { %v14345_v37 = vadd.f32 %v16692_v31, %v14270_v53 }
 0x82f   :  { %v16694_v60 = vpop.f32.mrf.mxu1 }
 0x830   :  { %v16695_v18 = vadd.f32 %v16694_v60, %v16693_v27 }
 0x832   :  { %v14350_v2 = vadd.f32 %v16695_v18, %v14275_v17 }
 0x839   :  { %v16728_v56 = vpop.f32.mrf.mxu0 }
 0x83b   :  { %v16729_v51 = vpop.f32.mrf.mxu0 }
 0x83c   :  { %v16730_v14 = vadd.f32 %v16729_v51, %v16728_v56 }
 0x83d   :  { %v16731_v32 = vpop.f32.mrf.mxu0 }
 0x83e   :  { %v14420_v47 = vadd.f32 %v16730_v14, %v14345_v37 }
 0x83f   :  { %v16732_v9 = vpop.f32.mrf.mxu0 }
 0x840   :  { %v16733_v25 = vadd.f32 %v16732_v9, %v16731_v32 }
 0x842   :  { %v14425_v39 = vadd.f32 %v16733_v25, %v14350_v2 }
 0x8bd   :  { %v16798_v46 = vpop.f32.mrf.mxu1 }
 0x8be   :  { %v14500_v49 = vadd.f32 %v16798_v46, %v14425_v39 }
 0x8bf   :  { %v14494_v38 = vpop.f32.mrf.mxu1 }
 0x8c0   :  { %v14495_v42 = vadd.f32 %v14494_v38, %v14420_v47 }
 0x8c2   :  { %14503 = vmax.xlane.f32.xlu0 %v14495_v42 }
 0x8c6   :  { %14505 = vmax.xlane.f32.xlu0 %v14500_v49 }
 0x94b   :  { %v14504_v6 = vpop.xlane.xlu0 %14503 }
 0x94c   :  { %v14507_v33 = vsub.f32 %v14495_v42, %v14504_v6 }
 0x94e   :  { %v14509_v45 = vmul.f32 1.442695, %v14507_v33 }
 0x94f   :  { %v14506_v40 = vpop.xlane.xlu0 %14505 }
 0x950   :  { %19362 = vpow2.f32 %v14509_v45  ;;  %v14508_v57 = vsub.f32 %v14500_v49, %v14506_v40 }
 0x952   :  { %v14511_v30 = vmul.f32 1.442695, %v14508_v57 }
 0x954   :  { %19364 = vpow2.f32 %v14511_v30 }
 0x95d   :  { %v19363_v7 = vpop.eup %19362 }
 0x95e   :  { %14513 = vadd.xlane.f32.xlu1 %v19363_v7 }
 0x961   :  { %v19365_v52 = vpop.eup %19364 }
 0x962   :  { %14515 = vadd.xlane.f32.xlu1 %v19365_v52 }
 0x9e7   :  { %v14514_v1 = vpop.xlane.xlu1 %14513 }
 0x9e8   :  { %19366 = vrcp.f32 %v14514_v1 }
 0x9eb   :  { %v14516_v62 = vpop.xlane.xlu1 %14515 }
 0x9ec   :  { %19368 = vrcp.f32 %v14516_v62 }
 0x9f5   :  { %v19367_v54 = vpop.eup %19366 }
 0x9f6   :  { %v14518_v55 = vmul.f32 %v19367_v54, %v19363_v7 }
 0x9f8   :  { %14521 = vst [vmem:[#allocation11] sm:$0xff] %v14518_v55 }
 0x9f9   :  { %v19369_v28 = vpop.eup %19368 }
 0x9fa   :  { %v14520_v58 = vmul.f32 %v19369_v28, %v19365_v52 }
 0x9fc   :  { %14522 = vst [vmem:[#allocation11 + $0x8] sm:$0xff] %v14520_v58 }
 0x9fd   :  { %19484 = shalt.err (!%p19481_p1)
}
 0x9fe   :  { %14534 = dma.vmem_to_hbm [thread:$0]  %s14529_s4, 256, %s20206_s5, [#allocation4], %s19505_s28, %s19505_s28, %s19506_s29  }
 0x9ff   :  { %19499 = dma.done.wait [#allocation4], 256  }
 0xa00   :  { %19500 = vsyncadd [#allocation4], 4294967040 }
 0xa01   :  { %14538 = vsyncpa [#allocation3], 1 }
 0xa02   :  { %14539 = vsyncpa [#allocation6], 1 }
 0xa03   :  { %14540 = vsyncpa [#allocation9], 1 }
 0xa04   :  { %14541 = vsyncpa [#allocation4], 1 }

</bundles_post_ra>
